<compile_context>
chip_gen: v6e
topology: v6e:2x2x1
jax: 0.10.0
libtpu: 0.0.40
codegen_flags: <defaults>
</compile_context>

<pallas_src>
import functools

import jax
import jax.numpy as jnp
from jax.experimental import pallas as pl
from jax.experimental.pallas import tpu as pltpu


def _dblock_fused_kernel(x_ref, w_ref, b_ref, o_ref,
                         pad0_ref, pad1_ref, cols_ref, acc_ref,
                         *, H, W, C, dilations, pmax, row_tile):
    # x_ref    : (1, H, W, C)            one batch element (NHWC)
    # w_ref    : (4, 9*C, C)             im2col-flattened weights, (dy,dx,cin) rows
    # b_ref    : (4, 1, C)               biases (f32)
    # o_ref    : (1, H, W, C)            residual output
    # pad0/1   : (H+2p, W+2p, C) f32     ping-pong halo buffers (shared by all convs)
    # cols_ref : (row_tile, W, 9*C)      im2col slab (f32 or bf16)
    # acc_ref  : (H, W, C) f32           residual accumulator

    Wp = W + 2 * pmax
    pads = (pad0_ref, pad1_ref)

    # Zero only the halo frame of both ping-pong buffers; the interiors are
    # fully overwritten below, so this is all the zero padding the dilated
    # convs ever observe (extra zeros beyond dilation d are harmless).
    zrow = jnp.zeros((pmax, Wp, C), jnp.float32)
    zcol = jnp.zeros((H, pmax, C), jnp.float32)
    for buf in pads:
        buf[0:pmax, :, :] = zrow
        buf[pmax + H:pmax + H + pmax, :, :] = zrow
        buf[pmax:pmax + H, 0:pmax, :] = zcol
        buf[pmax:pmax + H, pmax + W:pmax + W + pmax, :] = zcol

    # Seed residual accumulator and the first conv's input interior.
    x = x_ref[0].astype(jnp.float32)                         # (H, W, C)
    acc_ref[...] = x
    pads[0][pmax:pmax + H, pmax:pmax + W, :] = x

    cols_dtype = cols_ref.dtype
    n_conv = len(dilations)

    for i, d in enumerate(dilations):
        src = pads[i % 2]          # padded input of this conv
        dst = pads[(i + 1) % 2]    # padded input of the next conv
        w_i = w_ref[i]             # (9C, C)
        b_i = b_ref[i]             # (1, C)
        last = (i == n_conv - 1)

        # Row-tiled im2col + single K=9C MXU matmul per tile (bias+ReLU fused).
        for r0 in range(0, H, row_tile):
            for dy in range(3):
                ys = pmax + r0 + (dy - 1) * d
                for dx in range(3):
                    xs = pmax + (dx - 1) * d
                    t = dy * 3 + dx
                    # Plain 3-D slab copy (no strided-window reshape).
                    cols_ref[:, :, t * C:(t + 1) * C] = (
                        src[ys:ys + row_tile, xs:xs + W, :].astype(cols_dtype))

            cols = cols_ref[...].reshape(row_tile * W, 9 * C)   # dense reshape
            y = jnp.dot(cols, w_i, preferred_element_type=jnp.float32)
            y = jnp.maximum(y + b_i, 0.0)                        # bias + ReLU
            y3 = y.reshape(row_tile, W, C)

            acc_ref[r0:r0 + row_tile, :, :] += y3
            if not last:   # the last conv only feeds the residual sum
                dst[pmax + r0:pmax + r0 + row_tile, pmax:pmax + W, :] = y3

    o_ref[0] = acc_ref[...].astype(o_ref.dtype)


def _pick_row_tile(H, requested=None, max_rows=64):
    if requested is not None:
        if H % requested != 0:
            raise ValueError(f"row_tile={requested} must divide H={H}")
        return requested
    for t in range(min(H, max_rows), 0, -1):
        if H % t == 0:
            return t
    return H


def dblock_forward_nhwc(x_nhwc, params, dilations=(1, 2, 4, 8),
                        row_tile=None, use_bf16_matmul=False):
    """Fused Dblock on NHWC input: x + relu(c1(x)) + relu(c2(.)) + relu(c3(.)) + relu(c4(.))."""
    N, H, W, C = x_nhwc.shape
    pmax = max(dilations)
    n_conv = len(dilations)
    TH = _pick_row_tile(H, row_tile)

    # NOTE: params carry HWIO weights (3, 3, Cin, Cout).  Real PyTorch Conv2d
    # weights are OIHW; convert with w.transpose(2, 3, 1, 0) before calling,
    # otherwise the im2col reshape below silently produces wrong results.
    w_all = jnp.stack([w.reshape(9 * C, C) for (w, _) in params])   # (4, 9C, C)
    b_all = jnp.stack([b.reshape(1, C) for (_, b) in params])       # (4, 1, C)

    cols_dtype = jnp.bfloat16 if use_bf16_matmul else jnp.float32
    if use_bf16_matmul:
        w_all = w_all.astype(jnp.bfloat16)

    # Scoped-VMEM budget from the actual footprint (+ margin), clamped to the
    # smallest physical VMEM across generations (v7x: 64 MiB).
    Hp, Wp = H + 2 * pmax, W + 2 * pmax
    itemsize = jnp.dtype(x_nhwc.dtype).itemsize
    scratch_bytes = (2 * Hp * Wp * C * 4                               # halo buffers
                     + TH * W * 9 * C * jnp.dtype(cols_dtype).itemsize  # im2col slab
                     + H * W * C * 4)                                   # accumulator
    block_bytes = 2 * (2 * H * W * C * itemsize)                        # in+out, dbl-buf
    const_bytes = 2 * (n_conv * (9 * C * C + C) * 4)                    # weights+bias
    vmem_limit = int(min(max(1.25 * (scratch_bytes + block_bytes + const_bytes)
                             + (2 << 20), 16 << 20), 64 << 20))

    kernel = functools.partial(
        _dblock_fused_kernel, H=H, W=W, C=C,
        dilations=tuple(dilations), pmax=pmax, row_tile=TH)

    return pl.pallas_call(
        kernel,
        out_shape=jax.ShapeDtypeStruct((N, H, W, C), x_nhwc.dtype),
        grid_spec=pltpu.PrefetchScalarGridSpec(
            num_scalar_prefetch=0,
            grid=(N,),
            in_specs=[
                pl.BlockSpec((1, H, W, C), lambda n: (n, 0, 0, 0)),
                pl.BlockSpec((n_conv, 9 * C, C), lambda n: (0, 0, 0)),
                pl.BlockSpec((n_conv, 1, C), lambda n: (0, 0, 0)),
            ],
            out_specs=pl.BlockSpec((1, H, W, C), lambda n: (n, 0, 0, 0)),
            scratch_shapes=[
                pltpu.VMEM((Hp, Wp, C), jnp.float32),      # pad buffer 0
                pltpu.VMEM((Hp, Wp, C), jnp.float32),      # pad buffer 1
                pltpu.VMEM((TH, W, 9 * C), cols_dtype),    # im2col slab
                pltpu.VMEM((H, W, C), jnp.float32),        # residual accumulator
            ],
        ),
        compiler_params=pltpu.CompilerParams(
            dimension_semantics=("parallel",),
            vmem_limit_bytes=vmem_limit),
    )(x_nhwc, w_all, b_all)


@functools.partial(jax.jit, static_argnames=("row_tile", "use_bf16_matmul"))
def dblock_forward(x_nchw, params, row_tile=None, use_bf16_matmul=False):
    """Matches Dblock.forward on NCHW input (layout glue around the fused kernel)."""
    x = jnp.transpose(x_nchw, (0, 2, 3, 1))   # NCHW -> NHWC
    out = dblock_forward_nhwc(x, params, row_tile=row_tile,
                              use_bf16_matmul=use_bf16_matmul)
    return jnp.transpose(out, (0, 3, 1, 2))   # NHWC -> NCHW


def init_dblock_params(key, channel, zero_bias=False):
    """Deterministic synthetic params. Weights HWIO (3,3,Cin,Cout); biases
    nonzero by default so the bias path is actually exercised (the PyTorch
    module zeroes them at init but they are trainable)."""
    keys = jax.random.split(key, 8)
    fan_in = channel * 9
    scale = (1.0 / fan_in) ** 0.5
    params = []
    for i in range(4):
        w = jax.random.normal(keys[2 * i], (3, 3, channel, channel),
                              jnp.float32) * scale
        if zero_bias:
            b = jnp.zeros((1, channel), jnp.float32)
        else:
            b = jax.random.normal(keys[2 * i + 1], (1, channel),
                                  jnp.float32) * 0.05
        params.append((w, b))
    return params


def _reference_forward(x_nchw, params):
    """Pure-JAX reference (lax conv) for correctness checking."""
    x = jnp.transpose(x_nchw, (0, 2, 3, 1))

    def conv(inp, w, b, d):
        y = jax.lax.conv_general_dilated(
            inp, w, window_strides=(1, 1),
            padding=[(d, d), (d, d)], rhs_dilation=(d, d),
            dimension_numbers=("NHWC", "HWIO", "NHWC"))
        return jnp.maximum(y + b.reshape(1, 1, 1, -1), 0.0)

    (w1, b1), (w2, b2), (w3, b3), (w4, b4) = params
    d1 = conv(x,  w1, b1, 1)
    d2 = conv(d1, w2, b2, 2)
    d3 = conv(d2, w3, b3, 4)
    d4 = conv(d3, w4, b4, 8)
    out = x + d1 + d2 + d3 + d4
    return jnp.transpose(out, (0, 3, 1, 2))


if __name__ == "__main__":
    key = jax.random.PRNGKey(0)
    k_x, k_p, k_x2, k_p2 = jax.random.split(key, 4)

    # Shape implied by the module: batch=2, channels=4, spatial=16.
    N, C, H, W = 2, 4, 16, 16
    x = jax.random.normal(k_x, (N, C, H, W), jnp.float32)
    params = init_dblock_params(k_p, C)
    out = jax.block_until_ready(dblock_forward(x, params))
    ref = _reference_forward(x, params)
    assert out.shape == (N, C, H, W)
    assert jnp.allclose(out, ref, rtol=1e-4, atol=1e-4), "mismatch (16x16x4)"

    # Second small shape exercising multiple in-kernel row tiles + nonzero bias.
    N2, C2, H2, W2 = 1, 8, 32, 32
    x2 = jax.random.normal(k_x2, (N2, C2, H2, W2), jnp.float32)
    params2 = init_dblock_params(k_p2, C2)
    out2 = jax.block_until_ready(dblock_forward(x2, params2, row_tile=16))
    ref2 = _reference_forward(x2, params2)
    assert jnp.allclose(out2, ref2, rtol=1e-4, atol=1e-4), "mismatch (32x32x8)"

    print("KERNEL_OK")
</pallas_src>

<mosaic_0001>
module attributes {stable_mosaic.version = 11 : i64} {
  func.func @_dblock_fused_kernel(%arg0: i32, %arg1: memref<1x16x16x4xf32, #tpu.memory_space<vmem>>, %arg2: memref<4x36x4xf32, #tpu.memory_space<vmem>>, %arg3: memref<4x1x4xf32, #tpu.memory_space<vmem>>, %arg4: memref<1x16x16x4xf32, #tpu.memory_space<vmem>>, %arg5: memref<32x32x4xf32, #tpu.memory_space<vmem>>, %arg6: memref<32x32x4xf32, #tpu.memory_space<vmem>>, %arg7: memref<16x16x36xf32, #tpu.memory_space<vmem>>, %arg8: memref<16x16x4xf32, #tpu.memory_space<vmem>>) attributes {dimension_semantics = [#tpu.dimension_semantics<parallel>], iteration_bounds = array<i64: 2>, scalar_prefetch = 0 : i64, scratch_operands = 4 : i64, tpu.core_type = #tpu.core_type<tc>, window_params = [{transform_indices = @transform_0, window_bounds = array<i64: 1, 16, 16, 4>}, {pipeline_mode = #tpu.pipeline_mode<synchronous>, transform_indices = @transform_1, window_bounds = array<i64: 4, 36, 4>}, {pipeline_mode = #tpu.pipeline_mode<synchronous>, transform_indices = @transform_2, window_bounds = array<i64: 4, 1, 4>}, {transform_indices = @transform_3, window_bounds = array<i64: 1, 16, 16, 4>}]} {
    %cst = arith.constant 0.000000e+00 : f32
    %0 = vector.broadcast %cst : f32 to vector<8x32x4xf32>
    %cst_0 = arith.constant 0.000000e+00 : f32
    %1 = vector.broadcast %cst_0 : f32 to vector<16x8x4xf32>
    %c0 = arith.constant 0 : index
    %c0_1 = arith.constant 0 : index
    %c0_2 = arith.constant 0 : index
    %2 = vector.load %arg5[%c0, %c0_1, %c0_2] : memref<32x32x4xf32, #tpu.memory_space<vmem>>, vector<8x32x4xf32>
    tpu.vector_store %arg5[%c0, %c0_1, %c0_2], %0 {strides = array<i32>} : memref<32x32x4xf32, #tpu.memory_space<vmem>>, vector<8x32x4xf32>,
    %c24 = arith.constant 24 : index
    %c0_3 = arith.constant 0 : index
    %c0_4 = arith.constant 0 : index
    %3 = vector.load %arg5[%c24, %c0_3, %c0_4] : memref<32x32x4xf32, #tpu.memory_space<vmem>>, vector<8x32x4xf32>
    tpu.vector_store %arg5[%c24, %c0_3, %c0_4], %0 {strides = array<i32>} : memref<32x32x4xf32, #tpu.memory_space<vmem>>, vector<8x32x4xf32>,
    %c8 = arith.constant 8 : index
    %c0_5 = arith.constant 0 : index
    %c0_6 = arith.constant 0 : index
    %4 = vector.load %arg5[%c8, %c0_5, %c0_6] : memref<32x32x4xf32, #tpu.memory_space<vmem>>, vector<16x8x4xf32>
    tpu.vector_store %arg5[%c8, %c0_5, %c0_6], %1 {strides = array<i32>} : memref<32x32x4xf32, #tpu.memory_space<vmem>>, vector<16x8x4xf32>,
    %c8_7 = arith.constant 8 : index
    %c24_8 = arith.constant 24 : index
    %c0_9 = arith.constant 0 : index
    %5 = vector.load %arg5[%c8_7, %c24_8, %c0_9] : memref<32x32x4xf32, #tpu.memory_space<vmem>>, vector<16x8x4xf32>
    tpu.vector_store %arg5[%c8_7, %c24_8, %c0_9], %1 {strides = array<i32>} : memref<32x32x4xf32, #tpu.memory_space<vmem>>, vector<16x8x4xf32>,
    %c0_10 = arith.constant 0 : index
    %c0_11 = arith.constant 0 : index
    %c0_12 = arith.constant 0 : index
    %6 = vector.load %arg6[%c0_10, %c0_11, %c0_12] : memref<32x32x4xf32, #tpu.memory_space<vmem>>, vector<8x32x4xf32>
    tpu.vector_store %arg6[%c0_10, %c0_11, %c0_12], %0 {strides = array<i32>} : memref<32x32x4xf32, #tpu.memory_space<vmem>>, vector<8x32x4xf32>,
    %c24_13 = arith.constant 24 : index
    %c0_14 = arith.constant 0 : index
    %c0_15 = arith.constant 0 : index
    %7 = vector.load %arg6[%c24_13, %c0_14, %c0_15] : memref<32x32x4xf32, #tpu.memory_space<vmem>>, vector<8x32x4xf32>
    tpu.vector_store %arg6[%c24_13, %c0_14, %c0_15], %0 {strides = array<i32>} : memref<32x32x4xf32, #tpu.memory_space<vmem>>, vector<8x32x4xf32>,
    %c8_16 = arith.constant 8 : index
    %c0_17 = arith.constant 0 : index
    %c0_18 = arith.constant 0 : index
    %8 = vector.load %arg6[%c8_16, %c0_17, %c0_18] : memref<32x32x4xf32, #tpu.memory_space<vmem>>, vector<16x8x4xf32>
    tpu.vector_store %arg6[%c8_16, %c0_17, %c0_18], %1 {strides = array<i32>} : memref<32x32x4xf32, #tpu.memory_space<vmem>>, vector<16x8x4xf32>,
    %c8_19 = arith.constant 8 : index
    %c24_20 = arith.constant 24 : index
    %c0_21 = arith.constant 0 : index
    %9 = vector.load %arg6[%c8_19, %c24_20, %c0_21] : memref<32x32x4xf32, #tpu.memory_space<vmem>>, vector<16x8x4xf32>
    tpu.vector_store %arg6[%c8_19, %c24_20, %c0_21], %1 {strides = array<i32>} : memref<32x32x4xf32, #tpu.memory_space<vmem>>, vector<16x8x4xf32>,
    %c0_22 = arith.constant 0 : index
    %c0_23 = arith.constant 0 : index
    %c0_24 = arith.constant 0 : index
    %c0_25 = arith.constant 0 : index
    %10 = vector.load %arg1[%c0_22, %c0_23, %c0_24, %c0_25] : memref<1x16x16x4xf32, #tpu.memory_space<vmem>>, vector<1x16x16x4xf32>
    %11 = vector.shape_cast %10 : vector<1x16x16x4xf32> to vector<16x16x4xf32>
    %c0_26 = arith.constant 0 : index
    %c0_27 = arith.constant 0 : index
    %c0_28 = arith.constant 0 : index
    %12 = vector.load %arg8[%c0_26, %c0_27, %c0_28] : memref<16x16x4xf32, #tpu.memory_space<vmem>>, vector<16x16x4xf32>
    tpu.vector_store %arg8[%c0_26, %c0_27, %c0_28], %11 {strides = array<i32>} : memref<16x16x4xf32, #tpu.memory_space<vmem>>, vector<16x16x4xf32>,
    %c8_29 = arith.constant 8 : index
    %c8_30 = arith.constant 8 : index
    %c0_31 = arith.constant 0 : index
    %13 = vector.load %arg5[%c8_29, %c8_30, %c0_31] : memref<32x32x4xf32, #tpu.memory_space<vmem>>, vector<16x16x4xf32>
    tpu.vector_store %arg5[%c8_29, %c8_30, %c0_31], %11 {strides = array<i32>} : memref<32x32x4xf32, #tpu.memory_space<vmem>>, vector<16x16x4xf32>,
    %c0_32 = arith.constant 0 : index
    %c0_33 = arith.constant 0 : index
    %c0_34 = arith.constant 0 : index
    %14 = vector.load %arg2[%c0_32, %c0_33, %c0_34] : memref<4x36x4xf32, #tpu.memory_space<vmem>>, vector<1x36x4xf32>
    %15 = vector.shape_cast %14 : vector<1x36x4xf32> to vector<36x4xf32>
    %c0_35 = arith.constant 0 : index
    %c0_36 = arith.constant 0 : index
    %c0_37 = arith.constant 0 : index
    %16 = vector.load %arg3[%c0_35, %c0_36, %c0_37] : memref<4x1x4xf32, #tpu.memory_space<vmem>>, vector<1x1x4xf32>
    %17 = vector.shape_cast %16 : vector<1x1x4xf32> to vector<1x4xf32>
    %c7 = arith.constant 7 : index
    %c7_38 = arith.constant 7 : index
    %c0_39 = arith.constant 0 : index
    %18 = vector.load %arg5[%c7, %c7_38, %c0_39] : memref<32x32x4xf32, #tpu.memory_space<vmem>>, vector<16x16x4xf32>
    %c0_40 = arith.constant 0 : index
    %c0_41 = arith.constant 0 : index
    %c0_42 = arith.constant 0 : index
    %19 = vector.load %arg7[%c0_40, %c0_41, %c0_42] : memref<16x16x36xf32, #tpu.memory_space<vmem>>, vector<16x16x4xf32>
    tpu.vector_store %arg7[%c0_40, %c0_41, %c0_42], %18 {strides = array<i32>} : memref<16x16x36xf32, #tpu.memory_space<vmem>>, vector<16x16x4xf32>,
    %c7_43 = arith.constant 7 : index
    %c8_44 = arith.constant 8 : index
    %c0_45 = arith.constant 0 : index
    %20 = vector.load %arg5[%c7_43, %c8_44, %c0_45] : memref<32x32x4xf32, #tpu.memory_space<vmem>>, vector<16x16x4xf32>
    %c0_46 = arith.constant 0 : index
    %c0_47 = arith.constant 0 : index
    %c4 = arith.constant 4 : index
    %21 = vector.load %arg7[%c0_46, %c0_47, %c4] : memref<16x16x36xf32, #tpu.memory_space<vmem>>, vector<16x16x4xf32>
    tpu.vector_store %arg7[%c0_46, %c0_47, %c4], %20 {strides = array<i32>} : memref<16x16x36xf32, #tpu.memory_space<vmem>>, vector<16x16x4xf32>,
    %c7_48 = arith.constant 7 : index
    %c9 = arith.constant 9 : index
    %c0_49 = arith.constant 0 : index
    %22 = vector.load %arg5[%c7_48, %c9, %c0_49] : memref<32x32x4xf32, #tpu.memory_space<vmem>>, vector<16x16x4xf32>
    %c0_50 = arith.constant 0 : index
    %c0_51 = arith.constant 0 : index
    %c8_52 = arith.constant 8 : index
    %23 = vector.load %arg7[%c0_50, %c0_51, %c8_52] : memref<16x16x36xf32, #tpu.memory_space<vmem>>, vector<16x16x4xf32>
    tpu.vector_store %arg7[%c0_50, %c0_51, %c8_52], %22 {strides = array<i32>} : memref<16x16x36xf32, #tpu.memory_space<vmem>>, vector<16x16x4xf32>,
    %c8_53 = arith.constant 8 : index
    %c7_54 = arith.constant 7 : index
    %c0_55 = arith.constant 0 : index
    %24 = vector.load %arg5[%c8_53, %c7_54, %c0_55] : memref<32x32x4xf32, #tpu.memory_space<vmem>>, vector<16x16x4xf32>
    %c0_56 = arith.constant 0 : index
    %c0_57 = arith.constant 0 : index
    %c12 = arith.constant 12 : index
    %25 = vector.load %arg7[%c0_56, %c0_57, %c12] : memref<16x16x36xf32, #tpu.memory_space<vmem>>, vector<16x16x4xf32>
    tpu.vector_store %arg7[%c0_56, %c0_57, %c12], %24 {strides = array<i32>} : memref<16x16x36xf32, #tpu.memory_space<vmem>>, vector<16x16x4xf32>,
    %c8_58 = arith.constant 8 : index
    %c8_59 = arith.constant 8 : index
    %c0_60 = arith.constant 0 : index
    %26 = vector.load %arg5[%c8_58, %c8_59, %c0_60] : memref<32x32x4xf32, #tpu.memory_space<vmem>>, vector<16x16x4xf32>
    %c0_61 = arith.constant 0 : index
    %c0_62 = arith.constant 0 : index
    %c16 = arith.constant 16 : index
    %27 = vector.load %arg7[%c0_61, %c0_62, %c16] : memref<16x16x36xf32, #tpu.memory_space<vmem>>, vector<16x16x4xf32>
    tpu.vector_store %arg7[%c0_61, %c0_62, %c16], %26 {strides = array<i32>} : memref<16x16x36xf32, #tpu.memory_space<vmem>>, vector<16x16x4xf32>,
    %c8_63 = arith.constant 8 : index
    %c9_64 = arith.constant 9 : index
    %c0_65 = arith.constant 0 : index
    %28 = vector.load %arg5[%c8_63, %c9_64, %c0_65] : memref<32x32x4xf32, #tpu.memory_space<vmem>>, vector<16x16x4xf32>
    %c0_66 = arith.constant 0 : index
    %c0_67 = arith.constant 0 : index
    %c20 = arith.constant 20 : index
    %29 = vector.load %arg7[%c0_66, %c0_67, %c20] : memref<16x16x36xf32, #tpu.memory_space<vmem>>, vector<16x16x4xf32>
    tpu.vector_store %arg7[%c0_66, %c0_67, %c20], %28 {strides = array<i32>} : memref<16x16x36xf32, #tpu.memory_space<vmem>>, vector<16x16x4xf32>,
    %c9_68 = arith.constant 9 : index
    %c7_69 = arith.constant 7 : index
    %c0_70 = arith.constant 0 : index
    %30 = vector.load %arg5[%c9_68, %c7_69, %c0_70] : memref<32x32x4xf32, #tpu.memory_space<vmem>>, vector<16x16x4xf32>
    %c0_71 = arith.constant 0 : index
    %c0_72 = arith.constant 0 : index
    %c24_73 = arith.constant 24 : index
    %31 = vector.load %arg7[%c0_71, %c0_72, %c24_73] : memref<16x16x36xf32, #tpu.memory_space<vmem>>, vector<16x16x4xf32>
    tpu.vector_store %arg7[%c0_71, %c0_72, %c24_73], %30 {strides = array<i32>} : memref<16x16x36xf32, #tpu.memory_space<vmem>>, vector<16x16x4xf32>,
    %c9_74 = arith.constant 9 : index
    %c8_75 = arith.constant 8 : index
    %c0_76 = arith.constant 0 : index
    %32 = vector.load %arg5[%c9_74, %c8_75, %c0_76] : memref<32x32x4xf32, #tpu.memory_space<vmem>>, vector<16x16x4xf32>
    %c0_77 = arith.constant 0 : index
    %c0_78 = arith.constant 0 : index
    %c28 = arith.constant 28 : index
    %33 = vector.load %arg7[%c0_77, %c0_78, %c28] : memref<16x16x36xf32, #tpu.memory_space<vmem>>, vector<16x16x4xf32>
    tpu.vector_store %arg7[%c0_77, %c0_78, %c28], %32 {strides = array<i32>} : memref<16x16x36xf32, #tpu.memory_space<vmem>>, vector<16x16x4xf32>,
    %c9_79 = arith.constant 9 : index
    %c9_80 = arith.constant 9 : index
    %c0_81 = arith.constant 0 : index
    %34 = vector.load %arg5[%c9_79, %c9_80, %c0_81] : memref<32x32x4xf32, #tpu.memory_space<vmem>>, vector<16x16x4xf32>
    %c0_82 = arith.constant 0 : index
    %c0_83 = arith.constant 0 : index
    %c32 = arith.constant 32 : index
    %35 = vector.load %arg7[%c0_82, %c0_83, %c32] : memref<16x16x36xf32, #tpu.memory_space<vmem>>, vector<16x16x4xf32>
    tpu.vector_store %arg7[%c0_82, %c0_83, %c32], %34 {strides = array<i32>} : memref<16x16x36xf32, #tpu.memory_space<vmem>>, vector<16x16x4xf32>,
    %c0_84 = arith.constant 0 : index
    %c0_85 = arith.constant 0 : index
    %c0_86 = arith.constant 0 : index
    %36 = vector.load %arg7[%c0_84, %c0_85, %c0_86] : memref<16x16x36xf32, #tpu.memory_space<vmem>>, vector<16x16x36xf32>
    %37 = vector.shape_cast %36 : vector<16x16x36xf32> to vector<256x36xf32>
    %cst_87 = arith.constant dense<0.000000e+00> : vector<256x4xf32>
    %38 = tpu.matmul %37, %15, %cst_87 {dimension_numbers = #tpu.dot_dimension_numbers<[1], [0], [0], [1], [0, 0, 1, 1], [], []>} : vector<256x36xf32>, vector<36x4xf32>, vector<256x4xf32> -> vector<256x4xf32>
    %39 = vector.broadcast %17 : vector<1x4xf32> to vector<256x4xf32>
    %40 = arith.addf %38, %39 : vector<256x4xf32>
    %cst_88 = arith.constant 0.000000e+00 : f32
    %41 = vector.broadcast %cst_88 : f32 to vector<256x4xf32>
    %42 = arith.maximumf %40, %41 : vector<256x4xf32>
    %43 = vector.shape_cast %42 : vector<256x4xf32> to vector<16x16x4xf32>
    %c0_89 = arith.constant 0 : index
    %c0_90 = arith.constant 0 : index
    %c0_91 = arith.constant 0 : index
    %44 = vector.load %arg8[%c0_89, %c0_90, %c0_91] : memref<16x16x4xf32, #tpu.memory_space<vmem>>, vector<16x16x4xf32>
    %45 = arith.addf %44, %43 : vector<16x16x4xf32>
    %c0_92 = arith.constant 0 : index
    %c0_93 = arith.constant 0 : index
    %c0_94 = arith.constant 0 : index
    %46 = vector.load %arg8[%c0_92, %c0_93, %c0_94] : memref<16x16x4xf32, #tpu.memory_space<vmem>>, vector<16x16x4xf32>
    tpu.vector_store %arg8[%c0_92, %c0_93, %c0_94], %45 {strides = array<i32>} : memref<16x16x4xf32, #tpu.memory_space<vmem>>, vector<16x16x4xf32>,
    %c8_95 = arith.constant 8 : index
    %c8_96 = arith.constant 8 : index
    %c0_97 = arith.constant 0 : index
    %47 = vector.load %arg6[%c8_95, %c8_96, %c0_97] : memref<32x32x4xf32, #tpu.memory_space<vmem>>, vector<16x16x4xf32>
    tpu.vector_store %arg6[%c8_95, %c8_96, %c0_97], %43 {strides = array<i32>} : memref<32x32x4xf32, #tpu.memory_space<vmem>>, vector<16x16x4xf32>,
    %c1 = arith.constant 1 : index
    %c0_98 = arith.constant 0 : index
    %c0_99 = arith.constant 0 : index
    %48 = vector.load %arg2[%c1, %c0_98, %c0_99] : memref<4x36x4xf32, #tpu.memory_space<vmem>>, vector<1x36x4xf32>
    %49 = vector.shape_cast %48 : vector<1x36x4xf32> to vector<36x4xf32>
    %c1_100 = arith.constant 1 : index
    %c0_101 = arith.constant 0 : index
    %c0_102 = arith.constant 0 : index
    %50 = vector.load %arg3[%c1_100, %c0_101, %c0_102] : memref<4x1x4xf32, #tpu.memory_space<vmem>>, vector<1x1x4xf32>
    %51 = vector.shape_cast %50 : vector<1x1x4xf32> to vector<1x4xf32>
    %c6 = arith.constant 6 : index
    %c6_103 = arith.constant 6 : index
    %c0_104 = arith.constant 0 : index
    %52 = vector.load %arg6[%c6, %c6_103, %c0_104] : memref<32x32x4xf32, #tpu.memory_space<vmem>>, vector<16x16x4xf32>
    %c0_105 = arith.constant 0 : index
    %c0_106 = arith.constant 0 : index
    %c0_107 = arith.constant 0 : index
    %53 = vector.load %arg7[%c0_105, %c0_106, %c0_107] : memref<16x16x36xf32, #tpu.memory_space<vmem>>, vector<16x16x4xf32>
    tpu.vector_store %arg7[%c0_105, %c0_106, %c0_107], %52 {strides = array<i32>} : memref<16x16x36xf32, #tpu.memory_space<vmem>>, vector<16x16x4xf32>,
    %c6_108 = arith.constant 6 : index
    %c8_109 = arith.constant 8 : index
    %c0_110 = arith.constant 0 : index
    %54 = vector.load %arg6[%c6_108, %c8_109, %c0_110] : memref<32x32x4xf32, #tpu.memory_space<vmem>>, vector<16x16x4xf32>
    %c0_111 = arith.constant 0 : index
    %c0_112 = arith.constant 0 : index
    %c4_113 = arith.constant 4 : index
    %55 = vector.load %arg7[%c0_111, %c0_112, %c4_113] : memref<16x16x36xf32, #tpu.memory_space<vmem>>, vector<16x16x4xf32>
    tpu.vector_store %arg7[%c0_111, %c0_112, %c4_113], %54 {strides = array<i32>} : memref<16x16x36xf32, #tpu.memory_space<vmem>>, vector<16x16x4xf32>,
    %c6_114 = arith.constant 6 : index
    %c10 = arith.constant 10 : index
    %c0_115 = arith.constant 0 : index
    %56 = vector.load %arg6[%c6_114, %c10, %c0_115] : memref<32x32x4xf32, #tpu.memory_space<vmem>>, vector<16x16x4xf32>
    %c0_116 = arith.constant 0 : index
    %c0_117 = arith.constant 0 : index
    %c8_118 = arith.constant 8 : index
    %57 = vector.load %arg7[%c0_116, %c0_117, %c8_118] : memref<16x16x36xf32, #tpu.memory_space<vmem>>, vector<16x16x4xf32>
    tpu.vector_store %arg7[%c0_116, %c0_117, %c8_118], %56 {strides = array<i32>} : memref<16x16x36xf32, #tpu.memory_space<vmem>>, vector<16x16x4xf32>,
    %c8_119 = arith.constant 8 : index
    %c6_120 = arith.constant 6 : index
    %c0_121 = arith.constant 0 : index
    %58 = vector.load %arg6[%c8_119, %c6_120, %c0_121] : memref<32x32x4xf32, #tpu.memory_space<vmem>>, vector<16x16x4xf32>
    %c0_122 = arith.constant 0 : index
    %c0_123 = arith.constant 0 : index
    %c12_124 = arith.constant 12 : index
    %59 = vector.load %arg7[%c0_122, %c0_123, %c12_124] : memref<16x16x36xf32, #tpu.memory_space<vmem>>, vector<16x16x4xf32>
    tpu.vector_store %arg7[%c0_122, %c0_123, %c12_124], %58 {strides = array<i32>} : memref<16x16x36xf32, #tpu.memory_space<vmem>>, vector<16x16x4xf32>,
    %c8_125 = arith.constant 8 : index
    %c8_126 = arith.constant 8 : index
    %c0_127 = arith.constant 0 : index
    %60 = vector.load %arg6[%c8_125, %c8_126, %c0_127] : memref<32x32x4xf32, #tpu.memory_space<vmem>>, vector<16x16x4xf32>
    %c0_128 = arith.constant 0 : index
    %c0_129 = arith.constant 0 : index
    %c16_130 = arith.constant 16 : index
    %61 = vector.load %arg7[%c0_128, %c0_129, %c16_130] : memref<16x16x36xf32, #tpu.memory_space<vmem>>, vector<16x16x4xf32>
    tpu.vector_store %arg7[%c0_128, %c0_129, %c16_130], %60 {strides = array<i32>} : memref<16x16x36xf32, #tpu.memory_space<vmem>>, vector<16x16x4xf32>,
    %c8_131 = arith.constant 8 : index
    %c10_132 = arith.constant 10 : index
    %c0_133 = arith.constant 0 : index
    %62 = vector.load %arg6[%c8_131, %c10_132, %c0_133] : memref<32x32x4xf32, #tpu.memory_space<vmem>>, vector<16x16x4xf32>
    %c0_134 = arith.constant 0 : index
    %c0_135 = arith.constant 0 : index
    %c20_136 = arith.constant 20 : index
    %63 = vector.load %arg7[%c0_134, %c0_135, %c20_136] : memref<16x16x36xf32, #tpu.memory_space<vmem>>, vector<16x16x4xf32>
    tpu.vector_store %arg7[%c0_134, %c0_135, %c20_136], %62 {strides = array<i32>} : memref<16x16x36xf32, #tpu.memory_space<vmem>>, vector<16x16x4xf32>,
    %c10_137 = arith.constant 10 : index
    %c6_138 = arith.constant 6 : index
    %c0_139 = arith.constant 0 : index
    %64 = vector.load %arg6[%c10_137, %c6_138, %c0_139] : memref<32x32x4xf32, #tpu.memory_space<vmem>>, vector<16x16x4xf32>
    %c0_140 = arith.constant 0 : index
    %c0_141 = arith.constant 0 : index
    %c24_142 = arith.constant 24 : index
    %65 = vector.load %arg7[%c0_140, %c0_141, %c24_142] : memref<16x16x36xf32, #tpu.memory_space<vmem>>, vector<16x16x4xf32>
    tpu.vector_store %arg7[%c0_140, %c0_141, %c24_142], %64 {strides = array<i32>} : memref<16x16x36xf32, #tpu.memory_space<vmem>>, vector<16x16x4xf32>,
    %c10_143 = arith.constant 10 : index
    %c8_144 = arith.constant 8 : index
    %c0_145 = arith.constant 0 : index
    %66 = vector.load %arg6[%c10_143, %c8_144, %c0_145] : memref<32x32x4xf32, #tpu.memory_space<vmem>>, vector<16x16x4xf32>
    %c0_146 = arith.constant 0 : index
    %c0_147 = arith.constant 0 : index
    %c28_148 = arith.constant 28 : index
    %67 = vector.load %arg7[%c0_146, %c0_147, %c28_148] : memref<16x16x36xf32, #tpu.memory_space<vmem>>, vector<16x16x4xf32>
    tpu.vector_store %arg7[%c0_146, %c0_147, %c28_148], %66 {strides = array<i32>} : memref<16x16x36xf32, #tpu.memory_space<vmem>>, vector<16x16x4xf32>,
    %c10_149 = arith.constant 10 : index
    %c10_150 = arith.constant 10 : index
    %c0_151 = arith.constant 0 : index
    %68 = vector.load %arg6[%c10_149, %c10_150, %c0_151] : memref<32x32x4xf32, #tpu.memory_space<vmem>>, vector<16x16x4xf32>
    %c0_152 = arith.constant 0 : index
    %c0_153 = arith.constant 0 : index
    %c32_154 = arith.constant 32 : index
    %69 = vector.load %arg7[%c0_152, %c0_153, %c32_154] : memref<16x16x36xf32, #tpu.memory_space<vmem>>, vector<16x16x4xf32>
    tpu.vector_store %arg7[%c0_152, %c0_153, %c32_154], %68 {strides = array<i32>} : memref<16x16x36xf32, #tpu.memory_space<vmem>>, vector<16x16x4xf32>,
    %c0_155 = arith.constant 0 : index
    %c0_156 = arith.constant 0 : index
    %c0_157 = arith.constant 0 : index
    %70 = vector.load %arg7[%c0_155, %c0_156, %c0_157] : memref<16x16x36xf32, #tpu.memory_space<vmem>>, vector<16x16x36xf32>
    %71 = vector.shape_cast %70 : vector<16x16x36xf32> to vector<256x36xf32>
    %cst_158 = arith.constant dense<0.000000e+00> : vector<256x4xf32>
    %72 = tpu.matmul %71, %49, %cst_158 {dimension_numbers = #tpu.dot_dimension_numbers<[1], [0], [0], [1], [0, 0, 1, 1], [], []>} : vector<256x36xf32>, vector<36x4xf32>, vector<256x4xf32> -> vector<256x4xf32>
    %73 = vector.broadcast %51 : vector<1x4xf32> to vector<256x4xf32>
    %74 = arith.addf %72, %73 : vector<256x4xf32>
    %cst_159 = arith.constant 0.000000e+00 : f32
    %75 = vector.broadcast %cst_159 : f32 to vector<256x4xf32>
    %76 = arith.maximumf %74, %75 : vector<256x4xf32>
    %77 = vector.shape_cast %76 : vector<256x4xf32> to vector<16x16x4xf32>
    %c0_160 = arith.constant 0 : index
    %c0_161 = arith.constant 0 : index
    %c0_162 = arith.constant 0 : index
    %78 = vector.load %arg8[%c0_160, %c0_161, %c0_162] : memref<16x16x4xf32, #tpu.memory_space<vmem>>, vector<16x16x4xf32>
    %79 = arith.addf %78, %77 : vector<16x16x4xf32>
    %c0_163 = arith.constant 0 : index
    %c0_164 = arith.constant 0 : index
    %c0_165 = arith.constant 0 : index
    %80 = vector.load %arg8[%c0_163, %c0_164, %c0_165] : memref<16x16x4xf32, #tpu.memory_space<vmem>>, vector<16x16x4xf32>
    tpu.vector_store %arg8[%c0_163, %c0_164, %c0_165], %79 {strides = array<i32>} : memref<16x16x4xf32, #tpu.memory_space<vmem>>, vector<16x16x4xf32>,
    %c8_166 = arith.constant 8 : index
    %c8_167 = arith.constant 8 : index
    %c0_168 = arith.constant 0 : index
    %81 = vector.load %arg5[%c8_166, %c8_167, %c0_168] : memref<32x32x4xf32, #tpu.memory_space<vmem>>, vector<16x16x4xf32>
    tpu.vector_store %arg5[%c8_166, %c8_167, %c0_168], %77 {strides = array<i32>} : memref<32x32x4xf32, #tpu.memory_space<vmem>>, vector<16x16x4xf32>,
    %c2 = arith.constant 2 : index
    %c0_169 = arith.constant 0 : index
    %c0_170 = arith.constant 0 : index
    %82 = vector.load %arg2[%c2, %c0_169, %c0_170] : memref<4x36x4xf32, #tpu.memory_space<vmem>>, vector<1x36x4xf32>
    %83 = vector.shape_cast %82 : vector<1x36x4xf32> to vector<36x4xf32>
    %c2_171 = arith.constant 2 : index
    %c0_172 = arith.constant 0 : index
    %c0_173 = arith.constant 0 : index
    %84 = vector.load %arg3[%c2_171, %c0_172, %c0_173] : memref<4x1x4xf32, #tpu.memory_space<vmem>>, vector<1x1x4xf32>
    %85 = vector.shape_cast %84 : vector<1x1x4xf32> to vector<1x4xf32>
    %c4_174 = arith.constant 4 : index
    %c4_175 = arith.constant 4 : index
    %c0_176 = arith.constant 0 : index
    %86 = vector.load %arg5[%c4_174, %c4_175, %c0_176] : memref<32x32x4xf32, #tpu.memory_space<vmem>>, vector<16x16x4xf32>
    %c0_177 = arith.constant 0 : index
    %c0_178 = arith.constant 0 : index
    %c0_179 = arith.constant 0 : index
    %87 = vector.load %arg7[%c0_177, %c0_178, %c0_179] : memref<16x16x36xf32, #tpu.memory_space<vmem>>, vector<16x16x4xf32>
    tpu.vector_store %arg7[%c0_177, %c0_178, %c0_179], %86 {strides = array<i32>} : memref<16x16x36xf32, #tpu.memory_space<vmem>>, vector<16x16x4xf32>,
    %c4_180 = arith.constant 4 : index
    %c8_181 = arith.constant 8 : index
    %c0_182 = arith.constant 0 : index
    %88 = vector.load %arg5[%c4_180, %c8_181, %c0_182] : memref<32x32x4xf32, #tpu.memory_space<vmem>>, vector<16x16x4xf32>
    %c0_183 = arith.constant 0 : index
    %c0_184 = arith.constant 0 : index
    %c4_185 = arith.constant 4 : index
    %89 = vector.load %arg7[%c0_183, %c0_184, %c4_185] : memref<16x16x36xf32, #tpu.memory_space<vmem>>, vector<16x16x4xf32>
    tpu.vector_store %arg7[%c0_183, %c0_184, %c4_185], %88 {strides = array<i32>} : memref<16x16x36xf32, #tpu.memory_space<vmem>>, vector<16x16x4xf32>,
    %c4_186 = arith.constant 4 : index
    %c12_187 = arith.constant 12 : index
    %c0_188 = arith.constant 0 : index
    %90 = vector.load %arg5[%c4_186, %c12_187, %c0_188] : memref<32x32x4xf32, #tpu.memory_space<vmem>>, vector<16x16x4xf32>
    %c0_189 = arith.constant 0 : index
    %c0_190 = arith.constant 0 : index
    %c8_191 = arith.constant 8 : index
    %91 = vector.load %arg7[%c0_189, %c0_190, %c8_191] : memref<16x16x36xf32, #tpu.memory_space<vmem>>, vector<16x16x4xf32>
    tpu.vector_store %arg7[%c0_189, %c0_190, %c8_191], %90 {strides = array<i32>} : memref<16x16x36xf32, #tpu.memory_space<vmem>>, vector<16x16x4xf32>,
    %c8_192 = arith.constant 8 : index
    %c4_193 = arith.constant 4 : index
    %c0_194 = arith.constant 0 : index
    %92 = vector.load %arg5[%c8_192, %c4_193, %c0_194] : memref<32x32x4xf32, #tpu.memory_space<vmem>>, vector<16x16x4xf32>
    %c0_195 = arith.constant 0 : index
    %c0_196 = arith.constant 0 : index
    %c12_197 = arith.constant 12 : index
    %93 = vector.load %arg7[%c0_195, %c0_196, %c12_197] : memref<16x16x36xf32, #tpu.memory_space<vmem>>, vector<16x16x4xf32>
    tpu.vector_store %arg7[%c0_195, %c0_196, %c12_197], %92 {strides = array<i32>} : memref<16x16x36xf32, #tpu.memory_space<vmem>>, vector<16x16x4xf32>,
    %c8_198 = arith.constant 8 : index
    %c8_199 = arith.constant 8 : index
    %c0_200 = arith.constant 0 : index
    %94 = vector.load %arg5[%c8_198, %c8_199, %c0_200] : memref<32x32x4xf32, #tpu.memory_space<vmem>>, vector<16x16x4xf32>
    %c0_201 = arith.constant 0 : index
    %c0_202 = arith.constant 0 : index
    %c16_203 = arith.constant 16 : index
    %95 = vector.load %arg7[%c0_201, %c0_202, %c16_203] : memref<16x16x36xf32, #tpu.memory_space<vmem>>, vector<16x16x4xf32>
    tpu.vector_store %arg7[%c0_201, %c0_202, %c16_203], %94 {strides = array<i32>} : memref<16x16x36xf32, #tpu.memory_space<vmem>>, vector<16x16x4xf32>,
    %c8_204 = arith.constant 8 : index
    %c12_205 = arith.constant 12 : index
    %c0_206 = arith.constant 0 : index
    %96 = vector.load %arg5[%c8_204, %c12_205, %c0_206] : memref<32x32x4xf32, #tpu.memory_space<vmem>>, vector<16x16x4xf32>
    %c0_207 = arith.constant 0 : index
    %c0_208 = arith.constant 0 : index
    %c20_209 = arith.constant 20 : index
    %97 = vector.load %arg7[%c0_207, %c0_208, %c20_209] : memref<16x16x36xf32, #tpu.memory_space<vmem>>, vector<16x16x4xf32>
    tpu.vector_store %arg7[%c0_207, %c0_208, %c20_209], %96 {strides = array<i32>} : memref<16x16x36xf32, #tpu.memory_space<vmem>>, vector<16x16x4xf32>,
    %c12_210 = arith.constant 12 : index
    %c4_211 = arith.constant 4 : index
    %c0_212 = arith.constant 0 : index
    %98 = vector.load %arg5[%c12_210, %c4_211, %c0_212] : memref<32x32x4xf32, #tpu.memory_space<vmem>>, vector<16x16x4xf32>
    %c0_213 = arith.constant 0 : index
    %c0_214 = arith.constant 0 : index
    %c24_215 = arith.constant 24 : index
    %99 = vector.load %arg7[%c0_213, %c0_214, %c24_215] : memref<16x16x36xf32, #tpu.memory_space<vmem>>, vector<16x16x4xf32>
    tpu.vector_store %arg7[%c0_213, %c0_214, %c24_215], %98 {strides = array<i32>} : memref<16x16x36xf32, #tpu.memory_space<vmem>>, vector<16x16x4xf32>,
    %c12_216 = arith.constant 12 : index
    %c8_217 = arith.constant 8 : index
    %c0_218 = arith.constant 0 : index
    %100 = vector.load %arg5[%c12_216, %c8_217, %c0_218] : memref<32x32x4xf32, #tpu.memory_space<vmem>>, vector<16x16x4xf32>
    %c0_219 = arith.constant 0 : index
    %c0_220 = arith.constant 0 : index
    %c28_221 = arith.constant 28 : index
    %101 = vector.load %arg7[%c0_219, %c0_220, %c28_221] : memref<16x16x36xf32, #tpu.memory_space<vmem>>, vector<16x16x4xf32>
    tpu.vector_store %arg7[%c0_219, %c0_220, %c28_221], %100 {strides = array<i32>} : memref<16x16x36xf32, #tpu.memory_space<vmem>>, vector<16x16x4xf32>,
    %c12_222 = arith.constant 12 : index
    %c12_223 = arith.constant 12 : index
    %c0_224 = arith.constant 0 : index
    %102 = vector.load %arg5[%c12_222, %c12_223, %c0_224] : memref<32x32x4xf32, #tpu.memory_space<vmem>>, vector<16x16x4xf32>
    %c0_225 = arith.constant 0 : index
    %c0_226 = arith.constant 0 : index
    %c32_227 = arith.constant 32 : index
    %103 = vector.load %arg7[%c0_225, %c0_226, %c32_227] : memref<16x16x36xf32, #tpu.memory_space<vmem>>, vector<16x16x4xf32>
    tpu.vector_store %arg7[%c0_225, %c0_226, %c32_227], %102 {strides = array<i32>} : memref<16x16x36xf32, #tpu.memory_space<vmem>>, vector<16x16x4xf32>,
    %c0_228 = arith.constant 0 : index
    %c0_229 = arith.constant 0 : index
    %c0_230 = arith.constant 0 : index
    %104 = vector.load %arg7[%c0_228, %c0_229, %c0_230] : memref<16x16x36xf32, #tpu.memory_space<vmem>>, vector<16x16x36xf32>
    %105 = vector.shape_cast %104 : vector<16x16x36xf32> to vector<256x36xf32>
    %cst_231 = arith.constant dense<0.000000e+00> : vector<256x4xf32>
    %106 = tpu.matmul %105, %83, %cst_231 {dimension_numbers = #tpu.dot_dimension_numbers<[1], [0], [0], [1], [0, 0, 1, 1], [], []>} : vector<256x36xf32>, vector<36x4xf32>, vector<256x4xf32> -> vector<256x4xf32>
    %107 = vector.broadcast %85 : vector<1x4xf32> to vector<256x4xf32>
    %108 = arith.addf %106, %107 : vector<256x4xf32>
    %cst_232 = arith.constant 0.000000e+00 : f32
    %109 = vector.broadcast %cst_232 : f32 to vector<256x4xf32>
    %110 = arith.maximumf %108, %109 : vector<256x4xf32>
    %111 = vector.shape_cast %110 : vector<256x4xf32> to vector<16x16x4xf32>
    %c0_233 = arith.constant 0 : index
    %c0_234 = arith.constant 0 : index
    %c0_235 = arith.constant 0 : index
    %112 = vector.load %arg8[%c0_233, %c0_234, %c0_235] : memref<16x16x4xf32, #tpu.memory_space<vmem>>, vector<16x16x4xf32>
    %113 = arith.addf %112, %111 : vector<16x16x4xf32>
    %c0_236 = arith.constant 0 : index
    %c0_237 = arith.constant 0 : index
    %c0_238 = arith.constant 0 : index
    %114 = vector.load %arg8[%c0_236, %c0_237, %c0_238] : memref<16x16x4xf32, #tpu.memory_space<vmem>>, vector<16x16x4xf32>
    tpu.vector_store %arg8[%c0_236, %c0_237, %c0_238], %113 {strides = array<i32>} : memref<16x16x4xf32, #tpu.memory_space<vmem>>, vector<16x16x4xf32>,
    %c8_239 = arith.constant 8 : index
    %c8_240 = arith.constant 8 : index
    %c0_241 = arith.constant 0 : index
    %115 = vector.load %arg6[%c8_239, %c8_240, %c0_241] : memref<32x32x4xf32, #tpu.memory_space<vmem>>, vector<16x16x4xf32>
    tpu.vector_store %arg6[%c8_239, %c8_240, %c0_241], %111 {strides = array<i32>} : memref<32x32x4xf32, #tpu.memory_space<vmem>>, vector<16x16x4xf32>,
    %c3 = arith.constant 3 : index
    %c0_242 = arith.constant 0 : index
    %c0_243 = arith.constant 0 : index
    %116 = vector.load %arg2[%c3, %c0_242, %c0_243] : memref<4x36x4xf32, #tpu.memory_space<vmem>>, vector<1x36x4xf32>
    %117 = vector.shape_cast %116 : vector<1x36x4xf32> to vector<36x4xf32>
    %c3_244 = arith.constant 3 : index
    %c0_245 = arith.constant 0 : index
    %c0_246 = arith.constant 0 : index
    %118 = vector.load %arg3[%c3_244, %c0_245, %c0_246] : memref<4x1x4xf32, #tpu.memory_space<vmem>>, vector<1x1x4xf32>
    %119 = vector.shape_cast %118 : vector<1x1x4xf32> to vector<1x4xf32>
    %c0_247 = arith.constant 0 : index
    %c0_248 = arith.constant 0 : index
    %c0_249 = arith.constant 0 : index
    %120 = vector.load %arg6[%c0_247, %c0_248, %c0_249] : memref<32x32x4xf32, #tpu.memory_space<vmem>>, vector<16x16x4xf32>
    %c0_250 = arith.constant 0 : index
    %c0_251 = arith.constant 0 : index
    %c0_252 = arith.constant 0 : index
    %121 = vector.load %arg7[%c0_250, %c0_251, %c0_252] : memref<16x16x36xf32, #tpu.memory_space<vmem>>, vector<16x16x4xf32>
    tpu.vector_store %arg7[%c0_250, %c0_251, %c0_252], %120 {strides = array<i32>} : memref<16x16x36xf32, #tpu.memory_space<vmem>>, vector<16x16x4xf32>,
    %c0_253 = arith.constant 0 : index
    %c8_254 = arith.constant 8 : index
    %c0_255 = arith.constant 0 : index
    %122 = vector.load %arg6[%c0_253, %c8_254, %c0_255] : memref<32x32x4xf32, #tpu.memory_space<vmem>>, vector<16x16x4xf32>
    %c0_256 = arith.constant 0 : index
    %c0_257 = arith.constant 0 : index
    %c4_258 = arith.constant 4 : index
    %123 = vector.load %arg7[%c0_256, %c0_257, %c4_258] : memref<16x16x36xf32, #tpu.memory_space<vmem>>, vector<16x16x4xf32>
    tpu.vector_store %arg7[%c0_256, %c0_257, %c4_258], %122 {strides = array<i32>} : memref<16x16x36xf32, #tpu.memory_space<vmem>>, vector<16x16x4xf32>,
    %c0_259 = arith.constant 0 : index
    %c16_260 = arith.constant 16 : index
    %c0_261 = arith.constant 0 : index
    %124 = vector.load %arg6[%c0_259, %c16_260, %c0_261] : memref<32x32x4xf32, #tpu.memory_space<vmem>>, vector<16x16x4xf32>
    %c0_262 = arith.constant 0 : index
    %c0_263 = arith.constant 0 : index
    %c8_264 = arith.constant 8 : index
    %125 = vector.load %arg7[%c0_262, %c0_263, %c8_264] : memref<16x16x36xf32, #tpu.memory_space<vmem>>, vector<16x16x4xf32>
    tpu.vector_store %arg7[%c0_262, %c0_263, %c8_264], %124 {strides = array<i32>} : memref<16x16x36xf32, #tpu.memory_space<vmem>>, vector<16x16x4xf32>,
    %c8_265 = arith.constant 8 : index
    %c0_266 = arith.constant 0 : index
    %c0_267 = arith.constant 0 : index
    %126 = vector.load %arg6[%c8_265, %c0_266, %c0_267] : memref<32x32x4xf32, #tpu.memory_space<vmem>>, vector<16x16x4xf32>
    %c0_268 = arith.constant 0 : index
    %c0_269 = arith.constant 0 : index
    %c12_270 = arith.constant 12 : index
    %127 = vector.load %arg7[%c0_268, %c0_269, %c12_270] : memref<16x16x36xf32, #tpu.memory_space<vmem>>, vector<16x16x4xf32>
    tpu.vector_store %arg7[%c0_268, %c0_269, %c12_270], %126 {strides = array<i32>} : memref<16x16x36xf32, #tpu.memory_space<vmem>>, vector<16x16x4xf32>,
    %c8_271 = arith.constant 8 : index
    %c8_272 = arith.constant 8 : index
    %c0_273 = arith.constant 0 : index
    %128 = vector.load %arg6[%c8_271, %c8_272, %c0_273] : memref<32x32x4xf32, #tpu.memory_space<vmem>>, vector<16x16x4xf32>
    %c0_274 = arith.constant 0 : index
    %c0_275 = arith.constant 0 : index
    %c16_276 = arith.constant 16 : index
    %129 = vector.load %arg7[%c0_274, %c0_275, %c16_276] : memref<16x16x36xf32, #tpu.memory_space<vmem>>, vector<16x16x4xf32>
    tpu.vector_store %arg7[%c0_274, %c0_275, %c16_276], %128 {strides = array<i32>} : memref<16x16x36xf32, #tpu.memory_space<vmem>>, vector<16x16x4xf32>,
    %c8_277 = arith.constant 8 : index
    %c16_278 = arith.constant 16 : index
    %c0_279 = arith.constant 0 : index
    %130 = vector.load %arg6[%c8_277, %c16_278, %c0_279] : memref<32x32x4xf32, #tpu.memory_space<vmem>>, vector<16x16x4xf32>
    %c0_280 = arith.constant 0 : index
    %c0_281 = arith.constant 0 : index
    %c20_282 = arith.constant 20 : index
    %131 = vector.load %arg7[%c0_280, %c0_281, %c20_282] : memref<16x16x36xf32, #tpu.memory_space<vmem>>, vector<16x16x4xf32>
    tpu.vector_store %arg7[%c0_280, %c0_281, %c20_282], %130 {strides = array<i32>} : memref<16x16x36xf32, #tpu.memory_space<vmem>>, vector<16x16x4xf32>,
    %c16_283 = arith.constant 16 : index
    %c0_284 = arith.constant 0 : index
    %c0_285 = arith.constant 0 : index
    %132 = vector.load %arg6[%c16_283, %c0_284, %c0_285] : memref<32x32x4xf32, #tpu.memory_space<vmem>>, vector<16x16x4xf32>
    %c0_286 = arith.constant 0 : index
    %c0_287 = arith.constant 0 : index
    %c24_288 = arith.constant 24 : index
    %133 = vector.load %arg7[%c0_286, %c0_287, %c24_288] : memref<16x16x36xf32, #tpu.memory_space<vmem>>, vector<16x16x4xf32>
    tpu.vector_store %arg7[%c0_286, %c0_287, %c24_288], %132 {strides = array<i32>} : memref<16x16x36xf32, #tpu.memory_space<vmem>>, vector<16x16x4xf32>,
    %c16_289 = arith.constant 16 : index
    %c8_290 = arith.constant 8 : index
    %c0_291 = arith.constant 0 : index
    %134 = vector.load %arg6[%c16_289, %c8_290, %c0_291] : memref<32x32x4xf32, #tpu.memory_space<vmem>>, vector<16x16x4xf32>
    %c0_292 = arith.constant 0 : index
    %c0_293 = arith.constant 0 : index
    %c28_294 = arith.constant 28 : index
    %135 = vector.load %arg7[%c0_292, %c0_293, %c28_294] : memref<16x16x36xf32, #tpu.memory_space<vmem>>, vector<16x16x4xf32>
    tpu.vector_store %arg7[%c0_292, %c0_293, %c28_294], %134 {strides = array<i32>} : memref<16x16x36xf32, #tpu.memory_space<vmem>>, vector<16x16x4xf32>,
    %c16_295 = arith.constant 16 : index
    %c16_296 = arith.constant 16 : index
    %c0_297 = arith.constant 0 : index
    %136 = vector.load %arg6[%c16_295, %c16_296, %c0_297] : memref<32x32x4xf32, #tpu.memory_space<vmem>>, vector<16x16x4xf32>
    %c0_298 = arith.constant 0 : index
    %c0_299 = arith.constant 0 : index
    %c32_300 = arith.constant 32 : index
    %137 = vector.load %arg7[%c0_298, %c0_299, %c32_300] : memref<16x16x36xf32, #tpu.memory_space<vmem>>, vector<16x16x4xf32>
    tpu.vector_store %arg7[%c0_298, %c0_299, %c32_300], %136 {strides = array<i32>} : memref<16x16x36xf32, #tpu.memory_space<vmem>>, vector<16x16x4xf32>,
    %c0_301 = arith.constant 0 : index
    %c0_302 = arith.constant 0 : index
    %c0_303 = arith.constant 0 : index
    %138 = vector.load %arg7[%c0_301, %c0_302, %c0_303] : memref<16x16x36xf32, #tpu.memory_space<vmem>>, vector<16x16x36xf32>
    %139 = vector.shape_cast %138 : vector<16x16x36xf32> to vector<256x36xf32>
    %cst_304 = arith.constant dense<0.000000e+00> : vector<256x4xf32>
    %140 = tpu.matmul %139, %117, %cst_304 {dimension_numbers = #tpu.dot_dimension_numbers<[1], [0], [0], [1], [0, 0, 1, 1], [], []>} : vector<256x36xf32>, vector<36x4xf32>, vector<256x4xf32> -> vector<256x4xf32>
    %141 = vector.broadcast %119 : vector<1x4xf32> to vector<256x4xf32>
    %142 = arith.addf %140, %141 : vector<256x4xf32>
    %cst_305 = arith.constant 0.000000e+00 : f32
    %143 = vector.broadcast %cst_305 : f32 to vector<256x4xf32>
    %144 = arith.maximumf %142, %143 : vector<256x4xf32>
    %145 = vector.shape_cast %144 : vector<256x4xf32> to vector<16x16x4xf32>
    %c0_306 = arith.constant 0 : index
    %c0_307 = arith.constant 0 : index
    %c0_308 = arith.constant 0 : index
    %146 = vector.load %arg8[%c0_306, %c0_307, %c0_308] : memref<16x16x4xf32, #tpu.memory_space<vmem>>, vector<16x16x4xf32>
    %147 = arith.addf %146, %145 : vector<16x16x4xf32>
    %c0_309 = arith.constant 0 : index
    %c0_310 = arith.constant 0 : index
    %c0_311 = arith.constant 0 : index
    %148 = vector.load %arg8[%c0_309, %c0_310, %c0_311] : memref<16x16x4xf32, #tpu.memory_space<vmem>>, vector<16x16x4xf32>
    tpu.vector_store %arg8[%c0_309, %c0_310, %c0_311], %147 {strides = array<i32>} : memref<16x16x4xf32, #tpu.memory_space<vmem>>, vector<16x16x4xf32>,
    %c0_312 = arith.constant 0 : index
    %c0_313 = arith.constant 0 : index
    %c0_314 = arith.constant 0 : index
    %149 = vector.load %arg8[%c0_312, %c0_313, %c0_314] : memref<16x16x4xf32, #tpu.memory_space<vmem>>, vector<16x16x4xf32>
    %c0_315 = arith.constant 0 : index
    %c0_316 = arith.constant 0 : index
    %c0_317 = arith.constant 0 : index
    %c0_318 = arith.constant 0 : index
    %150 = vector.load %arg4[%c0_315, %c0_316, %c0_317, %c0_318] : memref<1x16x16x4xf32, #tpu.memory_space<vmem>>, vector<1x16x16x4xf32>
    %151 = vector.shape_cast %150 : vector<1x16x16x4xf32> to vector<16x16x4xf32>
    %152 = vector.shape_cast %149 : vector<16x16x4xf32> to vector<1x16x16x4xf32>
    tpu.vector_store %arg4[%c0_315, %c0_316, %c0_317, %c0_318], %152 {strides = array<i32>} : memref<1x16x16x4xf32, #tpu.memory_space<vmem>>, vector<1x16x16x4xf32>,
    return
  }
  func.func @transform_0(%arg0: i32) -> (i32, i32, i32, i32) {
    %c0_i32 = arith.constant 0 : i32
    %c0_i32_0 = arith.constant 0 : i32
    %c0_i32_1 = arith.constant 0 : i32
    %c0_i32_2 = arith.constant 0 : i32
    return %arg0, %c0_i32, %c0_i32_0, %c0_i32_1 : i32, i32, i32, i32
  }
  func.func @transform_1(%arg0: i32) -> (i32, i32, i32) {
    %c0_i32 = arith.constant 0 : i32
    %c0_i32_0 = arith.constant 0 : i32
    %c0_i32_1 = arith.constant 0 : i32
    %c0_i32_2 = arith.constant 0 : i32
    return %c0_i32, %c0_i32_0, %c0_i32_1 : i32, i32, i32
  }
  func.func @transform_2(%arg0: i32) -> (i32, i32, i32) {
    %c0_i32 = arith.constant 0 : i32
    %c0_i32_0 = arith.constant 0 : i32
    %c0_i32_1 = arith.constant 0 : i32
    %c0_i32_2 = arith.constant 0 : i32
    return %c0_i32, %c0_i32_0, %c0_i32_1 : i32, i32, i32
  }
  func.func @transform_3(%arg0: i32) -> (i32, i32, i32, i32) {
    %c0_i32 = arith.constant 0 : i32
    %c0_i32_0 = arith.constant 0 : i32
    %c0_i32_1 = arith.constant 0 : i32
    %c0_i32_2 = arith.constant 0 : i32
    return %arg0, %c0_i32, %c0_i32_0, %c0_i32_1 : i32, i32, i32, i32
  }
}

</mosaic_0001>

<bundles_post_ra>
// kernel: dblock_forward.1
= control target key start
LH: loop header
LB: loop body
LE: loop exit
PB: predicated region body
PF: predicated region fallthrough
CT: control target
= control target key end

     0   :  { %s9687_s12 = smov 0   ;;  %s14487_s0 = inlined_call_operand.vmem [shape: f32[2,16,16,4], index: 0, kind: input, shape index: {}]   ;;  %s14488_s1 = inlined_call_operand.vmem [shape: f32[4,36,4], index: 1, kind: input, shape index: {}]   ;;  %s14489_s2 = inlined_call_operand.vmem [shape: f32[4,1,4], index: 2, kind: input, shape index: {}]   ;;  %s14490_s3 = inlined_call_operand.vmem [shape: f32[2,16,16,4], index: 3, kind: output, shape index: {}]  }
   0x1 LB: > { %s9086_s13 = sadd.s32 4294967295, %s9656_s12   ;;  %p9090_p0 = scmp.ge.s32.totalorder %s9656_s12, 1  ;;  %s9656_s12 = sphi %s9687_s12, %s13_s12  }
   0x2   : > { %p137_p1 = scmp.lt.s32.totalorder %s9656_s12, 3 }
   0x4   : > { %p138_p2 = pnand %p9090_p0, %p137_p1 }
   0x6   : > { %141 = sbr.rel (%p138_p2) target bundleno = 3186 (0xc72), region = 32 }
   0xb   : > { %vm171_vm0 = vcmask 31744   ;;  %p9697_p3 = scmp.lt.s32.totalorder %s9086_s13, 1  ;;  %v9658_v0 = vmov 0.0   ;;  %s9659_s19 = smov 4   ;;  %vm695_vm1 = vcmask 64544   ;;  %vm888_vm2 = vcmask 97344  }
   0xc   : > { %201 = vst.msk [vmem:[#allocation2 + $0xe8] sm:$0xff] %vm171_vm0, %v9658_v0  ;;  %188 = vst.msk [vmem:[#allocation2 + $0x80] sm:$0xff] %vm171_vm0, %v9658_v0  ;;  %s9660_s20 = smov 8   ;;  %s9661_s21 = smov 12   ;;  %vm1081_vm3 = vcmask 130144   ;;  %vm1274_vm4 = vcmask 162944  }
   0xd   : > { %189 = vst.msk [vmem:[#allocation2 + $0x88] sm:$0xff] %vm171_vm0, %v9658_v0  ;;  %190 = vst.msk [vmem:[#allocation2 + $0x90] sm:$0xff] %vm171_vm0, %v9658_v0  ;;  %s14673_s13 = smov (!%p9697_p3, %s9086_s13), 1  ;;  %s9662_s22 = smov 16   ;;  %vm1467_vm5 = vcmask 195744   ;;  %vm1661_vm6 = vcmask 228544  }
   0xe   : > { %191 = vst.msk [vmem:[#allocation2 + $0x98] sm:$0xff] %vm171_vm0, %v9658_v0  ;;  %192 = vst.msk [vmem:[#allocation2 + $0xa0] sm:$0xff] %vm171_vm0, %v9658_v0  ;;  %s9251_s15 = sshll.u32 %s14673_s13, 8  ;;  %s9663_s23 = smov 20   ;;  %vm2215_vm7 = vcmask 1043456   ;;  %vm1854_vm8 = vcmask 261344  }
   0xf   : > { %193 = vst.msk [vmem:[#allocation2 + $0xa8] sm:$0xff] %vm171_vm0, %v9658_v0  ;;  %194 = vst.msk [vmem:[#allocation2 + $0xb0] sm:$0xff] %vm171_vm0, %v9658_v0  ;;  %s10033_s18 = scalar_lea.vmem %s14487_s0, %s9251_s15  ;;  %s9664_s24 = smov 24   ;;  %vm2047_vm9 = vcmask 294144   ;;  %vm2118_vm10 = vcmask 293888  }
  0x10   : > { %195 = vst.msk [vmem:[#allocation2 + $0xb8] sm:$0xff] %vm171_vm0, %v9658_v0  ;;  %196 = vst.msk [vmem:[#allocation2 + $0xc0] sm:$0xff] %vm171_vm0, %v9658_v0  ;;  %v368_v1 = vld [vmem:[%s10033_s18] sm:$0xff]  ;;  %v369_v2 = vld [vmem:[%s10033_s18 + $0x8] sm:$0xff]  ;;  %s9665_s25 = smov 28   ;;  %s9666_s9 = smov 32  }
  0x11   : > { %197 = vst.msk [vmem:[#allocation2 + $0xc8] sm:$0xff] %vm171_vm0, %v9658_v0  ;;  %198 = vst.msk [vmem:[#allocation2 + $0xd0] sm:$0xff] %vm171_vm0, %v9658_v0  ;;  %v370_v3 = vld [vmem:[%s10033_s18 + $0x10] sm:$0xff]  ;;  %v371_v4 = vld [vmem:[%s10033_s18 + $0x18] sm:$0xff] }
  0x12   : > { %199 = vst.msk [vmem:[#allocation2 + $0xd8] sm:$0xff] %vm171_vm0, %v9658_v0  ;;  %200 = vst.msk [vmem:[#allocation2 + $0xe0] sm:$0xff] %vm171_vm0, %v9658_v0  ;;  %v372_v5 = vld [vmem:[%s10033_s18 + $0x20] sm:$0xff]  ;;  %v373_v6 = vld [vmem:[%s10033_s18 + $0x28] sm:$0xff] }
  0x13   : > { %202 = vst.msk [vmem:[#allocation2 + $0xf0] sm:$0xff] %vm171_vm0, %v9658_v0  ;;  %203 = vst.msk [vmem:[#allocation2 + $0xf8] sm:$0xff] %vm171_vm0, %v9658_v0  ;;  %v535_v7 = vld [vmem:[#allocation2 + $0xe8] sm:$0xff]  ;;  %v374_v9 = vld [vmem:[%s10033_s18 + $0x30] sm:$0xff] }
  0x14   : > { %205 = vst.msk [vmem:[#allocation2 + $0x300] sm:$0xff] %vm171_vm0, %v9658_v0  ;;  %206 = vst.msk [vmem:[#allocation2 + $0x308] sm:$0xff] %vm171_vm0, %v9658_v0  ;;  %599 = vrot.lane.b32.xlu0 %v535_v7, %s9659_s19  ;;  %v375_v10 = vld [vmem:[%s10033_s18 + $0x38] sm:$0xff]  ;;  %v376_v11 = vld [vmem:[%s10033_s18 + $0x40] sm:$0xff] }
  0x15   : > { %207 = vst.msk [vmem:[#allocation2 + $0x310] sm:$0xff] %vm171_vm0, %v9658_v0  ;;  %208 = vst.msk [vmem:[#allocation2 + $0x318] sm:$0xff] %vm171_vm0, %v9658_v0  ;;  %v377_v12 = vld [vmem:[%s10033_s18 + $0x48] sm:$0xff]  ;;  %v378_v13 = vld [vmem:[%s10033_s18 + $0x50] sm:$0xff] }
  0x16   : > { %209 = vst.msk [vmem:[#allocation2 + $0x320] sm:$0xff] %vm171_vm0, %v9658_v0  ;;  %210 = vst.msk [vmem:[#allocation2 + $0x328] sm:$0xff] %vm171_vm0, %v9658_v0  ;;  %v379_v14 = vld [vmem:[%s10033_s18 + $0x58] sm:$0xff]  ;;  %v380_v15 = vld [vmem:[%s10033_s18 + $0x60] sm:$0xff] }
  0x17   : > { %211 = vst.msk [vmem:[#allocation2 + $0x330] sm:$0xff] %vm171_vm0, %v9658_v0  ;;  %212 = vst.msk [vmem:[#allocation2 + $0x338] sm:$0xff] %vm171_vm0, %v9658_v0  ;;  %v381_v16 = vld [vmem:[%s10033_s18 + $0x68] sm:$0xff]  ;;  %v382_v17 = vld [vmem:[%s10033_s18 + $0x70] sm:$0xff] }
  0x18   : > { %213 = vst.msk [vmem:[#allocation2 + $0x340] sm:$0xff] %vm171_vm0, %v9658_v0  ;;  %214 = vst.msk [vmem:[#allocation2 + $0x348] sm:$0xff] %vm171_vm0, %v9658_v0  ;;  %v383_v18 = vld [vmem:[%s10033_s18 + $0x78] sm:$0xff]  ;;  %v384_v19 = vld [vmem:[%s10033_s18 + $0x80] sm:$0xff] }
  0x19   : > { %215 = vst.msk [vmem:[#allocation2 + $0x350] sm:$0xff] %vm171_vm0, %v9658_v0  ;;  %216 = vst.msk [vmem:[#allocation2 + $0x358] sm:$0xff] %vm171_vm0, %v9658_v0  ;;  %v385_v20 = vld [vmem:[%s10033_s18 + $0x88] sm:$0xff]  ;;  %v386_v21 = vld [vmem:[%s10033_s18 + $0x90] sm:$0xff] }
  0x1a   : > { %217 = vst.msk [vmem:[#allocation2 + $0x360] sm:$0xff] %vm171_vm0, %v9658_v0  ;;  %218 = vst.msk [vmem:[#allocation2 + $0x368] sm:$0xff] %vm171_vm0, %v9658_v0  ;;  %v536_v8 = vld [vmem:[#allocation2 + $0xf0] sm:$0xff]  ;;  %v387_v22 = vld [vmem:[%s10033_s18 + $0x98] sm:$0xff] }
  0x1b   : > { %219 = vst.msk [vmem:[#allocation2 + $0x370] sm:$0xff] %vm171_vm0, %v9658_v0  ;;  %220 = vst.msk [vmem:[#allocation2 + $0x378] sm:$0xff] %vm171_vm0, %v9658_v0  ;;  %601 = vrot.lane.b32.xlu0 %v536_v8, %s9659_s19  ;;  %v388_v23 = vld [vmem:[%s10033_s18 + $0xa0] sm:$0xff]  ;;  %v389_v24 = vld [vmem:[%s10033_s18 + $0xa8] sm:$0xff] }
  0x1c   : > { %238 = vst.msk [vmem:[#allocation2 + $0x100] sm:$0xff] %vm171_vm0, %v9658_v0  ;;  %239 = vst.msk [vmem:[#allocation2 + $0x120] sm:$0xff] %vm171_vm0, %v9658_v0  ;;  %v390_v28 = vld [vmem:[%s10033_s18 + $0xb0] sm:$0xff]  ;;  %v391_v29 = vld [vmem:[%s10033_s18 + $0xb8] sm:$0xff] }
  0x1d   : > { %240 = vst.msk [vmem:[#allocation2 + $0x140] sm:$0xff] %vm171_vm0, %v9658_v0  ;;  %241 = vst.msk [vmem:[#allocation2 + $0x160] sm:$0xff] %vm171_vm0, %v9658_v0  ;;  %v392_v33 = vld [vmem:[%s10033_s18 + $0xc0] sm:$0xff]  ;;  %v393_v34 = vld [vmem:[%s10033_s18 + $0xc8] sm:$0xff] }
  0x1e   : > { %242 = vst.msk [vmem:[#allocation2 + $0x180] sm:$0xff] %vm171_vm0, %v9658_v0  ;;  %243 = vst.msk [vmem:[#allocation2 + $0x1a0] sm:$0xff] %vm171_vm0, %v9658_v0  ;;  %v394_v35 = vld [vmem:[%s10033_s18 + $0xd0] sm:$0xff]  ;;  %v395_v36 = vld [vmem:[%s10033_s18 + $0xd8] sm:$0xff] }
  0x1f   : > { %244 = vst.msk [vmem:[#allocation2 + $0x1c0] sm:$0xff] %vm171_vm0, %v9658_v0  ;;  %245 = vst.msk [vmem:[#allocation2 + $0x1e0] sm:$0xff] %vm171_vm0, %v9658_v0  ;;  %v396_v37 = vld [vmem:[%s10033_s18 + $0xe0] sm:$0xff]  ;;  %v397_v38 = vld [vmem:[%s10033_s18 + $0xe8] sm:$0xff] }
  0x20   : > { %246 = vst.msk [vmem:[#allocation2 + $0x200] sm:$0xff] %vm171_vm0, %v9658_v0  ;;  %247 = vst.msk [vmem:[#allocation2 + $0x220] sm:$0xff] %vm171_vm0, %v9658_v0  ;;  %v471_v45 = vld [vmem:[#allocation2 + $0xe7] sm:$0xff]  ;;  %v472_v48 = vld [vmem:[#allocation2 + $0xef] sm:$0xff] }
  0x21   : > { %248 = vst.msk [vmem:[#allocation2 + $0x240] sm:$0xff] %vm171_vm0, %v9658_v0  ;;  %249 = vst.msk [vmem:[#allocation2 + $0x260] sm:$0xff] %vm171_vm0, %v9658_v0 }
  0x22   : > { %250 = vst.msk [vmem:[#allocation2 + $0x280] sm:$0xff] %vm171_vm0, %v9658_v0  ;;  %251 = vst.msk [vmem:[#allocation2 + $0x2a0] sm:$0xff] %vm171_vm0, %v9658_v0 }
  0x23   : > { %252 = vst.msk [vmem:[#allocation2 + $0x2c0] sm:$0xff] %vm171_vm0, %v9658_v0  ;;  %253 = vst.msk [vmem:[#allocation2 + $0x2e0] sm:$0xff] %vm171_vm0, %v9658_v0 }
  0x24   : > { %254 = vst.msk [vmem:[#allocation2 + $0x118] sm:$0xff] %vm171_vm0, %v9658_v0  ;;  %255 = vst.msk [vmem:[#allocation2 + $0x138] sm:$0xff] %vm171_vm0, %v9658_v0 }
  0x25   : > { %256 = vst.msk [vmem:[#allocation2 + $0x158] sm:$0xff] %vm171_vm0, %v9658_v0  ;;  %257 = vst.msk [vmem:[#allocation2 + $0x178] sm:$0xff] %vm171_vm0, %v9658_v0 }
  0x26   : > { %258 = vst.msk [vmem:[#allocation2 + $0x198] sm:$0xff] %vm171_vm0, %v9658_v0  ;;  %259 = vst.msk [vmem:[#allocation2 + $0x1b8] sm:$0xff] %vm171_vm0, %v9658_v0 }
  0x27   : > { %260 = vst.msk [vmem:[#allocation2 + $0x1d8] sm:$0xff] %vm171_vm0, %v9658_v0  ;;  %261 = vst.msk [vmem:[#allocation2 + $0x1f8] sm:$0xff] %vm171_vm0, %v9658_v0 }
  0x28   : > { %262 = vst.msk [vmem:[#allocation2 + $0x218] sm:$0xff] %vm171_vm0, %v9658_v0  ;;  %263 = vst.msk [vmem:[#allocation2 + $0x238] sm:$0xff] %vm171_vm0, %v9658_v0 }
  0x29   : > { %264 = vst.msk [vmem:[#allocation2 + $0x258] sm:$0xff] %vm171_vm0, %v9658_v0  ;;  %265 = vst.msk [vmem:[#allocation2 + $0x278] sm:$0xff] %vm171_vm0, %v9658_v0 }
  0x2a   : > { %266 = vst.msk [vmem:[#allocation2 + $0x298] sm:$0xff] %vm171_vm0, %v9658_v0  ;;  %267 = vst.msk [vmem:[#allocation2 + $0x2b8] sm:$0xff] %vm171_vm0, %v9658_v0 }
  0x2b   : > { %268 = vst.msk [vmem:[#allocation2 + $0x2d8] sm:$0xff] %vm171_vm0, %v9658_v0  ;;  %269 = vst.msk [vmem:[#allocation2 + $0x2f8] sm:$0xff] %vm171_vm0, %v9658_v0 }
  0x2c   : > { %270 = vst.msk [vmem:[#allocation3] sm:$0xff] %vm171_vm0, %v9658_v0  ;;  %271 = vst.msk [vmem:[#allocation3 + $0x8] sm:$0xff] %vm171_vm0, %v9658_v0 }
  0x2d   : > { %272 = vst.msk [vmem:[#allocation3 + $0x10] sm:$0xff] %vm171_vm0, %v9658_v0  ;;  %273 = vst.msk [vmem:[#allocation3 + $0x18] sm:$0xff] %vm171_vm0, %v9658_v0 }
  0x2e   : > { %274 = vst.msk [vmem:[#allocation3 + $0x20] sm:$0xff] %vm171_vm0, %v9658_v0  ;;  %275 = vst.msk [vmem:[#allocation3 + $0x28] sm:$0xff] %vm171_vm0, %v9658_v0 }
  0x2f   : > { %276 = vst.msk [vmem:[#allocation3 + $0x30] sm:$0xff] %vm171_vm0, %v9658_v0  ;;  %277 = vst.msk [vmem:[#allocation3 + $0x38] sm:$0xff] %vm171_vm0, %v9658_v0 }
  0x30   : > { %278 = vst.msk [vmem:[#allocation3 + $0x40] sm:$0xff] %vm171_vm0, %v9658_v0  ;;  %279 = vst.msk [vmem:[#allocation3 + $0x48] sm:$0xff] %vm171_vm0, %v9658_v0 }
  0x31   : > { %280 = vst.msk [vmem:[#allocation3 + $0x50] sm:$0xff] %vm171_vm0, %v9658_v0  ;;  %281 = vst.msk [vmem:[#allocation3 + $0x58] sm:$0xff] %vm171_vm0, %v9658_v0 }
  0x32   : > { %282 = vst.msk [vmem:[#allocation3 + $0x60] sm:$0xff] %vm171_vm0, %v9658_v0  ;;  %283 = vst.msk [vmem:[#allocation3 + $0x68] sm:$0xff] %vm171_vm0, %v9658_v0 }
  0x33   : > { %284 = vst.msk [vmem:[#allocation3 + $0x70] sm:$0xff] %vm171_vm0, %v9658_v0  ;;  %285 = vst.msk [vmem:[#allocation3 + $0x78] sm:$0xff] %vm171_vm0, %v9658_v0 }
  0x34   : > { %286 = vst.msk [vmem:[#allocation3 + $0x80] sm:$0xff] %vm171_vm0, %v9658_v0  ;;  %287 = vst.msk [vmem:[#allocation3 + $0x88] sm:$0xff] %vm171_vm0, %v9658_v0 }
  0x35   : > { %288 = vst.msk [vmem:[#allocation3 + $0x90] sm:$0xff] %vm171_vm0, %v9658_v0  ;;  %289 = vst.msk [vmem:[#allocation3 + $0x98] sm:$0xff] %vm171_vm0, %v9658_v0 }
  0x36   : > { %290 = vst.msk [vmem:[#allocation3 + $0xa0] sm:$0xff] %vm171_vm0, %v9658_v0  ;;  %291 = vst.msk [vmem:[#allocation3 + $0xa8] sm:$0xff] %vm171_vm0, %v9658_v0 }
  0x37   : > { %292 = vst.msk [vmem:[#allocation3 + $0xb0] sm:$0xff] %vm171_vm0, %v9658_v0  ;;  %293 = vst.msk [vmem:[#allocation3 + $0xb8] sm:$0xff] %vm171_vm0, %v9658_v0 }
  0x38   : > { %294 = vst.msk [vmem:[#allocation3 + $0xc0] sm:$0xff] %vm171_vm0, %v9658_v0  ;;  %295 = vst.msk [vmem:[#allocation3 + $0xc8] sm:$0xff] %vm171_vm0, %v9658_v0 }
  0x39   : > { %296 = vst.msk [vmem:[#allocation3 + $0xd0] sm:$0xff] %vm171_vm0, %v9658_v0  ;;  %297 = vst.msk [vmem:[#allocation3 + $0xd8] sm:$0xff] %vm171_vm0, %v9658_v0 }
  0x3a   : > { %298 = vst.msk [vmem:[#allocation3 + $0xe0] sm:$0xff] %vm171_vm0, %v9658_v0  ;;  %299 = vst.msk [vmem:[#allocation3 + $0xe8] sm:$0xff] %vm171_vm0, %v9658_v0 }
  0x3b   : > { %300 = vst.msk [vmem:[#allocation3 + $0xf0] sm:$0xff] %vm171_vm0, %v9658_v0  ;;  %301 = vst.msk [vmem:[#allocation3 + $0xf8] sm:$0xff] %vm171_vm0, %v9658_v0 }
  0x3c   : > { %303 = vst.msk [vmem:[#allocation3 + $0x300] sm:$0xff] %vm171_vm0, %v9658_v0  ;;  %304 = vst.msk [vmem:[#allocation3 + $0x308] sm:$0xff] %vm171_vm0, %v9658_v0 }
  0x3d   : > { %305 = vst.msk [vmem:[#allocation3 + $0x310] sm:$0xff] %vm171_vm0, %v9658_v0  ;;  %306 = vst.msk [vmem:[#allocation3 + $0x318] sm:$0xff] %vm171_vm0, %v9658_v0 }
  0x3e   : > { %307 = vst.msk [vmem:[#allocation3 + $0x320] sm:$0xff] %vm171_vm0, %v9658_v0  ;;  %308 = vst.msk [vmem:[#allocation3 + $0x328] sm:$0xff] %vm171_vm0, %v9658_v0 }
  0x3f   : > { %309 = vst.msk [vmem:[#allocation3 + $0x330] sm:$0xff] %vm171_vm0, %v9658_v0  ;;  %310 = vst.msk [vmem:[#allocation3 + $0x338] sm:$0xff] %vm171_vm0, %v9658_v0 }
  0x40   : > { %311 = vst.msk [vmem:[#allocation3 + $0x340] sm:$0xff] %vm171_vm0, %v9658_v0  ;;  %312 = vst.msk [vmem:[#allocation3 + $0x348] sm:$0xff] %vm171_vm0, %v9658_v0 }
  0x41   : > { %313 = vst.msk [vmem:[#allocation3 + $0x350] sm:$0xff] %vm171_vm0, %v9658_v0  ;;  %314 = vst.msk [vmem:[#allocation3 + $0x358] sm:$0xff] %vm171_vm0, %v9658_v0 }
  0x42   : > { %315 = vst.msk [vmem:[#allocation3 + $0x360] sm:$0xff] %vm171_vm0, %v9658_v0  ;;  %316 = vst.msk [vmem:[#allocation3 + $0x368] sm:$0xff] %vm171_vm0, %v9658_v0 }
  0x43   : > { %317 = vst.msk [vmem:[#allocation3 + $0x370] sm:$0xff] %vm171_vm0, %v9658_v0  ;;  %318 = vst.msk [vmem:[#allocation3 + $0x378] sm:$0xff] %vm171_vm0, %v9658_v0 }
  0x44   : > { %319 = vst.msk [vmem:[#allocation3 + $0x380] sm:$0xff] %vm171_vm0, %v9658_v0  ;;  %320 = vst.msk [vmem:[#allocation3 + $0x388] sm:$0xff] %vm171_vm0, %v9658_v0 }
  0x45   : > { %321 = vst.msk [vmem:[#allocation3 + $0x390] sm:$0xff] %vm171_vm0, %v9658_v0  ;;  %322 = vst.msk [vmem:[#allocation3 + $0x398] sm:$0xff] %vm171_vm0, %v9658_v0 }
  0x46   : > { %323 = vst.msk [vmem:[#allocation3 + $0x3a0] sm:$0xff] %vm171_vm0, %v9658_v0  ;;  %324 = vst.msk [vmem:[#allocation3 + $0x3a8] sm:$0xff] %vm171_vm0, %v9658_v0 }
  0x47   : > { %325 = vst.msk [vmem:[#allocation3 + $0x3b0] sm:$0xff] %vm171_vm0, %v9658_v0  ;;  %326 = vst.msk [vmem:[#allocation3 + $0x3b8] sm:$0xff] %vm171_vm0, %v9658_v0 }
  0x48   : > { %327 = vst.msk [vmem:[#allocation3 + $0x3c0] sm:$0xff] %vm171_vm0, %v9658_v0  ;;  %328 = vst.msk [vmem:[#allocation3 + $0x3c8] sm:$0xff] %vm171_vm0, %v9658_v0 }
  0x49   : > { %329 = vst.msk [vmem:[#allocation3 + $0x3d0] sm:$0xff] %vm171_vm0, %v9658_v0  ;;  %330 = vst.msk [vmem:[#allocation3 + $0x3d8] sm:$0xff] %vm171_vm0, %v9658_v0 }
  0x4a   : > { %331 = vst.msk [vmem:[#allocation3 + $0x3e0] sm:$0xff] %vm171_vm0, %v9658_v0  ;;  %332 = vst.msk [vmem:[#allocation3 + $0x3e8] sm:$0xff] %vm171_vm0, %v9658_v0 }
  0x4b   : > { %333 = vst.msk [vmem:[#allocation3 + $0x3f0] sm:$0xff] %vm171_vm0, %v9658_v0  ;;  %334 = vst.msk [vmem:[#allocation3 + $0x3f8] sm:$0xff] %vm171_vm0, %v9658_v0 }
  0x4c   : > { %336 = vst.msk [vmem:[#allocation3 + $0x100] sm:$0xff] %vm171_vm0, %v9658_v0  ;;  %337 = vst.msk [vmem:[#allocation3 + $0x120] sm:$0xff] %vm171_vm0, %v9658_v0 }
  0x4d   : > { %338 = vst.msk [vmem:[#allocation3 + $0x140] sm:$0xff] %vm171_vm0, %v9658_v0  ;;  %339 = vst.msk [vmem:[#allocation3 + $0x160] sm:$0xff] %vm171_vm0, %v9658_v0 }
  0x4e   : > { %340 = vst.msk [vmem:[#allocation3 + $0x180] sm:$0xff] %vm171_vm0, %v9658_v0  ;;  %341 = vst.msk [vmem:[#allocation3 + $0x1a0] sm:$0xff] %vm171_vm0, %v9658_v0 }
  0x4f   : > { %342 = vst.msk [vmem:[#allocation3 + $0x1c0] sm:$0xff] %vm171_vm0, %v9658_v0  ;;  %343 = vst.msk [vmem:[#allocation3 + $0x1e0] sm:$0xff] %vm171_vm0, %v9658_v0 }
  0x50   : > { %344 = vst.msk [vmem:[#allocation3 + $0x200] sm:$0xff] %vm171_vm0, %v9658_v0  ;;  %345 = vst.msk [vmem:[#allocation3 + $0x220] sm:$0xff] %vm171_vm0, %v9658_v0 }
  0x51   : > { %346 = vst.msk [vmem:[#allocation3 + $0x240] sm:$0xff] %vm171_vm0, %v9658_v0  ;;  %347 = vst.msk [vmem:[#allocation3 + $0x260] sm:$0xff] %vm171_vm0, %v9658_v0 }
  0x52   : > { %348 = vst.msk [vmem:[#allocation3 + $0x280] sm:$0xff] %vm171_vm0, %v9658_v0  ;;  %349 = vst.msk [vmem:[#allocation3 + $0x2a0] sm:$0xff] %vm171_vm0, %v9658_v0 }
  0x53   : > { %350 = vst.msk [vmem:[#allocation3 + $0x2c0] sm:$0xff] %vm171_vm0, %v9658_v0  ;;  %351 = vst.msk [vmem:[#allocation3 + $0x2e0] sm:$0xff] %vm171_vm0, %v9658_v0 }
  0x54   : > { %352 = vst.msk [vmem:[#allocation3 + $0x118] sm:$0xff] %vm171_vm0, %v9658_v0  ;;  %353 = vst.msk [vmem:[#allocation3 + $0x138] sm:$0xff] %vm171_vm0, %v9658_v0 }
  0x55   : > { %354 = vst.msk [vmem:[#allocation3 + $0x158] sm:$0xff] %vm171_vm0, %v9658_v0  ;;  %355 = vst.msk [vmem:[#allocation3 + $0x178] sm:$0xff] %vm171_vm0, %v9658_v0 }
  0x56   : > { %356 = vst.msk [vmem:[#allocation3 + $0x198] sm:$0xff] %vm171_vm0, %v9658_v0  ;;  %357 = vst.msk [vmem:[#allocation3 + $0x1b8] sm:$0xff] %vm171_vm0, %v9658_v0 }
  0x57   : > { %358 = vst.msk [vmem:[#allocation3 + $0x1d8] sm:$0xff] %vm171_vm0, %v9658_v0  ;;  %359 = vst.msk [vmem:[#allocation3 + $0x1f8] sm:$0xff] %vm171_vm0, %v9658_v0 }
  0x58   : > { %360 = vst.msk [vmem:[#allocation3 + $0x218] sm:$0xff] %vm171_vm0, %v9658_v0  ;;  %361 = vst.msk [vmem:[#allocation3 + $0x238] sm:$0xff] %vm171_vm0, %v9658_v0 }
  0x59   : > { %362 = vst.msk [vmem:[#allocation3 + $0x258] sm:$0xff] %vm171_vm0, %v9658_v0  ;;  %363 = vst.msk [vmem:[#allocation3 + $0x278] sm:$0xff] %vm171_vm0, %v9658_v0 }
  0x5a   : > { %364 = vst.msk [vmem:[#allocation3 + $0x298] sm:$0xff] %vm171_vm0, %v9658_v0  ;;  %365 = vst.msk [vmem:[#allocation3 + $0x2b8] sm:$0xff] %vm171_vm0, %v9658_v0 }
  0x5b   : > { %366 = vst.msk [vmem:[#allocation3 + $0x2d8] sm:$0xff] %vm171_vm0, %v9658_v0  ;;  %367 = vst.msk [vmem:[#allocation3 + $0x2f8] sm:$0xff] %vm171_vm0, %v9658_v0 }
  0x5c   : > { %432 = vst.msk [vmem:[#allocation2 + $0x108] sm:$0xff] %vm171_vm0, %v368_v1  ;;  %400 = vst.msk [vmem:[#allocation5] sm:$0xff] %vm171_vm0, %v368_v1 }
  0x5d   : > { %433 = vst.msk [vmem:[#allocation2 + $0x110] sm:$0xff] %vm171_vm0, %v369_v2  ;;  %401 = vst.msk [vmem:[#allocation5 + $0x8] sm:$0xff] %vm171_vm0, %v369_v2 }
  0x5e   : > { %434 = vst.msk [vmem:[#allocation2 + $0x128] sm:$0xff] %vm171_vm0, %v370_v3  ;;  %402 = vst.msk [vmem:[#allocation5 + $0x10] sm:$0xff] %vm171_vm0, %v370_v3 }
  0x5f   : > { %435 = vst.msk [vmem:[#allocation2 + $0x130] sm:$0xff] %vm171_vm0, %v371_v4  ;;  %403 = vst.msk [vmem:[#allocation5 + $0x18] sm:$0xff] %vm171_vm0, %v371_v4 }
  0x60   : > { %436 = vst.msk [vmem:[#allocation2 + $0x148] sm:$0xff] %vm171_vm0, %v372_v5  ;;  %404 = vst.msk [vmem:[#allocation5 + $0x20] sm:$0xff] %vm171_vm0, %v372_v5 }
  0x61   : > { %437 = vst.msk [vmem:[#allocation2 + $0x150] sm:$0xff] %vm171_vm0, %v373_v6  ;;  %405 = vst.msk [vmem:[#allocation5 + $0x28] sm:$0xff] %vm171_vm0, %v373_v6 }
  0x62   : > { %438 = vst.msk [vmem:[#allocation2 + $0x168] sm:$0xff] %vm171_vm0, %v374_v9  ;;  %406 = vst.msk [vmem:[#allocation5 + $0x30] sm:$0xff] %vm171_vm0, %v374_v9 }
  0x63   : > { %439 = vst.msk [vmem:[#allocation2 + $0x170] sm:$0xff] %vm171_vm0, %v375_v10  ;;  %407 = vst.msk [vmem:[#allocation5 + $0x38] sm:$0xff] %vm171_vm0, %v375_v10  ;;  %v10097_v25 = vld [vmem:[#allocation2 + $0x108] sm:$0xff] }
  0x64   : > { %440 = vst.msk [vmem:[#allocation2 + $0x188] sm:$0xff] %vm171_vm0, %v376_v11  ;;  %408 = vst.msk [vmem:[#allocation5 + $0x40] sm:$0xff] %vm171_vm0, %v376_v11  ;;  %603 = vrot.lane.b32.xlu1 %v10097_v25, %s9659_s19  ;;  %v10109_v27 = vld [vmem:[#allocation2 + $0x110] sm:$0xff]  ;;  %v10173_v46 = vld [vmem:[#allocation2 + $0x107] sm:$0xff] }
  0x65   : > { %441 = vst.msk [vmem:[#allocation2 + $0x190] sm:$0xff] %vm171_vm0, %v377_v12  ;;  %409 = vst.msk [vmem:[#allocation5 + $0x48] sm:$0xff] %vm171_vm0, %v377_v12  ;;  %v10099_v26 = vld [vmem:[#allocation2 + $0x128] sm:$0xff] }
  0x66   : > { %442 = vst.msk [vmem:[#allocation2 + $0x1a8] sm:$0xff] %vm171_vm0, %v378_v13  ;;  %410 = vst.msk [vmem:[#allocation5 + $0x50] sm:$0xff] %vm171_vm0, %v378_v13  ;;  %607 = vrot.lane.b32.xlu0 %v10099_v26, %s9659_s19  ;;  %v10123_v31 = vld [vmem:[#allocation2 + $0x130] sm:$0xff]  ;;  %v10189_v51 = vld [vmem:[#allocation2 + $0x127] sm:$0xff] }
  0x67   : > { %443 = vst.msk [vmem:[#allocation2 + $0x1b0] sm:$0xff] %vm171_vm0, %v379_v14  ;;  %411 = vst.msk [vmem:[#allocation5 + $0x58] sm:$0xff] %vm171_vm0, %v379_v14  ;;  %v10119_v30 = vld [vmem:[#allocation2 + $0x148] sm:$0xff] }
  0x68   : > { %444 = vst.msk [vmem:[#allocation2 + $0x1c8] sm:$0xff] %vm171_vm0, %v380_v15  ;;  %412 = vst.msk [vmem:[#allocation5 + $0x60] sm:$0xff] %vm171_vm0, %v380_v15  ;;  %605 = vrot.lane.b32.xlu1 %v10109_v27, %s9659_s19  ;;  %v10143_v39 = vld [vmem:[#allocation2 + $0x150] sm:$0xff]  ;;  %v10201_v54 = vld [vmem:[#allocation2 + $0x147] sm:$0xff] }
  0x69   : > { %445 = vst.msk [vmem:[#allocation2 + $0x1d0] sm:$0xff] %vm171_vm0, %v381_v16  ;;  %413 = vst.msk [vmem:[#allocation5 + $0x68] sm:$0xff] %vm171_vm0, %v381_v16  ;;  %v10127_v32 = vld [vmem:[#allocation2 + $0x168] sm:$0xff] }
  0x6a   : > { %446 = vst.msk [vmem:[#allocation2 + $0x1e8] sm:$0xff] %vm171_vm0, %v382_v17  ;;  %414 = vst.msk [vmem:[#allocation5 + $0x70] sm:$0xff] %vm171_vm0, %v382_v17  ;;  %611 = vrot.lane.b32.xlu0 %v10119_v30, %s9659_s19  ;;  %v10157_v41 = vld [vmem:[#allocation2 + $0x170] sm:$0xff]  ;;  %v10211_v57 = vld [vmem:[#allocation2 + $0x167] sm:$0xff] }
  0x6b   : > { %447 = vst.msk [vmem:[#allocation2 + $0x1f0] sm:$0xff] %vm171_vm0, %v383_v18  ;;  %415 = vst.msk [vmem:[#allocation5 + $0x78] sm:$0xff] %vm171_vm0, %v383_v18  ;;  %v10153_v40 = vld [vmem:[#allocation2 + $0x188] sm:$0xff] }
  0x6c   : > { %448 = vst.msk [vmem:[#allocation2 + $0x208] sm:$0xff] %vm171_vm0, %v384_v19  ;;  %416 = vst.msk [vmem:[#allocation5 + $0x80] sm:$0xff] %vm171_vm0, %v384_v19  ;;  %609 = vrot.lane.b32.xlu1 %v10123_v31, %s9659_s19  ;;  %v10165_v43 = vld [vmem:[#allocation2 + $0x190] sm:$0xff]  ;;  %v10215_v59 = vld [vmem:[#allocation2 + $0x187] sm:$0xff] }
  0x6d   : > { %449 = vst.msk [vmem:[#allocation2 + $0x210] sm:$0xff] %vm171_vm0, %v385_v20  ;;  %417 = vst.msk [vmem:[#allocation5 + $0x88] sm:$0xff] %vm171_vm0, %v385_v20  ;;  %v10161_v42 = vld [vmem:[#allocation2 + $0x1a8] sm:$0xff] }
  0x6e   : > { %450 = vst.msk [vmem:[#allocation2 + $0x228] sm:$0xff] %vm171_vm0, %v386_v21  ;;  %418 = vst.msk [vmem:[#allocation5 + $0x90] sm:$0xff] %vm171_vm0, %v386_v21  ;;  %615 = vrot.lane.b32.xlu0 %v10127_v32, %s9659_s19  ;;  %v10175_v47 = vld [vmem:[#allocation2 + $0x1b0] sm:$0xff]  ;;  %v10227_v61 = vld [vmem:[#allocation2 + $0x1a7] sm:$0xff] }
  0x6f   : > { %451 = vst.msk [vmem:[#allocation2 + $0x230] sm:$0xff] %vm171_vm0, %v387_v22  ;;  %419 = vst.msk [vmem:[#allocation5 + $0x98] sm:$0xff] %vm171_vm0, %v387_v22  ;;  %v10169_v44 = vld [vmem:[#allocation2 + $0x1c8] sm:$0xff] }
  0x70   : > { %452 = vst.msk [vmem:[#allocation2 + $0x248] sm:$0xff] %vm171_vm0, %v388_v23  ;;  %420 = vst.msk [vmem:[#allocation5 + $0xa0] sm:$0xff] %vm171_vm0, %v388_v23  ;;  %613 = vrot.lane.b32.xlu1 %v10143_v39, %s9659_s19  ;;  %v10183_v49 = vld [vmem:[#allocation2 + $0x10f] sm:$0xff]  ;;  %v10239_v0 = vld [vmem:[#allocation2 + $0x1c7] sm:$0xff] }
  0x71   : > { %453 = vst.msk [vmem:[#allocation2 + $0x250] sm:$0xff] %vm171_vm0, %v389_v24  ;;  %421 = vst.msk [vmem:[#allocation5 + $0xa8] sm:$0xff] %vm171_vm0, %v389_v24  ;;  %v10185_v50 = vld [vmem:[#allocation2 + $0x1e8] sm:$0xff]  ;;  %v10195_v53 = vld [vmem:[#allocation2 + $0x1d0] sm:$0xff] }
  0x72   : > { %454 = vst.msk [vmem:[#allocation2 + $0x268] sm:$0xff] %vm171_vm0, %v390_v28  ;;  %422 = vst.msk [vmem:[#allocation5 + $0xb0] sm:$0xff] %vm171_vm0, %v390_v28  ;;  %619 = vrot.lane.b32.xlu0 %v10153_v40, %s9659_s19  ;;  %v10191_v52 = vld [vmem:[#allocation2 + $0x12f] sm:$0xff]  ;;  %v10243_v2 = vld [vmem:[#allocation2 + $0x1e7] sm:$0xff] }
  0x73   : > { %455 = vst.msk [vmem:[#allocation2 + $0x270] sm:$0xff] %vm171_vm0, %v391_v29  ;;  %423 = vst.msk [vmem:[#allocation5 + $0xb8] sm:$0xff] %vm171_vm0, %v391_v29  ;;  %v10203_v55 = vld [vmem:[#allocation2 + $0x14f] sm:$0xff]  ;;  %v10255_v4 = vld [vmem:[#allocation2 + $0x207] sm:$0xff] }
  0x74   : > { %456 = vst.msk [vmem:[#allocation2 + $0x288] sm:$0xff] %vm171_vm0, %v392_v33  ;;  %424 = vst.msk [vmem:[#allocation5 + $0xc0] sm:$0xff] %vm171_vm0, %v392_v33  ;;  %617 = vrot.lane.b32.xlu1 %v10157_v41, %s9659_s19  ;;  %v10205_v56 = vld [vmem:[#allocation2 + $0x208] sm:$0xff]  ;;  %v10231_v63 = vld [vmem:[#allocation2 + $0x1f0] sm:$0xff] }
  0x75   : > { %457 = vst.msk [vmem:[#allocation2 + $0x290] sm:$0xff] %vm171_vm0, %v393_v34  ;;  %425 = vst.msk [vmem:[#allocation5 + $0xc8] sm:$0xff] %vm171_vm0, %v393_v34  ;;  %v10213_v58 = vld [vmem:[#allocation2 + $0x16f] sm:$0xff]  ;;  %v10265_v6 = vld [vmem:[#allocation2 + $0x227] sm:$0xff] }
  0x76   : > { %458 = vst.msk [vmem:[#allocation2 + $0x2a8] sm:$0xff] %vm171_vm0, %v394_v35  ;;  %426 = vst.msk [vmem:[#allocation5 + $0xd0] sm:$0xff] %vm171_vm0, %v394_v35  ;;  %623 = vrot.lane.b32.xlu0 %v10161_v42, %s9659_s19  ;;  %v10225_v60 = vld [vmem:[#allocation2 + $0x18f] sm:$0xff] }
  0x77   : > { %459 = vst.msk [vmem:[#allocation2 + $0x2b0] sm:$0xff] %vm171_vm0, %v395_v36  ;;  %427 = vst.msk [vmem:[#allocation5 + $0xd8] sm:$0xff] %vm171_vm0, %v395_v36  ;;  %v10229_v62 = vld [vmem:[#allocation2 + $0x1af] sm:$0xff]  ;;  %v10269_v8 = vld [vmem:[#allocation2 + $0x247] sm:$0xff] }
  0x78   : > { %460 = vst.msk [vmem:[#allocation2 + $0x2c8] sm:$0xff] %vm171_vm0, %v396_v37  ;;  %428 = vst.msk [vmem:[#allocation5 + $0xe0] sm:$0xff] %vm171_vm0, %v396_v37  ;;  %621 = vrot.lane.b32.xlu1 %v10165_v43, %s9659_s19  ;;  %v10241_v1 = vld [vmem:[#allocation2 + $0x1cf] sm:$0xff]  ;;  %v399_v36 = vld [vmem:[%s10033_s18 + $0xf8] sm:$0xff] }
  0x79   : > { %461 = vst.msk [vmem:[#allocation2 + $0x2d0] sm:$0xff] %vm171_vm0, %v397_v38  ;;  %429 = vst.msk [vmem:[#allocation5 + $0xe8] sm:$0xff] %vm171_vm0, %v397_v38  ;;  %v10253_v3 = vld [vmem:[#allocation2 + $0x1ef] sm:$0xff]  ;;  %v10287_v11 = vld [vmem:[#allocation2 + $0x267] sm:$0xff] }
  0x7a   : > { %503 = vst.msk [vmem:[#allocation4] sm:$0xff] %vm171_vm0, %v471_v45  ;;  %505 = vst.msk [vmem:[#allocation4 + $0x10] sm:$0xff] %vm171_vm0, %v10173_v46  ;;  %627 = vrot.lane.b32.xlu0 %v10169_v44, %s9659_s19  ;;  %v10257_v5 = vld [vmem:[#allocation2 + $0x20f] sm:$0xff] }
  0x7b   : > { %504 = vst.msk [vmem:[#allocation4 + $0x8] sm:$0xff] %vm171_vm0, %v472_v48  ;;  %506 = vst.msk [vmem:[#allocation4 + $0x18] sm:$0xff] %vm171_vm0, %v10183_v49  ;;  %v10267_v7 = vld [vmem:[#allocation2 + $0x22f] sm:$0xff]  ;;  %v10303_v15 = vld [vmem:[#allocation2 + $0x287] sm:$0xff] }
  0x7c   : > { %625 = vrot.lane.b32.xlu1 %v10175_v47, %s9659_s19  ;;  %507 = vst.msk [vmem:[#allocation4 + $0x20] sm:$0xff] %vm171_vm0, %v10189_v51  ;;  %508 = vst.msk [vmem:[#allocation4 + $0x28] sm:$0xff] %vm171_vm0, %v10191_v52  ;;  %v10279_v9 = vld [vmem:[#allocation2 + $0x24f] sm:$0xff] }
  0x7d   : > { %509 = vst.msk [vmem:[#allocation4 + $0x30] sm:$0xff] %vm171_vm0, %v10201_v54  ;;  %510 = vst.msk [vmem:[#allocation4 + $0x38] sm:$0xff] %vm171_vm0, %v10203_v55  ;;  %v10281_v10 = vld [vmem:[#allocation2 + $0x228] sm:$0xff]  ;;  %v10291_v13 = vld [vmem:[#allocation2 + $0x210] sm:$0xff] }
  0x7e   : > { %631 = vrot.lane.b32.xlu0 %v10185_v50, %s9659_s19  ;;  %511 = vst.msk [vmem:[#allocation4 + $0x40] sm:$0xff] %vm171_vm0, %v10211_v57  ;;  %512 = vst.msk [vmem:[#allocation4 + $0x48] sm:$0xff] %vm171_vm0, %v10213_v58  ;;  %v10289_v12 = vld [vmem:[#allocation2 + $0x26f] sm:$0xff]  ;;  %v10319_v19 = vld [vmem:[#allocation2 + $0x2a7] sm:$0xff] }
  0x7f   : > { %513 = vst.msk [vmem:[#allocation4 + $0x50] sm:$0xff] %vm171_vm0, %v10215_v59  ;;  %514 = vst.msk [vmem:[#allocation4 + $0x58] sm:$0xff] %vm171_vm0, %v10225_v60  ;;  %v10299_v14 = vld [vmem:[#allocation2 + $0x248] sm:$0xff]  ;;  %v10307_v17 = vld [vmem:[#allocation2 + $0x230] sm:$0xff] }
  0x80   : > { %515 = vst.msk [vmem:[#allocation4 + $0x60] sm:$0xff] %vm171_vm0, %v10227_v61  ;;  %516 = vst.msk [vmem:[#allocation4 + $0x68] sm:$0xff] %vm171_vm0, %v10229_v62  ;;  %629 = vrot.lane.b32.xlu1 %v10195_v53, %s9659_s19  ;;  %v10305_v16 = vld [vmem:[#allocation2 + $0x28f] sm:$0xff]  ;;  %v10335_v23 = vld [vmem:[#allocation2 + $0x2c7] sm:$0xff] }
  0x81   : > { %517 = vst.msk [vmem:[#allocation4 + $0x70] sm:$0xff] %vm171_vm0, %v10239_v0  ;;  %518 = vst.msk [vmem:[#allocation4 + $0x78] sm:$0xff] %vm171_vm0, %v10241_v1  ;;  %v10315_v18 = vld [vmem:[#allocation2 + $0x268] sm:$0xff]  ;;  %v10323_v21 = vld [vmem:[#allocation2 + $0x250] sm:$0xff] }
  0x82   : > { %519 = vst.msk [vmem:[#allocation4 + $0x80] sm:$0xff] %vm171_vm0, %v10243_v2  ;;  %520 = vst.msk [vmem:[#allocation4 + $0x88] sm:$0xff] %vm171_vm0, %v10253_v3  ;;  %635 = vrot.lane.b32.xlu0 %v10205_v56, %s9659_s19  ;;  %v10321_v20 = vld [vmem:[#allocation2 + $0x2af] sm:$0xff] }
  0x83   : > { %521 = vst.msk [vmem:[#allocation4 + $0x90] sm:$0xff] %vm171_vm0, %v10255_v4  ;;  %522 = vst.msk [vmem:[#allocation4 + $0x98] sm:$0xff] %vm171_vm0, %v10257_v5  ;;  %v10331_v22 = vld [vmem:[#allocation2 + $0x288] sm:$0xff]  ;;  %v10339_v28 = vld [vmem:[#allocation2 + $0x270] sm:$0xff] }
  0x84   : > { %523 = vst.msk [vmem:[#allocation4 + $0xa0] sm:$0xff] %vm171_vm0, %v10265_v6  ;;  %524 = vst.msk [vmem:[#allocation4 + $0xa8] sm:$0xff] %vm171_vm0, %v10267_v7  ;;  %633 = vrot.lane.b32.xlu1 %v10231_v63, %s9659_s19  ;;  %v10337_v24 = vld [vmem:[#allocation2 + $0x2cf] sm:$0xff] }
  0x85   : > { %525 = vst.msk [vmem:[#allocation4 + $0xb0] sm:$0xff] %vm171_vm0, %v10269_v8  ;;  %526 = vst.msk [vmem:[#allocation4 + $0xb8] sm:$0xff] %vm171_vm0, %v10279_v9  ;;  %v10347_v29 = vld [vmem:[#allocation2 + $0x2a8] sm:$0xff]  ;;  %v10351_v33 = vld [vmem:[#allocation2 + $0x290] sm:$0xff] }
  0x86   : > { %527 = vst.msk [vmem:[#allocation4 + $0xc0] sm:$0xff] %vm171_vm0, %v10287_v11  ;;  %528 = vst.msk [vmem:[#allocation4 + $0xc8] sm:$0xff] %vm171_vm0, %v10289_v12  ;;  %639 = vrot.lane.b32.xlu0 %v10281_v10, %s9659_s19  ;;  %v398_v34 = vld [vmem:[%s10033_s18 + $0xf0] sm:$0xff]  ;;  %v10356_v35 = vld [vmem:[#allocation2 + $0x2c8] sm:$0xff] }
  0x87   : > { %529 = vst.msk [vmem:[#allocation4 + $0xd0] sm:$0xff] %vm171_vm0, %v10303_v15  ;;  %530 = vst.msk [vmem:[#allocation4 + $0xd8] sm:$0xff] %vm171_vm0, %v10305_v16  ;;  %v10365_v37 = vld [vmem:[#allocation2 + $0x2b0] sm:$0xff] }
  0x88   : > { %637 = vrot.lane.b32.xlu1 %v10291_v13, %s9659_s19  ;;  %531 = vst.msk [vmem:[#allocation4 + $0xe0] sm:$0xff] %vm171_vm0, %v10319_v19  ;;  %532 = vst.msk [vmem:[#allocation4 + $0xe8] sm:$0xff] %vm171_vm0, %v10321_v20  ;;  %v728_v38 = vld [vmem:[#allocation2 + $0xe9] sm:$0xff] }
  0x89   : > { %533 = vst.msk [vmem:[#allocation4 + $0xf0] sm:$0xff] %vm171_vm0, %v10335_v23  ;;  %534 = vst.msk [vmem:[#allocation4 + $0xf8] sm:$0xff] %vm171_vm0, %v10337_v24  ;;  %v10371_v45 = vld [vmem:[#allocation2 + $0x2d0] sm:$0xff] }
  0x8a   : > { %643 = vrot.lane.b32.xlu0 %v10299_v14, %s9659_s19  ;;  %14552 = vst [vmem:[#allocation6_spill] sm:$0xff] %v10351_v33  ;;  %14553 = vst [vmem:[#allocation7_spill] sm:$0xff] %v10356_v35  ;;  %v10374_v48 = vld [vmem:[#allocation2 + $0x109] sm:$0xff] }
  0x8b   : > { %462 = vst.msk [vmem:[#allocation2 + $0x2e8] sm:$0xff] %vm171_vm0, %v398_v34  ;;  %430 = vst.msk [vmem:[#allocation5 + $0xf0] sm:$0xff] %vm171_vm0, %v398_v34  ;;  %v729_v34 = vld [vmem:[#allocation2 + $0xf1] sm:$0xff] }
  0x8c   : > { %641 = vrot.lane.b32.xlu1 %v10307_v17, %s9659_s19  ;;  %463 = vst.msk [vmem:[#allocation2 + $0x2f0] sm:$0xff] %vm171_vm0, %v399_v36  ;;  %431 = vst.msk [vmem:[#allocation5 + $0xf8] sm:$0xff] %vm171_vm0, %v399_v36  ;;  %v10380_v36 = vld [vmem:[#allocation2 + $0x129] sm:$0xff] }
  0x8d   : > { %14554 = vst [vmem:[#allocation8_spill] sm:$0xff] %v10365_v37  ;;  %14555 = vst [vmem:[#allocation9_spill] sm:$0xff] %v10371_v45 }
  0x8e   : > { %647 = vrot.lane.b32.xlu0 %v10315_v18, %s9659_s19  ;;  %14556 = vst [vmem:[#allocation10_spill] sm:$0xff] %v10374_v48  ;;  %14557 = vst [vmem:[#allocation11_spill] sm:$0xff] %v10380_v36 }
  0x90   : > { %645 = vrot.lane.b32.xlu1 %v10323_v21, %s9659_s19 }
  0x92   : > { %651 = vrot.lane.b32.xlu0 %v10331_v22, %s9659_s19 }
  0x94   : > { %649 = vrot.lane.b32.xlu1 %v10339_v28, %s9659_s19 }
  0x96   : > { %655 = vrot.lane.b32.xlu0 %v10347_v29, %s9659_s19 }
  0x98   : > { %653 = vrot.lane.b32.xlu1 %v10351_v33, %s9659_s19 }
  0x9a   : > { %659 = vrot.lane.b32.xlu0 %v10356_v35, %s9659_s19  ;;  %v10383_v35 = vld [vmem:[#allocation2 + $0x111] sm:$0xff] }
  0x9b   : > { %14558 = vst [vmem:[#allocation12_spill] sm:$0xff] %v10383_v35 }
  0x9c   : > { %657 = vrot.lane.b32.xlu1 %v10365_v37, %s9659_s19  ;;  %v10387_v37 = vld [vmem:[#allocation2 + $0x149] sm:$0xff] }
  0x9d   : > { %14559 = vst [vmem:[#allocation13_spill] sm:$0xff] %v10387_v37 }
  0x9e   : > { %792 = vrot.lane.b32.xlu0 %v728_v38, %s9660_s20  ;;  %v10391_v38 = vld [vmem:[#allocation2 + $0x131] sm:$0xff] }
  0x9f   : > { %14560 = vst [vmem:[#allocation14_spill] sm:$0xff] %v10391_v38 }
  0xa0   : > { %661 = vrot.lane.b32.xlu1 %v10371_v45, %s9659_s19  ;;  %v10471_v45 = vld [vmem:[#allocation2 + $0x271] sm:$0xff] }
  0xa1   : > { %14580 = vst [vmem:[#allocation34_spill] sm:$0xff] %v10471_v45 }
  0xa2   : > { %796 = vrot.lane.b32.xlu0 %v10374_v48, %s9660_s20  ;;  %v10395_v48 = vld [vmem:[#allocation2 + $0x169] sm:$0xff] }
  0xa3   : > { %14561 = vst [vmem:[#allocation15_spill] sm:$0xff] %v10395_v48 }
  0xa4   : > { %794 = vrot.lane.b32.xlu1 %v729_v34, %s9660_s20  ;;  %v10399_v34 = vld [vmem:[#allocation2 + $0x151] sm:$0xff] }
  0xa5   : > { %14562 = vst [vmem:[#allocation16_spill] sm:$0xff] %v10399_v34 }
  0xa6   : > { %800 = vrot.lane.b32.xlu0 %v10380_v36, %s9660_s20  ;;  %v10403_v36 = vld [vmem:[#allocation2 + $0x189] sm:$0xff] }
  0xa7   : > { %14563 = vst [vmem:[#allocation17_spill] sm:$0xff] %v10403_v36 }
  0xa8   : > { %798 = vrot.lane.b32.xlu1 %v10383_v35, %s9660_s20  ;;  %v10407_v35 = vld [vmem:[#allocation2 + $0x171] sm:$0xff] }
  0xa9   : > { %14564 = vst [vmem:[#allocation18_spill] sm:$0xff] %v10407_v35 }
  0xaa   : > { %804 = vrot.lane.b32.xlu0 %v10387_v37, %s9660_s20  ;;  %v10411_v37 = vld [vmem:[#allocation2 + $0x1a9] sm:$0xff] }
  0xab   : > { %14565 = vst [vmem:[#allocation19_spill] sm:$0xff] %v10411_v37 }
  0xac   : > { %802 = vrot.lane.b32.xlu1 %v10391_v38, %s9660_s20  ;;  %v10415_v38 = vld [vmem:[#allocation2 + $0x191] sm:$0xff] }
  0xad   : > { %14566 = vst [vmem:[#allocation20_spill] sm:$0xff] %v10415_v38 }
  0xae   : > { %808 = vrot.lane.b32.xlu0 %v10395_v48, %s9660_s20  ;;  %v10419_v48 = vld [vmem:[#allocation2 + $0x1c9] sm:$0xff] }
  0xaf   : > { %14567 = vst [vmem:[#allocation21_spill] sm:$0xff] %v10419_v48 }
  0xb0   : > { %806 = vrot.lane.b32.xlu1 %v10399_v34, %s9660_s20  ;;  %v10423_v34 = vld [vmem:[#allocation2 + $0x1b1] sm:$0xff] }
  0xb1   : > { %14568 = vst [vmem:[#allocation22_spill] sm:$0xff] %v10423_v34 }
  0xb2   : > { %812 = vrot.lane.b32.xlu0 %v10403_v36, %s9660_s20  ;;  %v10427_v36 = vld [vmem:[#allocation2 + $0x1e9] sm:$0xff] }
  0xb3   : > { %14569 = vst [vmem:[#allocation23_spill] sm:$0xff] %v10427_v36 }
  0xb4   : > { %810 = vrot.lane.b32.xlu1 %v10407_v35, %s9660_s20  ;;  %v10431_v35 = vld [vmem:[#allocation2 + $0x1d1] sm:$0xff] }
  0xb5   : > { %14570 = vst [vmem:[#allocation24_spill] sm:$0xff] %v10431_v35 }
  0xb6   : > { %816 = vrot.lane.b32.xlu0 %v10411_v37, %s9660_s20  ;;  %v10435_v37 = vld [vmem:[#allocation2 + $0x209] sm:$0xff] }
  0xb7   : > { %14571 = vst [vmem:[#allocation25_spill] sm:$0xff] %v10435_v37 }
  0xb8   : > { %814 = vrot.lane.b32.xlu1 %v10415_v38, %s9660_s20  ;;  %v10439_v38 = vld [vmem:[#allocation2 + $0x1f1] sm:$0xff] }
  0xb9   : > { %14572 = vst [vmem:[#allocation26_spill] sm:$0xff] %v10439_v38 }
  0xba   : > { %820 = vrot.lane.b32.xlu0 %v10419_v48, %s9660_s20  ;;  %v10443_v48 = vld [vmem:[#allocation2 + $0x229] sm:$0xff] }
  0xbb   : > { %14573 = vst [vmem:[#allocation27_spill] sm:$0xff] %v10443_v48 }
  0xbc   : > { %818 = vrot.lane.b32.xlu1 %v10423_v34, %s9660_s20  ;;  %v10447_v34 = vld [vmem:[#allocation2 + $0x211] sm:$0xff] }
  0xbd   : > { %14574 = vst [vmem:[#allocation28_spill] sm:$0xff] %v10447_v34 }
  0xbe   : > { %824 = vrot.lane.b32.xlu0 %v10427_v36, %s9660_s20  ;;  %v10451_v36 = vld [vmem:[#allocation2 + $0x249] sm:$0xff] }
  0xbf   : > { %14575 = vst [vmem:[#allocation29_spill] sm:$0xff] %v10451_v36 }
  0xc0   : > { %822 = vrot.lane.b32.xlu1 %v10431_v35, %s9660_s20  ;;  %v10455_v35 = vld [vmem:[#allocation2 + $0x231] sm:$0xff] }
  0xc1   : > { %14576 = vst [vmem:[#allocation30_spill] sm:$0xff] %v10455_v35 }
  0xc2   : > { %828 = vrot.lane.b32.xlu0 %v10435_v37, %s9660_s20  ;;  %v10459_v37 = vld [vmem:[#allocation2 + $0x269] sm:$0xff] }
  0xc3   : > { %14577 = vst [vmem:[#allocation31_spill] sm:$0xff] %v10459_v37 }
  0xc4   : > { %826 = vrot.lane.b32.xlu1 %v10439_v38, %s9660_s20  ;;  %v10463_v38 = vld [vmem:[#allocation2 + $0x251] sm:$0xff] }
  0xc5   : > { %14578 = vst [vmem:[#allocation32_spill] sm:$0xff] %v10463_v38 }
  0xc6   : > { %832 = vrot.lane.b32.xlu0 %v10443_v48, %s9660_s20  ;;  %v10467_v48 = vld [vmem:[#allocation2 + $0x289] sm:$0xff] }
  0xc7   : > { %14579 = vst [vmem:[#allocation33_spill] sm:$0xff] %v10467_v48 }
  0xc8   : > { %830 = vrot.lane.b32.xlu1 %v10447_v34, %s9660_s20  ;;  %v600_v34 = vpop.permute.xlu0 %599 }
  0xc9   : > { %696 = vst.msk [vmem:[#allocation4] sm:$0xff] %vm695_vm1, %v600_v34  ;;  %v10486_v34 = vld [vmem:[#allocation2 + $0x2c9] sm:$0xff] }
  0xca   : > { %836 = vrot.lane.b32.xlu0 %v10451_v36, %s9660_s20  ;;  %v10480_v36 = vld [vmem:[#allocation2 + $0x291] sm:$0xff] }
  0xcb   : > { %14581 = vst [vmem:[#allocation35_spill] sm:$0xff] %v10480_v36 }
  0xcc   : > { %834 = vrot.lane.b32.xlu1 %v10455_v35, %s9660_s20  ;;  %v10476_v35 = vld [vmem:[#allocation2 + $0x2a9] sm:$0xff] }
  0xce   : > { %840 = vrot.lane.b32.xlu0 %v10459_v37, %s9660_s20  ;;  %v602_v37 = vpop.permute.xlu0 %601 }
  0xcf   : > { %697 = vst.msk [vmem:[#allocation4 + $0x8] sm:$0xff] %vm695_vm1, %v602_v37  ;;  %v10498_v37 = vld [vmem:[#allocation2 + $0x2d1] sm:$0xff] }
  0xd0   : > { %838 = vrot.lane.b32.xlu1 %v10463_v38, %s9660_s20  ;;  %v10490_v38 = vld [vmem:[#allocation2 + $0x2b1] sm:$0xff] }
  0xd2   : > { %844 = vrot.lane.b32.xlu0 %v10467_v48, %s9660_s20 }
  0xd4   : > { %842 = vrot.lane.b32.xlu1 %v10471_v45, %s9660_s20 }
  0xd6   : > { %v604_v33 = vpop.permute.xlu1 %603  ;;  %848 = vrot.lane.b32.xlu0 %v10476_v35, %s9660_s20 }
  0xd7   : > { %698 = vst.msk [vmem:[#allocation4 + $0x10] sm:$0xff] %vm695_vm1, %v604_v33 }
  0xd8   : > { %846 = vrot.lane.b32.xlu1 %v10480_v36, %s9660_s20  ;;  %v608_v48 = vpop.permute.xlu0 %607 }
  0xd9   : > { %700 = vst.msk [vmem:[#allocation4 + $0x20] sm:$0xff] %vm695_vm1, %v608_v48 }
  0xda   : > { %v606_v45 = vpop.permute.xlu1 %605  ;;  %852 = vrot.lane.b32.xlu0 %v10486_v34, %s9660_s20 }
  0xdb   : > { %699 = vst.msk [vmem:[#allocation4 + $0x18] sm:$0xff] %vm695_vm1, %v606_v45 }
  0xdc   : > { %850 = vrot.lane.b32.xlu1 %v10490_v38, %s9660_s20  ;;  %v612_v33 = vpop.permute.xlu0 %611 }
  0xdd   : > { %702 = vst.msk [vmem:[#allocation4 + $0x30] sm:$0xff] %vm695_vm1, %v612_v33 }
  0xde   : > { %v610_v36 = vpop.permute.xlu1 %609  ;;  %985 = vrot.lane.b32.xlu0 %v10173_v46, %s9661_s21 }
  0xdf   : > { %701 = vst.msk [vmem:[#allocation4 + $0x28] sm:$0xff] %vm695_vm1, %v610_v36 }
  0xe0   : > { %854 = vrot.lane.b32.xlu1 %v10498_v37, %s9660_s20  ;;  %v616_v48 = vpop.permute.xlu0 %615 }
  0xe1   : > { %704 = vst.msk [vmem:[#allocation4 + $0x40] sm:$0xff] %vm695_vm1, %v616_v48 }
  0xe2   : > { %v614_v45 = vpop.permute.xlu1 %613  ;;  %989 = vrot.lane.b32.xlu0 %v10189_v51, %s9661_s21 }
  0xe3   : > { %703 = vst.msk [vmem:[#allocation4 + $0x38] sm:$0xff] %vm695_vm1, %v614_v45 }
  0xe4   : > { %987 = vrot.lane.b32.xlu1 %v10183_v49, %s9661_s21  ;;  %v620_v33 = vpop.permute.xlu0 %619 }
  0xe5   : > { %706 = vst.msk [vmem:[#allocation4 + $0x50] sm:$0xff] %vm695_vm1, %v620_v33 }
  0xe6   : > { %v618_v46 = vpop.permute.xlu1 %617  ;;  %993 = vrot.lane.b32.xlu0 %v10201_v54, %s9661_s21 }
  0xe7   : > { %705 = vst.msk [vmem:[#allocation4 + $0x48] sm:$0xff] %vm695_vm1, %v618_v46 }
  0xe8   : > { %991 = vrot.lane.b32.xlu1 %v10191_v52, %s9661_s21  ;;  %v624_v36 = vpop.permute.xlu0 %623 }
  0xe9   : > { %708 = vst.msk [vmem:[#allocation4 + $0x60] sm:$0xff] %vm695_vm1, %v624_v36 }
  0xea   : > { %v622_v48 = vpop.permute.xlu1 %621  ;;  %997 = vrot.lane.b32.xlu0 %v10211_v57, %s9661_s21 }
  0xeb   : > { %707 = vst.msk [vmem:[#allocation4 + $0x58] sm:$0xff] %vm695_vm1, %v622_v48 }
  0xec   : > { %995 = vrot.lane.b32.xlu1 %v10203_v55, %s9661_s21  ;;  %v628_v49 = vpop.permute.xlu0 %627 }
  0xed   : > { %710 = vst.msk [vmem:[#allocation4 + $0x70] sm:$0xff] %vm695_vm1, %v628_v49 }
  0xee   : > { %v626_v45 = vpop.permute.xlu1 %625  ;;  %1001 = vrot.lane.b32.xlu0 %v10215_v59, %s9661_s21 }
  0xef   : > { %709 = vst.msk [vmem:[#allocation4 + $0x68] sm:$0xff] %vm695_vm1, %v626_v45 }
  0xf0   : > { %999 = vrot.lane.b32.xlu1 %v10213_v58, %s9661_s21  ;;  %v632_v33 = vpop.permute.xlu0 %631 }
  0xf1   : > { %712 = vst.msk [vmem:[#allocation4 + $0x80] sm:$0xff] %vm695_vm1, %v632_v33 }
  0xf2   : > { %v630_v46 = vpop.permute.xlu1 %629  ;;  %1005 = vrot.lane.b32.xlu0 %v10227_v61, %s9661_s21 }
  0xf3   : > { %711 = vst.msk [vmem:[#allocation4 + $0x78] sm:$0xff] %vm695_vm1, %v630_v46 }
  0xf4   : > { %1003 = vrot.lane.b32.xlu1 %v10225_v60, %s9661_s21  ;;  %v636_v36 = vpop.permute.xlu0 %635 }
  0xf5   : > { %714 = vst.msk [vmem:[#allocation4 + $0x90] sm:$0xff] %vm695_vm1, %v636_v36 }
  0xf6   : > { %v634_v48 = vpop.permute.xlu1 %633  ;;  %1009 = vrot.lane.b32.xlu0 %v10239_v0, %s9661_s21 }
  0xf7   : > { %713 = vst.msk [vmem:[#allocation4 + $0x88] sm:$0xff] %vm695_vm1, %v634_v48 }
  0xf8   : > { %1007 = vrot.lane.b32.xlu1 %v10229_v62, %s9661_s21  ;;  %v640_v49 = vpop.permute.xlu0 %639 }
  0xf9   : > { %716 = vst.msk [vmem:[#allocation4 + $0xa0] sm:$0xff] %vm695_vm1, %v640_v49 }
  0xfa   : > { %v638_v45 = vpop.permute.xlu1 %637  ;;  %1013 = vrot.lane.b32.xlu0 %v10243_v2, %s9661_s21 }
  0xfb   : > { %715 = vst.msk [vmem:[#allocation4 + $0x98] sm:$0xff] %vm695_vm1, %v638_v45 }
  0xfc   : > { %1011 = vrot.lane.b32.xlu1 %v10241_v1, %s9661_s21  ;;  %v644_v33 = vpop.permute.xlu0 %643 }
  0xfd   : > { %718 = vst.msk [vmem:[#allocation4 + $0xb0] sm:$0xff] %vm695_vm1, %v644_v33 }
  0xfe   : > { %v642_v46 = vpop.permute.xlu1 %641  ;;  %1017 = vrot.lane.b32.xlu0 %v10255_v4, %s9661_s21 }
  0xff   : > { %717 = vst.msk [vmem:[#allocation4 + $0xa8] sm:$0xff] %vm695_vm1, %v642_v46 }
 0x100   : > { %1015 = vrot.lane.b32.xlu1 %v10253_v3, %s9661_s21  ;;  %v648_v36 = vpop.permute.xlu0 %647 }
 0x101   : > { %720 = vst.msk [vmem:[#allocation4 + $0xc0] sm:$0xff] %vm695_vm1, %v648_v36 }
 0x102   : > { %v646_v48 = vpop.permute.xlu1 %645  ;;  %1021 = vrot.lane.b32.xlu0 %v10265_v6, %s9661_s21 }
 0x103   : > { %719 = vst.msk [vmem:[#allocation4 + $0xb8] sm:$0xff] %vm695_vm1, %v646_v48 }
 0x104   : > { %1019 = vrot.lane.b32.xlu1 %v10257_v5, %s9661_s21  ;;  %v652_v49 = vpop.permute.xlu0 %651 }
 0x105   : > { %722 = vst.msk [vmem:[#allocation4 + $0xd0] sm:$0xff] %vm695_vm1, %v652_v49 }
 0x106   : > { %v650_v45 = vpop.permute.xlu1 %649  ;;  %1025 = vrot.lane.b32.xlu0 %v10269_v8, %s9661_s21 }
 0x107   : > { %721 = vst.msk [vmem:[#allocation4 + $0xc8] sm:$0xff] %vm695_vm1, %v650_v45 }
 0x108   : > { %1023 = vrot.lane.b32.xlu1 %v10267_v7, %s9661_s21  ;;  %v656_v33 = vpop.permute.xlu0 %655 }
 0x109   : > { %724 = vst.msk [vmem:[#allocation4 + $0xe0] sm:$0xff] %vm695_vm1, %v656_v33 }
 0x10a   : > { %v654_v46 = vpop.permute.xlu1 %653  ;;  %1029 = vrot.lane.b32.xlu0 %v10287_v11, %s9661_s21 }
 0x10b   : > { %723 = vst.msk [vmem:[#allocation4 + $0xd8] sm:$0xff] %vm695_vm1, %v654_v46 }
 0x10c   : > { %1027 = vrot.lane.b32.xlu1 %v10279_v9, %s9661_s21  ;;  %v660_v36 = vpop.permute.xlu0 %659 }
 0x10d   : > { %726 = vst.msk [vmem:[#allocation4 + $0xf0] sm:$0xff] %vm695_vm1, %v660_v36  ;;  %v10588_v36 = vld [vmem:[#allocation2 + $0x2e7] sm:$0xff] }
 0x10e   : > { %v658_v48 = vpop.permute.xlu1 %657  ;;  %1033 = vrot.lane.b32.xlu0 %v10303_v15, %s9661_s21 }
 0x10f   : > { %725 = vst.msk [vmem:[#allocation4 + $0xe8] sm:$0xff] %vm695_vm1, %v658_v48 }
 0x110   : > { %1031 = vrot.lane.b32.xlu1 %v10289_v12, %s9661_s21  ;;  %v793_v49 = vpop.permute.xlu0 %792 }
 0x111   : > { %889 = vst.msk [vmem:[#allocation4] sm:$0xff] %vm888_vm2, %v793_v49 }
 0x112   : > { %v662_v45 = vpop.permute.xlu1 %661  ;;  %1037 = vrot.lane.b32.xlu0 %v10319_v19, %s9661_s21 }
 0x113   : > { %727 = vst.msk [vmem:[#allocation4 + $0xf8] sm:$0xff] %vm695_vm1, %v662_v45 }
 0x114   : > { %1035 = vrot.lane.b32.xlu1 %v10305_v16, %s9661_s21  ;;  %v797_v33 = vpop.permute.xlu0 %796 }
 0x115   : > { %891 = vst.msk [vmem:[#allocation4 + $0x10] sm:$0xff] %vm888_vm2, %v797_v33  ;;  %v10598_v33 = vld [vmem:[#allocation2 + $0x2ef] sm:$0xff] }
 0x116   : > { %v795_v46 = vpop.permute.xlu1 %794  ;;  %1041 = vrot.lane.b32.xlu0 %v10335_v23, %s9661_s21 }
 0x117   : > { %890 = vst.msk [vmem:[#allocation4 + $0x8] sm:$0xff] %vm888_vm2, %v795_v46 }
 0x118   : > { %1039 = vrot.lane.b32.xlu1 %v10321_v20, %s9661_s21  ;;  %v801_v48 = vpop.permute.xlu0 %800 }
 0x119   : > { %893 = vst.msk [vmem:[#allocation4 + $0x20] sm:$0xff] %vm888_vm2, %v801_v48 }
 0x11a   : > { %v799_v49 = vpop.permute.xlu1 %798  ;;  %1045 = vrot.lane.b32.xlu0 %v10588_v36, %s9661_s21 }
 0x11b   : > { %892 = vst.msk [vmem:[#allocation4 + $0x18] sm:$0xff] %vm888_vm2, %v799_v49 }
 0x11c   : > { %1043 = vrot.lane.b32.xlu1 %v10337_v24, %s9661_s21  ;;  %v805_v45 = vpop.permute.xlu0 %804 }
 0x11d   : > { %895 = vst.msk [vmem:[#allocation4 + $0x30] sm:$0xff] %vm888_vm2, %v805_v45 }
 0x11e   : > { %v803_v46 = vpop.permute.xlu1 %802  ;;  %1178 = vrot.lane.b32.xlu0 %v10097_v25, %s9662_s22 }
 0x11f   : > { %894 = vst.msk [vmem:[#allocation4 + $0x28] sm:$0xff] %vm888_vm2, %v803_v46 }
 0x120   : > { %1047 = vrot.lane.b32.xlu1 %v10598_v33, %s9661_s21  ;;  %v809_v48 = vpop.permute.xlu0 %808 }
 0x121   : > { %897 = vst.msk [vmem:[#allocation4 + $0x40] sm:$0xff] %vm888_vm2, %v809_v48 }
 0x122   : > { %v807_v49 = vpop.permute.xlu1 %806  ;;  %1182 = vrot.lane.b32.xlu0 %v10099_v26, %s9662_s22 }
 0x123   : > { %896 = vst.msk [vmem:[#allocation4 + $0x38] sm:$0xff] %vm888_vm2, %v807_v49  ;;  %v14583_v49 = vld [vmem:[#allocation7_spill] sm:$0xff] }
 0x124   : > { %1180 = vrot.lane.b32.xlu1 %v10109_v27, %s9662_s22  ;;  %v813_v45 = vpop.permute.xlu0 %812 }
 0x125   : > { %899 = vst.msk [vmem:[#allocation4 + $0x50] sm:$0xff] %vm888_vm2, %v813_v45  ;;  %v14584_v45 = vld [vmem:[#allocation8_spill] sm:$0xff] }
 0x126   : > { %v811_v25 = vpop.permute.xlu1 %810  ;;  %1186 = vrot.lane.b32.xlu0 %v10119_v30, %s9662_s22 }
 0x127   : > { %898 = vst.msk [vmem:[#allocation4 + $0x48] sm:$0xff] %vm888_vm2, %v811_v25 }
 0x128   : > { %1184 = vrot.lane.b32.xlu1 %v10123_v31, %s9662_s22  ;;  %v817_v46 = vpop.permute.xlu0 %816 }
 0x129   : > { %901 = vst.msk [vmem:[#allocation4 + $0x60] sm:$0xff] %vm888_vm2, %v817_v46  ;;  %v14585_v46 = vld [vmem:[#allocation9_spill] sm:$0xff] }
 0x12a   : > { %v815_v26 = vpop.permute.xlu1 %814  ;;  %1190 = vrot.lane.b32.xlu0 %v10127_v32, %s9662_s22 }
 0x12b   : > { %900 = vst.msk [vmem:[#allocation4 + $0x58] sm:$0xff] %vm888_vm2, %v815_v26 }
 0x12c   : > { %1188 = vrot.lane.b32.xlu1 %v10143_v39, %s9662_s22  ;;  %v821_v27 = vpop.permute.xlu0 %820 }
 0x12d   : > { %903 = vst.msk [vmem:[#allocation4 + $0x70] sm:$0xff] %vm888_vm2, %v821_v27  ;;  %v10698_v27 = vld [vmem:[#allocation2 + $0x2f0] sm:$0xff] }
 0x12e   : > { %v819_v30 = vpop.permute.xlu1 %818  ;;  %1194 = vrot.lane.b32.xlu0 %v10153_v40, %s9662_s22 }
 0x12f   : > { %902 = vst.msk [vmem:[#allocation4 + $0x68] sm:$0xff] %vm888_vm2, %v819_v30 }
 0x130   : > { %1192 = vrot.lane.b32.xlu1 %v10157_v41, %s9662_s22  ;;  %v825_v31 = vpop.permute.xlu0 %824 }
 0x131   : > { %905 = vst.msk [vmem:[#allocation4 + $0x80] sm:$0xff] %vm888_vm2, %v825_v31  ;;  %v14586_v31 = vld [vmem:[#allocation10_spill] sm:$0xff] }
 0x132   : > { %v823_v32 = vpop.permute.xlu1 %822  ;;  %1198 = vrot.lane.b32.xlu0 %v10161_v42, %s9662_s22 }
 0x133   : > { %904 = vst.msk [vmem:[#allocation4 + $0x78] sm:$0xff] %vm888_vm2, %v823_v32 }
 0x134   : > { %1196 = vrot.lane.b32.xlu1 %v10165_v43, %s9662_s22  ;;  %v829_v39 = vpop.permute.xlu0 %828 }
 0x135   : > { %907 = vst.msk [vmem:[#allocation4 + $0x90] sm:$0xff] %vm888_vm2, %v829_v39 }
 0x136   : > { %v827_v40 = vpop.permute.xlu1 %826  ;;  %1202 = vrot.lane.b32.xlu0 %v10169_v44, %s9662_s22 }
 0x137   : > { %906 = vst.msk [vmem:[#allocation4 + $0x88] sm:$0xff] %vm888_vm2, %v827_v40  ;;  %v14587_v40 = vld [vmem:[#allocation11_spill] sm:$0xff] }
 0x138   : > { %1200 = vrot.lane.b32.xlu1 %v10175_v47, %s9662_s22  ;;  %v833_v41 = vpop.permute.xlu0 %832 }
 0x139   : > { %909 = vst.msk [vmem:[#allocation4 + $0xa0] sm:$0xff] %vm888_vm2, %v833_v41  ;;  %v14588_v41 = vld [vmem:[#allocation12_spill] sm:$0xff] }
 0x13a   : > { %v831_v42 = vpop.permute.xlu1 %830  ;;  %1206 = vrot.lane.b32.xlu0 %v10185_v50, %s9662_s22 }
 0x13b   : > { %908 = vst.msk [vmem:[#allocation4 + $0x98] sm:$0xff] %vm888_vm2, %v831_v42 }
 0x13c   : > { %1204 = vrot.lane.b32.xlu1 %v10195_v53, %s9662_s22  ;;  %v837_v43 = vpop.permute.xlu0 %836 }
 0x13d   : > { %911 = vst.msk [vmem:[#allocation4 + $0xb0] sm:$0xff] %vm888_vm2, %v837_v43 }
 0x13e   : > { %v835_v44 = vpop.permute.xlu1 %834  ;;  %1210 = vrot.lane.b32.xlu0 %v10205_v56, %s9662_s22 }
 0x13f   : > { %910 = vst.msk [vmem:[#allocation4 + $0xa8] sm:$0xff] %vm888_vm2, %v835_v44  ;;  %v14589_v44 = vld [vmem:[#allocation13_spill] sm:$0xff] }
 0x140   : > { %1208 = vrot.lane.b32.xlu1 %v10231_v63, %s9662_s22  ;;  %v841_v47 = vpop.permute.xlu0 %840 }
 0x141   : > { %913 = vst.msk [vmem:[#allocation4 + $0xc0] sm:$0xff] %vm888_vm2, %v841_v47  ;;  %v14590_v47 = vld [vmem:[#allocation14_spill] sm:$0xff] }
 0x142   : > { %v839_v50 = vpop.permute.xlu1 %838  ;;  %1214 = vrot.lane.b32.xlu0 %v10281_v10, %s9662_s22 }
 0x143   : > { %912 = vst.msk [vmem:[#allocation4 + $0xb8] sm:$0xff] %vm888_vm2, %v839_v50 }
 0x144   : > { %1212 = vrot.lane.b32.xlu1 %v10291_v13, %s9662_s22  ;;  %v845_v53 = vpop.permute.xlu0 %844 }
 0x145   : > { %915 = vst.msk [vmem:[#allocation4 + $0xd0] sm:$0xff] %vm888_vm2, %v845_v53 }
 0x146   : > { %v843_v56 = vpop.permute.xlu1 %842  ;;  %1218 = vrot.lane.b32.xlu0 %v10299_v14, %s9662_s22 }
 0x147   : > { %914 = vst.msk [vmem:[#allocation4 + $0xc8] sm:$0xff] %vm888_vm2, %v843_v56  ;;  %v14591_v56 = vld [vmem:[#allocation15_spill] sm:$0xff] }
 0x148   : > { %1216 = vrot.lane.b32.xlu1 %v10307_v17, %s9662_s22  ;;  %v849_v63 = vpop.permute.xlu0 %848 }
 0x149   : > { %917 = vst.msk [vmem:[#allocation4 + $0xe0] sm:$0xff] %vm888_vm2, %v849_v63  ;;  %v14592_v63 = vld [vmem:[#allocation16_spill] sm:$0xff] }
 0x14a   : > { %v847_v10 = vpop.permute.xlu1 %846  ;;  %1222 = vrot.lane.b32.xlu0 %v10315_v18, %s9662_s22 }
 0x14b   : > { %916 = vst.msk [vmem:[#allocation4 + $0xd8] sm:$0xff] %vm888_vm2, %v847_v10 }
 0x14c   : > { %1220 = vrot.lane.b32.xlu1 %v10323_v21, %s9662_s22  ;;  %v853_v13 = vpop.permute.xlu0 %852  ;;  %v14582_v21 = vld [vmem:[#allocation6_spill] sm:$0xff] }
 0x14d   : > { %919 = vst.msk [vmem:[#allocation4 + $0xf0] sm:$0xff] %vm888_vm2, %v853_v13 }
 0x14e   : > { %v851_v14 = vpop.permute.xlu1 %850  ;;  %1226 = vrot.lane.b32.xlu0 %v10331_v22, %s9662_s22 }
 0x14f   : > { %918 = vst.msk [vmem:[#allocation4 + $0xe8] sm:$0xff] %vm888_vm2, %v851_v14  ;;  %v14593_v14 = vld [vmem:[#allocation17_spill] sm:$0xff] }
 0x150   : > { %1224 = vrot.lane.b32.xlu1 %v10339_v28, %s9662_s22  ;;  %v986_v17 = vpop.permute.xlu0 %985  ;;  %v10688_v28 = vld [vmem:[#allocation2 + $0x2e8] sm:$0xff] }
 0x151   : > { %1082 = vst.msk [vmem:[#allocation4] sm:$0xff] %vm1081_vm3, %v986_v17  ;;  %v14594_v17 = vld [vmem:[#allocation18_spill] sm:$0xff] }
 0x152   : > { %v855_v18 = vpop.permute.xlu1 %854  ;;  %1230 = vrot.lane.b32.xlu0 %v10347_v29, %s9662_s22 }
 0x153   : > { %920 = vst.msk [vmem:[#allocation4 + $0xf8] sm:$0xff] %vm888_vm2, %v855_v18 }
 0x154   : > { %1228 = vrot.lane.b32.xlu1 %v14582_v21, %s9662_s22  ;;  %v990_v48 = vpop.permute.xlu0 %989 }
 0x155   : > { %1084 = vst.msk [vmem:[#allocation4 + $0x10] sm:$0xff] %vm1081_vm3, %v990_v48  ;;  %v14595_v48 = vld [vmem:[#allocation19_spill] sm:$0xff] }
 0x156   : > { %v988_v22 = vpop.permute.xlu1 %987  ;;  %1234 = vrot.lane.b32.xlu0 %v14583_v49, %s9662_s22 }
 0x157   : > { %1083 = vst.msk [vmem:[#allocation4 + $0x8] sm:$0xff] %vm1081_vm3, %v988_v22  ;;  %v14596_v22 = vld [vmem:[#allocation20_spill] sm:$0xff] }
 0x158   : > { %1232 = vrot.lane.b32.xlu1 %v14584_v45, %s9662_s22  ;;  %v994_v29 = vpop.permute.xlu0 %993 }
 0x159   : > { %1086 = vst.msk [vmem:[#allocation4 + $0x20] sm:$0xff] %vm1081_vm3, %v994_v29  ;;  %v14597_v29 = vld [vmem:[#allocation21_spill] sm:$0xff] }
 0x15a   : > { %v992_v25 = vpop.permute.xlu1 %991  ;;  %1238 = vrot.lane.b32.xlu0 %v10688_v28, %s9662_s22 }
 0x15b   : > { %1085 = vst.msk [vmem:[#allocation4 + $0x18] sm:$0xff] %vm1081_vm3, %v992_v25  ;;  %v14598_v25 = vld [vmem:[#allocation22_spill] sm:$0xff] }
 0x15c   : > { %1236 = vrot.lane.b32.xlu1 %v14585_v46, %s9662_s22  ;;  %v998_v26 = vpop.permute.xlu0 %997 }
 0x15d   : > { %1088 = vst.msk [vmem:[#allocation4 + $0x30] sm:$0xff] %vm1081_vm3, %v998_v26 }
 0x15e   : > { %v996_v30 = vpop.permute.xlu1 %995  ;;  %1371 = vrot.lane.b32.xlu0 %v14586_v31, %s9663_s23  ;;  %v14600_v31 = vld [vmem:[#allocation24_spill] sm:$0xff] }
 0x15f   : > { %1087 = vst.msk [vmem:[#allocation4 + $0x28] sm:$0xff] %vm1081_vm3, %v996_v30  ;;  %v14599_v30 = vld [vmem:[#allocation23_spill] sm:$0xff] }
 0x160   : > { %1240 = vrot.lane.b32.xlu1 %v10698_v27, %s9662_s22  ;;  %v1002_v32 = vpop.permute.xlu0 %1001 }
 0x161   : > { %1090 = vst.msk [vmem:[#allocation4 + $0x40] sm:$0xff] %vm1081_vm3, %v1002_v32 }
 0x162   : > { %v1000_v39 = vpop.permute.xlu1 %999  ;;  %1375 = vrot.lane.b32.xlu0 %v14587_v40, %s9663_s23  ;;  %v14601_v40 = vld [vmem:[#allocation25_spill] sm:$0xff] }
 0x163   : > { %1089 = vst.msk [vmem:[#allocation4 + $0x38] sm:$0xff] %vm1081_vm3, %v1000_v39 }
 0x164   : > { %1373 = vrot.lane.b32.xlu1 %v14588_v41, %s9663_s23  ;;  %v1006_v42 = vpop.permute.xlu0 %1005  ;;  %v14602_v41 = vld [vmem:[#allocation26_spill] sm:$0xff] }
 0x165   : > { %1092 = vst.msk [vmem:[#allocation4 + $0x50] sm:$0xff] %vm1081_vm3, %v1006_v42 }
 0x166   : > { %v1004_v43 = vpop.permute.xlu1 %1003  ;;  %1379 = vrot.lane.b32.xlu0 %v14589_v44, %s9663_s23  ;;  %v14603_v44 = vld [vmem:[#allocation27_spill] sm:$0xff] }
 0x167   : > { %1091 = vst.msk [vmem:[#allocation4 + $0x48] sm:$0xff] %vm1081_vm3, %v1004_v43 }
 0x168   : > { %1377 = vrot.lane.b32.xlu1 %v14590_v47, %s9663_s23  ;;  %v1010_v50 = vpop.permute.xlu0 %1009  ;;  %v14604_v47 = vld [vmem:[#allocation28_spill] sm:$0xff] }
 0x169   : > { %1094 = vst.msk [vmem:[#allocation4 + $0x60] sm:$0xff] %vm1081_vm3, %v1010_v50 }
 0x16a   : > { %v1008_v53 = vpop.permute.xlu1 %1007  ;;  %1383 = vrot.lane.b32.xlu0 %v14591_v56, %s9663_s23  ;;  %v14605_v56 = vld [vmem:[#allocation29_spill] sm:$0xff] }
 0x16b   : > { %1093 = vst.msk [vmem:[#allocation4 + $0x58] sm:$0xff] %vm1081_vm3, %v1008_v53 }
 0x16c   : > { %1381 = vrot.lane.b32.xlu1 %v14592_v63, %s9663_s23  ;;  %v1014_v10 = vpop.permute.xlu0 %1013  ;;  %v14606_v63 = vld [vmem:[#allocation30_spill] sm:$0xff] }
 0x16d   : > { %1096 = vst.msk [vmem:[#allocation4 + $0x70] sm:$0xff] %vm1081_vm3, %v1014_v10 }
 0x16e   : > { %v1012_v13 = vpop.permute.xlu1 %1011  ;;  %1387 = vrot.lane.b32.xlu0 %v14593_v14, %s9663_s23  ;;  %v14607_v14 = vld [vmem:[#allocation31_spill] sm:$0xff] }
 0x16f   : > { %1095 = vst.msk [vmem:[#allocation4 + $0x68] sm:$0xff] %vm1081_vm3, %v1012_v13 }
 0x170   : > { %1385 = vrot.lane.b32.xlu1 %v14594_v17, %s9663_s23  ;;  %v1018_v18 = vpop.permute.xlu0 %1017  ;;  %v14608_v17 = vld [vmem:[#allocation32_spill] sm:$0xff] }
 0x171   : > { %1098 = vst.msk [vmem:[#allocation4 + $0x80] sm:$0xff] %vm1081_vm3, %v1018_v18 }
 0x172   : > { %v1016_v21 = vpop.permute.xlu1 %1015  ;;  %1391 = vrot.lane.b32.xlu0 %v14595_v48, %s9663_s23  ;;  %v14609_v48 = vld [vmem:[#allocation33_spill] sm:$0xff] }
 0x173   : > { %1097 = vst.msk [vmem:[#allocation4 + $0x78] sm:$0xff] %vm1081_vm3, %v1016_v21 }
 0x174   : > { %1389 = vrot.lane.b32.xlu1 %v14596_v22, %s9663_s23  ;;  %v1022_v49 = vpop.permute.xlu0 %1021  ;;  %v14610_v22 = vld [vmem:[#allocation34_spill] sm:$0xff] }
 0x175   : > { %1100 = vst.msk [vmem:[#allocation4 + $0x90] sm:$0xff] %vm1081_vm3, %v1022_v49 }
 0x176   : > { %v1020_v45 = vpop.permute.xlu1 %1019  ;;  %1395 = vrot.lane.b32.xlu0 %v14597_v29, %s9663_s23  ;;  %v14611_v29 = vld [vmem:[#allocation35_spill] sm:$0xff] }
 0x177   : > { %1099 = vst.msk [vmem:[#allocation4 + $0x88] sm:$0xff] %vm1081_vm3, %v1020_v45 }
 0x178   : > { %1393 = vrot.lane.b32.xlu1 %v14598_v25, %s9663_s23  ;;  %v1026_v46 = vpop.permute.xlu0 %1025 }
 0x179   : > { %1102 = vst.msk [vmem:[#allocation4 + $0xa0] sm:$0xff] %vm1081_vm3, %v1026_v46 }
 0x17a   : > { %v1024_v26 = vpop.permute.xlu1 %1023  ;;  %1399 = vrot.lane.b32.xlu0 %v14599_v30, %s9663_s23 }
 0x17b   : > { %1101 = vst.msk [vmem:[#allocation4 + $0x98] sm:$0xff] %vm1081_vm3, %v1024_v26  ;;  %v1337_v26 = vld [vmem:[#allocation2 + $0x2e9] sm:$0xff] }
 0x17c   : > { %1397 = vrot.lane.b32.xlu1 %v14600_v31, %s9663_s23  ;;  %v1030_v32 = vpop.permute.xlu0 %1029 }
 0x17d   : > { %1104 = vst.msk [vmem:[#allocation4 + $0xb0] sm:$0xff] %vm1081_vm3, %v1030_v32  ;;  %v1338_v32 = vld [vmem:[#allocation2 + $0x2f1] sm:$0xff] }
 0x17e   : > { %v1028_v39 = vpop.permute.xlu1 %1027  ;;  %1403 = vrot.lane.b32.xlu0 %v14601_v40, %s9663_s23 }
 0x17f   : > { %1103 = vst.msk [vmem:[#allocation4 + $0xa8] sm:$0xff] %vm1081_vm3, %v1028_v39 }
 0x180   : > { %1401 = vrot.lane.b32.xlu1 %v14602_v41, %s9663_s23  ;;  %v1034_v42 = vpop.permute.xlu0 %1033 }
 0x181   : > { %1106 = vst.msk [vmem:[#allocation4 + $0xc0] sm:$0xff] %vm1081_vm3, %v1034_v42 }
 0x182   : > { %v1032_v43 = vpop.permute.xlu1 %1031  ;;  %1407 = vrot.lane.b32.xlu0 %v14603_v44, %s9663_s23 }
 0x183   : > { %1105 = vst.msk [vmem:[#allocation4 + $0xb8] sm:$0xff] %vm1081_vm3, %v1032_v43 }
 0x184   : > { %1405 = vrot.lane.b32.xlu1 %v14604_v47, %s9663_s23  ;;  %v1038_v50 = vpop.permute.xlu0 %1037  ;;  %v1695_v47 = vld [vmem:[#allocation2 + $0x130] sm:$0xff] }
 0x185   : > { %1108 = vst.msk [vmem:[#allocation4 + $0xd0] sm:$0xff] %vm1081_vm3, %v1038_v50 }
 0x186   : > { %v1036_v53 = vpop.permute.xlu1 %1035  ;;  %1411 = vrot.lane.b32.xlu0 %v14605_v56, %s9663_s23  ;;  %v1697_v56 = vld [vmem:[#allocation2 + $0x150] sm:$0xff] }
 0x187   : > { %1107 = vst.msk [vmem:[#allocation4 + $0xc8] sm:$0xff] %vm1081_vm3, %v1036_v53 }
 0x188   : > { %1409 = vrot.lane.b32.xlu1 %v14606_v63, %s9663_s23  ;;  %v1042_v10 = vpop.permute.xlu0 %1041 }
 0x189   : > { %1110 = vst.msk [vmem:[#allocation4 + $0xe0] sm:$0xff] %vm1081_vm3, %v1042_v10  ;;  %v1700_v10 = vld [vmem:[#allocation2 + $0x188] sm:$0xff] }
 0x18a   : > { %v1040_v13 = vpop.permute.xlu1 %1039  ;;  %1415 = vrot.lane.b32.xlu0 %v14607_v14, %s9663_s23  ;;  %v1699_v14 = vld [vmem:[#allocation2 + $0x170] sm:$0xff] }
 0x18b   : > { %1109 = vst.msk [vmem:[#allocation4 + $0xd8] sm:$0xff] %vm1081_vm3, %v1040_v13 }
 0x18c   : > { %1413 = vrot.lane.b32.xlu1 %v14608_v17, %s9663_s23  ;;  %v1046_v18 = vpop.permute.xlu0 %1045 }
 0x18d   : > { %1112 = vst.msk [vmem:[#allocation4 + $0xf0] sm:$0xff] %vm1081_vm3, %v1046_v18  ;;  %v1702_v18 = vld [vmem:[#allocation2 + $0x1a8] sm:$0xff] }
 0x18e   : > { %v1044_v21 = vpop.permute.xlu1 %1043  ;;  %1419 = vrot.lane.b32.xlu0 %v14609_v48, %s9663_s23  ;;  %v1701_v48 = vld [vmem:[#allocation2 + $0x190] sm:$0xff] }
 0x18f   : > { %1111 = vst.msk [vmem:[#allocation4 + $0xe8] sm:$0xff] %vm1081_vm3, %v1044_v21 }
 0x190   : > { %1417 = vrot.lane.b32.xlu1 %v14610_v22, %s9663_s23  ;;  %v1179_v49 = vpop.permute.xlu0 %1178 }
 0x191   : > { %1275 = vst.msk [vmem:[#allocation4] sm:$0xff] %vm1274_vm4, %v1179_v49  ;;  %v1704_v49 = vld [vmem:[#allocation2 + $0x1c8] sm:$0xff] }
 0x192   : > { %v1048_v45 = vpop.permute.xlu1 %1047  ;;  %1423 = vrot.lane.b32.xlu0 %v10476_v35, %s9663_s23 }
 0x193   : > { %1113 = vst.msk [vmem:[#allocation4 + $0xf8] sm:$0xff] %vm1081_vm3, %v1048_v45 }
 0x194   : > { %1421 = vrot.lane.b32.xlu1 %v14611_v29, %s9663_s23  ;;  %v1183_v25 = vpop.permute.xlu0 %1182  ;;  %v1703_v29 = vld [vmem:[#allocation2 + $0x1b0] sm:$0xff] }
 0x195   : > { %1277 = vst.msk [vmem:[#allocation4 + $0x10] sm:$0xff] %vm1274_vm4, %v1183_v25 }
 0x196   : > { %v1181_v46 = vpop.permute.xlu1 %1180  ;;  %1427 = vrot.lane.b32.xlu0 %v10486_v34, %s9663_s23 }
 0x197   : > { %1276 = vst.msk [vmem:[#allocation4 + $0x8] sm:$0xff] %vm1274_vm4, %v1181_v46  ;;  %v1706_v46 = vld [vmem:[#allocation2 + $0x1e8] sm:$0xff] }
 0x198   : > { %1425 = vrot.lane.b32.xlu1 %v10490_v38, %s9663_s23  ;;  %v1187_v30 = vpop.permute.xlu0 %1186 }
 0x199   : > { %1279 = vst.msk [vmem:[#allocation4 + $0x20] sm:$0xff] %vm1274_vm4, %v1187_v30  ;;  %v1705_v30 = vld [vmem:[#allocation2 + $0x1d0] sm:$0xff] }
 0x19a   : > { %v1185_v35 = vpop.permute.xlu1 %1184  ;;  %1431 = vrot.lane.b32.xlu0 %v1337_v26, %s9663_s23 }
 0x19b   : > { %1278 = vst.msk [vmem:[#allocation4 + $0x18] sm:$0xff] %vm1274_vm4, %v1185_v35 }
 0x19c   : > { %1429 = vrot.lane.b32.xlu1 %v10498_v37, %s9663_s23  ;;  %v1191_v31 = vpop.permute.xlu0 %1190 }
 0x19d   : > { %1281 = vst.msk [vmem:[#allocation4 + $0x30] sm:$0xff] %vm1274_vm4, %v1191_v31  ;;  %v1708_v31 = vld [vmem:[#allocation2 + $0x208] sm:$0xff] }
 0x19e   : > { %v1189_v34 = vpop.permute.xlu1 %1188  ;;  %1565 = vrot.lane.b32.xlu0 %v10189_v51, %s9664_s24 }
 0x19f   : > { %1280 = vst.msk [vmem:[#allocation4 + $0x28] sm:$0xff] %vm1274_vm4, %v1189_v34  ;;  %v1707_v34 = vld [vmem:[#allocation2 + $0x1f0] sm:$0xff] }
 0x1a0   : > { %1433 = vrot.lane.b32.xlu1 %v1338_v32, %s9663_s23  ;;  %v1195_v38 = vpop.permute.xlu0 %1194 }
 0x1a1   : > { %1283 = vst.msk [vmem:[#allocation4 + $0x40] sm:$0xff] %vm1274_vm4, %v1195_v38 }
 0x1a2   : > { %v1193_v39 = vpop.permute.xlu1 %1192  ;;  %1569 = vrot.lane.b32.xlu0 %v10201_v54, %s9664_s24 }
 0x1a3   : > { %1282 = vst.msk [vmem:[#allocation4 + $0x38] sm:$0xff] %vm1274_vm4, %v1193_v39  ;;  %v1710_v39 = vld [vmem:[#allocation2 + $0x228] sm:$0xff] }
 0x1a4   : > { %1567 = vrot.lane.b32.xlu1 %v10191_v52, %s9664_s24  ;;  %v1199_v37 = vpop.permute.xlu0 %1198 }
 0x1a5   : > { %1285 = vst.msk [vmem:[#allocation4 + $0x50] sm:$0xff] %vm1274_vm4, %v1199_v37 }
 0x1a6   : > { %v1197_v51 = vpop.permute.xlu1 %1196  ;;  %1573 = vrot.lane.b32.xlu0 %v10211_v57, %s9664_s24 }
 0x1a7   : > { %1284 = vst.msk [vmem:[#allocation4 + $0x48] sm:$0xff] %vm1274_vm4, %v1197_v51  ;;  %v1709_v51 = vld [vmem:[#allocation2 + $0x210] sm:$0xff] }
 0x1a8   : > { %1571 = vrot.lane.b32.xlu1 %v10203_v55, %s9664_s24  ;;  %v1203_v40 = vpop.permute.xlu0 %1202 }
 0x1a9   : > { %1287 = vst.msk [vmem:[#allocation4 + $0x60] sm:$0xff] %vm1274_vm4, %v1203_v40 }
 0x1aa   : > { %v1201_v54 = vpop.permute.xlu1 %1200  ;;  %1577 = vrot.lane.b32.xlu0 %v10215_v59, %s9664_s24 }
 0x1ab   : > { %1286 = vst.msk [vmem:[#allocation4 + $0x58] sm:$0xff] %vm1274_vm4, %v1201_v54  ;;  %v1712_v54 = vld [vmem:[#allocation2 + $0x248] sm:$0xff] }
 0x1ac   : > { %1575 = vrot.lane.b32.xlu1 %v10213_v58, %s9664_s24  ;;  %v1207_v52 = vpop.permute.xlu0 %1206 }
 0x1ad   : > { %1289 = vst.msk [vmem:[#allocation4 + $0x70] sm:$0xff] %vm1274_vm4, %v1207_v52 }
 0x1ae   : > { %v1205_v57 = vpop.permute.xlu1 %1204  ;;  %1581 = vrot.lane.b32.xlu0 %v10227_v61, %s9664_s24 }
 0x1af   : > { %1288 = vst.msk [vmem:[#allocation4 + $0x68] sm:$0xff] %vm1274_vm4, %v1205_v57  ;;  %v1711_v57 = vld [vmem:[#allocation2 + $0x230] sm:$0xff] }
 0x1b0   : > { %1579 = vrot.lane.b32.xlu1 %v10225_v60, %s9664_s24  ;;  %v1211_v55 = vpop.permute.xlu0 %1210 }
 0x1b1   : > { %1291 = vst.msk [vmem:[#allocation4 + $0x80] sm:$0xff] %vm1274_vm4, %v1211_v55 }
 0x1b2   : > { %v1209_v59 = vpop.permute.xlu1 %1208  ;;  %1585 = vrot.lane.b32.xlu0 %v10239_v0, %s9664_s24 }
 0x1b3   : > { %1290 = vst.msk [vmem:[#allocation4 + $0x78] sm:$0xff] %vm1274_vm4, %v1209_v59  ;;  %v1714_v59 = vld [vmem:[#allocation2 + $0x268] sm:$0xff] }
 0x1b4   : > { %1583 = vrot.lane.b32.xlu1 %v10229_v62, %s9664_s24  ;;  %v1215_v58 = vpop.permute.xlu0 %1214 }
 0x1b5   : > { %1293 = vst.msk [vmem:[#allocation4 + $0x90] sm:$0xff] %vm1274_vm4, %v1215_v58 }
 0x1b6   : > { %v1213_v61 = vpop.permute.xlu1 %1212  ;;  %1589 = vrot.lane.b32.xlu0 %v10243_v2, %s9664_s24 }
 0x1b7   : > { %1292 = vst.msk [vmem:[#allocation4 + $0x88] sm:$0xff] %vm1274_vm4, %v1213_v61  ;;  %v1713_v61 = vld [vmem:[#allocation2 + $0x250] sm:$0xff] }
 0x1b8   : > { %1587 = vrot.lane.b32.xlu1 %v10241_v1, %s9664_s24  ;;  %v1219_v60 = vpop.permute.xlu0 %1218 }
 0x1b9   : > { %1295 = vst.msk [vmem:[#allocation4 + $0xa0] sm:$0xff] %vm1274_vm4, %v1219_v60 }
 0x1ba   : > { %v1217_v0 = vpop.permute.xlu1 %1216  ;;  %1593 = vrot.lane.b32.xlu0 %v10255_v4, %s9664_s24 }
 0x1bb   : > { %1294 = vst.msk [vmem:[#allocation4 + $0x98] sm:$0xff] %vm1274_vm4, %v1217_v0  ;;  %v1716_v0 = vld [vmem:[#allocation2 + $0x288] sm:$0xff] }
 0x1bc   : > { %1591 = vrot.lane.b32.xlu1 %v10253_v3, %s9664_s24  ;;  %v1223_v62 = vpop.permute.xlu0 %1222 }
 0x1bd   : > { %1297 = vst.msk [vmem:[#allocation4 + $0xb0] sm:$0xff] %vm1274_vm4, %v1223_v62 }
 0x1be   : > { %v1221_v2 = vpop.permute.xlu1 %1220  ;;  %1597 = vrot.lane.b32.xlu0 %v10265_v6, %s9664_s24 }
 0x1bf   : > { %1296 = vst.msk [vmem:[#allocation4 + $0xa8] sm:$0xff] %vm1274_vm4, %v1221_v2  ;;  %v1715_v2 = vld [vmem:[#allocation2 + $0x270] sm:$0xff] }
 0x1c0   : > { %1595 = vrot.lane.b32.xlu1 %v10257_v5, %s9664_s24  ;;  %v1227_v1 = vpop.permute.xlu0 %1226 }
 0x1c1   : > { %1299 = vst.msk [vmem:[#allocation4 + $0xc0] sm:$0xff] %vm1274_vm4, %v1227_v1 }
 0x1c2   : > { %v1225_v4 = vpop.permute.xlu1 %1224  ;;  %1601 = vrot.lane.b32.xlu0 %v10269_v8, %s9664_s24 }
 0x1c3   : > { %1298 = vst.msk [vmem:[#allocation4 + $0xb8] sm:$0xff] %vm1274_vm4, %v1225_v4  ;;  %v1718_v4 = vld [vmem:[#allocation2 + $0x2a8] sm:$0xff] }
 0x1c4   : > { %1599 = vrot.lane.b32.xlu1 %v10267_v7, %s9664_s24  ;;  %v1231_v3 = vpop.permute.xlu0 %1230 }
 0x1c5   : > { %1301 = vst.msk [vmem:[#allocation4 + $0xd0] sm:$0xff] %vm1274_vm4, %v1231_v3 }
 0x1c6   : > { %v1229_v6 = vpop.permute.xlu1 %1228  ;;  %1605 = vrot.lane.b32.xlu0 %v10287_v11, %s9664_s24 }
 0x1c7   : > { %1300 = vst.msk [vmem:[#allocation4 + $0xc8] sm:$0xff] %vm1274_vm4, %v1229_v6  ;;  %v1717_v6 = vld [vmem:[#allocation2 + $0x290] sm:$0xff] }
 0x1c8   : > { %1603 = vrot.lane.b32.xlu1 %v10279_v9, %s9664_s24  ;;  %v1235_v5 = vpop.permute.xlu0 %1234 }
 0x1c9   : > { %1303 = vst.msk [vmem:[#allocation4 + $0xe0] sm:$0xff] %vm1274_vm4, %v1235_v5 }
 0x1ca   : > { %v1233_v8 = vpop.permute.xlu1 %1232  ;;  %1609 = vrot.lane.b32.xlu0 %v10303_v15, %s9664_s24 }
 0x1cb   : > { %1302 = vst.msk [vmem:[#allocation4 + $0xd8] sm:$0xff] %vm1274_vm4, %v1233_v8  ;;  %v1720_v8 = vld [vmem:[#allocation2 + $0x2c8] sm:$0xff] }
 0x1cc   : > { %1607 = vrot.lane.b32.xlu1 %v10289_v12, %s9664_s24  ;;  %v1239_v7 = vpop.permute.xlu0 %1238 }
 0x1cd   : > { %1305 = vst.msk [vmem:[#allocation4 + $0xf0] sm:$0xff] %vm1274_vm4, %v1239_v7 }
 0x1ce   : > { %v1237_v11 = vpop.permute.xlu1 %1236  ;;  %1613 = vrot.lane.b32.xlu0 %v10319_v19, %s9664_s24 }
 0x1cf   : > { %1304 = vst.msk [vmem:[#allocation4 + $0xe8] sm:$0xff] %vm1274_vm4, %v1237_v11  ;;  %v1719_v11 = vld [vmem:[#allocation2 + $0x2b0] sm:$0xff] }
 0x1d0   : > { %1611 = vrot.lane.b32.xlu1 %v10305_v16, %s9664_s24  ;;  %v1372_v9 = vpop.permute.xlu0 %1371  ;;  %v1531_v16 = vld [vmem:[#allocation2 + $0x307] sm:$0xff] }
 0x1d1   : > { %1468 = vst.msk [vmem:[#allocation4] sm:$0xff] %vm1467_vm5, %v1372_v9 }
 0x1d2   : > { %v1241_v15 = vpop.permute.xlu1 %1240  ;;  %1617 = vrot.lane.b32.xlu0 %v10335_v23, %s9664_s24 }
 0x1d3   : > { %1306 = vst.msk [vmem:[#allocation4 + $0xf8] sm:$0xff] %vm1274_vm4, %v1241_v15  ;;  %v468_v15 = vld [vmem:[%s14488_s1 + $0x20] sm:$0xf] }
 0x1d4   : > { %1615 = vrot.lane.b32.xlu1 %v10321_v20, %s9664_s24  ;;  %v1376_v12 = vpop.permute.xlu0 %1375  ;;  %v1694_v20 = vld [vmem:[#allocation2 + $0x128] sm:$0xff]  ;;  %9401 = vmatprep.subr.msk.mxu0 %vm2215_vm7, %v468_v15 }
 0x1d5   : > { %1470 = vst.msk [vmem:[#allocation4 + $0x10] sm:$0xff] %vm1467_vm5, %v1376_v12  ;;  %9402 = vmatpush3.msk.msra.mxu0 %vm2215_vm7, %v468_v15 }
 0x1d6   : > { %v1374_v19 = vpop.permute.xlu1 %1373  ;;  %1621 = vrot.lane.b32.xlu0 %v10588_v36, %s9664_s24  ;;  %v1532_v36 = vld [vmem:[#allocation2 + $0x30f] sm:$0xff] }
 0x1d7   : > { %1469 = vst.msk [vmem:[#allocation4 + $0x8] sm:$0xff] %vm1467_vm5, %v1374_v19  ;;  %v1721_v19 = vld [vmem:[#allocation2 + $0x2d0] sm:$0xff] }
 0x1d8   : > { %1619 = vrot.lane.b32.xlu1 %v10337_v24, %s9664_s24  ;;  %v1380_v41 = vpop.permute.xlu0 %1379  ;;  %v1696_v24 = vld [vmem:[#allocation2 + $0x148] sm:$0xff] }
 0x1d9   : > { %1472 = vst.msk [vmem:[#allocation4 + $0x20] sm:$0xff] %vm1467_vm5, %v1380_v41  ;;  %v467_v41 = vld [vmem:[%s14488_s1 + $0x18] sm:$0xff] }
 0x1da   : > { %v1378_v23 = vpop.permute.xlu1 %1377  ;;  %1625 = vrot.lane.b32.xlu0 %v1531_v16, %s9664_s24  ;;  %9403 = vmatprep.subr.mxu0 %v467_v41 }
 0x1db   : > { %1471 = vst.msk [vmem:[#allocation4 + $0x18] sm:$0xff] %vm1467_vm5, %v1378_v23  ;;  %v1724_v23 = vld [vmem:[#allocation2 + $0x308] sm:$0xff]  ;;  %9404 = vmatpush3.msra.mxu0 %v467_v41 }
 0x1dc   : > { %1623 = vrot.lane.b32.xlu1 %v10598_v33, %s9664_s24  ;;  %v1384_v42 = vpop.permute.xlu0 %1383  ;;  %v1698_v33 = vld [vmem:[#allocation2 + $0x168] sm:$0xff] }
 0x1dd   : > { %1474 = vst.msk [vmem:[#allocation4 + $0x30] sm:$0xff] %vm1467_vm5, %v1384_v42 }
 0x1de   : > { %v1382_v43 = vpop.permute.xlu1 %1381  ;;  %1758 = vrot.lane.b32.xlu0 %v1694_v20, %s9665_s25  ;;  %v466_v20 = vld [vmem:[%s14488_s1 + $0x10] sm:$0xff] }
 0x1df   : > { %1473 = vst.msk [vmem:[#allocation4 + $0x28] sm:$0xff] %vm1467_vm5, %v1382_v43  ;;  %9405 = vmatprep.subr.mxu0 %v466_v20  ;;  %v1887_v43 = vld [vmem:[#allocation2 + $0x129] sm:$0xff] }
 0x1e0   : > { %1627 = vrot.lane.b32.xlu1 %v1532_v36, %s9664_s24  ;;  %v1388_v44 = vpop.permute.xlu0 %1387  ;;  %9406 = vmatpush3.msra.mxu0 %v466_v20  ;;  %v465_v36 = vld [vmem:[%s14488_s1 + $0x8] sm:$0xff] }
 0x1e1   : > { %1476 = vst.msk [vmem:[#allocation4 + $0x40] sm:$0xff] %vm1467_vm5, %v1388_v44  ;;  %9407 = vmatprep.subr.mxu0 %v465_v36 }
 0x1e2   : > { %v1386_v50 = vpop.permute.xlu1 %1385  ;;  %1762 = vrot.lane.b32.xlu0 %v1696_v24, %s9665_s25  ;;  %v464_v24 = vld [vmem:[%s14488_s1] sm:$0xff]  ;;  %9408 = vmatpush3.msra.mxu0 %v465_v36  ;;  %v1916_v36 = vld [vmem:[#allocation2 + $0x2f1] sm:$0xff] }
 0x1e3   : > { %1475 = vst.msk [vmem:[#allocation4 + $0x38] sm:$0xff] %vm1467_vm5, %v1386_v50  ;;  %9409 = vmatprep.subr.mxu0 %v464_v24 }
 0x1e4   : > { %1760 = vrot.lane.b32.xlu1 %v1695_v47, %s9665_s25  ;;  %v1392_v53 = vpop.permute.xlu0 %1391  ;;  %v1725_v47 = vld [vmem:[#allocation2 + $0x310] sm:$0xff]  ;;  %9410 = vmatpush3.msra.mxu0 %v464_v24 }
 0x1e5   : > { %1478 = vst.msk [vmem:[#allocation4 + $0x50] sm:$0xff] %vm1467_vm5, %v1392_v53 }
 0x1e6   : > { %v1390_v63 = vpop.permute.xlu1 %1389  ;;  %1766 = vrot.lane.b32.xlu0 %v1698_v33, %s9665_s25  ;;  %v1889_v33 = vld [vmem:[#allocation2 + $0x149] sm:$0xff] }
 0x1e7   : > { %1477 = vst.msk [vmem:[#allocation4 + $0x48] sm:$0xff] %vm1467_vm5, %v1390_v63  ;;  %v1891_v63 = vld [vmem:[#allocation2 + $0x169] sm:$0xff] }
 0x1e8   : > { %1764 = vrot.lane.b32.xlu1 %v1697_v56, %s9665_s25  ;;  %v1396_v13 = vpop.permute.xlu0 %1395  ;;  %v1888_v56 = vld [vmem:[#allocation2 + $0x131] sm:$0xff] }
 0x1e9   : > { %1480 = vst.msk [vmem:[#allocation4 + $0x60] sm:$0xff] %vm1467_vm5, %v1396_v13  ;;  %v1890_v13 = vld [vmem:[#allocation2 + $0x151] sm:$0xff] }
 0x1ea   : > { %v1394_v17 = vpop.permute.xlu1 %1393  ;;  %1770 = vrot.lane.b32.xlu0 %v1700_v10, %s9665_s25 }
 0x1eb   : > { %1479 = vst.msk [vmem:[#allocation4 + $0x58] sm:$0xff] %vm1467_vm5, %v1394_v17  ;;  %v1893_v17 = vld [vmem:[#allocation2 + $0x189] sm:$0xff] }
 0x1ec   : > { %1768 = vrot.lane.b32.xlu1 %v1699_v14, %s9665_s25  ;;  %v1400_v21 = vpop.permute.xlu0 %1399 }
 0x1ed   : > { %1482 = vst.msk [vmem:[#allocation4 + $0x70] sm:$0xff] %vm1467_vm5, %v1400_v21  ;;  %v1892_v21 = vld [vmem:[#allocation2 + $0x171] sm:$0xff] }
 0x1ee   : > { %v1398_v22 = vpop.permute.xlu1 %1397  ;;  %1774 = vrot.lane.b32.xlu0 %v1702_v18, %s9665_s25 }
 0x1ef   : > { %1481 = vst.msk [vmem:[#allocation4 + $0x68] sm:$0xff] %vm1467_vm5, %v1398_v22  ;;  %v1895_v22 = vld [vmem:[#allocation2 + $0x1a9] sm:$0xff] }
 0x1f0   : > { %1772 = vrot.lane.b32.xlu1 %v1701_v48, %s9665_s25  ;;  %v1404_v45 = vpop.permute.xlu0 %1403 }
 0x1f1   : > { %1484 = vst.msk [vmem:[#allocation4 + $0x80] sm:$0xff] %vm1467_vm5, %v1404_v45  ;;  %v1894_v45 = vld [vmem:[#allocation2 + $0x191] sm:$0xff] }
 0x1f2   : > { %v1402_v25 = vpop.permute.xlu1 %1401  ;;  %1778 = vrot.lane.b32.xlu0 %v1704_v49, %s9665_s25 }
 0x1f3   : > { %1483 = vst.msk [vmem:[#allocation4 + $0x78] sm:$0xff] %vm1467_vm5, %v1402_v25  ;;  %v1897_v25 = vld [vmem:[#allocation2 + $0x1c9] sm:$0xff] }
 0x1f4   : > { %1776 = vrot.lane.b32.xlu1 %v1703_v29, %s9665_s25  ;;  %v1408_v26 = vpop.permute.xlu0 %1407 }
 0x1f5   : > { %1486 = vst.msk [vmem:[#allocation4 + $0x90] sm:$0xff] %vm1467_vm5, %v1408_v26  ;;  %v1896_v26 = vld [vmem:[#allocation2 + $0x1b1] sm:$0xff] }
 0x1f6   : > { %v1406_v35 = vpop.permute.xlu1 %1405  ;;  %1782 = vrot.lane.b32.xlu0 %v1706_v46, %s9665_s25 }
 0x1f7   : > { %1485 = vst.msk [vmem:[#allocation4 + $0x88] sm:$0xff] %vm1467_vm5, %v1406_v35  ;;  %v1899_v35 = vld [vmem:[#allocation2 + $0x1e9] sm:$0xff] }
 0x1f8   : > { %1780 = vrot.lane.b32.xlu1 %v1705_v30, %s9665_s25  ;;  %v1412_v32 = vpop.permute.xlu0 %1411 }
 0x1f9   : > { %1488 = vst.msk [vmem:[#allocation4 + $0xa0] sm:$0xff] %vm1467_vm5, %v1412_v32  ;;  %v1898_v32 = vld [vmem:[#allocation2 + $0x1d1] sm:$0xff] }
 0x1fa   : > { %v1410_v38 = vpop.permute.xlu1 %1409  ;;  %1786 = vrot.lane.b32.xlu0 %v1708_v31, %s9665_s25 }
 0x1fb   : > { %1487 = vst.msk [vmem:[#allocation4 + $0x98] sm:$0xff] %vm1467_vm5, %v1410_v38  ;;  %v1901_v38 = vld [vmem:[#allocation2 + $0x209] sm:$0xff] }
 0x1fc   : > { %1784 = vrot.lane.b32.xlu1 %v1707_v34, %s9665_s25  ;;  %v1416_v37 = vpop.permute.xlu0 %1415 }
 0x1fd   : > { %1490 = vst.msk [vmem:[#allocation4 + $0xb0] sm:$0xff] %vm1467_vm5, %v1416_v37  ;;  %v1900_v37 = vld [vmem:[#allocation2 + $0x1f1] sm:$0xff] }
 0x1fe   : > { %v1414_v40 = vpop.permute.xlu1 %1413  ;;  %1790 = vrot.lane.b32.xlu0 %v1710_v39, %s9665_s25 }
 0x1ff   : > { %1489 = vst.msk [vmem:[#allocation4 + $0xa8] sm:$0xff] %vm1467_vm5, %v1414_v40  ;;  %v1903_v40 = vld [vmem:[#allocation2 + $0x229] sm:$0xff] }
 0x200   : > { %1788 = vrot.lane.b32.xlu1 %v1709_v51, %s9665_s25  ;;  %v1420_v52 = vpop.permute.xlu0 %1419 }
 0x201   : > { %1492 = vst.msk [vmem:[#allocation4 + $0xc0] sm:$0xff] %vm1467_vm5, %v1420_v52  ;;  %v1902_v52 = vld [vmem:[#allocation2 + $0x211] sm:$0xff] }
 0x202   : > { %v1418_v55 = vpop.permute.xlu1 %1417  ;;  %1794 = vrot.lane.b32.xlu0 %v1712_v54, %s9665_s25 }
 0x203   : > { %1491 = vst.msk [vmem:[#allocation4 + $0xb8] sm:$0xff] %vm1467_vm5, %v1418_v55  ;;  %v1905_v55 = vld [vmem:[#allocation2 + $0x249] sm:$0xff] }
 0x204   : > { %1792 = vrot.lane.b32.xlu1 %v1711_v57, %s9665_s25  ;;  %v1424_v58 = vpop.permute.xlu0 %1423 }
 0x205   : > { %1494 = vst.msk [vmem:[#allocation4 + $0xd0] sm:$0xff] %vm1467_vm5, %v1424_v58  ;;  %v1904_v58 = vld [vmem:[#allocation2 + $0x231] sm:$0xff] }
 0x206   : > { %v1422_v60 = vpop.permute.xlu1 %1421  ;;  %1798 = vrot.lane.b32.xlu0 %v1714_v59, %s9665_s25 }
 0x207   : > { %1493 = vst.msk [vmem:[#allocation4 + $0xc8] sm:$0xff] %vm1467_vm5, %v1422_v60  ;;  %v1907_v60 = vld [vmem:[#allocation2 + $0x269] sm:$0xff] }
 0x208   : > { %1796 = vrot.lane.b32.xlu1 %v1713_v61, %s9665_s25  ;;  %v1428_v62 = vpop.permute.xlu0 %1427 }
 0x209   : > { %1496 = vst.msk [vmem:[#allocation4 + $0xe0] sm:$0xff] %vm1467_vm5, %v1428_v62  ;;  %v1906_v62 = vld [vmem:[#allocation2 + $0x251] sm:$0xff] }
 0x20a   : > { %v1426_v1 = vpop.permute.xlu1 %1425  ;;  %1802 = vrot.lane.b32.xlu0 %v1716_v0, %s9665_s25 }
 0x20b   : > { %1495 = vst.msk [vmem:[#allocation4 + $0xd8] sm:$0xff] %vm1467_vm5, %v1426_v1  ;;  %v1909_v1 = vld [vmem:[#allocation2 + $0x289] sm:$0xff] }
 0x20c   : > { %1800 = vrot.lane.b32.xlu1 %v1715_v2, %s9665_s25  ;;  %v1432_v3 = vpop.permute.xlu0 %1431 }
 0x20d   : > { %1498 = vst.msk [vmem:[#allocation4 + $0xf0] sm:$0xff] %vm1467_vm5, %v1432_v3  ;;  %v1908_v3 = vld [vmem:[#allocation2 + $0x271] sm:$0xff] }
 0x20e   : > { %v1430_v5 = vpop.permute.xlu1 %1429  ;;  %1806 = vrot.lane.b32.xlu0 %v1718_v4, %s9665_s25 }
 0x20f   : > { %1497 = vst.msk [vmem:[#allocation4 + $0xe8] sm:$0xff] %vm1467_vm5, %v1430_v5  ;;  %v1911_v5 = vld [vmem:[#allocation2 + $0x2a9] sm:$0xff] }
 0x210   : > { %1804 = vrot.lane.b32.xlu1 %v1717_v6, %s9665_s25  ;;  %v1566_v7 = vpop.permute.xlu0 %1565 }
 0x211   : > { %1662 = vst.msk [vmem:[#allocation4] sm:$0xff] %vm1661_vm6, %v1566_v7  ;;  %v1910_v7 = vld [vmem:[#allocation2 + $0x291] sm:$0xff] }
 0x212   : > { %v1434_v9 = vpop.permute.xlu1 %1433  ;;  %1810 = vrot.lane.b32.xlu0 %v1720_v8, %s9665_s25 }
 0x213   : > { %1499 = vst.msk [vmem:[#allocation4 + $0xf8] sm:$0xff] %vm1467_vm5, %v1434_v9  ;;  %v1913_v9 = vld [vmem:[#allocation2 + $0x2c9] sm:$0xff] }
 0x214   : > { %1808 = vrot.lane.b32.xlu1 %v1719_v11, %s9665_s25  ;;  %v1570_v12 = vpop.permute.xlu0 %1569 }
 0x215   : > { %1664 = vst.msk [vmem:[#allocation4 + $0x10] sm:$0xff] %vm1661_vm6, %v1570_v12  ;;  %v1912_v12 = vld [vmem:[#allocation2 + $0x2b1] sm:$0xff] }
 0x216   : > { %v1568_v16 = vpop.permute.xlu1 %1567  ;;  %1814 = vrot.lane.b32.xlu0 %v10688_v28, %s9665_s25 }
 0x217   : > { %1663 = vst.msk [vmem:[#allocation4 + $0x8] sm:$0xff] %vm1661_vm6, %v1568_v16  ;;  %v1915_v16 = vld [vmem:[#allocation2 + $0x2e9] sm:$0xff] }
 0x218   : > { %1812 = vrot.lane.b32.xlu1 %v1721_v19, %s9665_s25  ;;  %v1574_v42 = vpop.permute.xlu0 %1573 }
 0x219   : > { %1666 = vst.msk [vmem:[#allocation4 + $0x20] sm:$0xff] %vm1661_vm6, %v1574_v42  ;;  %v1917_v42 = vld [vmem:[#allocation2 + $0x309] sm:$0xff] }
 0x21a   : > { %v1572_v28 = vpop.permute.xlu1 %1571  ;;  %1818 = vrot.lane.b32.xlu0 %v1724_v23, %s9665_s25  ;;  %v1914_v23 = vld [vmem:[#allocation2 + $0x2d1] sm:$0xff] }
 0x21b   : > { %1665 = vst.msk [vmem:[#allocation4 + $0x18] sm:$0xff] %vm1661_vm6, %v1572_v28 }
 0x21c   : > { %1816 = vrot.lane.b32.xlu1 %v10698_v27, %s9665_s25  ;;  %v1578_v44 = vpop.permute.xlu0 %1577 }
 0x21d   : > { %1668 = vst.msk [vmem:[#allocation4 + $0x30] sm:$0xff] %vm1661_vm6, %v1578_v44  ;;  %v1918_v44 = vld [vmem:[#allocation2 + $0x311] sm:$0xff] }
 0x21e   : > { %v1576_v50 = vpop.permute.xlu1 %1575  ;;  %1951 = vrot.lane.b32.xlu0 %v1887_v43, %s9666_s9 }
 0x21f   : > { %1667 = vst.msk [vmem:[#allocation4 + $0x28] sm:$0xff] %vm1661_vm6, %v1576_v50 }
 0x220   : > { %1820 = vrot.lane.b32.xlu1 %v1725_v47, %s9665_s25  ;;  %v1582_v53 = vpop.permute.xlu0 %1581 }
 0x221   : > { %1670 = vst.msk [vmem:[#allocation4 + $0x40] sm:$0xff] %vm1661_vm6, %v1582_v53 }
 0x222   : > { %v1580_v27 = vpop.permute.xlu1 %1579  ;;  %1955 = vrot.lane.b32.xlu0 %v1889_v33, %s9666_s9 }
 0x223   : > { %1669 = vst.msk [vmem:[#allocation4 + $0x38] sm:$0xff] %vm1661_vm6, %v1580_v27 }
 0x224   : > { %1953 = vrot.lane.b32.xlu1 %v1888_v56, %s9666_s9  ;;  %v1586_v10 = vpop.permute.xlu0 %1585 }
 0x225   : > { %1672 = vst.msk [vmem:[#allocation4 + $0x50] sm:$0xff] %vm1661_vm6, %v1586_v10 }
 0x226   : > { %v1584_v14 = vpop.permute.xlu1 %1583  ;;  %1959 = vrot.lane.b32.xlu0 %v1891_v63, %s9666_s9 }
 0x227   : > { %1671 = vst.msk [vmem:[#allocation4 + $0x48] sm:$0xff] %vm1661_vm6, %v1584_v14 }
 0x228   : > { %1957 = vrot.lane.b32.xlu1 %v1890_v13, %s9666_s9  ;;  %v1590_v18 = vpop.permute.xlu0 %1589 }
 0x229   : > { %1674 = vst.msk [vmem:[#allocation4 + $0x60] sm:$0xff] %vm1661_vm6, %v1590_v18 }
 0x22a   : > { %v1588_v48 = vpop.permute.xlu1 %1587  ;;  %1963 = vrot.lane.b32.xlu0 %v1893_v17, %s9666_s9 }
 0x22b   : > { %1673 = vst.msk [vmem:[#allocation4 + $0x58] sm:$0xff] %vm1661_vm6, %v1588_v48 }
 0x22c   : > { %1961 = vrot.lane.b32.xlu1 %v1892_v21, %s9666_s9  ;;  %v1594_v49 = vpop.permute.xlu0 %1593 }
 0x22d   : > { %1676 = vst.msk [vmem:[#allocation4 + $0x70] sm:$0xff] %vm1661_vm6, %v1594_v49 }
 0x22e   : > { %v1592_v29 = vpop.permute.xlu1 %1591  ;;  %1967 = vrot.lane.b32.xlu0 %v1895_v22, %s9666_s9 }
 0x22f   : > { %1675 = vst.msk [vmem:[#allocation4 + $0x68] sm:$0xff] %vm1661_vm6, %v1592_v29 }
 0x230   : > { %1965 = vrot.lane.b32.xlu1 %v1894_v45, %s9666_s9  ;;  %v1598_v46 = vpop.permute.xlu0 %1597 }
 0x231   : > { %1678 = vst.msk [vmem:[#allocation4 + $0x80] sm:$0xff] %vm1661_vm6, %v1598_v46 }
 0x232   : > { %v1596_v30 = vpop.permute.xlu1 %1595  ;;  %1971 = vrot.lane.b32.xlu0 %v1897_v25, %s9666_s9 }
 0x233   : > { %1677 = vst.msk [vmem:[#allocation4 + $0x78] sm:$0xff] %vm1661_vm6, %v1596_v30 }
 0x234   : > { %1969 = vrot.lane.b32.xlu1 %v1896_v26, %s9666_s9  ;;  %v1602_v31 = vpop.permute.xlu0 %1601 }
 0x235   : > { %1680 = vst.msk [vmem:[#allocation4 + $0x90] sm:$0xff] %vm1661_vm6, %v1602_v31 }
 0x236   : > { %v1600_v34 = vpop.permute.xlu1 %1599  ;;  %1975 = vrot.lane.b32.xlu0 %v1899_v35, %s9666_s9 }
 0x237   : > { %1679 = vst.msk [vmem:[#allocation4 + $0x88] sm:$0xff] %vm1661_vm6, %v1600_v34 }
 0x238   : > { %1973 = vrot.lane.b32.xlu1 %v1898_v32, %s9666_s9  ;;  %v1606_v39 = vpop.permute.xlu0 %1605 }
 0x239   : > { %1682 = vst.msk [vmem:[#allocation4 + $0xa0] sm:$0xff] %vm1661_vm6, %v1606_v39 }
 0x23a   : > { %v1604_v51 = vpop.permute.xlu1 %1603  ;;  %1979 = vrot.lane.b32.xlu0 %v1901_v38, %s9666_s9 }
 0x23b   : > { %1681 = vst.msk [vmem:[#allocation4 + $0x98] sm:$0xff] %vm1661_vm6, %v1604_v51 }
 0x23c   : > { %1977 = vrot.lane.b32.xlu1 %v1900_v37, %s9666_s9  ;;  %v1610_v54 = vpop.permute.xlu0 %1609 }
 0x23d   : > { %1684 = vst.msk [vmem:[#allocation4 + $0xb0] sm:$0xff] %vm1661_vm6, %v1610_v54 }
 0x23e   : > { %v1608_v57 = vpop.permute.xlu1 %1607  ;;  %1983 = vrot.lane.b32.xlu0 %v1903_v40, %s9666_s9 }
 0x23f   : > { %1683 = vst.msk [vmem:[#allocation4 + $0xa8] sm:$0xff] %vm1661_vm6, %v1608_v57 }
 0x240   : > { %1981 = vrot.lane.b32.xlu1 %v1902_v52, %s9666_s9  ;;  %v1614_v59 = vpop.permute.xlu0 %1613 }
 0x241   : > { %1686 = vst.msk [vmem:[#allocation4 + $0xc0] sm:$0xff] %vm1661_vm6, %v1614_v59 }
 0x242   : > { %v1612_v61 = vpop.permute.xlu1 %1611  ;;  %1987 = vrot.lane.b32.xlu0 %v1905_v55, %s9666_s9 }
 0x243   : > { %1685 = vst.msk [vmem:[#allocation4 + $0xb8] sm:$0xff] %vm1661_vm6, %v1612_v61 }
 0x244   : > { %1985 = vrot.lane.b32.xlu1 %v1904_v58, %s9666_s9  ;;  %v1618_v0 = vpop.permute.xlu0 %1617 }
 0x245   : > { %1688 = vst.msk [vmem:[#allocation4 + $0xd0] sm:$0xff] %vm1661_vm6, %v1618_v0 }
 0x246   : > { %v1616_v2 = vpop.permute.xlu1 %1615  ;;  %1991 = vrot.lane.b32.xlu0 %v1907_v60, %s9666_s9 }
 0x247   : > { %1687 = vst.msk [vmem:[#allocation4 + $0xc8] sm:$0xff] %vm1661_vm6, %v1616_v2 }
 0x248   : > { %1989 = vrot.lane.b32.xlu1 %v1906_v62, %s9666_s9  ;;  %v1622_v4 = vpop.permute.xlu0 %1621 }
 0x249   : > { %1690 = vst.msk [vmem:[#allocation4 + $0xe0] sm:$0xff] %vm1661_vm6, %v1622_v4 }
 0x24a   : > { %v1620_v6 = vpop.permute.xlu1 %1619  ;;  %1995 = vrot.lane.b32.xlu0 %v1909_v1, %s9666_s9 }
 0x24b   : > { %1689 = vst.msk [vmem:[#allocation4 + $0xd8] sm:$0xff] %vm1661_vm6, %v1620_v6 }
 0x24c   : > { %1993 = vrot.lane.b32.xlu1 %v1908_v3, %s9666_s9  ;;  %v1626_v8 = vpop.permute.xlu0 %1625 }
 0x24d   : > { %1692 = vst.msk [vmem:[#allocation4 + $0xf0] sm:$0xff] %vm1661_vm6, %v1626_v8 }
 0x24e   : > { %v1624_v11 = vpop.permute.xlu1 %1623  ;;  %1999 = vrot.lane.b32.xlu0 %v1911_v5, %s9666_s9 }
 0x24f   : > { %1691 = vst.msk [vmem:[#allocation4 + $0xe8] sm:$0xff] %vm1661_vm6, %v1624_v11 }
 0x250   : > { %1997 = vrot.lane.b32.xlu1 %v1910_v7, %s9666_s9  ;;  %v1759_v15 = vpop.permute.xlu0 %1758 }
 0x251   : > { %1855 = vst.msk [vmem:[#allocation4] sm:$0xff] %vm1854_vm8, %v1759_v15 }
 0x252   : > { %v1628_v19 = vpop.permute.xlu1 %1627  ;;  %2003 = vrot.lane.b32.xlu0 %v1913_v9, %s9666_s9 }
 0x253   : > { %1693 = vst.msk [vmem:[#allocation4 + $0xf8] sm:$0xff] %vm1661_vm6, %v1628_v19 }
 0x254   : > { %2001 = vrot.lane.b32.xlu1 %v1912_v12, %s9666_s9  ;;  %v1763_v41 = vpop.permute.xlu0 %1762 }
 0x255   : > { %1857 = vst.msk [vmem:[#allocation4 + $0x10] sm:$0xff] %vm1854_vm8, %v1763_v41 }
 0x256   : > { %v1761_v20 = vpop.permute.xlu1 %1760  ;;  %2007 = vrot.lane.b32.xlu0 %v1915_v16, %s9666_s9 }
 0x257   : > { %1856 = vst.msk [vmem:[#allocation4 + $0x8] sm:$0xff] %vm1854_vm8, %v1761_v20 }
 0x258   : > { %2005 = vrot.lane.b32.xlu1 %v1914_v23, %s9666_s9  ;;  %v1767_v28 = vpop.permute.xlu0 %1766 }
 0x259   : > { %1859 = vst.msk [vmem:[#allocation4 + $0x20] sm:$0xff] %vm1854_vm8, %v1767_v28 }
 0x25a   : > { %v1765_v43 = vpop.permute.xlu1 %1764  ;;  %2011 = vrot.lane.b32.xlu0 %v1917_v42, %s9666_s9 }
 0x25b   : > { %1858 = vst.msk [vmem:[#allocation4 + $0x18] sm:$0xff] %vm1854_vm8, %v1765_v43 }
 0x25c   : > { %v1771_v24 = vpop.permute.xlu0 %1770  ;;  %2009 = vrot.lane.b32.xlu1 %v1916_v36, %s9666_s9 }
 0x25d   : > { %1861 = vst.msk [vmem:[#allocation4 + $0x30] sm:$0xff] %vm1854_vm8, %v1771_v24 }
 0x25e   : > { %v1769_v47 = vpop.permute.xlu1 %1768 }
 0x25f   : > { %1860 = vst.msk [vmem:[#allocation4 + $0x28] sm:$0xff] %vm1854_vm8, %v1769_v47 }
 0x260   : > { %v1775_v50 = vpop.permute.xlu0 %1774  ;;  %2013 = vrot.lane.b32.xlu1 %v1918_v44, %s9666_s9 }
 0x261   : > { %1863 = vst.msk [vmem:[#allocation4 + $0x40] sm:$0xff] %vm1854_vm8, %v1775_v50 }
 0x262   : > { %v1773_v33 = vpop.permute.xlu1 %1772 }
 0x263   : > { %1862 = vst.msk [vmem:[#allocation4 + $0x38] sm:$0xff] %vm1854_vm8, %v1773_v33 }
 0x264   : > { %v1779_v53 = vpop.permute.xlu0 %1778 }
 0x265   : > { %1865 = vst.msk [vmem:[#allocation4 + $0x50] sm:$0xff] %vm1854_vm8, %v1779_v53 }
 0x266   : > { %v1777_v56 = vpop.permute.xlu1 %1776 }
 0x267   : > { %1864 = vst.msk [vmem:[#allocation4 + $0x48] sm:$0xff] %vm1854_vm8, %v1777_v56 }
 0x268   : > { %v1783_v27 = vpop.permute.xlu0 %1782 }
 0x269   : > { %1867 = vst.msk [vmem:[#allocation4 + $0x60] sm:$0xff] %vm1854_vm8, %v1783_v27 }
 0x26a   : > { %v1781_v63 = vpop.permute.xlu1 %1780 }
 0x26b   : > { %1866 = vst.msk [vmem:[#allocation4 + $0x58] sm:$0xff] %vm1854_vm8, %v1781_v63 }
 0x26c   : > { %v1787_v10 = vpop.permute.xlu0 %1786 }
 0x26d   : > { %1869 = vst.msk [vmem:[#allocation4 + $0x70] sm:$0xff] %vm1854_vm8, %v1787_v10 }
 0x26e   : > { %v1785_v13 = vpop.permute.xlu1 %1784 }
 0x26f   : > { %1868 = vst.msk [vmem:[#allocation4 + $0x68] sm:$0xff] %vm1854_vm8, %v1785_v13 }
 0x270   : > { %v1791_v14 = vpop.permute.xlu0 %1790 }
 0x271   : > { %1871 = vst.msk [vmem:[#allocation4 + $0x80] sm:$0xff] %vm1854_vm8, %v1791_v14 }
 0x272   : > { %v1789_v17 = vpop.permute.xlu1 %1788 }
 0x273   : > { %1870 = vst.msk [vmem:[#allocation4 + $0x78] sm:$0xff] %vm1854_vm8, %v1789_v17 }
 0x274   : > { %v1795_v18 = vpop.permute.xlu0 %1794 }
 0x275   : > { %1873 = vst.msk [vmem:[#allocation4 + $0x90] sm:$0xff] %vm1854_vm8, %v1795_v18 }
 0x276   : > { %v1793_v21 = vpop.permute.xlu1 %1792 }
 0x277   : > { %1872 = vst.msk [vmem:[#allocation4 + $0x88] sm:$0xff] %vm1854_vm8, %v1793_v21 }
 0x278   : > { %v1799_v48 = vpop.permute.xlu0 %1798 }
 0x279   : > { %1875 = vst.msk [vmem:[#allocation4 + $0xa0] sm:$0xff] %vm1854_vm8, %v1799_v48 }
 0x27a   : > { %v1797_v22 = vpop.permute.xlu1 %1796 }
 0x27b   : > { %1874 = vst.msk [vmem:[#allocation4 + $0x98] sm:$0xff] %vm1854_vm8, %v1797_v22 }
 0x27c   : > { %v1803_v49 = vpop.permute.xlu0 %1802 }
 0x27d   : > { %1877 = vst.msk [vmem:[#allocation4 + $0xb0] sm:$0xff] %vm1854_vm8, %v1803_v49 }
 0x27e   : > { %v1801_v45 = vpop.permute.xlu1 %1800 }
 0x27f   : > { %1876 = vst.msk [vmem:[#allocation4 + $0xa8] sm:$0xff] %vm1854_vm8, %v1801_v45 }
 0x280   : > { %v1807_v29 = vpop.permute.xlu0 %1806 }
 0x281   : > { %1879 = vst.msk [vmem:[#allocation4 + $0xc0] sm:$0xff] %vm1854_vm8, %v1807_v29 }
 0x282   : > { %v1805_v25 = vpop.permute.xlu1 %1804 }
 0x283   : > { %1878 = vst.msk [vmem:[#allocation4 + $0xb8] sm:$0xff] %vm1854_vm8, %v1805_v25 }
 0x284   : > { %v1811_v46 = vpop.permute.xlu0 %1810 }
 0x285   : > { %1881 = vst.msk [vmem:[#allocation4 + $0xd0] sm:$0xff] %vm1854_vm8, %v1811_v46 }
 0x286   : > { %v1809_v26 = vpop.permute.xlu1 %1808 }
 0x287   : > { %1880 = vst.msk [vmem:[#allocation4 + $0xc8] sm:$0xff] %vm1854_vm8, %v1809_v26 }
 0x288   : > { %v1815_v30 = vpop.permute.xlu0 %1814 }
 0x289   : > { %1883 = vst.msk [vmem:[#allocation4 + $0xe0] sm:$0xff] %vm1854_vm8, %v1815_v30 }
 0x28a   : > { %v1813_v35 = vpop.permute.xlu1 %1812 }
 0x28b   : > { %1882 = vst.msk [vmem:[#allocation4 + $0xd8] sm:$0xff] %vm1854_vm8, %v1813_v35 }
 0x28c   : > { %v1819_v31 = vpop.permute.xlu0 %1818 }
 0x28d   : > { %1885 = vst.msk [vmem:[#allocation4 + $0xf0] sm:$0xff] %vm1854_vm8, %v1819_v31 }
 0x28e   : > { %v1817_v32 = vpop.permute.xlu1 %1816 }
 0x28f   : > { %1884 = vst.msk [vmem:[#allocation4 + $0xe8] sm:$0xff] %vm1854_vm8, %v1817_v32 }
 0x290   : > { %v1952_v34 = vpop.permute.xlu0 %1951 }
 0x291   : > { %2048 = vst.msk [vmem:[#allocation4] sm:$0xff] %vm2047_vm9, %v1952_v34 }
 0x292   : > { %v1821_v38 = vpop.permute.xlu1 %1820 }
 0x293   : > { %1886 = vst.msk [vmem:[#allocation4 + $0xf8] sm:$0xff] %vm1854_vm8, %v1821_v38  ;;  %v2678_v38 = vld [vmem:[#allocation3 + $0xd0] sm:$0xff] }
 0x294   : > { %v1956_v39 = vpop.permute.xlu0 %1955  ;;  %2743 = vrot.lane.b32.xlu1 %v2678_v38, %s9659_s19 }
 0x295   : > { %2050 = vst.msk [vmem:[#allocation4 + $0x10] sm:$0xff] %vm2047_vm9, %v1956_v39  ;;  %v2677_v39 = vld [vmem:[#allocation3 + $0xc8] sm:$0xff] }
 0x296   : > { %v1954_v37 = vpop.permute.xlu1 %1953  ;;  %2741 = vrot.lane.b32.xlu0 %v2677_v39, %s9659_s19 }
 0x297   : > { %2049 = vst.msk [vmem:[#allocation4 + $0x8] sm:$0xff] %vm2047_vm9, %v1954_v37  ;;  %v2680_v37 = vld [vmem:[#allocation3 + $0xf0] sm:$0xff] }
 0x298   : > { %v1960_v51 = vpop.permute.xlu0 %1959  ;;  %v2080_v40 = vld [vmem:[#allocation4] sm:$0xff]  ;;  %2747 = vrot.lane.b32.xlu1 %v2680_v37, %s9659_s19 }
 0x299   : > { %2052 = vst.msk [vmem:[#allocation4 + $0x20] sm:$0xff] %vm2047_vm9, %v1960_v51  ;;  %9411 = vmatprep.mubr.msk.f32.mxu0 %vm2118_vm10, %v2080_v40  ;;  %v2679_v51 = vld [vmem:[#allocation3 + $0xe8] sm:$0xff] }
 0x29a   : > { %v1958_v54 = vpop.permute.xlu1 %1957  ;;  %2745 = vrot.lane.b32.xlu0 %v2679_v51, %s9659_s19  ;;  %v2614_v40 = vld [vmem:[#allocation3 + $0xce] sm:$0xff]  ;;  %v2484_v51 = vld [vmem:[#allocation5 + $0x40] sm:$0xff] }
 0x29b   : > { %2051 = vst.msk [vmem:[#allocation4 + $0x18] sm:$0xff] %vm2047_vm9, %v1958_v54 }
 0x29c   : > { %v1964_v52 = vpop.permute.xlu0 %1963  ;;  %v2082_v57 = vld [vmem:[#allocation4 + $0x10] sm:$0xff] }
 0x29d   : > { %2054 = vst.msk [vmem:[#allocation4 + $0x30] sm:$0xff] %vm2047_vm9, %v1964_v52  ;;  %v2613_v52 = vld [vmem:[#allocation3 + $0xc6] sm:$0xff] }
 0x29e   : > { %v1962_v55 = vpop.permute.xlu1 %1961  ;;  %v2081_v59 = vld [vmem:[#allocation4 + $0x8] sm:$0xff]  ;;  %2645 = vst.msk [vmem:[#allocation4] sm:$0xff] %vm171_vm0, %v2613_v52 }
 0x29f   : > { %2053 = vst.msk [vmem:[#allocation4 + $0x28] sm:$0xff] %vm2047_vm9, %v1962_v55  ;;  %9412 = vmatmul.mubr.msk.f32.vlgmr.msra.gmra.mxu0 %vm2118_vm10, %v2081_v59  ;;  %v2616_v55 = vld [vmem:[#allocation3 + $0xee] sm:$0xff] }
 0x2a0   : > { %9414 = vmatprep.mubr.msk.f32.mxu0 %vm2118_vm10, %v2082_v57  ;;  %v1968_v58 = vpop.permute.xlu0 %1967  ;;  %v2084_v61 = vld [vmem:[#allocation4 + $0x20] sm:$0xff]  ;;  %2646 = vst.msk [vmem:[#allocation4 + $0x8] sm:$0xff] %vm171_vm0, %v2614_v40 }
 0x2a1   : > { %2056 = vst.msk [vmem:[#allocation4 + $0x40] sm:$0xff] %vm2047_vm9, %v1968_v58  ;;  %v2615_v58 = vld [vmem:[#allocation3 + $0xe6] sm:$0xff] }
 0x2a2   : > { %v1966_v60 = vpop.permute.xlu1 %1965  ;;  %v2083_v0 = vld [vmem:[#allocation4 + $0x18] sm:$0xff]  ;;  %2647 = vst.msk [vmem:[#allocation4 + $0x10] sm:$0xff] %vm171_vm0, %v2615_v58 }
 0x2a3   : > { %2055 = vst.msk [vmem:[#allocation4 + $0x38] sm:$0xff] %vm2047_vm9, %v1966_v60  ;;  %9415 = vmatmul.mubr.msk.f32.gmra.mxu0 %vm2118_vm10, %v2083_v0  ;;  %v11142_v60 = vld [vmem:[%s14489_s2] ss:$0 sm:$0xff] }
 0x2a4   : > { %9417 = vmatprep.mubr.msk.f32.mxu0 %vm2118_vm10, %v2084_v61  ;;  %v1972_v62 = vpop.permute.xlu0 %1971  ;;  %v2086_v2 = vld [vmem:[#allocation4 + $0x30] sm:$0xff]  ;;  %2648 = vst.msk [vmem:[#allocation4 + $0x18] sm:$0xff] %vm171_vm0, %v2616_v55 }
 0x2a5   : > { %2058 = vst.msk [vmem:[#allocation4 + $0x50] sm:$0xff] %vm2047_vm9, %v1972_v62 }
 0x2a6   : > { %v1970_v1 = vpop.permute.xlu1 %1969  ;;  %v2085_v4 = vld [vmem:[#allocation4 + $0x28] sm:$0xff] }
 0x2a7   : > { %2057 = vst.msk [vmem:[#allocation4 + $0x48] sm:$0xff] %vm2047_vm9, %v1970_v1  ;;  %9418 = vmatmul.mubr.msk.f32.gmra.mxu0 %vm2118_vm10, %v2085_v4 }
 0x2a8   : > { %9420 = vmatprep.mubr.msk.f32.mxu0 %vm2118_vm10, %v2086_v2  ;;  %v1976_v3 = vpop.permute.xlu0 %1975  ;;  %v2088_v6 = vld [vmem:[#allocation4 + $0x40] sm:$0xff]  ;;  %v2477_v2 = vld [vmem:[#allocation5 + $0x8] sm:$0xff] }
 0x2a9   : > { %2060 = vst.msk [vmem:[#allocation4 + $0x60] sm:$0xff] %vm2047_vm9, %v1976_v3 }
 0x2aa   : > { %v1974_v5 = vpop.permute.xlu1 %1973  ;;  %v2087_v8 = vld [vmem:[#allocation4 + $0x38] sm:$0xff] }
 0x2ab   : > { %2059 = vst.msk [vmem:[#allocation4 + $0x58] sm:$0xff] %vm2047_vm9, %v1974_v5  ;;  %9421 = vmatmul.mubr.msk.f32.gmra.mxu0 %vm2118_vm10, %v2087_v8 }
 0x2ac   : > { %9423 = vmatprep.mubr.msk.f32.mxu0 %vm2118_vm10, %v2088_v6  ;;  %v1980_v7 = vpop.permute.xlu0 %1979  ;;  %v2090_v11 = vld [vmem:[#allocation4 + $0x50] sm:$0xff]  ;;  %v2476_v6 = vld [vmem:[#allocation5] sm:$0xff] }
 0x2ad   : > { %2062 = vst.msk [vmem:[#allocation4 + $0x70] sm:$0xff] %vm2047_vm9, %v1980_v7 }
 0x2ae   : > { %v1978_v9 = vpop.permute.xlu1 %1977  ;;  %v2089_v15 = vld [vmem:[#allocation4 + $0x48] sm:$0xff] }
 0x2af   : > { %2061 = vst.msk [vmem:[#allocation4 + $0x68] sm:$0xff] %vm2047_vm9, %v1978_v9  ;;  %9424 = vmatmul.mubr.msk.f32.gmra.mxu0 %vm2118_vm10, %v2089_v15  ;;  %v2479_v9 = vld [vmem:[#allocation5 + $0x18] sm:$0xff] }
 0x2b0   : > { %9426 = vmatprep.mubr.msk.f32.mxu0 %vm2118_vm10, %v2090_v11  ;;  %v1984_v12 = vpop.permute.xlu0 %1983  ;;  %v2092_v19 = vld [vmem:[#allocation4 + $0x60] sm:$0xff] }
 0x2b1   : > { %2064 = vst.msk [vmem:[#allocation4 + $0x80] sm:$0xff] %vm2047_vm9, %v1984_v12 }
 0x2b2   : > { %v1982_v16 = vpop.permute.xlu1 %1981  ;;  %v2091_v41 = vld [vmem:[#allocation4 + $0x58] sm:$0xff] }
 0x2b3   : > { %2063 = vst.msk [vmem:[#allocation4 + $0x78] sm:$0xff] %vm2047_vm9, %v1982_v16  ;;  %9427 = vmatmul.mubr.msk.f32.gmra.mxu0 %vm2118_vm10, %v2091_v41  ;;  %v2478_v41 = vld [vmem:[#allocation5 + $0x10] sm:$0xff] }
 0x2b4   : > { %9429 = vmatprep.mubr.msk.f32.mxu0 %vm2118_vm10, %v2092_v19  ;;  %v1988_v23 = vpop.permute.xlu0 %1987  ;;  %v2094_v20 = vld [vmem:[#allocation4 + $0x70] sm:$0xff] }
 0x2b5   : > { %2066 = vst.msk [vmem:[#allocation4 + $0x90] sm:$0xff] %vm2047_vm9, %v1988_v23 }
 0x2b6   : > { %v1986_v42 = vpop.permute.xlu1 %1985  ;;  %v2093_v28 = vld [vmem:[#allocation4 + $0x68] sm:$0xff] }
 0x2b7   : > { %2065 = vst.msk [vmem:[#allocation4 + $0x88] sm:$0xff] %vm2047_vm9, %v1986_v42  ;;  %9430 = vmatmul.mubr.msk.f32.gmra.mxu0 %vm2118_vm10, %v2093_v28 }
 0x2b8   : > { %9432 = vmatprep.mubr.msk.f32.mxu0 %vm2118_vm10, %v2094_v20  ;;  %v1992_v36 = vpop.permute.xlu0 %1991  ;;  %v2096_v43 = vld [vmem:[#allocation4 + $0x80] sm:$0xff] }
 0x2b9   : > { %2068 = vst.msk [vmem:[#allocation4 + $0xa0] sm:$0xff] %vm2047_vm9, %v1992_v36  ;;  %v2481_v36 = vld [vmem:[#allocation5 + $0x28] sm:$0xff] }
 0x2ba   : > { %v1990_v24 = vpop.permute.xlu1 %1989  ;;  %v2095_v44 = vld [vmem:[#allocation4 + $0x78] sm:$0xff] }
 0x2bb   : > { %2067 = vst.msk [vmem:[#allocation4 + $0x98] sm:$0xff] %vm2047_vm9, %v1990_v24  ;;  %9433 = vmatmul.mubr.msk.f32.gmra.mxu0 %vm2118_vm10, %v2095_v44 }
 0x2bc   : > { %9435 = vmatprep.mubr.msk.f32.mxu0 %vm2118_vm10, %v2096_v43  ;;  %v1996_v47 = vpop.permute.xlu0 %1995  ;;  %v2098_v50 = vld [vmem:[#allocation4 + $0x90] sm:$0xff] }
 0x2bd   : > { %2070 = vst.msk [vmem:[#allocation4 + $0xb0] sm:$0xff] %vm2047_vm9, %v1996_v47 }
 0x2be   : > { %v1994_v33 = vpop.permute.xlu1 %1993  ;;  %v2097_v53 = vld [vmem:[#allocation4 + $0x88] sm:$0xff] }
 0x2bf   : > { %2069 = vst.msk [vmem:[#allocation4 + $0xa8] sm:$0xff] %vm2047_vm9, %v1994_v33  ;;  %9436 = vmatmul.mubr.msk.f32.gmra.mxu0 %vm2118_vm10, %v2097_v53 }
 0x2c0   : > { %9438 = vmatprep.mubr.msk.f32.mxu0 %vm2118_vm10, %v2098_v50  ;;  %v2000_v56 = vpop.permute.xlu0 %1999  ;;  %v2100_v27 = vld [vmem:[#allocation4 + $0xa0] sm:$0xff] }
 0x2c1   : > { %2072 = vst.msk [vmem:[#allocation4 + $0xc0] sm:$0xff] %vm2047_vm9, %v2000_v56  ;;  %v2480_v50 = vld [vmem:[#allocation5 + $0x20] sm:$0xff] }
 0x2c2   : > { %v1998_v63 = vpop.permute.xlu1 %1997  ;;  %v2099_v10 = vld [vmem:[#allocation4 + $0x98] sm:$0xff] }
 0x2c3   : > { %2071 = vst.msk [vmem:[#allocation4 + $0xb8] sm:$0xff] %vm2047_vm9, %v1998_v63  ;;  %9439 = vmatmul.mubr.msk.f32.gmra.mxu0 %vm2118_vm10, %v2099_v10  ;;  %v2483_v10 = vld [vmem:[#allocation5 + $0x38] sm:$0xff] }
 0x2c4   : > { %9441 = vmatprep.mubr.msk.f32.mxu0 %vm2118_vm10, %v2100_v27  ;;  %v2004_v13 = vpop.permute.xlu0 %2003  ;;  %v2102_v14 = vld [vmem:[#allocation4 + $0xb0] sm:$0xff] }
 0x2c5   : > { %2074 = vst.msk [vmem:[#allocation4 + $0xd0] sm:$0xff] %vm2047_vm9, %v2004_v13 }
 0x2c6   : > { %v2002_v17 = vpop.permute.xlu1 %2001  ;;  %v2101_v18 = vld [vmem:[#allocation4 + $0xa8] sm:$0xff] }
 0x2c7   : > { %2073 = vst.msk [vmem:[#allocation4 + $0xc8] sm:$0xff] %vm2047_vm9, %v2002_v17  ;;  %9442 = vmatmul.mubr.msk.f32.gmra.mxu0 %vm2118_vm10, %v2101_v18 }
 0x2c8   : > { %9444 = vmatprep.mubr.msk.f32.mxu0 %vm2118_vm10, %v2102_v14  ;;  %v2008_v21 = vpop.permute.xlu0 %2007  ;;  %v2104_v48 = vld [vmem:[#allocation4 + $0xc0] sm:$0xff] }
 0x2c9   : > { %2076 = vst.msk [vmem:[#allocation4 + $0xe0] sm:$0xff] %vm2047_vm9, %v2008_v21 }
 0x2ca   : > { %v2006_v22 = vpop.permute.xlu1 %2005  ;;  %v2103_v49 = vld [vmem:[#allocation4 + $0xb8] sm:$0xff] }
 0x2cb   : > { %2075 = vst.msk [vmem:[#allocation4 + $0xd8] sm:$0xff] %vm2047_vm9, %v2006_v22  ;;  %9445 = vmatmul.mubr.msk.f32.gmra.mxu0 %vm2118_vm10, %v2103_v49  ;;  %v2482_v49 = vld [vmem:[#allocation5 + $0x30] sm:$0xff] }
 0x2cc   : > { %9447 = vmatprep.mubr.msk.f32.mxu0 %vm2118_vm10, %v2104_v48  ;;  %v2012_v45 = vpop.permute.xlu0 %2011  ;;  %v2106_v29 = vld [vmem:[#allocation4 + $0xd0] sm:$0xff] }
 0x2cd   : > { %2078 = vst.msk [vmem:[#allocation4 + $0xf0] sm:$0xff] %vm2047_vm9, %v2012_v45 }
 0x2ce   : > { %v2105_v25 = vld [vmem:[#allocation4 + $0xc8] sm:$0xff]  ;;  %v2010_v46 = vpop.permute.xlu1 %2009 }
 0x2cf   : > { %9448 = vmatmul.mubr.msk.f32.gmra.mxu0 %vm2118_vm10, %v2105_v25  ;;  %2077 = vst.msk [vmem:[#allocation4 + $0xe8] sm:$0xff] %vm2047_vm9, %v2010_v46 }
 0x2d0   : > { %9450 = vmatprep.mubr.msk.f32.mxu0 %vm2118_vm10, %v2106_v29  ;;  %v2108_v26 = vld [vmem:[#allocation4 + $0xe0] sm:$0xff] }
 0x2d2   : > { %v2107_v30 = vld [vmem:[#allocation4 + $0xd8] sm:$0xff]  ;;  %v2014_v35 = vpop.permute.xlu1 %2013 }
 0x2d3   : > { %9451 = vmatmul.mubr.msk.f32.gmra.mxu0 %vm2118_vm10, %v2107_v30  ;;  %2079 = vst.msk [vmem:[#allocation4 + $0xf8] sm:$0xff] %vm2047_vm9, %v2014_v35  ;;  %v2485_v30 = vld [vmem:[#allocation5 + $0x48] sm:$0xff] }
 0x2d4   : > { %9453 = vmatprep.mubr.msk.f32.mxu0 %vm2118_vm10, %v2108_v26  ;;  %v2110_v31 = vld [vmem:[#allocation4 + $0xf0] sm:$0xff] }
 0x2d6   : > { %v2109_v32 = vld [vmem:[#allocation4 + $0xe8] sm:$0xff] }
 0x2d7   : > { %9454 = vmatmul.mubr.msk.f32.gmra.mxu0 %vm2118_vm10, %v2109_v32 }
 0x2d8   : > { %9456 = vmatprep.mubr.msk.f32.mxu0 %vm2118_vm10, %v2110_v31 }
 0x2da   : > { %v2111_v34 = vld [vmem:[#allocation4 + $0xf8] sm:$0xff] }
 0x2db   : > { %9457 = vmatmul.mubr.msk.f32.gmra.mxu0 %vm2118_vm10, %v2111_v34 }
 0x306   : > { %v2744_v54 = vpop.permute.xlu1 %2743 }
 0x307   : > { %2838 = vst.msk [vmem:[#allocation4 + $0x8] sm:$0xff] %vm695_vm1, %v2744_v54 }
 0x308   : > { %v2742_v57 = vpop.permute.xlu0 %2741 }
 0x309   : > { %2837 = vst.msk [vmem:[#allocation4] sm:$0xff] %vm695_vm1, %v2742_v57 }
 0x30a   : > { %v2748_v59 = vpop.permute.xlu1 %2747 }
 0x30b   : > { %2840 = vst.msk [vmem:[#allocation4 + $0x18] sm:$0xff] %vm695_vm1, %v2748_v59  ;;  %v2487_v59 = vld [vmem:[#allocation5 + $0x58] sm:$0xff] }
 0x30c   : > { %v2746_v61 = vpop.permute.xlu0 %2745 }
 0x30d   : > { %2839 = vst.msk [vmem:[#allocation4 + $0x10] sm:$0xff] %vm695_vm1, %v2746_v61 }
 0x35f   : > { %v9413_v0 = vpop.f32.mrf.mxu0 }
 0x360   : > { %v2291_v62 = vadd.f32 %v9413_v0, %v11142_v60 }
 0x361   : > { %v2285_v1 = vpop.f32.mrf.mxu0 }
 0x362   : > { %v2445_v4 = vmax.f32 %v2291_v62, 0.0  ;;  %v2286_v3 = vadd.f32 %v11142_v60, %v2285_v1 }
 0x363   : > { %v9416_v5 = vpop.f32.mrf.mxu0 }
 0x364   : > { %v2509_v8 = vadd.f32 %v2477_v2, %v2445_v4  ;;  %2573 = vst.msk [vmem:[#allocation3 + $0x110] sm:$0xff] %vm171_vm0, %v2445_v4  ;;  %v2444_v7 = vmax.f32 %v2286_v3, 0.0  ;;  %v2301_v11 = vadd.f32 %v9416_v5, %v11142_v60  ;;  %v2486_v3 = vld [vmem:[#allocation5 + $0x50] sm:$0xff] }
 0x365   : > { %v2295_v15 = vpop.f32.mrf.mxu0 }
 0x366   : > { %2541 = vst.msk [vmem:[#allocation5 + $0x8] sm:$0xff] %vm171_vm0, %v2509_v8  ;;  %v2508_v12 = vadd.f32 %v2476_v6, %v2444_v7  ;;  %2572 = vst.msk [vmem:[#allocation3 + $0x108] sm:$0xff] %vm171_vm0, %v2444_v7  ;;  %v2447_v19 = vmax.f32 %v2301_v11, 0.0  ;;  %v2296_v16 = vadd.f32 %v11142_v60, %v2295_v15 }
 0x367   : > { %v9419_v23 = vpop.f32.mrf.mxu0 }
 0x368   : > { %2540 = vst.msk [vmem:[#allocation5] sm:$0xff] %vm171_vm0, %v2508_v12  ;;  %v2511_v20 = vadd.f32 %v2479_v9, %v2447_v19  ;;  %2575 = vst.msk [vmem:[#allocation3 + $0x130] sm:$0xff] %vm171_vm0, %v2447_v19  ;;  %v2446_v42 = vmax.f32 %v2296_v16, 0.0  ;;  %v2311_v28 = vadd.f32 %v9419_v23, %v11142_v60  ;;  %v2489_v9 = vld [vmem:[#allocation5 + $0x68] sm:$0xff] }
 0x369   : > { %v2305_v43 = vpop.f32.mrf.mxu0 }
 0x36a   : > { %2543 = vst.msk [vmem:[#allocation5 + $0x18] sm:$0xff] %vm171_vm0, %v2511_v20  ;;  %v2510_v24 = vadd.f32 %v2478_v41, %v2446_v42  ;;  %2574 = vst.msk [vmem:[#allocation3 + $0x128] sm:$0xff] %vm171_vm0, %v2446_v42  ;;  %v2449_v44 = vmax.f32 %v2311_v28, 0.0  ;;  %v2306_v47 = vadd.f32 %v11142_v60, %v2305_v43  ;;  %v2488_v42 = vld [vmem:[#allocation5 + $0x60] sm:$0xff] }
 0x36b   : > { %v9422_v33 = vpop.f32.mrf.mxu0  ;;  %v11158_v53 = vld [vmem:[#allocation3 + $0x110] sm:$0xff] }
 0x36c   : > { %2542 = vst.msk [vmem:[#allocation5 + $0x10] sm:$0xff] %vm171_vm0, %v2510_v24  ;;  %v2513_v56 = vadd.f32 %v2481_v36, %v2449_v44  ;;  %2577 = vst.msk [vmem:[#allocation3 + $0x150] sm:$0xff] %vm171_vm0, %v2449_v44  ;;  %v2448_v27 = vmax.f32 %v2306_v47, 0.0  ;;  %v2321_v63 = vadd.f32 %v9422_v33, %v11142_v60  ;;  %2751 = vrot.lane.b32.xlu1 %v11158_v53, %s9659_s19  ;;  %v2491_v47 = vld [vmem:[#allocation5 + $0x78] sm:$0xff] }
 0x36d   : > { %v2315_v13 = vpop.f32.mrf.mxu0  ;;  %v11165_v14 = vld [vmem:[#allocation3 + $0x108] sm:$0xff] }
 0x36e   : > { %v11167_v17 = vld [vmem:[#allocation3 + $0x10e] sm:$0xff]  ;;  %2545 = vst.msk [vmem:[#allocation5 + $0x28] sm:$0xff] %vm171_vm0, %v2513_v56  ;;  %v2512_v18 = vadd.f32 %v2480_v50, %v2448_v27  ;;  %2576 = vst.msk [vmem:[#allocation3 + $0x148] sm:$0xff] %vm171_vm0, %v2448_v27  ;;  %v2451_v21 = vmax.f32 %v2321_v63, 0.0  ;;  %v2316_v48 = vadd.f32 %v11142_v60, %v2315_v13  ;;  %2749 = vrot.lane.b32.xlu0 %v11165_v14, %s9659_s19  ;;  %v11176_v22 = vld [vmem:[#allocation3 + $0x106] sm:$0xff] }
 0x36f   : > { %2650 = vst.msk [vmem:[#allocation4 + $0x28] sm:$0xff] %vm171_vm0, %v11167_v17  ;;  %v9425_v45 = vpop.f32.mrf.mxu0  ;;  %v11178_v29 = vld [vmem:[#allocation3 + $0x130] sm:$0xff]  ;;  %2649 = vst.msk [vmem:[#allocation4 + $0x20] sm:$0xff] %vm171_vm0, %v11176_v22 }
 0x370   : > { %2544 = vst.msk [vmem:[#allocation5 + $0x20] sm:$0xff] %vm171_vm0, %v2512_v18  ;;  %v2515_v25 = vadd.f32 %v2483_v10, %v2451_v21  ;;  %2579 = vst.msk [vmem:[#allocation3 + $0x170] sm:$0xff] %vm171_vm0, %v2451_v21  ;;  %v2450_v46 = vmax.f32 %v2316_v48, 0.0  ;;  %v2331_v26 = vadd.f32 %v9425_v45, %v11142_v60  ;;  %2755 = vrot.lane.b32.xlu1 %v11178_v29, %s9659_s19  ;;  %v2490_v18 = vld [vmem:[#allocation5 + $0x70] sm:$0xff] }
 0x371   : > { %v2325_v35 = vpop.f32.mrf.mxu0  ;;  %v11187_v31 = vld [vmem:[#allocation3 + $0x128] sm:$0xff] }
 0x372   : > { %v11189_v32 = vld [vmem:[#allocation3 + $0x12e] sm:$0xff]  ;;  %2547 = vst.msk [vmem:[#allocation5 + $0x38] sm:$0xff] %vm171_vm0, %v2515_v25  ;;  %v2514_v34 = vadd.f32 %v2482_v49, %v2450_v46  ;;  %2578 = vst.msk [vmem:[#allocation3 + $0x168] sm:$0xff] %vm171_vm0, %v2450_v46  ;;  %v2453_v38 = vmax.f32 %v2331_v26, 0.0  ;;  %v2326_v39 = vadd.f32 %v11142_v60, %v2325_v35  ;;  %2753 = vrot.lane.b32.xlu0 %v11187_v31, %s9659_s19  ;;  %v11198_v37 = vld [vmem:[#allocation3 + $0x126] sm:$0xff] }
 0x373   : > { %2652 = vst.msk [vmem:[#allocation4 + $0x38] sm:$0xff] %vm171_vm0, %v11189_v32  ;;  %v9428_v40 = vpop.f32.mrf.mxu0  ;;  %v11200_v54 = vld [vmem:[#allocation3 + $0x150] sm:$0xff]  ;;  %2651 = vst.msk [vmem:[#allocation4 + $0x30] sm:$0xff] %vm171_vm0, %v11198_v37  ;;  %v2493_v46 = vld [vmem:[#allocation5 + $0x88] sm:$0xff] }
 0x374   : > { %2546 = vst.msk [vmem:[#allocation5 + $0x30] sm:$0xff] %vm171_vm0, %v2514_v34  ;;  %v2517_v52 = vadd.f32 %v2485_v30, %v2453_v38  ;;  %2581 = vst.msk [vmem:[#allocation3 + $0x190] sm:$0xff] %vm171_vm0, %v2453_v38  ;;  %v2452_v57 = vmax.f32 %v2326_v39, 0.0  ;;  %v2341_v55 = vadd.f32 %v9428_v40, %v11142_v60  ;;  %2759 = vrot.lane.b32.xlu1 %v11200_v54, %s9659_s19  ;;  %v2492_v40 = vld [vmem:[#allocation5 + $0x80] sm:$0xff] }
 0x375   : > { %v2335_v58 = vpop.f32.mrf.mxu0  ;;  %v11209_v61 = vld [vmem:[#allocation3 + $0x148] sm:$0xff] }
 0x376   : > { %v11211_v0 = vld [vmem:[#allocation3 + $0x14e] sm:$0xff]  ;;  %2549 = vst.msk [vmem:[#allocation5 + $0x48] sm:$0xff] %vm171_vm0, %v2517_v52  ;;  %v2516_v62 = vadd.f32 %v2484_v51, %v2452_v57  ;;  %2580 = vst.msk [vmem:[#allocation3 + $0x188] sm:$0xff] %vm171_vm0, %v2452_v57  ;;  %v2455_v2 = vmax.f32 %v2341_v55, 0.0  ;;  %v2336_v1 = vadd.f32 %v11142_v60, %v2335_v58  ;;  %2757 = vrot.lane.b32.xlu0 %v11209_v61, %s9659_s19  ;;  %v11220_v4 = vld [vmem:[#allocation3 + $0x146] sm:$0xff] }
 0x377   : > { %2654 = vst.msk [vmem:[#allocation4 + $0x48] sm:$0xff] %vm171_vm0, %v11211_v0  ;;  %v9431_v6 = vpop.f32.mrf.mxu0  ;;  %v11222_v5 = vld [vmem:[#allocation3 + $0x170] sm:$0xff]  ;;  %2653 = vst.msk [vmem:[#allocation4 + $0x40] sm:$0xff] %vm171_vm0, %v11220_v4 }
 0x378   : > { %2548 = vst.msk [vmem:[#allocation5 + $0x40] sm:$0xff] %vm171_vm0, %v2516_v62  ;;  %v2519_v8 = vadd.f32 %v2487_v59, %v2455_v2  ;;  %2583 = vst.msk [vmem:[#allocation3 + $0x1b0] sm:$0xff] %vm171_vm0, %v2455_v2  ;;  %v2454_v7 = vmax.f32 %v2336_v1, 0.0  ;;  %v2351_v11 = vadd.f32 %v9431_v6, %v11142_v60  ;;  %2763 = vrot.lane.b32.xlu1 %v11222_v5, %s9659_s19  ;;  %v2495_v62 = vld [vmem:[#allocation5 + $0x98] sm:$0xff] }
 0x379   : > { %v2345_v15 = vpop.f32.mrf.mxu0  ;;  %v11231_v12 = vld [vmem:[#allocation3 + $0x168] sm:$0xff] }
 0x37a   : > { %v11233_v19 = vld [vmem:[#allocation3 + $0x16e] sm:$0xff]  ;;  %2551 = vst.msk [vmem:[#allocation5 + $0x58] sm:$0xff] %vm171_vm0, %v2519_v8  ;;  %v2518_v16 = vadd.f32 %v2486_v3, %v2454_v7  ;;  %2582 = vst.msk [vmem:[#allocation3 + $0x1a8] sm:$0xff] %vm171_vm0, %v2454_v7  ;;  %v2457_v41 = vmax.f32 %v2351_v11, 0.0  ;;  %v2346_v23 = vadd.f32 %v11142_v60, %v2345_v15  ;;  %2761 = vrot.lane.b32.xlu0 %v11231_v12, %s9659_s19  ;;  %v11242_v20 = vld [vmem:[#allocation3 + $0x166] sm:$0xff] }
 0x37b   : > { %2656 = vst.msk [vmem:[#allocation4 + $0x58] sm:$0xff] %vm171_vm0, %v11233_v19  ;;  %v9434_v28 = vpop.f32.mrf.mxu0  ;;  %v11244_v36 = vld [vmem:[#allocation3 + $0x190] sm:$0xff]  ;;  %2655 = vst.msk [vmem:[#allocation4 + $0x50] sm:$0xff] %vm171_vm0, %v11242_v20 }
 0x37c   : > { %2550 = vst.msk [vmem:[#allocation5 + $0x50] sm:$0xff] %vm171_vm0, %v2518_v16  ;;  %v2521_v43 = vadd.f32 %v2489_v9, %v2457_v41  ;;  %2585 = vst.msk [vmem:[#allocation3 + $0x1d0] sm:$0xff] %vm171_vm0, %v2457_v41  ;;  %v2456_v24 = vmax.f32 %v2346_v23, 0.0  ;;  %v2361_v44 = vadd.f32 %v9434_v28, %v11142_v60  ;;  %2767 = vrot.lane.b32.xlu1 %v11244_v36, %s9659_s19  ;;  %v2494_v9 = vld [vmem:[#allocation5 + $0x90] sm:$0xff]  ;;  %v2497_v28 = vld [vmem:[#allocation5 + $0xa8] sm:$0xff] }
 0x37d   : > { %v2355_v50 = vpop.f32.mrf.mxu0  ;;  %v11253_v33 = vld [vmem:[#allocation3 + $0x188] sm:$0xff] }
 0x37e   : > { %v11255_v56 = vld [vmem:[#allocation3 + $0x18e] sm:$0xff]  ;;  %2553 = vst.msk [vmem:[#allocation5 + $0x68] sm:$0xff] %vm171_vm0, %v2521_v43  ;;  %v2520_v27 = vadd.f32 %v2488_v42, %v2456_v24  ;;  %2584 = vst.msk [vmem:[#allocation3 + $0x1c8] sm:$0xff] %vm171_vm0, %v2456_v24  ;;  %v2459_v63 = vmax.f32 %v2361_v44, 0.0  ;;  %v2356_v10 = vadd.f32 %v11142_v60, %v2355_v50  ;;  %2765 = vrot.lane.b32.xlu0 %v11253_v33, %s9659_s19  ;;  %v11264_v13 = vld [vmem:[#allocation3 + $0x186] sm:$0xff] }
 0x37f   : > { %2658 = vst.msk [vmem:[#allocation4 + $0x68] sm:$0xff] %vm171_vm0, %v11255_v56  ;;  %v9437_v21 = vpop.f32.mrf.mxu0  ;;  %v11266_v48 = vld [vmem:[#allocation3 + $0x1b0] sm:$0xff]  ;;  %2657 = vst.msk [vmem:[#allocation4 + $0x60] sm:$0xff] %vm171_vm0, %v11264_v13 }
 0x380   : > { %2552 = vst.msk [vmem:[#allocation5 + $0x60] sm:$0xff] %vm171_vm0, %v2520_v27  ;;  %v2523_v49 = vadd.f32 %v2491_v47, %v2459_v63  ;;  %2587 = vst.msk [vmem:[#allocation3 + $0x1f0] sm:$0xff] %vm171_vm0, %v2459_v63  ;;  %v2458_v45 = vmax.f32 %v2356_v10, 0.0  ;;  %v2371_v25 = vadd.f32 %v9437_v21, %v11142_v60  ;;  %2771 = vrot.lane.b32.xlu1 %v11266_v48, %s9659_s19  ;;  %v2496_v10 = vld [vmem:[#allocation5 + $0xa0] sm:$0xff] }
 0x381   : > { %v2365_v26 = vpop.f32.mrf.mxu0  ;;  %v11275_v30 = vld [vmem:[#allocation3 + $0x1a8] sm:$0xff] }
 0x382   : > { %v11277_v35 = vld [vmem:[#allocation3 + $0x1ae] sm:$0xff]  ;;  %2555 = vst.msk [vmem:[#allocation5 + $0x78] sm:$0xff] %vm171_vm0, %v2523_v49  ;;  %v2522_v34 = vadd.f32 %v2490_v18, %v2458_v45  ;;  %2586 = vst.msk [vmem:[#allocation3 + $0x1e8] sm:$0xff] %vm171_vm0, %v2458_v45  ;;  %v2461_v38 = vmax.f32 %v2371_v25, 0.0  ;;  %v2366_v39 = vadd.f32 %v11142_v60, %v2365_v26  ;;  %2769 = vrot.lane.b32.xlu0 %v11275_v30, %s9659_s19  ;;  %v11286_v51 = vld [vmem:[#allocation3 + $0x1a6] sm:$0xff] }
 0x383   : > { %2660 = vst.msk [vmem:[#allocation4 + $0x78] sm:$0xff] %vm171_vm0, %v11277_v35  ;;  %v9440_v52 = vpop.f32.mrf.mxu0  ;;  %v11288_v57 = vld [vmem:[#allocation3 + $0x1d0] sm:$0xff]  ;;  %2659 = vst.msk [vmem:[#allocation4 + $0x70] sm:$0xff] %vm171_vm0, %v11286_v51 }
 0x384   : > { %2554 = vst.msk [vmem:[#allocation5 + $0x70] sm:$0xff] %vm171_vm0, %v2522_v34  ;;  %v2525_v55 = vadd.f32 %v2493_v46, %v2461_v38  ;;  %2589 = vst.msk [vmem:[#allocation3 + $0x210] sm:$0xff] %vm171_vm0, %v2461_v38  ;;  %v2460_v59 = vmax.f32 %v2366_v39, 0.0  ;;  %v2381_v58 = vadd.f32 %v9440_v52, %v11142_v60  ;;  %2775 = vrot.lane.b32.xlu1 %v11288_v57, %s9659_s19  ;;  %v2499_v46 = vld [vmem:[#allocation5 + $0xb8] sm:$0xff] }
 0x385   : > { %v2375_v2 = vpop.f32.mrf.mxu0  ;;  %v11297_v1 = vld [vmem:[#allocation3 + $0x1c8] sm:$0xff] }
 0x386   : > { %v11299_v3 = vld [vmem:[#allocation3 + $0x1ce] sm:$0xff]  ;;  %2557 = vst.msk [vmem:[#allocation5 + $0x88] sm:$0xff] %vm171_vm0, %v2525_v55  ;;  %v2524_v6 = vadd.f32 %v2492_v40, %v2460_v59  ;;  %2588 = vst.msk [vmem:[#allocation3 + $0x208] sm:$0xff] %vm171_vm0, %v2460_v59  ;;  %v2463_v8 = vmax.f32 %v2381_v58, 0.0  ;;  %v2376_v7 = vadd.f32 %v11142_v60, %v2375_v2  ;;  %2773 = vrot.lane.b32.xlu0 %v11297_v1, %s9659_s19  ;;  %v11308_v11 = vld [vmem:[#allocation3 + $0x1c6] sm:$0xff] }
 0x387   : > { %2662 = vst.msk [vmem:[#allocation4 + $0x88] sm:$0xff] %vm171_vm0, %v11299_v3  ;;  %v9443_v15 = vpop.f32.mrf.mxu0  ;;  %v11310_v16 = vld [vmem:[#allocation3 + $0x1f0] sm:$0xff]  ;;  %2661 = vst.msk [vmem:[#allocation4 + $0x80] sm:$0xff] %vm171_vm0, %v11308_v11 }
 0x388   : > { %2556 = vst.msk [vmem:[#allocation5 + $0x80] sm:$0xff] %vm171_vm0, %v2524_v6  ;;  %v2527_v41 = vadd.f32 %v2495_v62, %v2463_v8  ;;  %2591 = vst.msk [vmem:[#allocation3 + $0x230] sm:$0xff] %vm171_vm0, %v2463_v8  ;;  %v2462_v23 = vmax.f32 %v2376_v7, 0.0  ;;  %v2391_v42 = vadd.f32 %v9443_v15, %v11142_v60  ;;  %2779 = vrot.lane.b32.xlu1 %v11310_v16, %s9659_s19  ;;  %v2498_v59 = vld [vmem:[#allocation5 + $0xb0] sm:$0xff]  ;;  %v2501_v7 = vld [vmem:[#allocation5 + $0xc8] sm:$0xff] }
 0x389   : > { %v2385_v43 = vpop.f32.mrf.mxu0  ;;  %v11319_v24 = vld [vmem:[#allocation3 + $0x1e8] sm:$0xff] }
 0x38a   : > { %v11321_v44 = vld [vmem:[#allocation3 + $0x1ee] sm:$0xff]  ;;  %2559 = vst.msk [vmem:[#allocation5 + $0x98] sm:$0xff] %vm171_vm0, %v2527_v41  ;;  %v2526_v47 = vadd.f32 %v2494_v9, %v2462_v23  ;;  %2590 = vst.msk [vmem:[#allocation3 + $0x228] sm:$0xff] %vm171_vm0, %v2462_v23  ;;  %v2465_v50 = vmax.f32 %v2391_v42, 0.0  ;;  %v2386_v27 = vadd.f32 %v11142_v60, %v2385_v43  ;;  %2777 = vrot.lane.b32.xlu0 %v11319_v24, %s9659_s19  ;;  %v11330_v63 = vld [vmem:[#allocation3 + $0x1e6] sm:$0xff] }
 0x38b   : > { %2664 = vst.msk [vmem:[#allocation4 + $0x98] sm:$0xff] %vm171_vm0, %v11321_v44  ;;  %v9446_v18 = vpop.f32.mrf.mxu0  ;;  %v11332_v21 = vld [vmem:[#allocation3 + $0x210] sm:$0xff]  ;;  %2663 = vst.msk [vmem:[#allocation4 + $0x90] sm:$0xff] %vm171_vm0, %v11330_v63 }
 0x38c   : > { %2558 = vst.msk [vmem:[#allocation5 + $0x90] sm:$0xff] %vm171_vm0, %v2526_v47  ;;  %v2529_v49 = vadd.f32 %v2497_v28, %v2465_v50  ;;  %2593 = vst.msk [vmem:[#allocation3 + $0x250] sm:$0xff] %vm171_vm0, %v2465_v50  ;;  %v2464_v45 = vmax.f32 %v2386_v27, 0.0  ;;  %v2401_v25 = vadd.f32 %v9446_v18, %v11142_v60  ;;  %2783 = vrot.lane.b32.xlu1 %v11332_v21, %s9659_s19  ;;  %v2500_v47 = vld [vmem:[#allocation5 + $0xc0] sm:$0xff] }
 0x38d   : > { %v2395_v26 = vpop.f32.mrf.mxu0  ;;  %v11341_v34 = vld [vmem:[#allocation3 + $0x208] sm:$0xff] }
 0x38e   : > { %v11343_v38 = vld [vmem:[#allocation3 + $0x20e] sm:$0xff]  ;;  %2561 = vst.msk [vmem:[#allocation5 + $0xa8] sm:$0xff] %vm171_vm0, %v2529_v49  ;;  %v2528_v39 = vadd.f32 %v2496_v10, %v2464_v45  ;;  %2592 = vst.msk [vmem:[#allocation3 + $0x248] sm:$0xff] %vm171_vm0, %v2464_v45  ;;  %v2467_v40 = vmax.f32 %v2401_v25, 0.0  ;;  %v2396_v52 = vadd.f32 %v11142_v60, %v2395_v26  ;;  %2781 = vrot.lane.b32.xlu0 %v11341_v34, %s9659_s19  ;;  %v11352_v55 = vld [vmem:[#allocation3 + $0x206] sm:$0xff] }
 0x38f   : > { %2666 = vst.msk [vmem:[#allocation4 + $0xa8] sm:$0xff] %vm171_vm0, %v11343_v38  ;;  %v9449_v58 = vpop.f32.mrf.mxu0  ;;  %v11354_v62 = vld [vmem:[#allocation3 + $0x230] sm:$0xff]  ;;  %2665 = vst.msk [vmem:[#allocation4 + $0xa0] sm:$0xff] %vm171_vm0, %v11352_v55  ;;  %v2503_v45 = vld [vmem:[#allocation5 + $0xd8] sm:$0xff] }
 0x390   : > { %2560 = vst.msk [vmem:[#allocation5 + $0xa0] sm:$0xff] %vm171_vm0, %v2528_v39  ;;  %v2531_v2 = vadd.f32 %v2499_v46, %v2467_v40  ;;  %2595 = vst.msk [vmem:[#allocation3 + $0x270] sm:$0xff] %vm171_vm0, %v2467_v40  ;;  %v2466_v6 = vmax.f32 %v2396_v52, 0.0  ;;  %v2411_v8 = vadd.f32 %v9449_v58, %v11142_v60  ;;  %2787 = vrot.lane.b32.xlu1 %v11354_v62, %s9659_s19  ;;  %v2502_v58 = vld [vmem:[#allocation5 + $0xd0] sm:$0xff] }
 0x391   : > { %v2405_v9 = vpop.f32.mrf.mxu0  ;;  %v11363_v15 = vld [vmem:[#allocation3 + $0x228] sm:$0xff] }
 0x392   : > { %v11365_v41 = vld [vmem:[#allocation3 + $0x22e] sm:$0xff]  ;;  %2563 = vst.msk [vmem:[#allocation5 + $0xb8] sm:$0xff] %vm171_vm0, %v2531_v2  ;;  %v2530_v23 = vadd.f32 %v2498_v59, %v2466_v6  ;;  %2594 = vst.msk [vmem:[#allocation3 + $0x268] sm:$0xff] %vm171_vm0, %v2466_v6  ;;  %v2469_v42 = vmax.f32 %v2411_v8, 0.0  ;;  %v2406_v28 = vadd.f32 %v11142_v60, %v2405_v9  ;;  %2785 = vrot.lane.b32.xlu0 %v11363_v15, %s9659_s19  ;;  %v11374_v43 = vld [vmem:[#allocation3 + $0x226] sm:$0xff] }
 0x393   : > { %2668 = vst.msk [vmem:[#allocation4 + $0xb8] sm:$0xff] %vm171_vm0, %v11365_v41  ;;  %v9452_v50 = vpop.f32.mrf.mxu0  ;;  %v11376_v27 = vld [vmem:[#allocation3 + $0x250] sm:$0xff]  ;;  %2667 = vst.msk [vmem:[#allocation4 + $0xb0] sm:$0xff] %vm171_vm0, %v11374_v43 }
 0x394   : > { %2562 = vst.msk [vmem:[#allocation5 + $0xb0] sm:$0xff] %vm171_vm0, %v2530_v23  ;;  %v2533_v10 = vadd.f32 %v2501_v7, %v2469_v42  ;;  %2597 = vst.msk [vmem:[#allocation3 + $0x290] sm:$0xff] %vm171_vm0, %v2469_v42  ;;  %v2468_v18 = vmax.f32 %v2406_v28, 0.0  ;;  %v2421_v49 = vadd.f32 %v9452_v50, %v11142_v60  ;;  %2791 = vrot.lane.b32.xlu1 %v11376_v27, %s9659_s19  ;;  %v2505_v28 = vld [vmem:[#allocation5 + $0xe8] sm:$0xff] }
 0x395   : > { %v2415_v25 = vpop.f32.mrf.mxu0  ;;  %v11385_v46 = vld [vmem:[#allocation3 + $0x248] sm:$0xff] }
 0x396   : > { %v11387_v26 = vld [vmem:[#allocation3 + $0x24e] sm:$0xff]  ;;  %2565 = vst.msk [vmem:[#allocation5 + $0xc8] sm:$0xff] %vm171_vm0, %v2533_v10  ;;  %v2532_v39 = vadd.f32 %v2500_v47, %v2468_v18  ;;  %2596 = vst.msk [vmem:[#allocation3 + $0x288] sm:$0xff] %vm171_vm0, %v2468_v18  ;;  %v2471_v40 = vmax.f32 %v2421_v49, 0.0  ;;  %v2416_v52 = vadd.f32 %v11142_v60, %v2415_v25  ;;  %2789 = vrot.lane.b32.xlu0 %v11385_v46, %s9659_s19  ;;  %v11396_v59 = vld [vmem:[#allocation3 + $0x246] sm:$0xff] }
 0x397   : > { %2670 = vst.msk [vmem:[#allocation4 + $0xc8] sm:$0xff] %vm171_vm0, %v11387_v26  ;;  %v11398_v2 = vld [vmem:[#allocation3 + $0x270] sm:$0xff]  ;;  %2669 = vst.msk [vmem:[#allocation4 + $0xc0] sm:$0xff] %vm171_vm0, %v11396_v59  ;;  %v9455_v6 = vpop.f32.mrf.mxu0  ;;  %v2504_v25 = vld [vmem:[#allocation5 + $0xe0] sm:$0xff] }
 0x398   : > { %2564 = vst.msk [vmem:[#allocation5 + $0xc0] sm:$0xff] %vm171_vm0, %v2532_v39  ;;  %v2535_v8 = vadd.f32 %v2503_v45, %v2471_v40  ;;  %2599 = vst.msk [vmem:[#allocation3 + $0x2b0] sm:$0xff] %vm171_vm0, %v2471_v40  ;;  %v2470_v7 = vmax.f32 %v2416_v52, 0.0  ;;  %2795 = vrot.lane.b32.xlu1 %v11398_v2, %s9659_s19  ;;  %v2431_v9 = vadd.f32 %v9455_v6, %v11142_v60 }
 0x399   : > { %v11407_v23 = vld [vmem:[#allocation3 + $0x268] sm:$0xff]  ;;  %v2425_v47 = vpop.f32.mrf.mxu0 }
 0x39a   : > { %v11409_v42 = vld [vmem:[#allocation3 + $0x26e] sm:$0xff]  ;;  %2567 = vst.msk [vmem:[#allocation5 + $0xd8] sm:$0xff] %vm171_vm0, %v2535_v8  ;;  %v2534_v50 = vadd.f32 %v2502_v58, %v2470_v7  ;;  %2598 = vst.msk [vmem:[#allocation3 + $0x2a8] sm:$0xff] %vm171_vm0, %v2470_v7  ;;  %2793 = vrot.lane.b32.xlu0 %v11407_v23, %s9659_s19  ;;  %v11417_v10 = vld [vmem:[#allocation3 + $0x266] sm:$0xff]  ;;  %v2473_v18 = vmax.f32 %v2431_v9, 0.0  ;;  %v2426_v49 = vadd.f32 %v11142_v60, %v2425_v47 }
 0x39b   : > { %2672 = vst.msk [vmem:[#allocation4 + $0xd8] sm:$0xff] %vm171_vm0, %v11409_v42  ;;  %v11420_v45 = vld [vmem:[#allocation3 + $0x290] sm:$0xff]  ;;  %2671 = vst.msk [vmem:[#allocation4 + $0xd0] sm:$0xff] %vm171_vm0, %v11417_v10  ;;  %v9458_v39 = vpop.f32.mrf.mxu0  ;;  %v2507_v7 = vld [vmem:[#allocation5 + $0xf8] sm:$0xff] }
 0x39c   : > { %2566 = vst.msk [vmem:[#allocation5 + $0xd0] sm:$0xff] %vm171_vm0, %v2534_v50  ;;  %2799 = vrot.lane.b32.xlu1 %v11420_v45, %s9659_s19  ;;  %v2537_v40 = vadd.f32 %v2505_v28, %v2473_v18  ;;  %2601 = vst.msk [vmem:[#allocation3 + $0x2d0] sm:$0xff] %vm171_vm0, %v2473_v18  ;;  %v2472_v52 = vmax.f32 %v2426_v49, 0.0  ;;  %v2441_v58 = vadd.f32 %v9458_v39, %v11142_v60  ;;  %v2506_v39 = vld [vmem:[#allocation5 + $0xf0] sm:$0xff] }
 0x39d   : > { %v11429_v6 = vld [vmem:[#allocation3 + $0x288] sm:$0xff]  ;;  %v2435_v9 = vpop.f32.mrf.mxu0 }
 0x39e   : > { %14612 = vst [vmem:[#allocation6_spill] sm:$0xff] %v11429_v6  ;;  %v11431_v8 = vld [vmem:[#allocation3 + $0x28e] sm:$0xff]  ;;  %2797 = vrot.lane.b32.xlu0 %v11429_v6, %s9659_s19  ;;  %2569 = vst.msk [vmem:[#allocation5 + $0xe8] sm:$0xff] %vm171_vm0, %v2537_v40  ;;  %v2536_v28 = vadd.f32 %v2504_v25, %v2472_v52  ;;  %v11439_v47 = vld [vmem:[#allocation3 + $0x286] sm:$0xff]  ;;  %v2475_v50 = vmax.f32 %v2441_v58, 0.0  ;;  %v2436_v18 = vadd.f32 %v11142_v60, %v2435_v9 }
 0x39f   : > { %2674 = vst.msk [vmem:[#allocation4 + $0xe8] sm:$0xff] %vm171_vm0, %v11431_v8  ;;  %2600 = vst.msk [vmem:[#allocation3 + $0x2c8] sm:$0xff] %vm171_vm0, %v2472_v52  ;;  %v11442_v49 = vld [vmem:[#allocation3 + $0x2b0] sm:$0xff] }
 0x3a0   : > { %2673 = vst.msk [vmem:[#allocation4 + $0xe0] sm:$0xff] %vm171_vm0, %v11439_v47  ;;  %2803 = vrot.lane.b32.xlu1 %v11442_v49, %s9659_s19  ;;  %2568 = vst.msk [vmem:[#allocation5 + $0xe0] sm:$0xff] %vm171_vm0, %v2536_v28  ;;  %v2539_v40 = vadd.f32 %v2507_v7, %v2475_v50  ;;  %v2474_v25 = vmax.f32 %v2436_v18, 0.0  ;;  %v2870_v58 = vld [vmem:[#allocation3 + $0xd2] sm:$0xff]  ;;  %v2869_v9 = vld [vmem:[#allocation3 + $0xca] sm:$0xff] }
 0x3a1   : > { %2603 = vst.msk [vmem:[#allocation3 + $0x2f0] sm:$0xff] %vm171_vm0, %v2475_v50  ;;  %v11450_v52 = vld [vmem:[#allocation3 + $0x2a8] sm:$0xff]  ;;  %v2872_v28 = vld [vmem:[#allocation3 + $0xf2] sm:$0xff] }
 0x3a2   : > { %v11452_v6 = vld [vmem:[#allocation3 + $0x2ae] sm:$0xff]  ;;  %2801 = vrot.lane.b32.xlu0 %v11450_v52, %s9659_s19  ;;  %2571 = vst.msk [vmem:[#allocation5 + $0xf8] sm:$0xff] %vm171_vm0, %v2539_v40  ;;  %v2538_v60 = vadd.f32 %v2506_v39, %v2474_v25  ;;  %2602 = vst.msk [vmem:[#allocation3 + $0x2e8] sm:$0xff] %vm171_vm0, %v2474_v25  ;;  %v11460_v7 = vld [vmem:[#allocation3 + $0x2a6] sm:$0xff] }
 0x3a3   : > { %2676 = vst.msk [vmem:[#allocation4 + $0xf8] sm:$0xff] %vm171_vm0, %v11452_v6  ;;  %2675 = vst.msk [vmem:[#allocation4 + $0xf0] sm:$0xff] %vm171_vm0, %v11460_v7  ;;  %v2871_v50 = vld [vmem:[#allocation3 + $0xea] sm:$0xff]  ;;  %v11469_v18 = vld [vmem:[#allocation3 + $0x112] sm:$0xff] }
 0x3a4   : > { %2935 = vrot.lane.b32.xlu1 %v2870_v58, %s9660_s20  ;;  %2570 = vst.msk [vmem:[#allocation5 + $0xf0] sm:$0xff] %vm171_vm0, %v2538_v60  ;;  %v11473_v39 = vld [vmem:[#allocation3 + $0x10a] sm:$0xff]  ;;  %v11477_v40 = vld [vmem:[#allocation3 + $0x132] sm:$0xff] }
 0x3a5   : > { %14613 = vst [vmem:[#allocation7_spill] sm:$0xff] %v11477_v40  ;;  %v11481_v25 = vld [vmem:[#allocation3 + $0x12a] sm:$0xff]  ;;  %v11485_v58 = vld [vmem:[#allocation3 + $0x152] sm:$0xff] }
 0x3a6   : > { %2933 = vrot.lane.b32.xlu0 %v2869_v9, %s9660_s20  ;;  %14614 = vst [vmem:[#allocation8_spill] sm:$0xff] %v11481_v25  ;;  %14615 = vst [vmem:[#allocation9_spill] sm:$0xff] %v11485_v58  ;;  %v11489_v60 = vld [vmem:[#allocation3 + $0x14a] sm:$0xff]  ;;  %v11493_v9 = vld [vmem:[#allocation3 + $0x172] sm:$0xff] }
 0x3a7   : > { %14616 = vst [vmem:[#allocation10_spill] sm:$0xff] %v11489_v60  ;;  %14617 = vst [vmem:[#allocation11_spill] sm:$0xff] %v11493_v9 }
 0x3a8   : > { %2939 = vrot.lane.b32.xlu1 %v2872_v28, %s9660_s20  ;;  %v11497_v28 = vld [vmem:[#allocation3 + $0x16a] sm:$0xff] }
 0x3a9   : > { %14618 = vst [vmem:[#allocation12_spill] sm:$0xff] %v11497_v28 }
 0x3aa   : > { %2937 = vrot.lane.b32.xlu0 %v2871_v50, %s9660_s20  ;;  %v11501_v50 = vld [vmem:[#allocation3 + $0x192] sm:$0xff] }
 0x3ab   : > { %14619 = vst [vmem:[#allocation13_spill] sm:$0xff] %v11501_v50 }
 0x3ac   : > { %2943 = vrot.lane.b32.xlu1 %v11469_v18, %s9660_s20 }
 0x3ae   : > { %2941 = vrot.lane.b32.xlu0 %v11473_v39, %s9660_s20 }
 0x3b0   : > { %2947 = vrot.lane.b32.xlu1 %v11477_v40, %s9660_s20 }
 0x3b2   : > { %2945 = vrot.lane.b32.xlu0 %v11481_v25, %s9660_s20 }
 0x3b4   : > { %2951 = vrot.lane.b32.xlu1 %v11485_v58, %s9660_s20  ;;  %v11505_v58 = vld [vmem:[#allocation3 + $0x18a] sm:$0xff] }
 0x3b5   : > { %14620 = vst [vmem:[#allocation14_spill] sm:$0xff] %v11505_v58 }
 0x3b6   : > { %2949 = vrot.lane.b32.xlu0 %v11489_v60, %s9660_s20  ;;  %v11509_v60 = vld [vmem:[#allocation3 + $0x1b2] sm:$0xff] }
 0x3b7   : > { %14621 = vst [vmem:[#allocation15_spill] sm:$0xff] %v11509_v60 }
 0x3b8   : > { %2955 = vrot.lane.b32.xlu1 %v11493_v9, %s9660_s20  ;;  %v11513_v9 = vld [vmem:[#allocation3 + $0x1aa] sm:$0xff] }
 0x3b9   : > { %14622 = vst [vmem:[#allocation16_spill] sm:$0xff] %v11513_v9 }
 0x3ba   : > { %2953 = vrot.lane.b32.xlu0 %v11497_v28, %s9660_s20  ;;  %v11517_v28 = vld [vmem:[#allocation3 + $0x1d2] sm:$0xff] }
 0x3bb   : > { %14623 = vst [vmem:[#allocation17_spill] sm:$0xff] %v11517_v28 }
 0x3bc   : > { %2959 = vrot.lane.b32.xlu1 %v11501_v50, %s9660_s20  ;;  %v11521_v50 = vld [vmem:[#allocation3 + $0x1ca] sm:$0xff] }
 0x3bd   : > { %14624 = vst [vmem:[#allocation18_spill] sm:$0xff] %v11521_v50 }
 0x3be   : > { %2957 = vrot.lane.b32.xlu0 %v11505_v58, %s9660_s20  ;;  %v11525_v58 = vld [vmem:[#allocation3 + $0x1f2] sm:$0xff] }
 0x3bf   : > { %14625 = vst [vmem:[#allocation19_spill] sm:$0xff] %v11525_v58 }
 0x3c0   : > { %2963 = vrot.lane.b32.xlu1 %v11509_v60, %s9660_s20  ;;  %v11529_v60 = vld [vmem:[#allocation3 + $0x1ea] sm:$0xff] }
 0x3c1   : > { %14626 = vst [vmem:[#allocation20_spill] sm:$0xff] %v11529_v60 }
 0x3c2   : > { %2961 = vrot.lane.b32.xlu0 %v11513_v9, %s9660_s20  ;;  %v11533_v9 = vld [vmem:[#allocation3 + $0x212] sm:$0xff] }
 0x3c3   : > { %14627 = vst [vmem:[#allocation21_spill] sm:$0xff] %v11533_v9 }
 0x3c4   : > { %2967 = vrot.lane.b32.xlu1 %v11517_v28, %s9660_s20  ;;  %v11537_v28 = vld [vmem:[#allocation3 + $0x20a] sm:$0xff] }
 0x3c5   : > { %14628 = vst [vmem:[#allocation22_spill] sm:$0xff] %v11537_v28 }
 0x3c6   : > { %2965 = vrot.lane.b32.xlu0 %v11521_v50, %s9660_s20  ;;  %v11541_v50 = vld [vmem:[#allocation3 + $0x232] sm:$0xff] }
 0x3c7   : > { %14629 = vst [vmem:[#allocation23_spill] sm:$0xff] %v11541_v50 }
 0x3c8   : > { %2971 = vrot.lane.b32.xlu1 %v11525_v58, %s9660_s20  ;;  %v11545_v58 = vld [vmem:[#allocation3 + $0x22a] sm:$0xff] }
 0x3c9   : > { %14630 = vst [vmem:[#allocation24_spill] sm:$0xff] %v11545_v58 }
 0x3ca   : > { %2969 = vrot.lane.b32.xlu0 %v11529_v60, %s9660_s20  ;;  %v11549_v60 = vld [vmem:[#allocation3 + $0x252] sm:$0xff] }
 0x3cb   : > { %14631 = vst [vmem:[#allocation25_spill] sm:$0xff] %v11549_v60 }
 0x3cc   : > { %2975 = vrot.lane.b32.xlu1 %v11533_v9, %s9660_s20  ;;  %v11553_v9 = vld [vmem:[#allocation3 + $0x24a] sm:$0xff] }
 0x3cd   : > { %14632 = vst [vmem:[#allocation26_spill] sm:$0xff] %v11553_v9 }
 0x3ce   : > { %2973 = vrot.lane.b32.xlu0 %v11537_v28, %s9660_s20  ;;  %v11557_v28 = vld [vmem:[#allocation3 + $0x272] sm:$0xff] }
 0x3cf   : > { %14633 = vst [vmem:[#allocation27_spill] sm:$0xff] %v11557_v28 }
 0x3d0   : > { %2979 = vrot.lane.b32.xlu1 %v11541_v50, %s9660_s20  ;;  %v11561_v50 = vld [vmem:[#allocation3 + $0x26a] sm:$0xff] }
 0x3d1   : > { %14634 = vst [vmem:[#allocation28_spill] sm:$0xff] %v11561_v50 }
 0x3d2   : > { %2977 = vrot.lane.b32.xlu0 %v11545_v58, %s9660_s20  ;;  %v11565_v58 = vld [vmem:[#allocation3 + $0x292] sm:$0xff] }
 0x3d4   : > { %2983 = vrot.lane.b32.xlu1 %v11549_v60, %s9660_s20  ;;  %v11569_v60 = vld [vmem:[#allocation3 + $0x28a] sm:$0xff] }
 0x3d5   : > { %14635 = vst [vmem:[#allocation29_spill] sm:$0xff] %v11569_v60 }
 0x3d6   : > { %2981 = vrot.lane.b32.xlu0 %v11553_v9, %s9660_s20  ;;  %v11574_v9 = vld [vmem:[#allocation3 + $0x2b2] sm:$0xff] }
 0x3d8   : > { %2987 = vrot.lane.b32.xlu1 %v11557_v28, %s9660_s20 }
 0x3da   : > { %2985 = vrot.lane.b32.xlu0 %v11561_v50, %s9660_s20  ;;  %v11579_v50 = vld [vmem:[#allocation3 + $0x2aa] sm:$0xff] }
 0x3db   : > { %14636 = vst [vmem:[#allocation30_spill] sm:$0xff] %v11579_v50 }
 0x3dc   : > { %2991 = vrot.lane.b32.xlu1 %v11565_v58, %s9660_s20 }
 0x3de   : > { %v2752_v25 = vpop.permute.xlu1 %2751  ;;  %2989 = vrot.lane.b32.xlu0 %v11569_v60, %s9660_s20 }
 0x3df   : > { %2842 = vst.msk [vmem:[#allocation4 + $0x28] sm:$0xff] %vm695_vm1, %v2752_v25 }
 0x3e0   : > { %v2750_v28 = vpop.permute.xlu0 %2749  ;;  %2995 = vrot.lane.b32.xlu1 %v11574_v9, %s9660_s20 }
 0x3e1   : > { %2841 = vst.msk [vmem:[#allocation4 + $0x20] sm:$0xff] %vm695_vm1, %v2750_v28 }
 0x3e2   : > { %v2756_v40 = vpop.permute.xlu1 %2755  ;;  %2993 = vrot.lane.b32.xlu0 %v11579_v50, %s9660_s20 }
 0x3e3   : > { %2844 = vst.msk [vmem:[#allocation4 + $0x38] sm:$0xff] %vm695_vm1, %v2756_v40 }
 0x3e4   : > { %3127 = vrot.lane.b32.xlu1 %v11167_v17, %s9661_s21  ;;  %v2754_v25 = vpop.permute.xlu0 %2753 }
 0x3e5   : > { %2843 = vst.msk [vmem:[#allocation4 + $0x30] sm:$0xff] %vm695_vm1, %v2754_v25 }
 0x3e6   : > { %v2760_v60 = vpop.permute.xlu1 %2759  ;;  %3125 = vrot.lane.b32.xlu0 %v11176_v22, %s9661_s21 }
 0x3e7   : > { %2846 = vst.msk [vmem:[#allocation4 + $0x48] sm:$0xff] %vm695_vm1, %v2760_v60 }
 0x3e8   : > { %3131 = vrot.lane.b32.xlu1 %v11189_v32, %s9661_s21  ;;  %v2758_v28 = vpop.permute.xlu0 %2757 }
 0x3e9   : > { %2845 = vst.msk [vmem:[#allocation4 + $0x40] sm:$0xff] %vm695_vm1, %v2758_v28 }
 0x3ea   : > { %v2764_v50 = vpop.permute.xlu1 %2763  ;;  %3129 = vrot.lane.b32.xlu0 %v11198_v37, %s9661_s21 }
 0x3eb   : > { %2848 = vst.msk [vmem:[#allocation4 + $0x58] sm:$0xff] %vm695_vm1, %v2764_v50 }
 0x3ec   : > { %3135 = vrot.lane.b32.xlu1 %v11211_v0, %s9661_s21  ;;  %v2762_v17 = vpop.permute.xlu0 %2761 }
 0x3ed   : > { %2847 = vst.msk [vmem:[#allocation4 + $0x50] sm:$0xff] %vm695_vm1, %v2762_v17 }
 0x3ee   : > { %v2768_v22 = vpop.permute.xlu1 %2767  ;;  %3133 = vrot.lane.b32.xlu0 %v11220_v4, %s9661_s21 }
 0x3ef   : > { %2850 = vst.msk [vmem:[#allocation4 + $0x68] sm:$0xff] %vm695_vm1, %v2768_v22 }
 0x3f0   : > { %3139 = vrot.lane.b32.xlu1 %v11233_v19, %s9661_s21  ;;  %v2766_v32 = vpop.permute.xlu0 %2765 }
 0x3f1   : > { %2849 = vst.msk [vmem:[#allocation4 + $0x60] sm:$0xff] %vm695_vm1, %v2766_v32 }
 0x3f2   : > { %v2772_v37 = vpop.permute.xlu1 %2771  ;;  %3137 = vrot.lane.b32.xlu0 %v11242_v20, %s9661_s21 }
 0x3f3   : > { %2852 = vst.msk [vmem:[#allocation4 + $0x78] sm:$0xff] %vm695_vm1, %v2772_v37 }
 0x3f4   : > { %3143 = vrot.lane.b32.xlu1 %v11255_v56, %s9661_s21  ;;  %v2770_v40 = vpop.permute.xlu0 %2769 }
 0x3f5   : > { %2851 = vst.msk [vmem:[#allocation4 + $0x70] sm:$0xff] %vm695_vm1, %v2770_v40 }
 0x3f6   : > { %v2776_v60 = vpop.permute.xlu1 %2775  ;;  %3141 = vrot.lane.b32.xlu0 %v11264_v13, %s9661_s21 }
 0x3f7   : > { %2854 = vst.msk [vmem:[#allocation4 + $0x88] sm:$0xff] %vm695_vm1, %v2776_v60 }
 0x3f8   : > { %3147 = vrot.lane.b32.xlu1 %v11277_v35, %s9661_s21  ;;  %v2774_v50 = vpop.permute.xlu0 %2773 }
 0x3f9   : > { %2853 = vst.msk [vmem:[#allocation4 + $0x80] sm:$0xff] %vm695_vm1, %v2774_v50 }
 0x3fa   : > { %v2780_v25 = vpop.permute.xlu1 %2779  ;;  %3145 = vrot.lane.b32.xlu0 %v11286_v51, %s9661_s21 }
 0x3fb   : > { %2856 = vst.msk [vmem:[#allocation4 + $0x98] sm:$0xff] %vm695_vm1, %v2780_v25 }
 0x3fc   : > { %3151 = vrot.lane.b32.xlu1 %v11299_v3, %s9661_s21  ;;  %v2778_v28 = vpop.permute.xlu0 %2777 }
 0x3fd   : > { %2855 = vst.msk [vmem:[#allocation4 + $0x90] sm:$0xff] %vm695_vm1, %v2778_v28 }
 0x3fe   : > { %v2784_v17 = vpop.permute.xlu1 %2783  ;;  %3149 = vrot.lane.b32.xlu0 %v11308_v11, %s9661_s21 }
 0x3ff   : > { %2858 = vst.msk [vmem:[#allocation4 + $0xa8] sm:$0xff] %vm695_vm1, %v2784_v17 }
 0x400   : > { %3155 = vrot.lane.b32.xlu1 %v11321_v44, %s9661_s21  ;;  %v2782_v22 = vpop.permute.xlu0 %2781 }
 0x401   : > { %2857 = vst.msk [vmem:[#allocation4 + $0xa0] sm:$0xff] %vm695_vm1, %v2782_v22 }
 0x402   : > { %v2788_v32 = vpop.permute.xlu1 %2787  ;;  %3153 = vrot.lane.b32.xlu0 %v11330_v63, %s9661_s21 }
 0x403   : > { %2860 = vst.msk [vmem:[#allocation4 + $0xb8] sm:$0xff] %vm695_vm1, %v2788_v32 }
 0x404   : > { %3159 = vrot.lane.b32.xlu1 %v11343_v38, %s9661_s21  ;;  %v2786_v37 = vpop.permute.xlu0 %2785 }
 0x405   : > { %2859 = vst.msk [vmem:[#allocation4 + $0xb0] sm:$0xff] %vm695_vm1, %v2786_v37 }
 0x406   : > { %v2792_v40 = vpop.permute.xlu1 %2791  ;;  %3157 = vrot.lane.b32.xlu0 %v11352_v55, %s9661_s21 }
 0x407   : > { %2862 = vst.msk [vmem:[#allocation4 + $0xc8] sm:$0xff] %vm695_vm1, %v2792_v40 }
 0x408   : > { %3163 = vrot.lane.b32.xlu1 %v11365_v41, %s9661_s21  ;;  %v2790_v60 = vpop.permute.xlu0 %2789 }
 0x409   : > { %2861 = vst.msk [vmem:[#allocation4 + $0xc0] sm:$0xff] %vm695_vm1, %v2790_v60  ;;  %v11665_v60 = vld [vmem:[#allocation3 + $0x2ce] sm:$0xff] }
 0x40a   : > { %v2796_v50 = vpop.permute.xlu1 %2795  ;;  %3161 = vrot.lane.b32.xlu0 %v11374_v43, %s9661_s21 }
 0x40b   : > { %2864 = vst.msk [vmem:[#allocation4 + $0xd8] sm:$0xff] %vm695_vm1, %v2796_v50 }
 0x40c   : > { %3167 = vrot.lane.b32.xlu1 %v11387_v26, %s9661_s21  ;;  %v2794_v25 = vpop.permute.xlu0 %2793 }
 0x40d   : > { %2863 = vst.msk [vmem:[#allocation4 + $0xd0] sm:$0xff] %vm695_vm1, %v2794_v25 }
 0x40e   : > { %v2800_v28 = vpop.permute.xlu1 %2799  ;;  %3165 = vrot.lane.b32.xlu0 %v11396_v59, %s9661_s21 }
 0x40f   : > { %2866 = vst.msk [vmem:[#allocation4 + $0xe8] sm:$0xff] %vm695_vm1, %v2800_v28  ;;  %v11673_v28 = vld [vmem:[#allocation3 + $0x2c6] sm:$0xff] }
 0x410   : > { %3171 = vrot.lane.b32.xlu1 %v11409_v42, %s9661_s21  ;;  %v2798_v17 = vpop.permute.xlu0 %2797 }
 0x411   : > { %2865 = vst.msk [vmem:[#allocation4 + $0xe0] sm:$0xff] %vm695_vm1, %v2798_v17  ;;  %v11675_v17 = vld [vmem:[#allocation3 + $0x2ee] sm:$0xff] }
 0x412   : > { %v2804_v22 = vpop.permute.xlu1 %2803  ;;  %3169 = vrot.lane.b32.xlu0 %v11417_v10, %s9661_s21 }
 0x413   : > { %2868 = vst.msk [vmem:[#allocation4 + $0xf8] sm:$0xff] %vm695_vm1, %v2804_v22 }
 0x414   : > { %3175 = vrot.lane.b32.xlu1 %v11431_v8, %s9661_s21  ;;  %v2802_v32 = vpop.permute.xlu0 %2801 }
 0x415   : > { %2867 = vst.msk [vmem:[#allocation4 + $0xf0] sm:$0xff] %vm695_vm1, %v2802_v32 }
 0x416   : > { %v2936_v37 = vpop.permute.xlu1 %2935  ;;  %3173 = vrot.lane.b32.xlu0 %v11439_v47, %s9661_s21 }
 0x417   : > { %3030 = vst.msk [vmem:[#allocation4 + $0x8] sm:$0xff] %vm888_vm2, %v2936_v37  ;;  %v11683_v37 = vld [vmem:[#allocation3 + $0x2e6] sm:$0xff] }
 0x418   : > { %3179 = vrot.lane.b32.xlu1 %v11452_v6, %s9661_s21  ;;  %v2934_v40 = vpop.permute.xlu0 %2933 }
 0x419   : > { %3029 = vst.msk [vmem:[#allocation4] sm:$0xff] %vm888_vm2, %v2934_v40 }
 0x41a   : > { %v2940_v50 = vpop.permute.xlu1 %2939  ;;  %3177 = vrot.lane.b32.xlu0 %v11460_v7, %s9661_s21 }
 0x41b   : > { %3032 = vst.msk [vmem:[#allocation4 + $0x18] sm:$0xff] %vm888_vm2, %v2940_v50 }
 0x41c   : > { %3183 = vrot.lane.b32.xlu1 %v11665_v60, %s9661_s21  ;;  %v2938_v25 = vpop.permute.xlu0 %2937 }
 0x41d   : > { %3031 = vst.msk [vmem:[#allocation4 + $0x10] sm:$0xff] %vm888_vm2, %v2938_v25 }
 0x41e   : > { %v2944_v22 = vpop.permute.xlu1 %2943  ;;  %3181 = vrot.lane.b32.xlu0 %v11673_v28, %s9661_s21 }
 0x41f   : > { %3034 = vst.msk [vmem:[#allocation4 + $0x28] sm:$0xff] %vm888_vm2, %v2944_v22 }
 0x420   : > { %3187 = vrot.lane.b32.xlu1 %v11675_v17, %s9661_s21  ;;  %v2942_v32 = vpop.permute.xlu0 %2941 }
 0x421   : > { %3033 = vst.msk [vmem:[#allocation4 + $0x20] sm:$0xff] %vm888_vm2, %v2942_v32 }
 0x422   : > { %v2948_v40 = vpop.permute.xlu1 %2947  ;;  %3185 = vrot.lane.b32.xlu0 %v11683_v37, %s9661_s21 }
 0x423   : > { %3036 = vst.msk [vmem:[#allocation4 + $0x38] sm:$0xff] %vm888_vm2, %v2948_v40  ;;  %v14637_v40 = vld [vmem:[#allocation6_spill] sm:$0xff] }
 0x424   : > { %3319 = vrot.lane.b32.xlu1 %v11158_v53, %s9662_s22  ;;  %v2946_v50 = vpop.permute.xlu0 %2945 }
 0x425   : > { %3035 = vst.msk [vmem:[#allocation4 + $0x30] sm:$0xff] %vm888_vm2, %v2946_v50 }
 0x426   : > { %v2952_v25 = vpop.permute.xlu1 %2951  ;;  %3317 = vrot.lane.b32.xlu0 %v11165_v14, %s9662_s22 }
 0x427   : > { %3038 = vst.msk [vmem:[#allocation4 + $0x48] sm:$0xff] %vm888_vm2, %v2952_v25  ;;  %v11777_v25 = vld [vmem:[#allocation3 + $0x2c8] sm:$0xff] }
 0x428   : > { %3323 = vrot.lane.b32.xlu1 %v11178_v29, %s9662_s22  ;;  %v2950_v22 = vpop.permute.xlu0 %2949 }
 0x429   : > { %3037 = vst.msk [vmem:[#allocation4 + $0x40] sm:$0xff] %vm888_vm2, %v2950_v22  ;;  %v11782_v22 = vld [vmem:[#allocation3 + $0x2f0] sm:$0xff] }
 0x42a   : > { %v2956_v32 = vpop.permute.xlu1 %2955  ;;  %3321 = vrot.lane.b32.xlu0 %v11187_v31, %s9662_s22 }
 0x42b   : > { %3040 = vst.msk [vmem:[#allocation4 + $0x58] sm:$0xff] %vm888_vm2, %v2956_v32  ;;  %v11787_v32 = vld [vmem:[#allocation3 + $0x2e8] sm:$0xff] }
 0x42c   : > { %3327 = vrot.lane.b32.xlu1 %v11200_v54, %s9662_s22  ;;  %v2954_v53 = vpop.permute.xlu0 %2953 }
 0x42d   : > { %3039 = vst.msk [vmem:[#allocation4 + $0x50] sm:$0xff] %vm888_vm2, %v2954_v53 }
 0x42e   : > { %v2960_v14 = vpop.permute.xlu1 %2959  ;;  %3325 = vrot.lane.b32.xlu0 %v11209_v61, %s9662_s22 }
 0x42f   : > { %3042 = vst.msk [vmem:[#allocation4 + $0x68] sm:$0xff] %vm888_vm2, %v2960_v14 }
 0x430   : > { %3331 = vrot.lane.b32.xlu1 %v11222_v5, %s9662_s22  ;;  %v2958_v29 = vpop.permute.xlu0 %2957 }
 0x431   : > { %3041 = vst.msk [vmem:[#allocation4 + $0x60] sm:$0xff] %vm888_vm2, %v2958_v29 }
 0x432   : > { %v2964_v31 = vpop.permute.xlu1 %2963  ;;  %3329 = vrot.lane.b32.xlu0 %v11231_v12, %s9662_s22 }
 0x433   : > { %3044 = vst.msk [vmem:[#allocation4 + $0x78] sm:$0xff] %vm888_vm2, %v2964_v31  ;;  %v14638_v31 = vld [vmem:[#allocation7_spill] sm:$0xff] }
 0x434   : > { %3335 = vrot.lane.b32.xlu1 %v11244_v36, %s9662_s22  ;;  %v2962_v54 = vpop.permute.xlu0 %2961 }
 0x435   : > { %3043 = vst.msk [vmem:[#allocation4 + $0x70] sm:$0xff] %vm888_vm2, %v2962_v54 }
 0x436   : > { %v2968_v61 = vpop.permute.xlu1 %2967  ;;  %3333 = vrot.lane.b32.xlu0 %v11253_v33, %s9662_s22 }
 0x437   : > { %3046 = vst.msk [vmem:[#allocation4 + $0x88] sm:$0xff] %vm888_vm2, %v2968_v61 }
 0x438   : > { %3339 = vrot.lane.b32.xlu1 %v11266_v48, %s9662_s22  ;;  %v2966_v5 = vpop.permute.xlu0 %2965 }
 0x439   : > { %3045 = vst.msk [vmem:[#allocation4 + $0x80] sm:$0xff] %vm888_vm2, %v2966_v5  ;;  %v14639_v5 = vld [vmem:[#allocation8_spill] sm:$0xff] }
 0x43a   : > { %v2972_v12 = vpop.permute.xlu1 %2971  ;;  %3337 = vrot.lane.b32.xlu0 %v11275_v30, %s9662_s22 }
 0x43b   : > { %3048 = vst.msk [vmem:[#allocation4 + $0x98] sm:$0xff] %vm888_vm2, %v2972_v12 }
 0x43c   : > { %3343 = vrot.lane.b32.xlu1 %v11288_v57, %s9662_s22  ;;  %v2970_v36 = vpop.permute.xlu0 %2969 }
 0x43d   : > { %3047 = vst.msk [vmem:[#allocation4 + $0x90] sm:$0xff] %vm888_vm2, %v2970_v36  ;;  %v14641_v36 = vld [vmem:[#allocation10_spill] sm:$0xff] }
 0x43e   : > { %v2976_v33 = vpop.permute.xlu1 %2975  ;;  %3341 = vrot.lane.b32.xlu0 %v11297_v1, %s9662_s22 }
 0x43f   : > { %3050 = vst.msk [vmem:[#allocation4 + $0xa8] sm:$0xff] %vm888_vm2, %v2976_v33  ;;  %v14642_v33 = vld [vmem:[#allocation11_spill] sm:$0xff] }
 0x440   : > { %3347 = vrot.lane.b32.xlu1 %v11310_v16, %s9662_s22  ;;  %v2974_v48 = vpop.permute.xlu0 %2973 }
 0x441   : > { %3049 = vst.msk [vmem:[#allocation4 + $0xa0] sm:$0xff] %vm888_vm2, %v2974_v48 }
 0x442   : > { %v2980_v30 = vpop.permute.xlu1 %2979  ;;  %3345 = vrot.lane.b32.xlu0 %v11319_v24, %s9662_s22 }
 0x443   : > { %3052 = vst.msk [vmem:[#allocation4 + $0xb8] sm:$0xff] %vm888_vm2, %v2980_v30 }
 0x444   : > { %3351 = vrot.lane.b32.xlu1 %v11332_v21, %s9662_s22  ;;  %v2978_v57 = vpop.permute.xlu0 %2977 }
 0x445   : > { %3051 = vst.msk [vmem:[#allocation4 + $0xb0] sm:$0xff] %vm888_vm2, %v2978_v57  ;;  %v14643_v57 = vld [vmem:[#allocation12_spill] sm:$0xff] }
 0x446   : > { %v2984_v1 = vpop.permute.xlu1 %2983  ;;  %3349 = vrot.lane.b32.xlu0 %v11341_v34, %s9662_s22 }
 0x447   : > { %3054 = vst.msk [vmem:[#allocation4 + $0xc8] sm:$0xff] %vm888_vm2, %v2984_v1  ;;  %v14644_v1 = vld [vmem:[#allocation13_spill] sm:$0xff] }
 0x448   : > { %3355 = vrot.lane.b32.xlu1 %v11354_v62, %s9662_s22  ;;  %v2982_v16 = vpop.permute.xlu0 %2981 }
 0x449   : > { %3053 = vst.msk [vmem:[#allocation4 + $0xc0] sm:$0xff] %vm888_vm2, %v2982_v16 }
 0x44a   : > { %v2988_v24 = vpop.permute.xlu1 %2987  ;;  %3353 = vrot.lane.b32.xlu0 %v11363_v15, %s9662_s22 }
 0x44b   : > { %3056 = vst.msk [vmem:[#allocation4 + $0xd8] sm:$0xff] %vm888_vm2, %v2988_v24 }
 0x44c   : > { %3359 = vrot.lane.b32.xlu1 %v11376_v27, %s9662_s22  ;;  %v2986_v21 = vpop.permute.xlu0 %2985 }
 0x44d   : > { %3055 = vst.msk [vmem:[#allocation4 + $0xd0] sm:$0xff] %vm888_vm2, %v2986_v21  ;;  %v14645_v21 = vld [vmem:[#allocation14_spill] sm:$0xff] }
 0x44e   : > { %v2992_v34 = vpop.permute.xlu1 %2991  ;;  %3357 = vrot.lane.b32.xlu0 %v11385_v46, %s9662_s22 }
 0x44f   : > { %3058 = vst.msk [vmem:[#allocation4 + $0xe8] sm:$0xff] %vm888_vm2, %v2992_v34  ;;  %v14646_v34 = vld [vmem:[#allocation15_spill] sm:$0xff] }
 0x450   : > { %3363 = vrot.lane.b32.xlu1 %v11398_v2, %s9662_s22  ;;  %v2990_v62 = vpop.permute.xlu0 %2989 }
 0x451   : > { %3057 = vst.msk [vmem:[#allocation4 + $0xe0] sm:$0xff] %vm888_vm2, %v2990_v62 }
 0x452   : > { %v2996_v15 = vpop.permute.xlu1 %2995  ;;  %3361 = vrot.lane.b32.xlu0 %v11407_v23, %s9662_s22 }
 0x453   : > { %3060 = vst.msk [vmem:[#allocation4 + $0xf8] sm:$0xff] %vm888_vm2, %v2996_v15 }
 0x454   : > { %3367 = vrot.lane.b32.xlu1 %v11420_v45, %s9662_s22  ;;  %v2994_v27 = vpop.permute.xlu0 %2993  ;;  %v11772_v45 = vld [vmem:[#allocation3 + $0x2d0] sm:$0xff] }
 0x455   : > { %3059 = vst.msk [vmem:[#allocation4 + $0xf0] sm:$0xff] %vm888_vm2, %v2994_v27  ;;  %v14647_v27 = vld [vmem:[#allocation16_spill] sm:$0xff] }
 0x456   : > { %v3128_v46 = vpop.permute.xlu1 %3127  ;;  %3365 = vrot.lane.b32.xlu0 %v14637_v40, %s9662_s22 }
 0x457   : > { %3222 = vst.msk [vmem:[#allocation4 + $0x8] sm:$0xff] %vm1081_vm3, %v3128_v46  ;;  %v14648_v46 = vld [vmem:[#allocation17_spill] sm:$0xff] }
 0x458   : > { %3371 = vrot.lane.b32.xlu1 %v11442_v49, %s9662_s22  ;;  %v3126_v2 = vpop.permute.xlu0 %3125 }
 0x459   : > { %3221 = vst.msk [vmem:[#allocation4] sm:$0xff] %vm1081_vm3, %v3126_v2 }
 0x45a   : > { %v3132_v23 = vpop.permute.xlu1 %3131  ;;  %3369 = vrot.lane.b32.xlu0 %v11450_v52, %s9662_s22 }
 0x45b   : > { %3224 = vst.msk [vmem:[#allocation4 + $0x18] sm:$0xff] %vm1081_vm3, %v3132_v23  ;;  %v14649_v23 = vld [vmem:[#allocation18_spill] sm:$0xff] }
 0x45c   : > { %3375 = vrot.lane.b32.xlu1 %v11772_v45, %s9662_s22  ;;  %v3130_v50 = vpop.permute.xlu0 %3129 }
 0x45d   : > { %3223 = vst.msk [vmem:[#allocation4 + $0x10] sm:$0xff] %vm1081_vm3, %v3130_v50  ;;  %v14650_v50 = vld [vmem:[#allocation19_spill] sm:$0xff] }
 0x45e   : > { %v3136_v49 = vpop.permute.xlu1 %3135  ;;  %3373 = vrot.lane.b32.xlu0 %v11777_v25, %s9662_s22 }
 0x45f   : > { %3226 = vst.msk [vmem:[#allocation4 + $0x28] sm:$0xff] %vm1081_vm3, %v3136_v49 }
 0x460   : > { %3379 = vrot.lane.b32.xlu1 %v11782_v22, %s9662_s22  ;;  %v3134_v52 = vpop.permute.xlu0 %3133 }
 0x461   : > { %3225 = vst.msk [vmem:[#allocation4 + $0x20] sm:$0xff] %vm1081_vm3, %v3134_v52 }
 0x462   : > { %v3140_v53 = vpop.permute.xlu1 %3139  ;;  %3377 = vrot.lane.b32.xlu0 %v11787_v32, %s9662_s22 }
 0x463   : > { %3228 = vst.msk [vmem:[#allocation4 + $0x38] sm:$0xff] %vm1081_vm3, %v3140_v53  ;;  %v14651_v53 = vld [vmem:[#allocation20_spill] sm:$0xff] }
 0x464   : > { %3511 = vrot.lane.b32.xlu1 %v11469_v18, %s9663_s23  ;;  %v3138_v14 = vpop.permute.xlu0 %3137  ;;  %v14640_v18 = vld [vmem:[#allocation9_spill] sm:$0xff] }
 0x465   : > { %3227 = vst.msk [vmem:[#allocation4 + $0x30] sm:$0xff] %vm1081_vm3, %v3138_v14  ;;  %v14652_v14 = vld [vmem:[#allocation21_spill] sm:$0xff] }
 0x466   : > { %v3144_v29 = vpop.permute.xlu1 %3143  ;;  %3509 = vrot.lane.b32.xlu0 %v11473_v39, %s9663_s23 }
 0x467   : > { %3230 = vst.msk [vmem:[#allocation4 + $0x48] sm:$0xff] %vm1081_vm3, %v3144_v29 }
 0x468   : > { %3515 = vrot.lane.b32.xlu1 %v14638_v31, %s9663_s23  ;;  %v3142_v54 = vpop.permute.xlu0 %3141 }
 0x469   : > { %3229 = vst.msk [vmem:[#allocation4 + $0x40] sm:$0xff] %vm1081_vm3, %v3142_v54  ;;  %v14653_v54 = vld [vmem:[#allocation22_spill] sm:$0xff] }
 0x46a   : > { %v3148_v61 = vpop.permute.xlu1 %3147  ;;  %3513 = vrot.lane.b32.xlu0 %v14639_v5, %s9663_s23 }
 0x46b   : > { %3232 = vst.msk [vmem:[#allocation4 + $0x58] sm:$0xff] %vm1081_vm3, %v3148_v61  ;;  %v14654_v61 = vld [vmem:[#allocation23_spill] sm:$0xff] }
 0x46c   : > { %3519 = vrot.lane.b32.xlu1 %v14640_v18, %s9663_s23  ;;  %v3146_v12 = vpop.permute.xlu0 %3145 }
 0x46d   : > { %3231 = vst.msk [vmem:[#allocation4 + $0x50] sm:$0xff] %vm1081_vm3, %v3146_v12  ;;  %v14655_v12 = vld [vmem:[#allocation24_spill] sm:$0xff] }
 0x46e   : > { %v3152_v39 = vpop.permute.xlu1 %3151  ;;  %3517 = vrot.lane.b32.xlu0 %v14641_v36, %s9663_s23 }
 0x46f   : > { %3234 = vst.msk [vmem:[#allocation4 + $0x68] sm:$0xff] %vm1081_vm3, %v3152_v39  ;;  %v14656_v39 = vld [vmem:[#allocation25_spill] sm:$0xff] }
 0x470   : > { %3523 = vrot.lane.b32.xlu1 %v14642_v33, %s9663_s23  ;;  %v3150_v48 = vpop.permute.xlu0 %3149 }
 0x471   : > { %3233 = vst.msk [vmem:[#allocation4 + $0x60] sm:$0xff] %vm1081_vm3, %v3150_v48  ;;  %v14657_v48 = vld [vmem:[#allocation26_spill] sm:$0xff] }
 0x472   : > { %v3156_v30 = vpop.permute.xlu1 %3155  ;;  %3521 = vrot.lane.b32.xlu0 %v14643_v57, %s9663_s23 }
 0x473   : > { %3236 = vst.msk [vmem:[#allocation4 + $0x78] sm:$0xff] %vm1081_vm3, %v3156_v30  ;;  %v14658_v30 = vld [vmem:[#allocation27_spill] sm:$0xff] }
 0x474   : > { %3527 = vrot.lane.b32.xlu1 %v14644_v1, %s9663_s23  ;;  %v3154_v16 = vpop.permute.xlu0 %3153 }
 0x475   : > { %3235 = vst.msk [vmem:[#allocation4 + $0x70] sm:$0xff] %vm1081_vm3, %v3154_v16  ;;  %v14659_v16 = vld [vmem:[#allocation28_spill] sm:$0xff] }
 0x476   : > { %v3160_v24 = vpop.permute.xlu1 %3159  ;;  %3525 = vrot.lane.b32.xlu0 %v14645_v21, %s9663_s23 }
 0x477   : > { %3238 = vst.msk [vmem:[#allocation4 + $0x88] sm:$0xff] %vm1081_vm3, %v3160_v24 }
 0x478   : > { %3531 = vrot.lane.b32.xlu1 %v14646_v34, %s9663_s23  ;;  %v3158_v62 = vpop.permute.xlu0 %3157  ;;  %v14660_v34 = vld [vmem:[#allocation29_spill] sm:$0xff] }
 0x479   : > { %3237 = vst.msk [vmem:[#allocation4 + $0x80] sm:$0xff] %vm1081_vm3, %v3158_v62 }
 0x47a   : > { %v3164_v15 = vpop.permute.xlu1 %3163  ;;  %3529 = vrot.lane.b32.xlu0 %v14647_v27, %s9663_s23  ;;  %v14661_v27 = vld [vmem:[#allocation30_spill] sm:$0xff] }
 0x47b   : > { %3240 = vst.msk [vmem:[#allocation4 + $0x98] sm:$0xff] %vm1081_vm3, %v3164_v15 }
 0x47c   : > { %3535 = vrot.lane.b32.xlu1 %v14648_v46, %s9663_s23  ;;  %v3162_v40 = vpop.permute.xlu0 %3161 }
 0x47d   : > { %3239 = vst.msk [vmem:[#allocation4 + $0x90] sm:$0xff] %vm1081_vm3, %v3162_v40  ;;  %v11881_v40 = vld [vmem:[#allocation3 + $0x2ca] sm:$0xff] }
 0x47e   : > { %v3168_v2 = vpop.permute.xlu1 %3167  ;;  %3533 = vrot.lane.b32.xlu0 %v14649_v23, %s9663_s23 }
 0x47f   : > { %3242 = vst.msk [vmem:[#allocation4 + $0xa8] sm:$0xff] %vm1081_vm3, %v3168_v2  ;;  %v11886_v2 = vld [vmem:[#allocation3 + $0x2f2] sm:$0xff] }
 0x480   : > { %3539 = vrot.lane.b32.xlu1 %v14650_v50, %s9663_s23  ;;  %v3166_v49 = vpop.permute.xlu0 %3165  ;;  %v11891_v50 = vld [vmem:[#allocation3 + $0x2ea] sm:$0xff] }
 0x481   : > { %3241 = vst.msk [vmem:[#allocation4 + $0xa0] sm:$0xff] %vm1081_vm3, %v3166_v49 }
 0x482   : > { %v3172_v52 = vpop.permute.xlu1 %3171  ;;  %3537 = vrot.lane.b32.xlu0 %v14651_v53, %s9663_s23 }
 0x483   : > { %3244 = vst.msk [vmem:[#allocation4 + $0xb8] sm:$0xff] %vm1081_vm3, %v3172_v52 }
 0x484   : > { %3543 = vrot.lane.b32.xlu1 %v14652_v14, %s9663_s23  ;;  %v3170_v29 = vpop.permute.xlu0 %3169 }
 0x485   : > { %3243 = vst.msk [vmem:[#allocation4 + $0xb0] sm:$0xff] %vm1081_vm3, %v3170_v29 }
 0x486   : > { %v3176_v31 = vpop.permute.xlu1 %3175  ;;  %3541 = vrot.lane.b32.xlu0 %v14653_v54, %s9663_s23 }
 0x487   : > { %3246 = vst.msk [vmem:[#allocation4 + $0xc8] sm:$0xff] %vm1081_vm3, %v3176_v31 }
 0x488   : > { %3547 = vrot.lane.b32.xlu1 %v14654_v61, %s9663_s23  ;;  %v3174_v5 = vpop.permute.xlu0 %3173 }
 0x489   : > { %3245 = vst.msk [vmem:[#allocation4 + $0xc0] sm:$0xff] %vm1081_vm3, %v3174_v5 }
 0x48a   : > { %v3180_v18 = vpop.permute.xlu1 %3179  ;;  %3545 = vrot.lane.b32.xlu0 %v14655_v12, %s9663_s23 }
 0x48b   : > { %3248 = vst.msk [vmem:[#allocation4 + $0xd8] sm:$0xff] %vm1081_vm3, %v3180_v18  ;;  %v3831_v18 = vld [vmem:[#allocation3 + $0x150] sm:$0xff] }
 0x48c   : > { %3551 = vrot.lane.b32.xlu1 %v14656_v39, %s9663_s23  ;;  %v3178_v36 = vpop.permute.xlu0 %3177  ;;  %v3830_v39 = vld [vmem:[#allocation3 + $0x148] sm:$0xff] }
 0x48d   : > { %3247 = vst.msk [vmem:[#allocation4 + $0xd0] sm:$0xff] %vm1081_vm3, %v3178_v36 }
 0x48e   : > { %v3184_v33 = vpop.permute.xlu1 %3183  ;;  %3549 = vrot.lane.b32.xlu0 %v14657_v48, %s9663_s23 }
 0x48f   : > { %3250 = vst.msk [vmem:[#allocation4 + $0xe8] sm:$0xff] %vm1081_vm3, %v3184_v33  ;;  %v3833_v33 = vld [vmem:[#allocation3 + $0x170] sm:$0xff] }
 0x490   : > { %3555 = vrot.lane.b32.xlu1 %v14658_v30, %s9663_s23  ;;  %v3182_v57 = vpop.permute.xlu0 %3181  ;;  %v3832_v30 = vld [vmem:[#allocation3 + $0x168] sm:$0xff] }
 0x491   : > { %3249 = vst.msk [vmem:[#allocation4 + $0xe0] sm:$0xff] %vm1081_vm3, %v3182_v57 }
 0x492   : > { %v3188_v1 = vpop.permute.xlu1 %3187  ;;  %3553 = vrot.lane.b32.xlu0 %v14659_v16, %s9663_s23 }
 0x493   : > { %3252 = vst.msk [vmem:[#allocation4 + $0xf8] sm:$0xff] %vm1081_vm3, %v3188_v1  ;;  %v3835_v1 = vld [vmem:[#allocation3 + $0x190] sm:$0xff] }
 0x494   : > { %3559 = vrot.lane.b32.xlu1 %v11565_v58, %s9663_s23  ;;  %v3186_v24 = vpop.permute.xlu0 %3185  ;;  %v11876_v58 = vld [vmem:[#allocation3 + $0x2d2] sm:$0xff] }
 0x495   : > { %3251 = vst.msk [vmem:[#allocation4 + $0xf0] sm:$0xff] %vm1081_vm3, %v3186_v24  ;;  %v3834_v24 = vld [vmem:[#allocation3 + $0x188] sm:$0xff] }
 0x496   : > { %v3320_v21 = vpop.permute.xlu1 %3319  ;;  %3557 = vrot.lane.b32.xlu0 %v14660_v34, %s9663_s23  ;;  %v3837_v34 = vld [vmem:[#allocation3 + $0x1b0] sm:$0xff] }
 0x497   : > { %3414 = vst.msk [vmem:[#allocation4 + $0x8] sm:$0xff] %vm1274_vm4, %v3320_v21 }
 0x498   : > { %3563 = vrot.lane.b32.xlu1 %v11574_v9, %s9663_s23  ;;  %v3318_v62 = vpop.permute.xlu0 %3317 }
 0x499   : > { %3413 = vst.msk [vmem:[#allocation4] sm:$0xff] %vm1274_vm4, %v3318_v62 }
 0x49a   : > { %v3324_v15 = vpop.permute.xlu1 %3323  ;;  %3561 = vrot.lane.b32.xlu0 %v14661_v27, %s9663_s23 }
 0x49b   : > { %3416 = vst.msk [vmem:[#allocation4 + $0x18] sm:$0xff] %vm1274_vm4, %v3324_v15  ;;  %v3836_v15 = vld [vmem:[#allocation3 + $0x1a8] sm:$0xff] }
 0x49c   : > { %3567 = vrot.lane.b32.xlu1 %v11876_v58, %s9663_s23  ;;  %v3322_v46 = vpop.permute.xlu0 %3321 }
 0x49d   : > { %3415 = vst.msk [vmem:[#allocation4 + $0x10] sm:$0xff] %vm1274_vm4, %v3322_v46  ;;  %v3839_v46 = vld [vmem:[#allocation3 + $0x1d0] sm:$0xff] }
 0x49e   : > { %v3328_v9 = vpop.permute.xlu1 %3327  ;;  %3565 = vrot.lane.b32.xlu0 %v11881_v40, %s9663_s23 }
 0x49f   : > { %3418 = vst.msk [vmem:[#allocation4 + $0x28] sm:$0xff] %vm1274_vm4, %v3328_v9 }
 0x4a0   : > { %3571 = vrot.lane.b32.xlu1 %v11886_v2, %s9663_s23  ;;  %v3326_v23 = vpop.permute.xlu0 %3325 }
 0x4a1   : > { %3417 = vst.msk [vmem:[#allocation4 + $0x20] sm:$0xff] %vm1274_vm4, %v3326_v23  ;;  %v3838_v23 = vld [vmem:[#allocation3 + $0x1c8] sm:$0xff] }
 0x4a2   : > { %v3332_v49 = vpop.permute.xlu1 %3331  ;;  %3569 = vrot.lane.b32.xlu0 %v11891_v50, %s9663_s23 }
 0x4a3   : > { %3420 = vst.msk [vmem:[#allocation4 + $0x38] sm:$0xff] %vm1274_vm4, %v3332_v49 }
 0x4a4   : > { %3704 = vrot.lane.b32.xlu1 %v11211_v0, %s9664_s24  ;;  %v3330_v52 = vpop.permute.xlu0 %3329 }
 0x4a5   : > { %3419 = vst.msk [vmem:[#allocation4 + $0x30] sm:$0xff] %vm1274_vm4, %v3330_v52  ;;  %v3841_v52 = vld [vmem:[#allocation3 + $0x1f0] sm:$0xff] }
 0x4a6   : > { %v3336_v53 = vpop.permute.xlu1 %3335  ;;  %3702 = vrot.lane.b32.xlu0 %v11220_v4, %s9664_s24 }
 0x4a7   : > { %3422 = vst.msk [vmem:[#allocation4 + $0x48] sm:$0xff] %vm1274_vm4, %v3336_v53 }
 0x4a8   : > { %3708 = vrot.lane.b32.xlu1 %v11233_v19, %s9664_s24  ;;  %v3334_v14 = vpop.permute.xlu0 %3333 }
 0x4a9   : > { %3421 = vst.msk [vmem:[#allocation4 + $0x40] sm:$0xff] %vm1274_vm4, %v3334_v14  ;;  %v3840_v14 = vld [vmem:[#allocation3 + $0x1e8] sm:$0xff] }
 0x4aa   : > { %v3340_v29 = vpop.permute.xlu1 %3339  ;;  %3706 = vrot.lane.b32.xlu0 %v11242_v20, %s9664_s24 }
 0x4ab   : > { %3424 = vst.msk [vmem:[#allocation4 + $0x58] sm:$0xff] %vm1274_vm4, %v3340_v29 }
 0x4ac   : > { %3712 = vrot.lane.b32.xlu1 %v11255_v56, %s9664_s24  ;;  %v3338_v0 = vpop.permute.xlu0 %3337 }
 0x4ad   : > { %3423 = vst.msk [vmem:[#allocation4 + $0x50] sm:$0xff] %vm1274_vm4, %v3338_v0  ;;  %v3843_v0 = vld [vmem:[#allocation3 + $0x210] sm:$0xff] }
 0x4ae   : > { %v3344_v4 = vpop.permute.xlu1 %3343  ;;  %3710 = vrot.lane.b32.xlu0 %v11264_v13, %s9664_s24 }
 0x4af   : > { %3426 = vst.msk [vmem:[#allocation4 + $0x68] sm:$0xff] %vm1274_vm4, %v3344_v4 }
 0x4b0   : > { %3716 = vrot.lane.b32.xlu1 %v11277_v35, %s9664_s24  ;;  %v3342_v19 = vpop.permute.xlu0 %3341 }
 0x4b1   : > { %3425 = vst.msk [vmem:[#allocation4 + $0x60] sm:$0xff] %vm1274_vm4, %v3342_v19  ;;  %v3842_v19 = vld [vmem:[#allocation3 + $0x208] sm:$0xff] }
 0x4b2   : > { %v3348_v20 = vpop.permute.xlu1 %3347  ;;  %3714 = vrot.lane.b32.xlu0 %v11286_v51, %s9664_s24 }
 0x4b3   : > { %3428 = vst.msk [vmem:[#allocation4 + $0x78] sm:$0xff] %vm1274_vm4, %v3348_v20 }
 0x4b4   : > { %3720 = vrot.lane.b32.xlu1 %v11299_v3, %s9664_s24  ;;  %v3346_v56 = vpop.permute.xlu0 %3345 }
 0x4b5   : > { %3427 = vst.msk [vmem:[#allocation4 + $0x70] sm:$0xff] %vm1274_vm4, %v3346_v56  ;;  %v3845_v56 = vld [vmem:[#allocation3 + $0x230] sm:$0xff] }
 0x4b6   : > { %v3352_v13 = vpop.permute.xlu1 %3351  ;;  %3718 = vrot.lane.b32.xlu0 %v11308_v11, %s9664_s24 }
 0x4b7   : > { %3430 = vst.msk [vmem:[#allocation4 + $0x88] sm:$0xff] %vm1274_vm4, %v3352_v13 }
 0x4b8   : > { %3724 = vrot.lane.b32.xlu1 %v11321_v44, %s9664_s24  ;;  %v3350_v35 = vpop.permute.xlu0 %3349 }
 0x4b9   : > { %3429 = vst.msk [vmem:[#allocation4 + $0x80] sm:$0xff] %vm1274_vm4, %v3350_v35  ;;  %v3844_v35 = vld [vmem:[#allocation3 + $0x228] sm:$0xff] }
 0x4ba   : > { %v3356_v51 = vpop.permute.xlu1 %3355  ;;  %3722 = vrot.lane.b32.xlu0 %v11330_v63, %s9664_s24 }
 0x4bb   : > { %3432 = vst.msk [vmem:[#allocation4 + $0x98] sm:$0xff] %vm1274_vm4, %v3356_v51 }
 0x4bc   : > { %3728 = vrot.lane.b32.xlu1 %v11343_v38, %s9664_s24  ;;  %v3354_v3 = vpop.permute.xlu0 %3353 }
 0x4bd   : > { %3431 = vst.msk [vmem:[#allocation4 + $0x90] sm:$0xff] %vm1274_vm4, %v3354_v3  ;;  %v3847_v3 = vld [vmem:[#allocation3 + $0x250] sm:$0xff] }
 0x4be   : > { %v3360_v11 = vpop.permute.xlu1 %3359  ;;  %3726 = vrot.lane.b32.xlu0 %v11352_v55, %s9664_s24 }
 0x4bf   : > { %3434 = vst.msk [vmem:[#allocation4 + $0xa8] sm:$0xff] %vm1274_vm4, %v3360_v11 }
 0x4c0   : > { %3732 = vrot.lane.b32.xlu1 %v11365_v41, %s9664_s24  ;;  %v3358_v44 = vpop.permute.xlu0 %3357 }
 0x4c1   : > { %3433 = vst.msk [vmem:[#allocation4 + $0xa0] sm:$0xff] %vm1274_vm4, %v3358_v44  ;;  %v3846_v44 = vld [vmem:[#allocation3 + $0x248] sm:$0xff] }
 0x4c2   : > { %v3364_v63 = vpop.permute.xlu1 %3363  ;;  %3730 = vrot.lane.b32.xlu0 %v11374_v43, %s9664_s24 }
 0x4c3   : > { %3436 = vst.msk [vmem:[#allocation4 + $0xb8] sm:$0xff] %vm1274_vm4, %v3364_v63 }
 0x4c4   : > { %3736 = vrot.lane.b32.xlu1 %v11387_v26, %s9664_s24  ;;  %v3362_v38 = vpop.permute.xlu0 %3361 }
 0x4c5   : > { %3435 = vst.msk [vmem:[#allocation4 + $0xb0] sm:$0xff] %vm1274_vm4, %v3362_v38  ;;  %v3849_v38 = vld [vmem:[#allocation3 + $0x270] sm:$0xff] }
 0x4c6   : > { %v3368_v55 = vpop.permute.xlu1 %3367  ;;  %3734 = vrot.lane.b32.xlu0 %v11396_v59, %s9664_s24 }
 0x4c7   : > { %3438 = vst.msk [vmem:[#allocation4 + $0xc8] sm:$0xff] %vm1274_vm4, %v3368_v55 }
 0x4c8   : > { %3740 = vrot.lane.b32.xlu1 %v11409_v42, %s9664_s24  ;;  %v3366_v41 = vpop.permute.xlu0 %3365 }
 0x4c9   : > { %3437 = vst.msk [vmem:[#allocation4 + $0xc0] sm:$0xff] %vm1274_vm4, %v3366_v41  ;;  %v3848_v41 = vld [vmem:[#allocation3 + $0x268] sm:$0xff] }
 0x4ca   : > { %v3372_v43 = vpop.permute.xlu1 %3371  ;;  %3738 = vrot.lane.b32.xlu0 %v11417_v10, %s9664_s24 }
 0x4cb   : > { %3440 = vst.msk [vmem:[#allocation4 + $0xd8] sm:$0xff] %vm1274_vm4, %v3372_v43 }
 0x4cc   : > { %3744 = vrot.lane.b32.xlu1 %v11431_v8, %s9664_s24  ;;  %v3370_v26 = vpop.permute.xlu0 %3369 }
 0x4cd   : > { %3439 = vst.msk [vmem:[#allocation4 + $0xd0] sm:$0xff] %vm1274_vm4, %v3370_v26  ;;  %v3851_v26 = vld [vmem:[#allocation3 + $0x290] sm:$0xff] }
 0x4ce   : > { %v3376_v59 = vpop.permute.xlu1 %3375  ;;  %3742 = vrot.lane.b32.xlu0 %v11439_v47, %s9664_s24 }
 0x4cf   : > { %3442 = vst.msk [vmem:[#allocation4 + $0xe8] sm:$0xff] %vm1274_vm4, %v3376_v59 }
 0x4d0   : > { %3748 = vrot.lane.b32.xlu1 %v11452_v6, %s9664_s24  ;;  %v3374_v42 = vpop.permute.xlu0 %3373 }
 0x4d1   : > { %3441 = vst.msk [vmem:[#allocation4 + $0xe0] sm:$0xff] %vm1274_vm4, %v3374_v42  ;;  %v3850_v42 = vld [vmem:[#allocation3 + $0x288] sm:$0xff] }
 0x4d2   : > { %v3380_v10 = vpop.permute.xlu1 %3379  ;;  %3746 = vrot.lane.b32.xlu0 %v11460_v7, %s9664_s24  ;;  %v3667_v7 = vld [vmem:[#allocation3 + $0x30e] sm:$0xff] }
 0x4d3   : > { %3444 = vst.msk [vmem:[#allocation4 + $0xf8] sm:$0xff] %vm1274_vm4, %v3380_v10 }
 0x4d4   : > { %3752 = vrot.lane.b32.xlu1 %v11665_v60, %s9664_s24  ;;  %v3378_v8 = vpop.permute.xlu0 %3377  ;;  %v3666_v60 = vld [vmem:[#allocation3 + $0x306] sm:$0xff] }
 0x4d5   : > { %3443 = vst.msk [vmem:[#allocation4 + $0xf0] sm:$0xff] %vm1274_vm4, %v3378_v8  ;;  %v3853_v8 = vld [vmem:[#allocation3 + $0x2b0] sm:$0xff] }
 0x4d6   : > { %v3512_v47 = vpop.permute.xlu1 %3511  ;;  %3750 = vrot.lane.b32.xlu0 %v11673_v28, %s9664_s24  ;;  %v3669_v28 = vld [vmem:[#allocation3 + $0x32e] sm:$0xff] }
 0x4d7   : > { %3606 = vst.msk [vmem:[#allocation4 + $0x8] sm:$0xff] %vm1467_vm5, %v3512_v47 }
 0x4d8   : > { %3756 = vrot.lane.b32.xlu1 %v11675_v17, %s9664_s24  ;;  %v3510_v6 = vpop.permute.xlu0 %3509  ;;  %v3668_v17 = vld [vmem:[#allocation3 + $0x326] sm:$0xff] }
 0x4d9   : > { %3605 = vst.msk [vmem:[#allocation4] sm:$0xff] %vm1467_vm5, %v3510_v6  ;;  %v3852_v6 = vld [vmem:[#allocation3 + $0x2a8] sm:$0xff] }
 0x4da   : > { %v3516_v31 = vpop.permute.xlu1 %3515  ;;  %3754 = vrot.lane.b32.xlu0 %v11683_v37, %s9664_s24 }
 0x4db   : > { %3608 = vst.msk [vmem:[#allocation4 + $0x18] sm:$0xff] %vm1467_vm5, %v3516_v31 }
 0x4dc   : > { %3760 = vrot.lane.b32.xlu1 %v3667_v7, %s9664_s24  ;;  %v3514_v54 = vpop.permute.xlu0 %3513 }
 0x4dd   : > { %3607 = vst.msk [vmem:[#allocation4 + $0x10] sm:$0xff] %vm1467_vm5, %v3514_v54  ;;  %v9133_v54 = vld [vmem:[%s14488_s1 + $0x48] sm:$0xf] }
 0x4de   : > { %v3520_v61 = vpop.permute.xlu1 %3519  ;;  %3758 = vrot.lane.b32.xlu0 %v3666_v60, %s9664_s24  ;;  %9459 = vmatprep.subr.msk.mxu1 %vm2215_vm7, %v9133_v54 }
 0x4df   : > { %3610 = vst.msk [vmem:[#allocation4 + $0x28] sm:$0xff] %vm1467_vm5, %v3520_v61  ;;  %9460 = vmatpush3.msk.msra.mxu1 %vm2215_vm7, %v9133_v54 }
 0x4e0   : > { %3764 = vrot.lane.b32.xlu1 %v3669_v28, %s9664_s24  ;;  %v3518_v5 = vpop.permute.xlu0 %3517 }
 0x4e1   : > { %3609 = vst.msk [vmem:[#allocation4 + $0x20] sm:$0xff] %vm1467_vm5, %v3518_v5 }
 0x4e2   : > { %v3524_v37 = vpop.permute.xlu1 %3523  ;;  %3762 = vrot.lane.b32.xlu0 %v3668_v17, %s9664_s24  ;;  %v9131_v17 = vld [vmem:[%s14488_s1 + $0x38] sm:$0xff] }
 0x4e3   : > { %3612 = vst.msk [vmem:[#allocation4 + $0x38] sm:$0xff] %vm1467_vm5, %v3524_v37  ;;  %v3861_v37 = vld [vmem:[#allocation3 + $0x330] sm:$0xff] }
 0x4e4   : > { %3896 = vrot.lane.b32.xlu1 %v3831_v18, %s9665_s25  ;;  %v3522_v12 = vpop.permute.xlu0 %3521 }
 0x4e5   : > { %3611 = vst.msk [vmem:[#allocation4 + $0x30] sm:$0xff] %vm1467_vm5, %v3522_v12  ;;  %v3860_v12 = vld [vmem:[#allocation3 + $0x328] sm:$0xff] }
 0x4e6   : > { %v3528_v36 = vpop.permute.xlu1 %3527  ;;  %3894 = vrot.lane.b32.xlu0 %v3830_v39, %s9665_s25  ;;  %v9129_v39 = vld [vmem:[%s14488_s1 + $0x28] sm:$0xff] }
 0x4e7   : > { %3614 = vst.msk [vmem:[#allocation4 + $0x48] sm:$0xff] %vm1467_vm5, %v3528_v36 }
 0x4e8   : > { %3900 = vrot.lane.b32.xlu1 %v3833_v33, %s9665_s25  ;;  %v3526_v48 = vpop.permute.xlu0 %3525 }
 0x4e9   : > { %3613 = vst.msk [vmem:[#allocation4 + $0x40] sm:$0xff] %vm1467_vm5, %v3526_v48  ;;  %v4023_v48 = vld [vmem:[#allocation3 + $0x152] sm:$0xff] }
 0x4ea   : > { %v3532_v57 = vpop.permute.xlu1 %3531  ;;  %3898 = vrot.lane.b32.xlu0 %v3832_v30, %s9665_s25 }
 0x4eb   : > { %3616 = vst.msk [vmem:[#allocation4 + $0x58] sm:$0xff] %vm1467_vm5, %v3532_v57  ;;  %v4022_v57 = vld [vmem:[#allocation3 + $0x14a] sm:$0xff] }
 0x4ec   : > { %3904 = vrot.lane.b32.xlu1 %v3835_v1, %s9665_s25  ;;  %v3530_v16 = vpop.permute.xlu0 %3529 }
 0x4ed   : > { %3615 = vst.msk [vmem:[#allocation4 + $0x50] sm:$0xff] %vm1467_vm5, %v3530_v16  ;;  %v4025_v16 = vld [vmem:[#allocation3 + $0x172] sm:$0xff] }
 0x4ee   : > { %v3536_v21 = vpop.permute.xlu1 %3535  ;;  %3902 = vrot.lane.b32.xlu0 %v3834_v24, %s9665_s25 }
 0x4ef   : > { %3618 = vst.msk [vmem:[#allocation4 + $0x68] sm:$0xff] %vm1467_vm5, %v3536_v21  ;;  %v4024_v21 = vld [vmem:[#allocation3 + $0x16a] sm:$0xff] }
 0x4f0   : > { %3908 = vrot.lane.b32.xlu1 %v3837_v34, %s9665_s25  ;;  %v3534_v62 = vpop.permute.xlu0 %3533 }
 0x4f1   : > { %3617 = vst.msk [vmem:[#allocation4 + $0x60] sm:$0xff] %vm1467_vm5, %v3534_v62  ;;  %v4027_v62 = vld [vmem:[#allocation3 + $0x192] sm:$0xff] }
 0x4f2   : > { %v3540_v27 = vpop.permute.xlu1 %3539  ;;  %3906 = vrot.lane.b32.xlu0 %v3836_v15, %s9665_s25 }
 0x4f3   : > { %3620 = vst.msk [vmem:[#allocation4 + $0x78] sm:$0xff] %vm1467_vm5, %v3540_v27  ;;  %v4026_v27 = vld [vmem:[#allocation3 + $0x18a] sm:$0xff] }
 0x4f4   : > { %3912 = vrot.lane.b32.xlu1 %v3839_v46, %s9665_s25  ;;  %v3538_v9 = vpop.permute.xlu0 %3537 }
 0x4f5   : > { %3619 = vst.msk [vmem:[#allocation4 + $0x70] sm:$0xff] %vm1467_vm5, %v3538_v9  ;;  %v4029_v9 = vld [vmem:[#allocation3 + $0x1b2] sm:$0xff] }
 0x4f6   : > { %v3544_v49 = vpop.permute.xlu1 %3543  ;;  %3910 = vrot.lane.b32.xlu0 %v3838_v23, %s9665_s25 }
 0x4f7   : > { %3622 = vst.msk [vmem:[#allocation4 + $0x88] sm:$0xff] %vm1467_vm5, %v3544_v49  ;;  %v4028_v49 = vld [vmem:[#allocation3 + $0x1aa] sm:$0xff] }
 0x4f8   : > { %3916 = vrot.lane.b32.xlu1 %v3841_v52, %s9665_s25  ;;  %v3542_v53 = vpop.permute.xlu0 %3541 }
 0x4f9   : > { %3621 = vst.msk [vmem:[#allocation4 + $0x80] sm:$0xff] %vm1467_vm5, %v3542_v53  ;;  %v4031_v53 = vld [vmem:[#allocation3 + $0x1d2] sm:$0xff] }
 0x4fa   : > { %v3548_v29 = vpop.permute.xlu1 %3547  ;;  %3914 = vrot.lane.b32.xlu0 %v3840_v14, %s9665_s25 }
 0x4fb   : > { %3624 = vst.msk [vmem:[#allocation4 + $0x98] sm:$0xff] %vm1467_vm5, %v3548_v29  ;;  %v4030_v29 = vld [vmem:[#allocation3 + $0x1ca] sm:$0xff] }
 0x4fc   : > { %3920 = vrot.lane.b32.xlu1 %v3843_v0, %s9665_s25  ;;  %v3546_v4 = vpop.permute.xlu0 %3545 }
 0x4fd   : > { %3623 = vst.msk [vmem:[#allocation4 + $0x90] sm:$0xff] %vm1467_vm5, %v3546_v4  ;;  %v4033_v4 = vld [vmem:[#allocation3 + $0x1f2] sm:$0xff] }
 0x4fe   : > { %v3552_v20 = vpop.permute.xlu1 %3551  ;;  %3918 = vrot.lane.b32.xlu0 %v3842_v19, %s9665_s25 }
 0x4ff   : > { %3626 = vst.msk [vmem:[#allocation4 + $0xa8] sm:$0xff] %vm1467_vm5, %v3552_v20  ;;  %v4032_v20 = vld [vmem:[#allocation3 + $0x1ea] sm:$0xff] }
 0x500   : > { %3924 = vrot.lane.b32.xlu1 %v3845_v56, %s9665_s25  ;;  %v3550_v13 = vpop.permute.xlu0 %3549 }
 0x501   : > { %3625 = vst.msk [vmem:[#allocation4 + $0xa0] sm:$0xff] %vm1467_vm5, %v3550_v13  ;;  %v4035_v13 = vld [vmem:[#allocation3 + $0x212] sm:$0xff] }
 0x502   : > { %v3556_v51 = vpop.permute.xlu1 %3555  ;;  %3922 = vrot.lane.b32.xlu0 %v3844_v35, %s9665_s25 }
 0x503   : > { %3628 = vst.msk [vmem:[#allocation4 + $0xb8] sm:$0xff] %vm1467_vm5, %v3556_v51  ;;  %v4034_v51 = vld [vmem:[#allocation3 + $0x20a] sm:$0xff] }
 0x504   : > { %3928 = vrot.lane.b32.xlu1 %v3847_v3, %s9665_s25  ;;  %v3554_v11 = vpop.permute.xlu0 %3553 }
 0x505   : > { %3627 = vst.msk [vmem:[#allocation4 + $0xb0] sm:$0xff] %vm1467_vm5, %v3554_v11  ;;  %v4037_v11 = vld [vmem:[#allocation3 + $0x232] sm:$0xff] }
 0x506   : > { %v3560_v63 = vpop.permute.xlu1 %3559  ;;  %3926 = vrot.lane.b32.xlu0 %v3846_v44, %s9665_s25 }
 0x507   : > { %3630 = vst.msk [vmem:[#allocation4 + $0xc8] sm:$0xff] %vm1467_vm5, %v3560_v63  ;;  %v4036_v63 = vld [vmem:[#allocation3 + $0x22a] sm:$0xff] }
 0x508   : > { %3932 = vrot.lane.b32.xlu1 %v3849_v38, %s9665_s25  ;;  %v3558_v55 = vpop.permute.xlu0 %3557 }
 0x509   : > { %3629 = vst.msk [vmem:[#allocation4 + $0xc0] sm:$0xff] %vm1467_vm5, %v3558_v55  ;;  %v4039_v55 = vld [vmem:[#allocation3 + $0x252] sm:$0xff] }
 0x50a   : > { %v3564_v43 = vpop.permute.xlu1 %3563  ;;  %3930 = vrot.lane.b32.xlu0 %v3848_v41, %s9665_s25 }
 0x50b   : > { %3632 = vst.msk [vmem:[#allocation4 + $0xd8] sm:$0xff] %vm1467_vm5, %v3564_v43  ;;  %v4038_v43 = vld [vmem:[#allocation3 + $0x24a] sm:$0xff] }
 0x50c   : > { %3936 = vrot.lane.b32.xlu1 %v3851_v26, %s9665_s25  ;;  %v3562_v59 = vpop.permute.xlu0 %3561 }
 0x50d   : > { %3631 = vst.msk [vmem:[#allocation4 + $0xd0] sm:$0xff] %vm1467_vm5, %v3562_v59  ;;  %v4041_v59 = vld [vmem:[#allocation3 + $0x272] sm:$0xff] }
 0x50e   : > { %v3568_v10 = vpop.permute.xlu1 %3567  ;;  %3934 = vrot.lane.b32.xlu0 %v3850_v42, %s9665_s25 }
 0x50f   : > { %3634 = vst.msk [vmem:[#allocation4 + $0xe8] sm:$0xff] %vm1467_vm5, %v3568_v10  ;;  %v4040_v10 = vld [vmem:[#allocation3 + $0x26a] sm:$0xff] }
 0x510   : > { %3940 = vrot.lane.b32.xlu1 %v3853_v8, %s9665_s25  ;;  %v3566_v47 = vpop.permute.xlu0 %3565 }
 0x511   : > { %3633 = vst.msk [vmem:[#allocation4 + $0xe0] sm:$0xff] %vm1467_vm5, %v3566_v47  ;;  %v4043_v47 = vld [vmem:[#allocation3 + $0x292] sm:$0xff] }
 0x512   : > { %v3572_v7 = vpop.permute.xlu1 %3571  ;;  %3938 = vrot.lane.b32.xlu0 %v3852_v6, %s9665_s25 }
 0x513   : > { %3636 = vst.msk [vmem:[#allocation4 + $0xf8] sm:$0xff] %vm1467_vm5, %v3572_v7  ;;  %v4042_v7 = vld [vmem:[#allocation3 + $0x28a] sm:$0xff] }
 0x514   : > { %3944 = vrot.lane.b32.xlu1 %v11772_v45, %s9665_s25  ;;  %v3570_v31 = vpop.permute.xlu0 %3569  ;;  %v3859_v45 = vld [vmem:[#allocation3 + $0x310] sm:$0xff] }
 0x515   : > { %3635 = vst.msk [vmem:[#allocation4 + $0xf0] sm:$0xff] %vm1467_vm5, %v3570_v31 }
 0x516   : > { %v3705_v60 = vpop.permute.xlu1 %3704  ;;  %3942 = vrot.lane.b32.xlu0 %v11777_v25, %s9665_s25  ;;  %v9132_v25 = vld [vmem:[%s14488_s1 + $0x40] sm:$0xff] }
 0x517   : > { %3799 = vst.msk [vmem:[#allocation4 + $0x8] sm:$0xff] %vm1661_vm6, %v3705_v60  ;;  %9461 = vmatprep.subr.mxu1 %v9132_v25  ;;  %v4045_v60 = vld [vmem:[#allocation3 + $0x2b2] sm:$0xff] }
 0x518   : > { %3948 = vrot.lane.b32.xlu1 %v11782_v22, %s9665_s25  ;;  %v3703_v28 = vpop.permute.xlu0 %3702  ;;  %v3858_v22 = vld [vmem:[#allocation3 + $0x308] sm:$0xff]  ;;  %9462 = vmatpush3.msra.mxu1 %v9132_v25 }
 0x519   : > { %3798 = vst.msk [vmem:[#allocation4] sm:$0xff] %vm1661_vm6, %v3703_v28  ;;  %9463 = vmatprep.subr.mxu1 %v9131_v17  ;;  %v4044_v28 = vld [vmem:[#allocation3 + $0x2aa] sm:$0xff] }
 0x51a   : > { %v3709_v61 = vpop.permute.xlu1 %3708  ;;  %3946 = vrot.lane.b32.xlu0 %v11787_v32, %s9665_s25  ;;  %9464 = vmatpush3.msra.mxu1 %v9131_v17  ;;  %v9130_v32 = vld [vmem:[%s14488_s1 + $0x30] sm:$0xff] }
 0x51b   : > { %3801 = vst.msk [vmem:[#allocation4 + $0x18] sm:$0xff] %vm1661_vm6, %v3709_v61  ;;  %9465 = vmatprep.subr.mxu1 %v9130_v32  ;;  %v4051_v17 = vld [vmem:[#allocation3 + $0x312] sm:$0xff] }
 0x51c   : > { %3952 = vrot.lane.b32.xlu1 %v3859_v45, %s9665_s25  ;;  %v3707_v5 = vpop.permute.xlu0 %3706  ;;  %9466 = vmatpush3.msra.mxu1 %v9130_v32 }
 0x51d   : > { %3800 = vst.msk [vmem:[#allocation4 + $0x10] sm:$0xff] %vm1661_vm6, %v3707_v5  ;;  %9467 = vmatprep.subr.mxu1 %v9129_v39 }
 0x51e   : > { %v3713_v18 = vpop.permute.xlu1 %3712  ;;  %3950 = vrot.lane.b32.xlu0 %v3858_v22, %s9665_s25  ;;  %9468 = vmatpush3.msra.mxu1 %v9129_v39  ;;  %v4809_v39 = vld [vmem:[#allocation2 + $0x88] sm:$0xff] }
 0x51f   : > { %3803 = vst.msk [vmem:[#allocation4 + $0x28] sm:$0xff] %vm1661_vm6, %v3713_v18 }
 0x520   : > { %3956 = vrot.lane.b32.xlu1 %v3861_v37, %s9665_s25  ;;  %v3711_v36 = vpop.permute.xlu0 %3710 }
 0x521   : > { %3802 = vst.msk [vmem:[#allocation4 + $0x20] sm:$0xff] %vm1661_vm6, %v3711_v36 }
 0x522   : > { %v3717_v33 = vpop.permute.xlu1 %3716  ;;  %3954 = vrot.lane.b32.xlu0 %v3860_v12, %s9665_s25 }
 0x523   : > { %3805 = vst.msk [vmem:[#allocation4 + $0x38] sm:$0xff] %vm1661_vm6, %v3717_v33 }
 0x524   : > { %4088 = vrot.lane.b32.xlu1 %v4023_v48, %s9666_s9  ;;  %v3715_v30 = vpop.permute.xlu0 %3714 }
 0x525   : > { %3804 = vst.msk [vmem:[#allocation4 + $0x30] sm:$0xff] %vm1661_vm6, %v3715_v30 }
 0x526   : > { %v3721_v1 = vpop.permute.xlu1 %3720  ;;  %4086 = vrot.lane.b32.xlu0 %v4022_v57, %s9666_s9 }
 0x527   : > { %3807 = vst.msk [vmem:[#allocation4 + $0x48] sm:$0xff] %vm1661_vm6, %v3721_v1 }
 0x528   : > { %4092 = vrot.lane.b32.xlu1 %v4025_v16, %s9666_s9  ;;  %v3719_v24 = vpop.permute.xlu0 %3718 }
 0x529   : > { %3806 = vst.msk [vmem:[#allocation4 + $0x40] sm:$0xff] %vm1661_vm6, %v3719_v24 }
 0x52a   : > { %v3725_v34 = vpop.permute.xlu1 %3724  ;;  %4090 = vrot.lane.b32.xlu0 %v4024_v21, %s9666_s9 }
 0x52b   : > { %3809 = vst.msk [vmem:[#allocation4 + $0x58] sm:$0xff] %vm1661_vm6, %v3725_v34 }
 0x52c   : > { %4096 = vrot.lane.b32.xlu1 %v4027_v62, %s9666_s9  ;;  %v3723_v15 = vpop.permute.xlu0 %3722 }
 0x52d   : > { %3808 = vst.msk [vmem:[#allocation4 + $0x50] sm:$0xff] %vm1661_vm6, %v3723_v15 }
 0x52e   : > { %v3729_v46 = vpop.permute.xlu1 %3728  ;;  %4094 = vrot.lane.b32.xlu0 %v4026_v27, %s9666_s9 }
 0x52f   : > { %3811 = vst.msk [vmem:[#allocation4 + $0x68] sm:$0xff] %vm1661_vm6, %v3729_v46 }
 0x530   : > { %4100 = vrot.lane.b32.xlu1 %v4029_v9, %s9666_s9  ;;  %v3727_v23 = vpop.permute.xlu0 %3726 }
 0x531   : > { %3810 = vst.msk [vmem:[#allocation4 + $0x60] sm:$0xff] %vm1661_vm6, %v3727_v23 }
 0x532   : > { %v3733_v52 = vpop.permute.xlu1 %3732  ;;  %4098 = vrot.lane.b32.xlu0 %v4028_v49, %s9666_s9 }
 0x533   : > { %3813 = vst.msk [vmem:[#allocation4 + $0x78] sm:$0xff] %vm1661_vm6, %v3733_v52 }
 0x534   : > { %4104 = vrot.lane.b32.xlu1 %v4031_v53, %s9666_s9  ;;  %v3731_v14 = vpop.permute.xlu0 %3730 }
 0x535   : > { %3812 = vst.msk [vmem:[#allocation4 + $0x70] sm:$0xff] %vm1661_vm6, %v3731_v14 }
 0x536   : > { %v3737_v0 = vpop.permute.xlu1 %3736  ;;  %4102 = vrot.lane.b32.xlu0 %v4030_v29, %s9666_s9 }
 0x537   : > { %3815 = vst.msk [vmem:[#allocation4 + $0x88] sm:$0xff] %vm1661_vm6, %v3737_v0 }
 0x538   : > { %4108 = vrot.lane.b32.xlu1 %v4033_v4, %s9666_s9  ;;  %v3735_v19 = vpop.permute.xlu0 %3734 }
 0x539   : > { %3814 = vst.msk [vmem:[#allocation4 + $0x80] sm:$0xff] %vm1661_vm6, %v3735_v19 }
 0x53a   : > { %v3741_v56 = vpop.permute.xlu1 %3740  ;;  %4106 = vrot.lane.b32.xlu0 %v4032_v20, %s9666_s9 }
 0x53b   : > { %3817 = vst.msk [vmem:[#allocation4 + $0x98] sm:$0xff] %vm1661_vm6, %v3741_v56 }
 0x53c   : > { %4112 = vrot.lane.b32.xlu1 %v4035_v13, %s9666_s9  ;;  %v3739_v35 = vpop.permute.xlu0 %3738 }
 0x53d   : > { %3816 = vst.msk [vmem:[#allocation4 + $0x90] sm:$0xff] %vm1661_vm6, %v3739_v35 }
 0x53e   : > { %v3745_v3 = vpop.permute.xlu1 %3744  ;;  %4110 = vrot.lane.b32.xlu0 %v4034_v51, %s9666_s9 }
 0x53f   : > { %3819 = vst.msk [vmem:[#allocation4 + $0xa8] sm:$0xff] %vm1661_vm6, %v3745_v3 }
 0x540   : > { %4116 = vrot.lane.b32.xlu1 %v4037_v11, %s9666_s9  ;;  %v3743_v44 = vpop.permute.xlu0 %3742 }
 0x541   : > { %3818 = vst.msk [vmem:[#allocation4 + $0xa0] sm:$0xff] %vm1661_vm6, %v3743_v44 }
 0x542   : > { %v3749_v38 = vpop.permute.xlu1 %3748  ;;  %4114 = vrot.lane.b32.xlu0 %v4036_v63, %s9666_s9 }
 0x543   : > { %3821 = vst.msk [vmem:[#allocation4 + $0xb8] sm:$0xff] %vm1661_vm6, %v3749_v38 }
 0x544   : > { %4120 = vrot.lane.b32.xlu1 %v4039_v55, %s9666_s9  ;;  %v3747_v41 = vpop.permute.xlu0 %3746 }
 0x545   : > { %3820 = vst.msk [vmem:[#allocation4 + $0xb0] sm:$0xff] %vm1661_vm6, %v3747_v41 }
 0x546   : > { %v3753_v26 = vpop.permute.xlu1 %3752  ;;  %4118 = vrot.lane.b32.xlu0 %v4038_v43, %s9666_s9 }
 0x547   : > { %3823 = vst.msk [vmem:[#allocation4 + $0xc8] sm:$0xff] %vm1661_vm6, %v3753_v26 }
 0x548   : > { %4124 = vrot.lane.b32.xlu1 %v4041_v59, %s9666_s9  ;;  %v3751_v42 = vpop.permute.xlu0 %3750 }
 0x549   : > { %3822 = vst.msk [vmem:[#allocation4 + $0xc0] sm:$0xff] %vm1661_vm6, %v3751_v42 }
 0x54a   : > { %v3757_v8 = vpop.permute.xlu1 %3756  ;;  %4122 = vrot.lane.b32.xlu0 %v4040_v10, %s9666_s9 }
 0x54b   : > { %3825 = vst.msk [vmem:[#allocation4 + $0xd8] sm:$0xff] %vm1661_vm6, %v3757_v8 }
 0x54c   : > { %4128 = vrot.lane.b32.xlu1 %v4043_v47, %s9666_s9  ;;  %v3755_v6 = vpop.permute.xlu0 %3754 }
 0x54d   : > { %3824 = vst.msk [vmem:[#allocation4 + $0xd0] sm:$0xff] %vm1661_vm6, %v3755_v6 }
 0x54e   : > { %v3761_v31 = vpop.permute.xlu1 %3760  ;;  %4126 = vrot.lane.b32.xlu0 %v4042_v7, %s9666_s9 }
 0x54f   : > { %3827 = vst.msk [vmem:[#allocation4 + $0xe8] sm:$0xff] %vm1661_vm6, %v3761_v31 }
 0x550   : > { %4132 = vrot.lane.b32.xlu1 %v4045_v60, %s9666_s9  ;;  %v3759_v54 = vpop.permute.xlu0 %3758 }
 0x551   : > { %3826 = vst.msk [vmem:[#allocation4 + $0xe0] sm:$0xff] %vm1661_vm6, %v3759_v54 }
 0x552   : > { %v3765_v45 = vpop.permute.xlu1 %3764  ;;  %4130 = vrot.lane.b32.xlu0 %v4044_v28, %s9666_s9 }
 0x553   : > { %3829 = vst.msk [vmem:[#allocation4 + $0xf8] sm:$0xff] %vm1661_vm6, %v3765_v45 }
 0x554   : > { %4136 = vrot.lane.b32.xlu1 %v11876_v58, %s9666_s9  ;;  %v3763_v25 = vpop.permute.xlu0 %3762  ;;  %v4050_v58 = vld [vmem:[#allocation3 + $0x30a] sm:$0xff] }
 0x555   : > { %3828 = vst.msk [vmem:[#allocation4 + $0xf0] sm:$0xff] %vm1661_vm6, %v3763_v25 }
 0x556   : > { %v3897_v61 = vpop.permute.xlu1 %3896  ;;  %4134 = vrot.lane.b32.xlu0 %v11881_v40, %s9666_s9  ;;  %v4053_v40 = vld [vmem:[#allocation3 + $0x332] sm:$0xff] }
 0x557   : > { %3991 = vst.msk [vmem:[#allocation4 + $0x8] sm:$0xff] %vm1854_vm8, %v3897_v61 }
 0x558   : > { %4140 = vrot.lane.b32.xlu1 %v11886_v2, %s9666_s9  ;;  %v3895_v22 = vpop.permute.xlu0 %3894  ;;  %v4052_v2 = vld [vmem:[#allocation3 + $0x32a] sm:$0xff] }
 0x559   : > { %3990 = vst.msk [vmem:[#allocation4] sm:$0xff] %vm1854_vm8, %v3895_v22 }
 0x55a   : > { %v3901_v5 = vpop.permute.xlu1 %3900  ;;  %4138 = vrot.lane.b32.xlu0 %v11891_v50, %s9666_s9  ;;  %v4810_v50 = vld [vmem:[#allocation2 + $0x90] sm:$0xff] }
 0x55b   : > { %3993 = vst.msk [vmem:[#allocation4 + $0x18] sm:$0xff] %vm1854_vm8, %v3901_v5 }
 0x55c   : > { %v3899_v37 = vpop.permute.xlu0 %3898  ;;  %4144 = vrot.lane.b32.xlu1 %v4051_v17, %s9666_s9 }
 0x55d   : > { %3992 = vst.msk [vmem:[#allocation4 + $0x10] sm:$0xff] %vm1854_vm8, %v3899_v37 }
 0x55e   : > { %v3905_v32 = vpop.permute.xlu1 %3904  ;;  %4142 = vrot.lane.b32.xlu0 %v4050_v58, %s9666_s9 }
 0x55f   : > { %3995 = vst.msk [vmem:[#allocation4 + $0x28] sm:$0xff] %vm1854_vm8, %v3905_v32 }
 0x560   : > { %v3903_v18 = vpop.permute.xlu0 %3902  ;;  %4148 = vrot.lane.b32.xlu1 %v4053_v40, %s9666_s9 }
 0x561   : > { %3994 = vst.msk [vmem:[#allocation4 + $0x20] sm:$0xff] %vm1854_vm8, %v3903_v18 }
 0x562   : > { %v3909_v12 = vpop.permute.xlu1 %3908  ;;  %4146 = vrot.lane.b32.xlu0 %v4052_v2, %s9666_s9 }
 0x563   : > { %3997 = vst.msk [vmem:[#allocation4 + $0x38] sm:$0xff] %vm1854_vm8, %v3909_v12 }
 0x564   : > { %v3907_v36 = vpop.permute.xlu0 %3906  ;;  %4875 = vrot.lane.b32.xlu1 %v4810_v50, %s9659_s19 }
 0x565   : > { %3996 = vst.msk [vmem:[#allocation4 + $0x30] sm:$0xff] %vm1854_vm8, %v3907_v36 }
 0x566   : > { %v3913_v33 = vpop.permute.xlu1 %3912  ;;  %4873 = vrot.lane.b32.xlu0 %v4809_v39, %s9659_s19 }
 0x567   : > { %3999 = vst.msk [vmem:[#allocation4 + $0x48] sm:$0xff] %vm1854_vm8, %v3913_v33 }
 0x568   : > { %v3911_v48 = vpop.permute.xlu0 %3910 }
 0x569   : > { %3998 = vst.msk [vmem:[#allocation4 + $0x40] sm:$0xff] %vm1854_vm8, %v3911_v48 }
 0x56a   : > { %v3917_v30 = vpop.permute.xlu1 %3916 }
 0x56b   : > { %4001 = vst.msk [vmem:[#allocation4 + $0x58] sm:$0xff] %vm1854_vm8, %v3917_v30 }
 0x56c   : > { %v3915_v57 = vpop.permute.xlu0 %3914 }
 0x56d   : > { %4000 = vst.msk [vmem:[#allocation4 + $0x50] sm:$0xff] %vm1854_vm8, %v3915_v57 }
 0x56e   : > { %v3921_v1 = vpop.permute.xlu1 %3920 }
 0x56f   : > { %4003 = vst.msk [vmem:[#allocation4 + $0x68] sm:$0xff] %vm1854_vm8, %v3921_v1 }
 0x570   : > { %v3919_v16 = vpop.permute.xlu0 %3918 }
 0x571   : > { %4002 = vst.msk [vmem:[#allocation4 + $0x60] sm:$0xff] %vm1854_vm8, %v3919_v16 }
 0x572   : > { %v3925_v24 = vpop.permute.xlu1 %3924 }
 0x573   : > { %4005 = vst.msk [vmem:[#allocation4 + $0x78] sm:$0xff] %vm1854_vm8, %v3925_v24 }
 0x574   : > { %v3923_v21 = vpop.permute.xlu0 %3922 }
 0x575   : > { %4004 = vst.msk [vmem:[#allocation4 + $0x70] sm:$0xff] %vm1854_vm8, %v3923_v21 }
 0x576   : > { %v3929_v34 = vpop.permute.xlu1 %3928 }
 0x577   : > { %4007 = vst.msk [vmem:[#allocation4 + $0x88] sm:$0xff] %vm1854_vm8, %v3929_v34 }
 0x578   : > { %v3927_v62 = vpop.permute.xlu0 %3926 }
 0x579   : > { %4006 = vst.msk [vmem:[#allocation4 + $0x80] sm:$0xff] %vm1854_vm8, %v3927_v62 }
 0x57a   : > { %v3933_v15 = vpop.permute.xlu1 %3932 }
 0x57b   : > { %4009 = vst.msk [vmem:[#allocation4 + $0x98] sm:$0xff] %vm1854_vm8, %v3933_v15 }
 0x57c   : > { %v3931_v27 = vpop.permute.xlu0 %3930 }
 0x57d   : > { %4008 = vst.msk [vmem:[#allocation4 + $0x90] sm:$0xff] %vm1854_vm8, %v3931_v27 }
 0x57e   : > { %v3937_v46 = vpop.permute.xlu1 %3936 }
 0x57f   : > { %4011 = vst.msk [vmem:[#allocation4 + $0xa8] sm:$0xff] %vm1854_vm8, %v3937_v46 }
 0x580   : > { %v3935_v9 = vpop.permute.xlu0 %3934 }
 0x581   : > { %4010 = vst.msk [vmem:[#allocation4 + $0xa0] sm:$0xff] %vm1854_vm8, %v3935_v9 }
 0x582   : > { %v3941_v23 = vpop.permute.xlu1 %3940 }
 0x583   : > { %4013 = vst.msk [vmem:[#allocation4 + $0xb8] sm:$0xff] %vm1854_vm8, %v3941_v23 }
 0x584   : > { %v3939_v49 = vpop.permute.xlu0 %3938 }
 0x585   : > { %4012 = vst.msk [vmem:[#allocation4 + $0xb0] sm:$0xff] %vm1854_vm8, %v3939_v49 }
 0x586   : > { %v3945_v52 = vpop.permute.xlu1 %3944 }
 0x587   : > { %4015 = vst.msk [vmem:[#allocation4 + $0xc8] sm:$0xff] %vm1854_vm8, %v3945_v52 }
 0x588   : > { %v3943_v53 = vpop.permute.xlu0 %3942 }
 0x589   : > { %4014 = vst.msk [vmem:[#allocation4 + $0xc0] sm:$0xff] %vm1854_vm8, %v3943_v53 }
 0x58a   : > { %v3949_v14 = vpop.permute.xlu1 %3948 }
 0x58b   : > { %4017 = vst.msk [vmem:[#allocation4 + $0xd8] sm:$0xff] %vm1854_vm8, %v3949_v14 }
 0x58c   : > { %v3947_v29 = vpop.permute.xlu0 %3946 }
 0x58d   : > { %4016 = vst.msk [vmem:[#allocation4 + $0xd0] sm:$0xff] %vm1854_vm8, %v3947_v29 }
 0x58e   : > { %v3953_v0 = vpop.permute.xlu1 %3952 }
 0x58f   : > { %4019 = vst.msk [vmem:[#allocation4 + $0xe8] sm:$0xff] %vm1854_vm8, %v3953_v0 }
 0x590   : > { %v3951_v4 = vpop.permute.xlu0 %3950 }
 0x591   : > { %4018 = vst.msk [vmem:[#allocation4 + $0xe0] sm:$0xff] %vm1854_vm8, %v3951_v4 }
 0x592   : > { %v3957_v19 = vpop.permute.xlu1 %3956 }
 0x593   : > { %4021 = vst.msk [vmem:[#allocation4 + $0xf8] sm:$0xff] %vm1854_vm8, %v3957_v19 }
 0x594   : > { %v3955_v20 = vpop.permute.xlu0 %3954 }
 0x595   : > { %4020 = vst.msk [vmem:[#allocation4 + $0xf0] sm:$0xff] %vm1854_vm8, %v3955_v20 }
 0x596   : > { %v4089_v56 = vpop.permute.xlu1 %4088 }
 0x597   : > { %4183 = vst.msk [vmem:[#allocation4 + $0x8] sm:$0xff] %vm2047_vm9, %v4089_v56  ;;  %v4812_v56 = vld [vmem:[#allocation2 + $0xb0] sm:$0xff] }
 0x598   : > { %v4087_v13 = vpop.permute.xlu0 %4086  ;;  %4879 = vrot.lane.b32.xlu1 %v4812_v56, %s9659_s19 }
 0x599   : > { %4182 = vst.msk [vmem:[#allocation4] sm:$0xff] %vm2047_vm9, %v4087_v13  ;;  %v4811_v13 = vld [vmem:[#allocation2 + $0xa8] sm:$0xff] }
 0x59a   : > { %v4093_v35 = vpop.permute.xlu1 %4092  ;;  %4877 = vrot.lane.b32.xlu0 %v4811_v13, %s9659_s19 }
 0x59b   : > { %4185 = vst.msk [vmem:[#allocation4 + $0x18] sm:$0xff] %vm2047_vm9, %v4093_v35  ;;  %v4814_v35 = vld [vmem:[#allocation2 + $0xd0] sm:$0xff] }
 0x59c   : > { %v4091_v51 = vpop.permute.xlu0 %4090  ;;  %4883 = vrot.lane.b32.xlu1 %v4814_v35, %s9659_s19 }
 0x59d   : > { %4184 = vst.msk [vmem:[#allocation4 + $0x10] sm:$0xff] %vm2047_vm9, %v4091_v51  ;;  %v4813_v51 = vld [vmem:[#allocation2 + $0xc8] sm:$0xff] }
 0x59e   : > { %v4097_v3 = vpop.permute.xlu1 %4096  ;;  %v4215_v63 = vld [vmem:[#allocation4 + $0x8] sm:$0xff]  ;;  %4881 = vrot.lane.b32.xlu0 %v4813_v51, %s9659_s19  ;;  %v4614_v51 = vld [vmem:[#allocation5 + $0x30] sm:$0xff] }
 0x59f   : > { %4187 = vst.msk [vmem:[#allocation4 + $0x28] sm:$0xff] %vm2047_vm9, %v4097_v3  ;;  %v4816_v3 = vld [vmem:[#allocation2 + $0xf0] sm:$0xff] }
 0x5a0   : > { %v4095_v11 = vpop.permute.xlu0 %4094  ;;  %v4214_v44 = vld [vmem:[#allocation4] sm:$0xff]  ;;  %4887 = vrot.lane.b32.xlu1 %v4816_v3, %s9659_s19 }
 0x5a1   : > { %4186 = vst.msk [vmem:[#allocation4 + $0x20] sm:$0xff] %vm2047_vm9, %v4095_v11  ;;  %9469 = vmatprep.mubr.msk.f32.mxu1 %vm2118_vm10, %v4214_v44  ;;  %v4815_v11 = vld [vmem:[#allocation2 + $0xe8] sm:$0xff] }
 0x5a2   : > { %v4101_v38 = vpop.permute.xlu1 %4100  ;;  %9470 = vmatmul.mubr.msk.f32.vlgmr.msra.gmra.mxu1 %vm2118_vm10, %v4215_v63  ;;  %v4217_v43 = vld [vmem:[#allocation4 + $0x18] sm:$0xff]  ;;  %4885 = vrot.lane.b32.xlu0 %v4815_v11, %s9659_s19  ;;  %v12238_v44 = vld [vmem:[#allocation2 + $0x8c] sm:$0xff] }
 0x5a3   : > { %4189 = vst.msk [vmem:[#allocation4 + $0x38] sm:$0xff] %vm2047_vm9, %v4101_v38  ;;  %v12240_v63 = vld [vmem:[#allocation2 + $0xac] sm:$0xff] }
 0x5a4   : > { %v4099_v55 = vpop.permute.xlu0 %4098  ;;  %v4216_v41 = vld [vmem:[#allocation4 + $0x10] sm:$0xff]  ;;  %4778 = vst.msk [vmem:[#allocation4 + $0x8] sm:$0xff] %vm171_vm0, %v12238_v44  ;;  %4780 = vst.msk [vmem:[#allocation4 + $0x18] sm:$0xff] %vm171_vm0, %v12240_v63 }
 0x5a5   : > { %4188 = vst.msk [vmem:[#allocation4 + $0x30] sm:$0xff] %vm2047_vm9, %v4099_v55  ;;  %9472 = vmatprep.mubr.msk.f32.mxu1 %vm2118_vm10, %v4216_v41  ;;  %v12242_v38 = vld [vmem:[#allocation2 + $0xcc] sm:$0xff] }
 0x5a6   : > { %v4105_v26 = vpop.permute.xlu1 %4104  ;;  %9473 = vmatmul.mubr.msk.f32.gmra.mxu1 %vm2118_vm10, %v4217_v43  ;;  %v4219_v10 = vld [vmem:[#allocation4 + $0x28] sm:$0xff] }
 0x5a7   : > { %4191 = vst.msk [vmem:[#allocation4 + $0x48] sm:$0xff] %vm2047_vm9, %v4105_v26  ;;  %v12250_v55 = vld [vmem:[#allocation2 + $0xec] sm:$0xff]  ;;  %v4745_v43 = vld [vmem:[#allocation2 + $0x84] sm:$0xff] }
 0x5a8   : > { %v4103_v59 = vpop.permute.xlu0 %4102  ;;  %v4218_v42 = vld [vmem:[#allocation4 + $0x20] sm:$0xff]  ;;  %4782 = vst.msk [vmem:[#allocation4 + $0x28] sm:$0xff] %vm171_vm0, %v12242_v38  ;;  %4777 = vst.msk [vmem:[#allocation4] sm:$0xff] %vm171_vm0, %v4745_v43 }
 0x5a9   : > { %4190 = vst.msk [vmem:[#allocation4 + $0x40] sm:$0xff] %vm2047_vm9, %v4103_v59  ;;  %9475 = vmatprep.mubr.msk.f32.mxu1 %vm2118_vm10, %v4218_v42  ;;  %v4747_v59 = vld [vmem:[#allocation2 + $0xa4] sm:$0xff] }
 0x5aa   : > { %v4109_v8 = vpop.permute.xlu1 %4108  ;;  %9476 = vmatmul.mubr.msk.f32.gmra.mxu1 %vm2118_vm10, %v4219_v10  ;;  %v4221_v7 = vld [vmem:[#allocation4 + $0x38] sm:$0xff]  ;;  %4779 = vst.msk [vmem:[#allocation4 + $0x10] sm:$0xff] %vm171_vm0, %v4747_v59  ;;  %v4749_v10 = vld [vmem:[#allocation2 + $0xc4] sm:$0xff] }
 0x5ab   : > { %4193 = vst.msk [vmem:[#allocation4 + $0x58] sm:$0xff] %vm2047_vm9, %v4109_v8 }
 0x5ac   : > { %v4107_v47 = vpop.permute.xlu0 %4106  ;;  %v4220_v6 = vld [vmem:[#allocation4 + $0x30] sm:$0xff]  ;;  %4784 = vst.msk [vmem:[#allocation4 + $0x38] sm:$0xff] %vm171_vm0, %v12250_v55  ;;  %4781 = vst.msk [vmem:[#allocation4 + $0x20] sm:$0xff] %vm171_vm0, %v4749_v10 }
 0x5ad   : > { %4192 = vst.msk [vmem:[#allocation4 + $0x50] sm:$0xff] %vm2047_vm9, %v4107_v47  ;;  %9478 = vmatprep.mubr.msk.f32.mxu1 %vm2118_vm10, %v4220_v6  ;;  %v4751_v6 = vld [vmem:[#allocation2 + $0xe4] sm:$0xff] }
 0x5ae   : > { %v4113_v31 = vpop.permute.xlu1 %4112  ;;  %9479 = vmatmul.mubr.msk.f32.gmra.mxu1 %vm2118_vm10, %v4221_v7  ;;  %v4223_v28 = vld [vmem:[#allocation4 + $0x48] sm:$0xff]  ;;  %4783 = vst.msk [vmem:[#allocation4 + $0x30] sm:$0xff] %vm171_vm0, %v4751_v6 }
 0x5af   : > { %4195 = vst.msk [vmem:[#allocation4 + $0x68] sm:$0xff] %vm2047_vm9, %v4113_v31  ;;  %v12267_v31 = vld [vmem:[%s14489_s2 + $0x1] ss:$0 sm:$0xff] }
 0x5b0   : > { %v4111_v60 = vpop.permute.xlu0 %4110  ;;  %v4222_v54 = vld [vmem:[#allocation4 + $0x40] sm:$0xff] }
 0x5b1   : > { %4194 = vst.msk [vmem:[#allocation4 + $0x60] sm:$0xff] %vm2047_vm9, %v4111_v60  ;;  %9481 = vmatprep.mubr.msk.f32.mxu1 %vm2118_vm10, %v4222_v54 }
 0x5b2   : > { %v4117_v45 = vpop.permute.xlu1 %4116  ;;  %9482 = vmatmul.mubr.msk.f32.gmra.mxu1 %vm2118_vm10, %v4223_v28  ;;  %v4225_v22 = vld [vmem:[#allocation4 + $0x58] sm:$0xff] }
 0x5b3   : > { %4197 = vst.msk [vmem:[#allocation4 + $0x78] sm:$0xff] %vm2047_vm9, %v4117_v45 }
 0x5b4   : > { %v4115_v25 = vpop.permute.xlu0 %4114  ;;  %v4224_v61 = vld [vmem:[#allocation4 + $0x50] sm:$0xff] }
 0x5b5   : > { %4196 = vst.msk [vmem:[#allocation4 + $0x70] sm:$0xff] %vm2047_vm9, %v4115_v25  ;;  %9484 = vmatprep.mubr.msk.f32.mxu1 %vm2118_vm10, %v4224_v61 }
 0x5b6   : > { %v4121_v17 = vpop.permute.xlu1 %4120  ;;  %9485 = vmatmul.mubr.msk.f32.gmra.mxu1 %vm2118_vm10, %v4225_v22  ;;  %v4227_v37 = vld [vmem:[#allocation4 + $0x68] sm:$0xff] }
 0x5b7   : > { %4199 = vst.msk [vmem:[#allocation4 + $0x88] sm:$0xff] %vm2047_vm9, %v4121_v17  ;;  %v4609_v17 = vld [vmem:[#allocation5 + $0x8] sm:$0xff] }
 0x5b8   : > { %v4119_v5 = vpop.permute.xlu0 %4118  ;;  %v4226_v58 = vld [vmem:[#allocation4 + $0x60] sm:$0xff] }
 0x5b9   : > { %4198 = vst.msk [vmem:[#allocation4 + $0x80] sm:$0xff] %vm2047_vm9, %v4119_v5  ;;  %9487 = vmatprep.mubr.msk.f32.mxu1 %vm2118_vm10, %v4226_v58 }
 0x5ba   : > { %v4125_v40 = vpop.permute.xlu1 %4124  ;;  %9488 = vmatmul.mubr.msk.f32.gmra.mxu1 %vm2118_vm10, %v4227_v37  ;;  %v4229_v18 = vld [vmem:[#allocation4 + $0x78] sm:$0xff] }
 0x5bb   : > { %4201 = vst.msk [vmem:[#allocation4 + $0x98] sm:$0xff] %vm2047_vm9, %v4125_v40 }
 0x5bc   : > { %v4123_v32 = vpop.permute.xlu0 %4122  ;;  %v4228_v2 = vld [vmem:[#allocation4 + $0x70] sm:$0xff] }
 0x5bd   : > { %4200 = vst.msk [vmem:[#allocation4 + $0x90] sm:$0xff] %vm2047_vm9, %v4123_v32  ;;  %9490 = vmatprep.mubr.msk.f32.mxu1 %vm2118_vm10, %v4228_v2  ;;  %v4608_v32 = vld [vmem:[#allocation5] sm:$0xff] }
 0x5be   : > { %v4129_v50 = vpop.permute.xlu1 %4128  ;;  %9491 = vmatmul.mubr.msk.f32.gmra.mxu1 %vm2118_vm10, %v4229_v18  ;;  %v4231_v36 = vld [vmem:[#allocation4 + $0x88] sm:$0xff] }
 0x5bf   : > { %4203 = vst.msk [vmem:[#allocation4 + $0xa8] sm:$0xff] %vm2047_vm9, %v4129_v50 }
 0x5c0   : > { %v4127_v12 = vpop.permute.xlu0 %4126  ;;  %v4230_v39 = vld [vmem:[#allocation4 + $0x80] sm:$0xff] }
 0x5c1   : > { %4202 = vst.msk [vmem:[#allocation4 + $0xa0] sm:$0xff] %vm2047_vm9, %v4127_v12  ;;  %9493 = vmatprep.mubr.msk.f32.mxu1 %vm2118_vm10, %v4230_v39  ;;  %v4611_v39 = vld [vmem:[#allocation5 + $0x18] sm:$0xff] }
 0x5c2   : > { %v4133_v33 = vpop.permute.xlu1 %4132  ;;  %9494 = vmatmul.mubr.msk.f32.gmra.mxu1 %vm2118_vm10, %v4231_v36  ;;  %v4233_v57 = vld [vmem:[#allocation4 + $0x98] sm:$0xff] }
 0x5c3   : > { %4205 = vst.msk [vmem:[#allocation4 + $0xb8] sm:$0xff] %vm2047_vm9, %v4133_v33 }
 0x5c4   : > { %v4131_v48 = vpop.permute.xlu0 %4130  ;;  %v4232_v30 = vld [vmem:[#allocation4 + $0x90] sm:$0xff] }
 0x5c5   : > { %4204 = vst.msk [vmem:[#allocation4 + $0xb0] sm:$0xff] %vm2047_vm9, %v4131_v48  ;;  %9496 = vmatprep.mubr.msk.f32.mxu1 %vm2118_vm10, %v4232_v30 }
 0x5c6   : > { %v4137_v1 = vpop.permute.xlu1 %4136  ;;  %9497 = vmatmul.mubr.msk.f32.gmra.mxu1 %vm2118_vm10, %v4233_v57  ;;  %v4235_v21 = vld [vmem:[#allocation4 + $0xa8] sm:$0xff]  ;;  %v4610_v57 = vld [vmem:[#allocation5 + $0x10] sm:$0xff] }
 0x5c7   : > { %4207 = vst.msk [vmem:[#allocation4 + $0xc8] sm:$0xff] %vm2047_vm9, %v4137_v1 }
 0x5c8   : > { %v4135_v16 = vpop.permute.xlu0 %4134  ;;  %v4234_v24 = vld [vmem:[#allocation4 + $0xa0] sm:$0xff] }
 0x5c9   : > { %4206 = vst.msk [vmem:[#allocation4 + $0xc0] sm:$0xff] %vm2047_vm9, %v4135_v16  ;;  %9499 = vmatprep.mubr.msk.f32.mxu1 %vm2118_vm10, %v4234_v24 }
 0x5ca   : > { %v4141_v34 = vpop.permute.xlu1 %4140  ;;  %9500 = vmatmul.mubr.msk.f32.gmra.mxu1 %vm2118_vm10, %v4235_v21  ;;  %v4237_v27 = vld [vmem:[#allocation4 + $0xb8] sm:$0xff] }
 0x5cb   : > { %4209 = vst.msk [vmem:[#allocation4 + $0xd8] sm:$0xff] %vm2047_vm9, %v4141_v34  ;;  %v4613_v34 = vld [vmem:[#allocation5 + $0x28] sm:$0xff] }
 0x5cc   : > { %v4139_v62 = vpop.permute.xlu0 %4138  ;;  %v4236_v15 = vld [vmem:[#allocation4 + $0xb0] sm:$0xff] }
 0x5cd   : > { %4208 = vst.msk [vmem:[#allocation4 + $0xd0] sm:$0xff] %vm2047_vm9, %v4139_v62  ;;  %9502 = vmatprep.mubr.msk.f32.mxu1 %vm2118_vm10, %v4236_v15 }
 0x5ce   : > { %9503 = vmatmul.mubr.msk.f32.gmra.mxu1 %vm2118_vm10, %v4237_v27  ;;  %v4145_v46 = vpop.permute.xlu1 %4144  ;;  %v4239_v49 = vld [vmem:[#allocation4 + $0xc8] sm:$0xff] }
 0x5cf   : > { %4211 = vst.msk [vmem:[#allocation4 + $0xe8] sm:$0xff] %vm2047_vm9, %v4145_v46 }
 0x5d0   : > { %v4143_v9 = vpop.permute.xlu0 %4142  ;;  %v4238_v23 = vld [vmem:[#allocation4 + $0xc0] sm:$0xff] }
 0x5d1   : > { %4210 = vst.msk [vmem:[#allocation4 + $0xe0] sm:$0xff] %vm2047_vm9, %v4143_v9  ;;  %9505 = vmatprep.mubr.msk.f32.mxu1 %vm2118_vm10, %v4238_v23  ;;  %v4612_v9 = vld [vmem:[#allocation5 + $0x20] sm:$0xff] }
 0x5d2   : > { %9506 = vmatmul.mubr.msk.f32.gmra.mxu1 %vm2118_vm10, %v4239_v49  ;;  %v4149_v52 = vpop.permute.xlu1 %4148  ;;  %v4241_v29 = vld [vmem:[#allocation4 + $0xd8] sm:$0xff] }
 0x5d3   : > { %4213 = vst.msk [vmem:[#allocation4 + $0xf8] sm:$0xff] %vm2047_vm9, %v4149_v52 }
 0x5d4   : > { %v4147_v53 = vpop.permute.xlu0 %4146  ;;  %v4240_v14 = vld [vmem:[#allocation4 + $0xd0] sm:$0xff] }
 0x5d5   : > { %4212 = vst.msk [vmem:[#allocation4 + $0xf0] sm:$0xff] %vm2047_vm9, %v4147_v53  ;;  %9508 = vmatprep.mubr.msk.f32.mxu1 %vm2118_vm10, %v4240_v14 }
 0x5d6   : > { %9509 = vmatmul.mubr.msk.f32.gmra.mxu1 %vm2118_vm10, %v4241_v29  ;;  %v4243_v0 = vld [vmem:[#allocation4 + $0xe8] sm:$0xff]  ;;  %v4876_v41 = vpop.permute.xlu1 %4875 }
 0x5d7   : > { %4970 = vst.msk [vmem:[#allocation4 + $0x8] sm:$0xff] %vm695_vm1, %v4876_v41 }
 0x5d8   : > { %v4242_v4 = vld [vmem:[#allocation4 + $0xe0] sm:$0xff]  ;;  %v4874_v26 = vpop.permute.xlu0 %4873 }
 0x5d9   : > { %9511 = vmatprep.mubr.msk.f32.mxu1 %vm2118_vm10, %v4242_v4  ;;  %4969 = vst.msk [vmem:[#allocation4] sm:$0xff] %vm695_vm1, %v4874_v26 }
 0x5da   : > { %9512 = vmatmul.mubr.msk.f32.gmra.mxu1 %vm2118_vm10, %v4243_v0  ;;  %v4245_v19 = vld [vmem:[#allocation4 + $0xf8] sm:$0xff] }
 0x5dc   : > { %v4244_v20 = vld [vmem:[#allocation4 + $0xf0] sm:$0xff] }
 0x5dd   : > { %9514 = vmatprep.mubr.msk.f32.mxu1 %vm2118_vm10, %v4244_v20 }
 0x5de   : > { %9515 = vmatmul.mubr.msk.f32.gmra.mxu1 %vm2118_vm10, %v4245_v19  ;;  %v4615_v19 = vld [vmem:[#allocation5 + $0x38] sm:$0xff] }
 0x60a   : > { %v4880_v42 = vpop.permute.xlu1 %4879 }
 0x60b   : > { %4972 = vst.msk [vmem:[#allocation4 + $0x18] sm:$0xff] %vm695_vm1, %v4880_v42 }
 0x60c   : > { %v4878_v8 = vpop.permute.xlu0 %4877 }
 0x60d   : > { %4971 = vst.msk [vmem:[#allocation4 + $0x10] sm:$0xff] %vm695_vm1, %v4878_v8  ;;  %v4617_v8 = vld [vmem:[#allocation5 + $0x48] sm:$0xff] }
 0x60e   : > { %v4884_v47 = vpop.permute.xlu1 %4883 }
 0x60f   : > { %4974 = vst.msk [vmem:[#allocation4 + $0x28] sm:$0xff] %vm695_vm1, %v4884_v47 }
 0x610   : > { %v4882_v7 = vpop.permute.xlu0 %4881 }
 0x611   : > { %4973 = vst.msk [vmem:[#allocation4 + $0x20] sm:$0xff] %vm695_vm1, %v4882_v7 }
 0x612   : > { %v4888_v60 = vpop.permute.xlu1 %4887 }
 0x613   : > { %4976 = vst.msk [vmem:[#allocation4 + $0x38] sm:$0xff] %vm695_vm1, %v4888_v60 }
 0x614   : > { %v4886_v28 = vpop.permute.xlu0 %4885 }
 0x615   : > { %4975 = vst.msk [vmem:[#allocation4 + $0x30] sm:$0xff] %vm695_vm1, %v4886_v28 }
 0x662   : > { %v9471_v54 = vpop.f32.mrf.mxu1 }
 0x663   : > { %v4423_v45 = vadd.f32 %v9471_v54, %v12267_v31  ;;  %v4616_v54 = vld [vmem:[#allocation5 + $0x40] sm:$0xff] }
 0x664   : > { %v4417_v25 = vpop.f32.mrf.mxu1 }
 0x665   : > { %v4577_v61 = vmax.f32 %v4423_v45, 0.0  ;;  %v4418_v22 = vadd.f32 %v12267_v31, %v4417_v25 }
 0x666   : > { %v9474_v5 = vpop.f32.mrf.mxu1 }
 0x667   : > { %v4641_v58 = vadd.f32 %v4609_v17, %v4577_v61  ;;  %4705 = vst.msk [vmem:[#allocation2 + $0x110] sm:$0xff] %vm171_vm0, %v4577_v61  ;;  %v4576_v37 = vmax.f32 %v4418_v22, 0.0  ;;  %v4433_v40 = vadd.f32 %v9474_v5, %v12267_v31 }
 0x668   : > { %v4427_v2 = vpop.f32.mrf.mxu1 }
 0x669   : > { %4673 = vst.msk [vmem:[#allocation5 + $0x8] sm:$0xff] %vm171_vm0, %v4641_v58  ;;  %v4640_v18 = vadd.f32 %v4608_v32, %v4576_v37  ;;  %4704 = vst.msk [vmem:[#allocation2 + $0x108] sm:$0xff] %vm171_vm0, %v4576_v37  ;;  %v4579_v50 = vmax.f32 %v4433_v40, 0.0  ;;  %v4428_v12 = vadd.f32 %v12267_v31, %v4427_v2  ;;  %v4619_v37 = vld [vmem:[#allocation5 + $0x58] sm:$0xff] }
 0x66a   : > { %v9477_v36 = vpop.f32.mrf.mxu1 }
 0x66b   : > { %4672 = vst.msk [vmem:[#allocation5] sm:$0xff] %vm171_vm0, %v4640_v18  ;;  %v4643_v33 = vadd.f32 %v4611_v39, %v4579_v50  ;;  %4707 = vst.msk [vmem:[#allocation2 + $0x130] sm:$0xff] %vm171_vm0, %v4579_v50  ;;  %v4578_v48 = vmax.f32 %v4428_v12, 0.0  ;;  %v4443_v30 = vadd.f32 %v9477_v36, %v12267_v31  ;;  %v4618_v50 = vld [vmem:[#allocation5 + $0x50] sm:$0xff] }
 0x66c   : > { %v4437_v1 = vpop.f32.mrf.mxu1 }
 0x66d   : > { %4675 = vst.msk [vmem:[#allocation5 + $0x18] sm:$0xff] %vm171_vm0, %v4643_v33  ;;  %v4642_v16 = vadd.f32 %v4610_v57, %v4578_v48  ;;  %4706 = vst.msk [vmem:[#allocation2 + $0x128] sm:$0xff] %vm171_vm0, %v4578_v48  ;;  %v4581_v24 = vmax.f32 %v4443_v30, 0.0  ;;  %v4438_v21 = vadd.f32 %v12267_v31, %v4437_v1 }
 0x66e   : > { %v9480_v62 = vpop.f32.mrf.mxu1  ;;  %v12284_v15 = vld [vmem:[#allocation2 + $0x110] sm:$0xff] }
 0x66f   : > { %4674 = vst.msk [vmem:[#allocation5 + $0x10] sm:$0xff] %vm171_vm0, %v4642_v16  ;;  %v4645_v27 = vadd.f32 %v4613_v34, %v4581_v24  ;;  %4709 = vst.msk [vmem:[#allocation2 + $0x150] sm:$0xff] %vm171_vm0, %v4581_v24  ;;  %v4580_v46 = vmax.f32 %v4438_v21, 0.0  ;;  %v4453_v23 = vadd.f32 %v9480_v62, %v12267_v31  ;;  %4891 = vrot.lane.b32.xlu1 %v12284_v15, %s9659_s19  ;;  %v4621_v16 = vld [vmem:[#allocation5 + $0x68] sm:$0xff] }
 0x670   : > { %v4447_v49 = vpop.f32.mrf.mxu1  ;;  %v12291_v52 = vld [vmem:[#allocation2 + $0x108] sm:$0xff] }
 0x671   : > { %v12293_v53 = vld [vmem:[#allocation2 + $0x10c] sm:$0xff]  ;;  %v12295_v14 = vld [vmem:[#allocation2 + $0x104] sm:$0xff]  ;;  %4677 = vst.msk [vmem:[#allocation5 + $0x28] sm:$0xff] %vm171_vm0, %v4645_v27  ;;  %v4644_v29 = vadd.f32 %v4612_v9, %v4580_v46  ;;  %4708 = vst.msk [vmem:[#allocation2 + $0x148] sm:$0xff] %vm171_vm0, %v4580_v46  ;;  %v4583_v0 = vmax.f32 %v4453_v23, 0.0  ;;  %v4448_v4 = vadd.f32 %v12267_v31, %v4447_v49  ;;  %4889 = vrot.lane.b32.xlu0 %v12291_v52, %s9659_s19 }
 0x672   : > { %4786 = vst.msk [vmem:[#allocation4 + $0x48] sm:$0xff] %vm171_vm0, %v12293_v53  ;;  %4785 = vst.msk [vmem:[#allocation4 + $0x40] sm:$0xff] %vm171_vm0, %v12295_v14  ;;  %v9483_v20 = vpop.f32.mrf.mxu1  ;;  %v12306_v56 = vld [vmem:[#allocation2 + $0x130] sm:$0xff]  ;;  %v4620_v27 = vld [vmem:[#allocation5 + $0x60] sm:$0xff] }
 0x673   : > { %4676 = vst.msk [vmem:[#allocation5 + $0x20] sm:$0xff] %vm171_vm0, %v4644_v29  ;;  %v4647_v13 = vadd.f32 %v4615_v19, %v4583_v0  ;;  %4711 = vst.msk [vmem:[#allocation2 + $0x170] sm:$0xff] %vm171_vm0, %v4583_v0  ;;  %v4582_v35 = vmax.f32 %v4448_v4, 0.0  ;;  %v4463_v3 = vadd.f32 %v9483_v20, %v12267_v31  ;;  %4895 = vrot.lane.b32.xlu1 %v12306_v56, %s9659_s19  ;;  %v4623_v20 = vld [vmem:[#allocation5 + $0x78] sm:$0xff] }
 0x674   : > { %v4457_v11 = vpop.f32.mrf.mxu1  ;;  %v12313_v41 = vld [vmem:[#allocation2 + $0x128] sm:$0xff] }
 0x675   : > { %v12315_v43 = vld [vmem:[#allocation2 + $0x12c] sm:$0xff]  ;;  %v12317_v26 = vld [vmem:[#allocation2 + $0x124] sm:$0xff]  ;;  %4679 = vst.msk [vmem:[#allocation5 + $0x38] sm:$0xff] %vm171_vm0, %v4647_v13  ;;  %v4646_v59 = vadd.f32 %v4614_v51, %v4582_v35  ;;  %4710 = vst.msk [vmem:[#allocation2 + $0x168] sm:$0xff] %vm171_vm0, %v4582_v35  ;;  %v4585_v42 = vmax.f32 %v4463_v3, 0.0  ;;  %v4458_v10 = vadd.f32 %v12267_v31, %v4457_v11  ;;  %4893 = vrot.lane.b32.xlu0 %v12313_v41, %s9659_s19 }
 0x676   : > { %4788 = vst.msk [vmem:[#allocation4 + $0x58] sm:$0xff] %vm171_vm0, %v12315_v43  ;;  %4787 = vst.msk [vmem:[#allocation4 + $0x50] sm:$0xff] %vm171_vm0, %v12317_v26  ;;  %v9486_v47 = vpop.f32.mrf.mxu1  ;;  %v12328_v6 = vld [vmem:[#allocation2 + $0x150] sm:$0xff] }
 0x677   : > { %4678 = vst.msk [vmem:[#allocation5 + $0x30] sm:$0xff] %vm171_vm0, %v4646_v59  ;;  %v4649_v7 = vadd.f32 %v4617_v8, %v4585_v42  ;;  %4713 = vst.msk [vmem:[#allocation2 + $0x190] sm:$0xff] %vm171_vm0, %v4585_v42  ;;  %v4584_v60 = vmax.f32 %v4458_v10, 0.0  ;;  %v4473_v28 = vadd.f32 %v9486_v47, %v12267_v31  ;;  %4899 = vrot.lane.b32.xlu1 %v12328_v6, %s9659_s19  ;;  %v4622_v11 = vld [vmem:[#allocation5 + $0x70] sm:$0xff] }
 0x678   : > { %v4467_v45 = vpop.f32.mrf.mxu1  ;;  %v12335_v25 = vld [vmem:[#allocation2 + $0x148] sm:$0xff] }
 0x679   : > { %v12337_v61 = vld [vmem:[#allocation2 + $0x14c] sm:$0xff]  ;;  %v12339_v22 = vld [vmem:[#allocation2 + $0x144] sm:$0xff]  ;;  %4681 = vst.msk [vmem:[#allocation5 + $0x48] sm:$0xff] %vm171_vm0, %v4649_v7  ;;  %v4648_v17 = vadd.f32 %v4616_v54, %v4584_v60  ;;  %4712 = vst.msk [vmem:[#allocation2 + $0x188] sm:$0xff] %vm171_vm0, %v4584_v60  ;;  %v4587_v5 = vmax.f32 %v4473_v28, 0.0  ;;  %v4468_v58 = vadd.f32 %v12267_v31, %v4467_v45  ;;  %4897 = vrot.lane.b32.xlu0 %v12335_v25, %s9659_s19 }
 0x67a   : > { %4790 = vst.msk [vmem:[#allocation4 + $0x68] sm:$0xff] %vm171_vm0, %v12337_v61  ;;  %4789 = vst.msk [vmem:[#allocation4 + $0x60] sm:$0xff] %vm171_vm0, %v12339_v22  ;;  %v9489_v40 = vpop.f32.mrf.mxu1  ;;  %v12350_v32 = vld [vmem:[#allocation2 + $0x170] sm:$0xff]  ;;  %v4625_v28 = vld [vmem:[#allocation5 + $0x88] sm:$0xff] }
 0x67b   : > { %4680 = vst.msk [vmem:[#allocation5 + $0x40] sm:$0xff] %vm171_vm0, %v4648_v17  ;;  %v4651_v2 = vadd.f32 %v4619_v37, %v4587_v5  ;;  %4715 = vst.msk [vmem:[#allocation2 + $0x1b0] sm:$0xff] %vm171_vm0, %v4587_v5  ;;  %v4586_v18 = vmax.f32 %v4468_v58, 0.0  ;;  %v4483_v12 = vadd.f32 %v9489_v40, %v12267_v31  ;;  %4903 = vrot.lane.b32.xlu1 %v12350_v32, %s9659_s19  ;;  %v4624_v37 = vld [vmem:[#allocation5 + $0x80] sm:$0xff] }
 0x67c   : > { %v4477_v39 = vpop.f32.mrf.mxu1  ;;  %v12357_v36 = vld [vmem:[#allocation2 + $0x168] sm:$0xff] }
 0x67d   : > { %v12359_v33 = vld [vmem:[#allocation2 + $0x16c] sm:$0xff]  ;;  %v12361_v48 = vld [vmem:[#allocation2 + $0x164] sm:$0xff]  ;;  %4683 = vst.msk [vmem:[#allocation5 + $0x58] sm:$0xff] %vm171_vm0, %v4651_v2  ;;  %v4650_v30 = vadd.f32 %v4618_v50, %v4586_v18  ;;  %4714 = vst.msk [vmem:[#allocation2 + $0x1a8] sm:$0xff] %vm171_vm0, %v4586_v18  ;;  %v4589_v57 = vmax.f32 %v4483_v12, 0.0  ;;  %v4478_v1 = vadd.f32 %v12267_v31, %v4477_v39  ;;  %4901 = vrot.lane.b32.xlu0 %v12357_v36, %s9659_s19 }
 0x67e   : > { %4792 = vst.msk [vmem:[#allocation4 + $0x78] sm:$0xff] %vm171_vm0, %v12359_v33  ;;  %4791 = vst.msk [vmem:[#allocation4 + $0x70] sm:$0xff] %vm171_vm0, %v12361_v48  ;;  %v9492_v24 = vpop.f32.mrf.mxu1  ;;  %v12372_v21 = vld [vmem:[#allocation2 + $0x190] sm:$0xff] }
 0x67f   : > { %4682 = vst.msk [vmem:[#allocation5 + $0x50] sm:$0xff] %vm171_vm0, %v4650_v30  ;;  %v4653_v34 = vadd.f32 %v4621_v16, %v4589_v57  ;;  %4717 = vst.msk [vmem:[#allocation2 + $0x1d0] sm:$0xff] %vm171_vm0, %v4589_v57  ;;  %v4588_v62 = vmax.f32 %v4478_v1, 0.0  ;;  %v4493_v46 = vadd.f32 %v9492_v24, %v12267_v31  ;;  %4907 = vrot.lane.b32.xlu1 %v12372_v21, %s9659_s19  ;;  %v4627_v1 = vld [vmem:[#allocation5 + $0x98] sm:$0xff] }
 0x680   : > { %v4487_v9 = vpop.f32.mrf.mxu1  ;;  %v12379_v23 = vld [vmem:[#allocation2 + $0x188] sm:$0xff] }
 0x681   : > { %v12381_v49 = vld [vmem:[#allocation2 + $0x18c] sm:$0xff]  ;;  %v12383_v29 = vld [vmem:[#allocation2 + $0x184] sm:$0xff]  ;;  %4685 = vst.msk [vmem:[#allocation5 + $0x68] sm:$0xff] %vm171_vm0, %v4653_v34  ;;  %v4652_v0 = vadd.f32 %v4620_v27, %v4588_v62  ;;  %4716 = vst.msk [vmem:[#allocation2 + $0x1c8] sm:$0xff] %vm171_vm0, %v4588_v62  ;;  %v4591_v4 = vmax.f32 %v4493_v46, 0.0  ;;  %v4488_v19 = vadd.f32 %v12267_v31, %v4487_v9  ;;  %4905 = vrot.lane.b32.xlu0 %v12379_v23, %s9659_s19 }
 0x682   : > { %4794 = vst.msk [vmem:[#allocation4 + $0x88] sm:$0xff] %vm171_vm0, %v12381_v49  ;;  %4793 = vst.msk [vmem:[#allocation4 + $0x80] sm:$0xff] %vm171_vm0, %v12383_v29  ;;  %v9495_v13 = vpop.f32.mrf.mxu1  ;;  %v12394_v35 = vld [vmem:[#allocation2 + $0x1b0] sm:$0xff] }
 0x683   : > { %4684 = vst.msk [vmem:[#allocation5 + $0x60] sm:$0xff] %vm171_vm0, %v4652_v0  ;;  %v4655_v51 = vadd.f32 %v4623_v20, %v4591_v4  ;;  %4719 = vst.msk [vmem:[#allocation2 + $0x1f0] sm:$0xff] %vm171_vm0, %v4591_v4  ;;  %v4590_v3 = vmax.f32 %v4488_v19, 0.0  ;;  %v4503_v59 = vadd.f32 %v9495_v13, %v12267_v31  ;;  %4911 = vrot.lane.b32.xlu1 %v12394_v35, %s9659_s19  ;;  %v4626_v27 = vld [vmem:[#allocation5 + $0x90] sm:$0xff] }
 0x684   : > { %v4497_v42 = vpop.f32.mrf.mxu1  ;;  %v12401_v10 = vld [vmem:[#allocation2 + $0x1a8] sm:$0xff] }
 0x685   : > { %v12403_v8 = vld [vmem:[#allocation2 + $0x1ac] sm:$0xff]  ;;  %v12405_v47 = vld [vmem:[#allocation2 + $0x1a4] sm:$0xff]  ;;  %4687 = vst.msk [vmem:[#allocation5 + $0x78] sm:$0xff] %vm171_vm0, %v4655_v51  ;;  %v4654_v7 = vadd.f32 %v4622_v11, %v4590_v3  ;;  %4718 = vst.msk [vmem:[#allocation2 + $0x1e8] sm:$0xff] %vm171_vm0, %v4590_v3  ;;  %v4593_v60 = vmax.f32 %v4503_v59, 0.0  ;;  %v4498_v54 = vadd.f32 %v12267_v31, %v4497_v42  ;;  %4909 = vrot.lane.b32.xlu0 %v12401_v10, %s9659_s19 }
 0x686   : > { %4796 = vst.msk [vmem:[#allocation4 + $0x98] sm:$0xff] %vm171_vm0, %v12403_v8  ;;  %4795 = vst.msk [vmem:[#allocation4 + $0x90] sm:$0xff] %vm171_vm0, %v12405_v47  ;;  %v9498_v45 = vpop.f32.mrf.mxu1  ;;  %v12416_v17 = vld [vmem:[#allocation2 + $0x1d0] sm:$0xff]  ;;  %v4629_v3 = vld [vmem:[#allocation5 + $0xa8] sm:$0xff] }
 0x687   : > { %4686 = vst.msk [vmem:[#allocation5 + $0x70] sm:$0xff] %vm171_vm0, %v4654_v7  ;;  %v4657_v5 = vadd.f32 %v4625_v28, %v4593_v60  ;;  %4721 = vst.msk [vmem:[#allocation2 + $0x210] sm:$0xff] %vm171_vm0, %v4593_v60  ;;  %v4592_v58 = vmax.f32 %v4498_v54, 0.0  ;;  %v4513_v40 = vadd.f32 %v9498_v45, %v12267_v31  ;;  %4915 = vrot.lane.b32.xlu1 %v12416_v17, %s9659_s19  ;;  %v4628_v60 = vld [vmem:[#allocation5 + $0xa0] sm:$0xff] }
 0x688   : > { %v4507_v2 = vpop.f32.mrf.mxu1  ;;  %v12423_v18 = vld [vmem:[#allocation2 + $0x1c8] sm:$0xff] }
 0x689   : > { %v12425_v50 = vld [vmem:[#allocation2 + $0x1cc] sm:$0xff]  ;;  %v12427_v12 = vld [vmem:[#allocation2 + $0x1c4] sm:$0xff]  ;;  %4689 = vst.msk [vmem:[#allocation5 + $0x88] sm:$0xff] %vm171_vm0, %v4657_v5  ;;  %v4656_v39 = vadd.f32 %v4624_v37, %v4592_v58  ;;  %4720 = vst.msk [vmem:[#allocation2 + $0x208] sm:$0xff] %vm171_vm0, %v4592_v58  ;;  %v4595_v30 = vmax.f32 %v4513_v40, 0.0  ;;  %v4508_v57 = vadd.f32 %v12267_v31, %v4507_v2  ;;  %4913 = vrot.lane.b32.xlu0 %v12423_v18, %s9659_s19 }
 0x68a   : > { %4798 = vst.msk [vmem:[#allocation4 + $0xa8] sm:$0xff] %vm171_vm0, %v12425_v50  ;;  %4797 = vst.msk [vmem:[#allocation4 + $0xa0] sm:$0xff] %vm171_vm0, %v12427_v12  ;;  %v9501_v16 = vpop.f32.mrf.mxu1  ;;  %v12438_v24 = vld [vmem:[#allocation2 + $0x1f0] sm:$0xff] }
 0x68b   : > { %4688 = vst.msk [vmem:[#allocation5 + $0x80] sm:$0xff] %vm171_vm0, %v4656_v39  ;;  %v4659_v34 = vadd.f32 %v4627_v1, %v4595_v30  ;;  %4723 = vst.msk [vmem:[#allocation2 + $0x230] sm:$0xff] %vm171_vm0, %v4595_v30  ;;  %v4594_v62 = vmax.f32 %v4508_v57, 0.0  ;;  %v4523_v46 = vadd.f32 %v9501_v16, %v12267_v31  ;;  %4919 = vrot.lane.b32.xlu1 %v12438_v24, %s9659_s19  ;;  %v4631_v39 = vld [vmem:[#allocation5 + $0xb8] sm:$0xff] }
 0x68c   : > { %v4517_v9 = vpop.f32.mrf.mxu1  ;;  %v12445_v0 = vld [vmem:[#allocation2 + $0x1e8] sm:$0xff] }
 0x68d   : > { %v12447_v4 = vld [vmem:[#allocation2 + $0x1ec] sm:$0xff]  ;;  %v12449_v19 = vld [vmem:[#allocation2 + $0x1e4] sm:$0xff]  ;;  %4691 = vst.msk [vmem:[#allocation5 + $0x98] sm:$0xff] %vm171_vm0, %v4659_v34  ;;  %v4658_v20 = vadd.f32 %v4626_v27, %v4594_v62  ;;  %4722 = vst.msk [vmem:[#allocation2 + $0x228] sm:$0xff] %vm171_vm0, %v4594_v62  ;;  %v4597_v13 = vmax.f32 %v4523_v46, 0.0  ;;  %v4518_v51 = vadd.f32 %v12267_v31, %v4517_v9  ;;  %4917 = vrot.lane.b32.xlu0 %v12445_v0, %s9659_s19 }
 0x68e   : > { %4800 = vst.msk [vmem:[#allocation4 + $0xb8] sm:$0xff] %vm171_vm0, %v12447_v4  ;;  %4799 = vst.msk [vmem:[#allocation4 + $0xb0] sm:$0xff] %vm171_vm0, %v12449_v19  ;;  %v9504_v11 = vpop.f32.mrf.mxu1  ;;  %v12460_v59 = vld [vmem:[#allocation2 + $0x210] sm:$0xff] }
 0x68f   : > { %4690 = vst.msk [vmem:[#allocation5 + $0x90] sm:$0xff] %vm171_vm0, %v4658_v20  ;;  %v4661_v42 = vadd.f32 %v4629_v3, %v4597_v13  ;;  %4725 = vst.msk [vmem:[#allocation2 + $0x250] sm:$0xff] %vm171_vm0, %v4597_v13  ;;  %v4596_v7 = vmax.f32 %v4518_v51, 0.0  ;;  %v4533_v54 = vadd.f32 %v9504_v11, %v12267_v31  ;;  %4923 = vrot.lane.b32.xlu1 %v12460_v59, %s9659_s19  ;;  %v4630_v34 = vld [vmem:[#allocation5 + $0xb0] sm:$0xff]  ;;  %v4633_v11 = vld [vmem:[#allocation5 + $0xc8] sm:$0xff] }
 0x690   : > { %v4527_v28 = vpop.f32.mrf.mxu1  ;;  %v12467_v45 = vld [vmem:[#allocation2 + $0x208] sm:$0xff] }
 0x691   : > { %v12469_v5 = vld [vmem:[#allocation2 + $0x20c] sm:$0xff]  ;;  %v12471_v58 = vld [vmem:[#allocation2 + $0x204] sm:$0xff]  ;;  %4693 = vst.msk [vmem:[#allocation5 + $0xa8] sm:$0xff] %vm171_vm0, %v4661_v42  ;;  %v4660_v37 = vadd.f32 %v4628_v60, %v4596_v7  ;;  %4724 = vst.msk [vmem:[#allocation2 + $0x248] sm:$0xff] %vm171_vm0, %v4596_v7  ;;  %v4599_v40 = vmax.f32 %v4533_v54, 0.0  ;;  %v4528_v2 = vadd.f32 %v12267_v31, %v4527_v28  ;;  %4921 = vrot.lane.b32.xlu0 %v12467_v45, %s9659_s19 }
 0x692   : > { %4802 = vst.msk [vmem:[#allocation4 + $0xc8] sm:$0xff] %vm171_vm0, %v12469_v5  ;;  %4801 = vst.msk [vmem:[#allocation4 + $0xc0] sm:$0xff] %vm171_vm0, %v12471_v58  ;;  %v9507_v30 = vpop.f32.mrf.mxu1  ;;  %v12482_v57 = vld [vmem:[#allocation2 + $0x230] sm:$0xff]  ;;  %v4632_v28 = vld [vmem:[#allocation5 + $0xc0] sm:$0xff] }
 0x693   : > { %4692 = vst.msk [vmem:[#allocation5 + $0xa0] sm:$0xff] %vm171_vm0, %v4660_v37  ;;  %v4663_v1 = vadd.f32 %v4631_v39, %v4599_v40  ;;  %4727 = vst.msk [vmem:[#allocation2 + $0x270] sm:$0xff] %vm171_vm0, %v4599_v40  ;;  %v4598_v16 = vmax.f32 %v4528_v2, 0.0  ;;  %v4543_v62 = vadd.f32 %v9507_v30, %v12267_v31  ;;  %4927 = vrot.lane.b32.xlu1 %v12482_v57, %s9659_s19 }
 0x694   : > { %v4537_v27 = vpop.f32.mrf.mxu1  ;;  %v12489_v46 = vld [vmem:[#allocation2 + $0x228] sm:$0xff] }
 0x695   : > { %v12491_v9 = vld [vmem:[#allocation2 + $0x22c] sm:$0xff]  ;;  %v12493_v20 = vld [vmem:[#allocation2 + $0x224] sm:$0xff]  ;;  %4695 = vst.msk [vmem:[#allocation5 + $0xb8] sm:$0xff] %vm171_vm0, %v4663_v1  ;;  %v4662_v13 = vadd.f32 %v4630_v34, %v4598_v16  ;;  %4726 = vst.msk [vmem:[#allocation2 + $0x268] sm:$0xff] %vm171_vm0, %v4598_v16  ;;  %v4601_v51 = vmax.f32 %v4543_v62, 0.0  ;;  %v4538_v3 = vadd.f32 %v12267_v31, %v4537_v27  ;;  %4925 = vrot.lane.b32.xlu0 %v12489_v46, %s9659_s19 }
 0x696   : > { %4804 = vst.msk [vmem:[#allocation4 + $0xd8] sm:$0xff] %vm171_vm0, %v12491_v9  ;;  %4803 = vst.msk [vmem:[#allocation4 + $0xd0] sm:$0xff] %vm171_vm0, %v12493_v20  ;;  %v9510_v42 = vpop.f32.mrf.mxu1  ;;  %v12504_v7 = vld [vmem:[#allocation2 + $0x250] sm:$0xff]  ;;  %v4635_v62 = vld [vmem:[#allocation5 + $0xd8] sm:$0xff] }
 0x697   : > { %14662 = vst [vmem:[#allocation31_spill] sm:$0xff] %v12504_v7  ;;  %4694 = vst.msk [vmem:[#allocation5 + $0xb0] sm:$0xff] %vm171_vm0, %v4662_v13  ;;  %v4665_v60 = vadd.f32 %v4633_v11, %v4601_v51  ;;  %v4600_v54 = vmax.f32 %v4538_v3, 0.0  ;;  %v4553_v37 = vadd.f32 %v9510_v42, %v12267_v31  ;;  %4931 = vrot.lane.b32.xlu1 %v12504_v7, %s9659_s19  ;;  %v4634_v11 = vld [vmem:[#allocation5 + $0xd0] sm:$0xff] }
 0x698   : > { %4729 = vst.msk [vmem:[#allocation2 + $0x290] sm:$0xff] %vm171_vm0, %v4601_v51  ;;  %v4547_v40 = vpop.f32.mrf.mxu1  ;;  %v12511_v2 = vld [vmem:[#allocation2 + $0x248] sm:$0xff] }
 0x699   : > { %14663 = vst [vmem:[#allocation32_spill] sm:$0xff] %v12511_v2  ;;  %v12513_v39 = vld [vmem:[#allocation2 + $0x24c] sm:$0xff]  ;;  %v12515_v30 = vld [vmem:[#allocation2 + $0x244] sm:$0xff]  ;;  %4697 = vst.msk [vmem:[#allocation5 + $0xc8] sm:$0xff] %vm171_vm0, %v4665_v60  ;;  %v4664_v1 = vadd.f32 %v4632_v28, %v4600_v54  ;;  %v4603_v16 = vmax.f32 %v4553_v37, 0.0  ;;  %v4548_v34 = vadd.f32 %v12267_v31, %v4547_v40  ;;  %4929 = vrot.lane.b32.xlu0 %v12511_v2, %s9659_s19 }
 0x69a   : > { %4728 = vst.msk [vmem:[#allocation2 + $0x288] sm:$0xff] %vm171_vm0, %v4600_v54  ;;  %4806 = vst.msk [vmem:[#allocation4 + $0xe8] sm:$0xff] %vm171_vm0, %v12513_v39  ;;  %v9513_v27 = vpop.f32.mrf.mxu1  ;;  %v12526_v13 = vld [vmem:[#allocation2 + $0x270] sm:$0xff] }
 0x69b   : > { %4805 = vst.msk [vmem:[#allocation4 + $0xe0] sm:$0xff] %vm171_vm0, %v12515_v30  ;;  %14664 = vst [vmem:[#allocation33_spill] sm:$0xff] %v12526_v13  ;;  %v4667_v51 = vadd.f32 %v4635_v62, %v4603_v16  ;;  %v4602_v3 = vmax.f32 %v4548_v34, 0.0  ;;  %v4563_v42 = vadd.f32 %v9513_v27, %v12267_v31  ;;  %4935 = vrot.lane.b32.xlu1 %v12526_v13, %s9659_s19  ;;  %v5002_v60 = vld [vmem:[#allocation2 + $0x94] sm:$0xff]  ;;  %v4637_v62 = vld [vmem:[#allocation5 + $0xe8] sm:$0xff] }
 0x69c   : > { %4696 = vst.msk [vmem:[#allocation5 + $0xc0] sm:$0xff] %vm171_vm0, %v4664_v1  ;;  %4731 = vst.msk [vmem:[#allocation2 + $0x2b0] sm:$0xff] %vm171_vm0, %v4603_v16  ;;  %v4557_v54 = vpop.f32.mrf.mxu1  ;;  %v12533_v28 = vld [vmem:[#allocation2 + $0x268] sm:$0xff] }
 0x69d   : > { %14665 = vst [vmem:[#allocation34_spill] sm:$0xff] %v12533_v28  ;;  %v12535_v37 = vld [vmem:[#allocation2 + $0x26c] sm:$0xff]  ;;  %v12537_v40 = vld [vmem:[#allocation2 + $0x264] sm:$0xff]  ;;  %4699 = vst.msk [vmem:[#allocation5 + $0xd8] sm:$0xff] %vm171_vm0, %v4667_v51  ;;  %v4666_v1 = vadd.f32 %v4634_v11, %v4602_v3  ;;  %v4605_v16 = vmax.f32 %v4563_v42, 0.0  ;;  %v4558_v34 = vadd.f32 %v12267_v31, %v4557_v54  ;;  %4933 = vrot.lane.b32.xlu0 %v12533_v28, %s9659_s19 }
 0x69e   : > { %4730 = vst.msk [vmem:[#allocation2 + $0x2a8] sm:$0xff] %vm171_vm0, %v4602_v3  ;;  %4808 = vst.msk [vmem:[#allocation4 + $0xf8] sm:$0xff] %vm171_vm0, %v12535_v37  ;;  %v9516_v27 = vpop.f32.mrf.mxu1  ;;  %v4636_v42 = vld [vmem:[#allocation5 + $0xe0] sm:$0xff]  ;;  %v5004_v28 = vld [vmem:[#allocation2 + $0xb4] sm:$0xff] }
 0x69f   : > { %4807 = vst.msk [vmem:[#allocation4 + $0xf0] sm:$0xff] %vm171_vm0, %v12537_v40  ;;  %4698 = vst.msk [vmem:[#allocation5 + $0xd0] sm:$0xff] %vm171_vm0, %v4666_v1  ;;  %v4669_v51 = vadd.f32 %v4637_v62, %v4605_v16  ;;  %v4604_v3 = vmax.f32 %v4558_v34, 0.0  ;;  %v4573_v11 = vadd.f32 %v9516_v27, %v12267_v31  ;;  %5067 = vrot.lane.b32.xlu1 %v5002_v60, %s9660_s20  ;;  %v4639_v1 = vld [vmem:[#allocation5 + $0xf8] sm:$0xff]  ;;  %v4638_v34 = vld [vmem:[#allocation5 + $0xf0] sm:$0xff] }
 0x6a0   : > { %4733 = vst.msk [vmem:[#allocation2 + $0x2d0] sm:$0xff] %vm171_vm0, %v4605_v16  ;;  %v4567_v54 = vpop.f32.mrf.mxu1  ;;  %v5006_v62 = vld [vmem:[#allocation2 + $0xd4] sm:$0xff] }
 0x6a1   : > { %4701 = vst.msk [vmem:[#allocation5 + $0xe8] sm:$0xff] %vm171_vm0, %v4669_v51  ;;  %v4668_v13 = vadd.f32 %v4636_v42, %v4604_v3  ;;  %4732 = vst.msk [vmem:[#allocation2 + $0x2c8] sm:$0xff] %vm171_vm0, %v4604_v3  ;;  %v4607_v2 = vmax.f32 %v4573_v11, 0.0  ;;  %v4568_v7 = vadd.f32 %v12267_v31, %v4567_v54  ;;  %5065 = vrot.lane.b32.xlu0 %v12238_v44, %s9660_s20  ;;  %v5008_v44 = vld [vmem:[#allocation2 + $0xf4] sm:$0xff] }
 0x6a2   : > { %v12571_v31 = vld [vmem:[#allocation2 + $0x114] sm:$0xff] }
 0x6a3   : > { %4700 = vst.msk [vmem:[#allocation5 + $0xe0] sm:$0xff] %vm171_vm0, %v4668_v13  ;;  %v4671_v16 = vadd.f32 %v4639_v1, %v4607_v2  ;;  %4735 = vst.msk [vmem:[#allocation2 + $0x2f0] sm:$0xff] %vm171_vm0, %v4607_v2  ;;  %v4606_v60 = vmax.f32 %v4568_v7, 0.0  ;;  %5071 = vrot.lane.b32.xlu1 %v5004_v28, %s9660_s20  ;;  %v12595_v7 = vld [vmem:[#allocation2 + $0x194] sm:$0xff] }
 0x6a4   : > { %v12601_v2 = vld [vmem:[#allocation2 + $0x1b4] sm:$0xff] }
 0x6a5   : > { %4703 = vst.msk [vmem:[#allocation5 + $0xf8] sm:$0xff] %vm171_vm0, %v4671_v16  ;;  %v4670_v27 = vadd.f32 %v4638_v34, %v4606_v60  ;;  %4734 = vst.msk [vmem:[#allocation2 + $0x2e8] sm:$0xff] %vm171_vm0, %v4606_v60  ;;  %5069 = vrot.lane.b32.xlu0 %v12240_v63, %s9660_s20  ;;  %v12577_v63 = vld [vmem:[#allocation2 + $0x134] sm:$0xff] }
 0x6a6   : > { %v12607_v13 = vld [vmem:[#allocation2 + $0x1d4] sm:$0xff] }
 0x6a7   : > { %4702 = vst.msk [vmem:[#allocation5 + $0xf0] sm:$0xff] %vm171_vm0, %v4670_v27  ;;  %5075 = vrot.lane.b32.xlu1 %v5006_v62, %s9660_s20  ;;  %v12613_v28 = vld [vmem:[#allocation2 + $0x1f4] sm:$0xff] }
 0x6a8   : > { %v12619_v51 = vld [vmem:[#allocation2 + $0x214] sm:$0xff] }
 0x6a9   : > { %5073 = vrot.lane.b32.xlu0 %v12242_v38, %s9660_s20  ;;  %v12583_v38 = vld [vmem:[#allocation2 + $0x154] sm:$0xff] }
 0x6aa   : > { %v12625_v3 = vld [vmem:[#allocation2 + $0x234] sm:$0xff] }
 0x6ab   : > { %5079 = vrot.lane.b32.xlu1 %v5008_v44, %s9660_s20  ;;  %v12631_v11 = vld [vmem:[#allocation2 + $0x254] sm:$0xff] }
 0x6ac   : > { %v12637_v42 = vld [vmem:[#allocation2 + $0x274] sm:$0xff] }
 0x6ad   : > { %5077 = vrot.lane.b32.xlu0 %v12250_v55, %s9660_s20  ;;  %v12589_v55 = vld [vmem:[#allocation2 + $0x174] sm:$0xff] }
 0x6af   : > { %5083 = vrot.lane.b32.xlu1 %v12571_v31, %s9660_s20 }
 0x6b1   : > { %5081 = vrot.lane.b32.xlu0 %v12293_v53, %s9660_s20 }
 0x6b3   : > { %5087 = vrot.lane.b32.xlu1 %v12577_v63, %s9660_s20 }
 0x6b5   : > { %5085 = vrot.lane.b32.xlu0 %v12315_v43, %s9660_s20 }
 0x6b7   : > { %5091 = vrot.lane.b32.xlu1 %v12583_v38, %s9660_s20 }
 0x6b9   : > { %5089 = vrot.lane.b32.xlu0 %v12337_v61, %s9660_s20 }
 0x6bb   : > { %5095 = vrot.lane.b32.xlu1 %v12589_v55, %s9660_s20 }
 0x6bd   : > { %5093 = vrot.lane.b32.xlu0 %v12359_v33, %s9660_s20 }
 0x6bf   : > { %5099 = vrot.lane.b32.xlu1 %v12595_v7, %s9660_s20 }
 0x6c1   : > { %5097 = vrot.lane.b32.xlu0 %v12381_v49, %s9660_s20 }
 0x6c3   : > { %5103 = vrot.lane.b32.xlu1 %v12601_v2, %s9660_s20 }
 0x6c5   : > { %5101 = vrot.lane.b32.xlu0 %v12403_v8, %s9660_s20 }
 0x6c7   : > { %5107 = vrot.lane.b32.xlu1 %v12607_v13, %s9660_s20 }
 0x6c9   : > { %5105 = vrot.lane.b32.xlu0 %v12425_v50, %s9660_s20 }
 0x6cb   : > { %5111 = vrot.lane.b32.xlu1 %v12613_v28, %s9660_s20 }
 0x6cd   : > { %5109 = vrot.lane.b32.xlu0 %v12447_v4, %s9660_s20 }
 0x6cf   : > { %5115 = vrot.lane.b32.xlu1 %v12619_v51, %s9660_s20 }
 0x6d1   : > { %5113 = vrot.lane.b32.xlu0 %v12469_v5, %s9660_s20 }
 0x6d3   : > { %5119 = vrot.lane.b32.xlu1 %v12625_v3, %s9660_s20 }
 0x6d5   : > { %5117 = vrot.lane.b32.xlu0 %v12491_v9, %s9660_s20 }
 0x6d7   : > { %5123 = vrot.lane.b32.xlu1 %v12631_v11, %s9660_s20 }
 0x6d9   : > { %5121 = vrot.lane.b32.xlu0 %v12513_v39, %s9660_s20 }
 0x6db   : > { %5127 = vrot.lane.b32.xlu1 %v12637_v42, %s9660_s20 }
 0x6dd   : > { %5125 = vrot.lane.b32.xlu0 %v12535_v37, %s9660_s20 }
 0x6df   : > { %5259 = vrot.lane.b32.xlu1 %v12293_v53, %s9661_s21 }
 0x6e1   : > { %v4892_v54 = vpop.permute.xlu1 %4891  ;;  %5257 = vrot.lane.b32.xlu0 %v12295_v14, %s9661_s21 }
 0x6e2   : > { %4978 = vst.msk [vmem:[#allocation4 + $0x48] sm:$0xff] %vm695_vm1, %v4892_v54 }
 0x6e3   : > { %v4890_v1 = vpop.permute.xlu0 %4889  ;;  %5263 = vrot.lane.b32.xlu1 %v12315_v43, %s9661_s21 }
 0x6e4   : > { %4977 = vst.msk [vmem:[#allocation4 + $0x40] sm:$0xff] %vm695_vm1, %v4890_v1 }
 0x6e5   : > { %v4896_v16 = vpop.permute.xlu1 %4895  ;;  %5261 = vrot.lane.b32.xlu0 %v12317_v26, %s9661_s21 }
 0x6e6   : > { %4980 = vst.msk [vmem:[#allocation4 + $0x58] sm:$0xff] %vm695_vm1, %v4896_v16 }
 0x6e7   : > { %v4894_v60 = vpop.permute.xlu0 %4893  ;;  %5267 = vrot.lane.b32.xlu1 %v12337_v61, %s9661_s21 }
 0x6e8   : > { %4979 = vst.msk [vmem:[#allocation4 + $0x50] sm:$0xff] %vm695_vm1, %v4894_v60 }
 0x6e9   : > { %v4900_v14 = vpop.permute.xlu1 %4899  ;;  %5265 = vrot.lane.b32.xlu0 %v12339_v22, %s9661_s21 }
 0x6ea   : > { %4982 = vst.msk [vmem:[#allocation4 + $0x68] sm:$0xff] %vm695_vm1, %v4900_v14 }
 0x6eb   : > { %v4898_v34 = vpop.permute.xlu0 %4897  ;;  %5271 = vrot.lane.b32.xlu1 %v12359_v33, %s9661_s21 }
 0x6ec   : > { %4981 = vst.msk [vmem:[#allocation4 + $0x60] sm:$0xff] %vm695_vm1, %v4898_v34 }
 0x6ed   : > { %v4904_v26 = vpop.permute.xlu1 %4903  ;;  %5269 = vrot.lane.b32.xlu0 %v12361_v48, %s9661_s21 }
 0x6ee   : > { %4984 = vst.msk [vmem:[#allocation4 + $0x78] sm:$0xff] %vm695_vm1, %v4904_v26 }
 0x6ef   : > { %5275 = vrot.lane.b32.xlu1 %v12381_v49, %s9661_s21  ;;  %v4902_v62 = vpop.permute.xlu0 %4901 }
 0x6f0   : > { %4983 = vst.msk [vmem:[#allocation4 + $0x70] sm:$0xff] %vm695_vm1, %v4902_v62 }
 0x6f1   : > { %v4908_v22 = vpop.permute.xlu1 %4907  ;;  %5273 = vrot.lane.b32.xlu0 %v12383_v29, %s9661_s21 }
 0x6f2   : > { %4986 = vst.msk [vmem:[#allocation4 + $0x88] sm:$0xff] %vm695_vm1, %v4908_v22 }
 0x6f3   : > { %5279 = vrot.lane.b32.xlu1 %v12403_v8, %s9661_s21  ;;  %v4906_v27 = vpop.permute.xlu0 %4905 }
 0x6f4   : > { %4985 = vst.msk [vmem:[#allocation4 + $0x80] sm:$0xff] %vm695_vm1, %v4906_v27 }
 0x6f5   : > { %v4912_v48 = vpop.permute.xlu1 %4911  ;;  %5277 = vrot.lane.b32.xlu0 %v12405_v47, %s9661_s21 }
 0x6f6   : > { %4988 = vst.msk [vmem:[#allocation4 + $0x98] sm:$0xff] %vm695_vm1, %v4912_v48 }
 0x6f7   : > { %5283 = vrot.lane.b32.xlu1 %v12425_v50, %s9661_s21  ;;  %v4910_v44 = vpop.permute.xlu0 %4909 }
 0x6f8   : > { %4987 = vst.msk [vmem:[#allocation4 + $0x90] sm:$0xff] %vm695_vm1, %v4910_v44  ;;  %v12714_v44 = vld [vmem:[#allocation2 + $0x28c] sm:$0xff] }
 0x6f9   : > { %v4916_v54 = vpop.permute.xlu1 %4915  ;;  %5281 = vrot.lane.b32.xlu0 %v12427_v12, %s9661_s21 }
 0x6fa   : > { %4990 = vst.msk [vmem:[#allocation4 + $0xa8] sm:$0xff] %vm695_vm1, %v4916_v54 }
 0x6fb   : > { %5287 = vrot.lane.b32.xlu1 %v12447_v4, %s9661_s21  ;;  %v4914_v1 = vpop.permute.xlu0 %4913 }
 0x6fc   : > { %4989 = vst.msk [vmem:[#allocation4 + $0xa0] sm:$0xff] %vm695_vm1, %v4914_v1  ;;  %v12719_v1 = vld [vmem:[#allocation2 + $0x284] sm:$0xff] }
 0x6fd   : > { %v4920_v16 = vpop.permute.xlu1 %4919  ;;  %5285 = vrot.lane.b32.xlu0 %v12449_v19, %s9661_s21 }
 0x6fe   : > { %4992 = vst.msk [vmem:[#allocation4 + $0xb8] sm:$0xff] %vm695_vm1, %v4920_v16 }
 0x6ff   : > { %5291 = vrot.lane.b32.xlu1 %v12469_v5, %s9661_s21  ;;  %v4918_v60 = vpop.permute.xlu0 %4917 }
 0x700   : > { %4991 = vst.msk [vmem:[#allocation4 + $0xb0] sm:$0xff] %vm695_vm1, %v4918_v60  ;;  %v12724_v60 = vld [vmem:[#allocation2 + $0x2ac] sm:$0xff] }
 0x701   : > { %v4924_v14 = vpop.permute.xlu1 %4923  ;;  %5289 = vrot.lane.b32.xlu0 %v12471_v58, %s9661_s21 }
 0x702   : > { %4994 = vst.msk [vmem:[#allocation4 + $0xc8] sm:$0xff] %vm695_vm1, %v4924_v14 }
 0x703   : > { %5295 = vrot.lane.b32.xlu1 %v12491_v9, %s9661_s21  ;;  %v4922_v34 = vpop.permute.xlu0 %4921 }
 0x704   : > { %4993 = vst.msk [vmem:[#allocation4 + $0xc0] sm:$0xff] %vm695_vm1, %v4922_v34  ;;  %v12729_v34 = vld [vmem:[#allocation2 + $0x2a4] sm:$0xff] }
 0x705   : > { %v4928_v26 = vpop.permute.xlu1 %4927  ;;  %5293 = vrot.lane.b32.xlu0 %v12493_v20, %s9661_s21 }
 0x706   : > { %4996 = vst.msk [vmem:[#allocation4 + $0xd8] sm:$0xff] %vm695_vm1, %v4928_v26  ;;  %v12731_v26 = vld [vmem:[#allocation2 + $0x2cc] sm:$0xff] }
 0x707   : > { %5299 = vrot.lane.b32.xlu1 %v12513_v39, %s9661_s21  ;;  %v4926_v62 = vpop.permute.xlu0 %4925 }
 0x708   : > { %4995 = vst.msk [vmem:[#allocation4 + $0xd0] sm:$0xff] %vm695_vm1, %v4926_v62 }
 0x709   : > { %v4932_v22 = vpop.permute.xlu1 %4931  ;;  %5297 = vrot.lane.b32.xlu0 %v12515_v30, %s9661_s21 }
 0x70a   : > { %4998 = vst.msk [vmem:[#allocation4 + $0xe8] sm:$0xff] %vm695_vm1, %v4932_v22 }
 0x70b   : > { %5303 = vrot.lane.b32.xlu1 %v12535_v37, %s9661_s21  ;;  %v4930_v27 = vpop.permute.xlu0 %4929 }
 0x70c   : > { %4997 = vst.msk [vmem:[#allocation4 + $0xe0] sm:$0xff] %vm695_vm1, %v4930_v27  ;;  %v12739_v27 = vld [vmem:[#allocation2 + $0x2c4] sm:$0xff] }
 0x70d   : > { %v4936_v48 = vpop.permute.xlu1 %4935  ;;  %5301 = vrot.lane.b32.xlu0 %v12537_v40, %s9661_s21 }
 0x70e   : > { %5000 = vst.msk [vmem:[#allocation4 + $0xf8] sm:$0xff] %vm695_vm1, %v4936_v48  ;;  %v12741_v48 = vld [vmem:[#allocation2 + $0x2ec] sm:$0xff] }
 0x70f   : > { %5307 = vrot.lane.b32.xlu1 %v12714_v44, %s9661_s21  ;;  %v4934_v54 = vpop.permute.xlu0 %4933 }
 0x710   : > { %4999 = vst.msk [vmem:[#allocation4 + $0xf0] sm:$0xff] %vm695_vm1, %v4934_v54 }
 0x711   : > { %v5068_v16 = vpop.permute.xlu1 %5067  ;;  %5305 = vrot.lane.b32.xlu0 %v12719_v1, %s9661_s21 }
 0x712   : > { %5162 = vst.msk [vmem:[#allocation4 + $0x8] sm:$0xff] %vm888_vm2, %v5068_v16 }
 0x713   : > { %5311 = vrot.lane.b32.xlu1 %v12724_v60, %s9661_s21  ;;  %v5066_v14 = vpop.permute.xlu0 %5065 }
 0x714   : > { %5161 = vst.msk [vmem:[#allocation4] sm:$0xff] %vm888_vm2, %v5066_v14  ;;  %v12749_v14 = vld [vmem:[#allocation2 + $0x2e4] sm:$0xff] }
 0x715   : > { %v5072_v62 = vpop.permute.xlu1 %5071  ;;  %5309 = vrot.lane.b32.xlu0 %v12729_v34, %s9661_s21  ;;  %14666 = vst [vmem:[#allocation35_spill] sm:$0xff] %v12749_v14 }
 0x716   : > { %5164 = vst.msk [vmem:[#allocation4 + $0x18] sm:$0xff] %vm888_vm2, %v5072_v62 }
 0x717   : > { %5315 = vrot.lane.b32.xlu1 %v12731_v26, %s9661_s21  ;;  %v5070_v22 = vpop.permute.xlu0 %5069 }
 0x718   : > { %5163 = vst.msk [vmem:[#allocation4 + $0x10] sm:$0xff] %vm888_vm2, %v5070_v22 }
 0x719   : > { %v5076_v54 = vpop.permute.xlu1 %5075  ;;  %5313 = vrot.lane.b32.xlu0 %v12739_v27, %s9661_s21 }
 0x71a   : > { %5166 = vst.msk [vmem:[#allocation4 + $0x28] sm:$0xff] %vm888_vm2, %v5076_v54 }
 0x71b   : > { %5319 = vrot.lane.b32.xlu1 %v12741_v48, %s9661_s21  ;;  %v5074_v16 = vpop.permute.xlu0 %5073 }
 0x71c   : > { %5165 = vst.msk [vmem:[#allocation4 + $0x20] sm:$0xff] %vm888_vm2, %v5074_v16 }
 0x71d   : > { %v5080_v62 = vpop.permute.xlu1 %5079  ;;  %5317 = vrot.lane.b32.xlu0 %v12749_v14, %s9661_s21 }
 0x71e   : > { %5168 = vst.msk [vmem:[#allocation4 + $0x38] sm:$0xff] %vm888_vm2, %v5080_v62  ;;  %v14668_v62 = vld [vmem:[#allocation32_spill] sm:$0xff] }
 0x71f   : > { %5451 = vrot.lane.b32.xlu1 %v12284_v15, %s9662_s22  ;;  %v5078_v22 = vpop.permute.xlu0 %5077 }
 0x720   : > { %5167 = vst.msk [vmem:[#allocation4 + $0x30] sm:$0xff] %vm888_vm2, %v5078_v22 }
 0x721   : > { %v5084_v54 = vpop.permute.xlu1 %5083  ;;  %5449 = vrot.lane.b32.xlu0 %v12291_v52, %s9662_s22 }
 0x722   : > { %5170 = vst.msk [vmem:[#allocation4 + $0x48] sm:$0xff] %vm888_vm2, %v5084_v54  ;;  %v14670_v54 = vld [vmem:[#allocation34_spill] sm:$0xff] }
 0x723   : > { %5455 = vrot.lane.b32.xlu1 %v12306_v56, %s9662_s22  ;;  %v5082_v16 = vpop.permute.xlu0 %5081 }
 0x724   : > { %5169 = vst.msk [vmem:[#allocation4 + $0x40] sm:$0xff] %vm888_vm2, %v5082_v16  ;;  %v12826_v16 = vld [vmem:[#allocation2 + $0x290] sm:$0xff] }
 0x725   : > { %v5088_v14 = vpop.permute.xlu1 %5087  ;;  %5453 = vrot.lane.b32.xlu0 %v12313_v41, %s9662_s22 }
 0x726   : > { %5172 = vst.msk [vmem:[#allocation4 + $0x58] sm:$0xff] %vm888_vm2, %v5088_v14 }
 0x727   : > { %5459 = vrot.lane.b32.xlu1 %v12328_v6, %s9662_s22  ;;  %v5086_v15 = vpop.permute.xlu0 %5085 }
 0x728   : > { %5171 = vst.msk [vmem:[#allocation4 + $0x50] sm:$0xff] %vm888_vm2, %v5086_v15 }
 0x729   : > { %v5092_v52 = vpop.permute.xlu1 %5091  ;;  %5457 = vrot.lane.b32.xlu0 %v12335_v25, %s9662_s22 }
 0x72a   : > { %5174 = vst.msk [vmem:[#allocation4 + $0x68] sm:$0xff] %vm888_vm2, %v5092_v52  ;;  %v12831_v52 = vld [vmem:[#allocation2 + $0x288] sm:$0xff] }
 0x72b   : > { %5463 = vrot.lane.b32.xlu1 %v12350_v32, %s9662_s22  ;;  %v5090_v56 = vpop.permute.xlu0 %5089 }
 0x72c   : > { %5173 = vst.msk [vmem:[#allocation4 + $0x60] sm:$0xff] %vm888_vm2, %v5090_v56 }
 0x72d   : > { %v5096_v41 = vpop.permute.xlu1 %5095  ;;  %5461 = vrot.lane.b32.xlu0 %v12357_v36, %s9662_s22 }
 0x72e   : > { %5176 = vst.msk [vmem:[#allocation4 + $0x78] sm:$0xff] %vm888_vm2, %v5096_v41  ;;  %v12836_v41 = vld [vmem:[#allocation2 + $0x2b0] sm:$0xff] }
 0x72f   : > { %5467 = vrot.lane.b32.xlu1 %v12372_v21, %s9662_s22  ;;  %v5094_v6 = vpop.permute.xlu0 %5093 }
 0x730   : > { %5175 = vst.msk [vmem:[#allocation4 + $0x70] sm:$0xff] %vm888_vm2, %v5094_v6 }
 0x731   : > { %v5100_v25 = vpop.permute.xlu1 %5099  ;;  %5465 = vrot.lane.b32.xlu0 %v12379_v23, %s9662_s22 }
 0x732   : > { %5178 = vst.msk [vmem:[#allocation4 + $0x88] sm:$0xff] %vm888_vm2, %v5100_v25  ;;  %v12841_v25 = vld [vmem:[#allocation2 + $0x2a8] sm:$0xff] }
 0x733   : > { %5471 = vrot.lane.b32.xlu1 %v12394_v35, %s9662_s22  ;;  %v5098_v32 = vpop.permute.xlu0 %5097 }
 0x734   : > { %5177 = vst.msk [vmem:[#allocation4 + $0x80] sm:$0xff] %vm888_vm2, %v5098_v32 }
 0x735   : > { %v5104_v36 = vpop.permute.xlu1 %5103  ;;  %5469 = vrot.lane.b32.xlu0 %v12401_v10, %s9662_s22 }
 0x736   : > { %5180 = vst.msk [vmem:[#allocation4 + $0x98] sm:$0xff] %vm888_vm2, %v5104_v36  ;;  %v12846_v36 = vld [vmem:[#allocation2 + $0x2d0] sm:$0xff] }
 0x737   : > { %5475 = vrot.lane.b32.xlu1 %v12416_v17, %s9662_s22  ;;  %v5102_v21 = vpop.permute.xlu0 %5101 }
 0x738   : > { %5179 = vst.msk [vmem:[#allocation4 + $0x90] sm:$0xff] %vm888_vm2, %v5102_v21 }
 0x739   : > { %v5108_v23 = vpop.permute.xlu1 %5107  ;;  %5473 = vrot.lane.b32.xlu0 %v12423_v18, %s9662_s22 }
 0x73a   : > { %5182 = vst.msk [vmem:[#allocation4 + $0xa8] sm:$0xff] %vm888_vm2, %v5108_v23  ;;  %v12851_v23 = vld [vmem:[#allocation2 + $0x2c8] sm:$0xff] }
 0x73b   : > { %5479 = vrot.lane.b32.xlu1 %v12438_v24, %s9662_s22  ;;  %v5106_v35 = vpop.permute.xlu0 %5105 }
 0x73c   : > { %5181 = vst.msk [vmem:[#allocation4 + $0xa0] sm:$0xff] %vm888_vm2, %v5106_v35 }
 0x73d   : > { %v5112_v10 = vpop.permute.xlu1 %5111  ;;  %5477 = vrot.lane.b32.xlu0 %v12445_v0, %s9662_s22 }
 0x73e   : > { %5184 = vst.msk [vmem:[#allocation4 + $0xb8] sm:$0xff] %vm888_vm2, %v5112_v10  ;;  %v12856_v10 = vld [vmem:[#allocation2 + $0x2f0] sm:$0xff] }
 0x73f   : > { %5483 = vrot.lane.b32.xlu1 %v12460_v59, %s9662_s22  ;;  %v5110_v17 = vpop.permute.xlu0 %5109  ;;  %v14667_v59 = vld [vmem:[#allocation31_spill] sm:$0xff] }
 0x740   : > { %5183 = vst.msk [vmem:[#allocation4 + $0xb0] sm:$0xff] %vm888_vm2, %v5110_v17 }
 0x741   : > { %v5116_v18 = vpop.permute.xlu1 %5115  ;;  %5481 = vrot.lane.b32.xlu0 %v12467_v45, %s9662_s22 }
 0x742   : > { %5186 = vst.msk [vmem:[#allocation4 + $0xc8] sm:$0xff] %vm888_vm2, %v5116_v18  ;;  %v12861_v18 = vld [vmem:[#allocation2 + $0x2e8] sm:$0xff] }
 0x743   : > { %5487 = vrot.lane.b32.xlu1 %v12482_v57, %s9662_s22  ;;  %v5114_v24 = vpop.permute.xlu0 %5113  ;;  %v14669_v57 = vld [vmem:[#allocation33_spill] sm:$0xff] }
 0x744   : > { %5185 = vst.msk [vmem:[#allocation4 + $0xc0] sm:$0xff] %vm888_vm2, %v5114_v24 }
 0x745   : > { %v5120_v0 = vpop.permute.xlu1 %5119  ;;  %5485 = vrot.lane.b32.xlu0 %v12489_v46, %s9662_s22 }
 0x746   : > { %5188 = vst.msk [vmem:[#allocation4 + $0xd8] sm:$0xff] %vm888_vm2, %v5120_v0 }
 0x747   : > { %5491 = vrot.lane.b32.xlu1 %v14667_v59, %s9662_s22  ;;  %v5118_v14 = vpop.permute.xlu0 %5117 }
 0x748   : > { %5187 = vst.msk [vmem:[#allocation4 + $0xd0] sm:$0xff] %vm888_vm2, %v5118_v14 }
 0x749   : > { %v5124_v45 = vpop.permute.xlu1 %5123  ;;  %5489 = vrot.lane.b32.xlu0 %v14668_v62, %s9662_s22 }
 0x74a   : > { %5190 = vst.msk [vmem:[#allocation4 + $0xe8] sm:$0xff] %vm888_vm2, %v5124_v45 }
 0x74b   : > { %5495 = vrot.lane.b32.xlu1 %v14669_v57, %s9662_s22  ;;  %v5122_v22 = vpop.permute.xlu0 %5121 }
 0x74c   : > { %5189 = vst.msk [vmem:[#allocation4 + $0xe0] sm:$0xff] %vm888_vm2, %v5122_v22 }
 0x74d   : > { %v5128_v46 = vpop.permute.xlu1 %5127  ;;  %5493 = vrot.lane.b32.xlu0 %v14670_v54, %s9662_s22 }
 0x74e   : > { %5192 = vst.msk [vmem:[#allocation4 + $0xf8] sm:$0xff] %vm888_vm2, %v5128_v46 }
 0x74f   : > { %5499 = vrot.lane.b32.xlu1 %v12826_v16, %s9662_s22  ;;  %v5126_v15 = vpop.permute.xlu0 %5125 }
 0x750   : > { %5191 = vst.msk [vmem:[#allocation4 + $0xf0] sm:$0xff] %vm888_vm2, %v5126_v15 }
 0x751   : > { %v5260_v56 = vpop.permute.xlu1 %5259  ;;  %5497 = vrot.lane.b32.xlu0 %v12831_v52, %s9662_s22 }
 0x752   : > { %5354 = vst.msk [vmem:[#allocation4 + $0x8] sm:$0xff] %vm1081_vm3, %v5260_v56 }
 0x753   : > { %5503 = vrot.lane.b32.xlu1 %v12836_v41, %s9662_s22  ;;  %v5258_v6 = vpop.permute.xlu0 %5257 }
 0x754   : > { %5353 = vst.msk [vmem:[#allocation4] sm:$0xff] %vm1081_vm3, %v5258_v6 }
 0x755   : > { %v5264_v32 = vpop.permute.xlu1 %5263  ;;  %5501 = vrot.lane.b32.xlu0 %v12841_v25, %s9662_s22 }
 0x756   : > { %5356 = vst.msk [vmem:[#allocation4 + $0x18] sm:$0xff] %vm1081_vm3, %v5264_v32 }
 0x757   : > { %5507 = vrot.lane.b32.xlu1 %v12846_v36, %s9662_s22  ;;  %v5262_v21 = vpop.permute.xlu0 %5261 }
 0x758   : > { %5355 = vst.msk [vmem:[#allocation4 + $0x10] sm:$0xff] %vm1081_vm3, %v5262_v21 }
 0x759   : > { %v5268_v35 = vpop.permute.xlu1 %5267  ;;  %5505 = vrot.lane.b32.xlu0 %v12851_v23, %s9662_s22 }
 0x75a   : > { %5358 = vst.msk [vmem:[#allocation4 + $0x28] sm:$0xff] %vm1081_vm3, %v5268_v35  ;;  %v12954_v35 = vld [vmem:[#allocation2 + $0x2d4] sm:$0xff] }
 0x75b   : > { %5511 = vrot.lane.b32.xlu1 %v12856_v10, %s9662_s22  ;;  %v5266_v17 = vpop.permute.xlu0 %5265 }
 0x75c   : > { %5357 = vst.msk [vmem:[#allocation4 + $0x20] sm:$0xff] %vm1081_vm3, %v5266_v17 }
 0x75d   : > { %v5272_v24 = vpop.permute.xlu1 %5271  ;;  %5509 = vrot.lane.b32.xlu0 %v12861_v18, %s9662_s22 }
 0x75e   : > { %5360 = vst.msk [vmem:[#allocation4 + $0x38] sm:$0xff] %vm1081_vm3, %v5272_v24 }
 0x75f   : > { %5643 = vrot.lane.b32.xlu1 %v12571_v31, %s9663_s23  ;;  %v5270_v0 = vpop.permute.xlu0 %5269 }
 0x760   : > { %5359 = vst.msk [vmem:[#allocation4 + $0x30] sm:$0xff] %vm1081_vm3, %v5270_v0  ;;  %v12962_v0 = vld [vmem:[#allocation2 + $0x2f4] sm:$0xff] }
 0x761   : > { %v5276_v59 = vpop.permute.xlu1 %5275  ;;  %5641 = vrot.lane.b32.xlu0 %v12293_v53, %s9663_s23 }
 0x762   : > { %5362 = vst.msk [vmem:[#allocation4 + $0x48] sm:$0xff] %vm1081_vm3, %v5276_v59 }
 0x763   : > { %5647 = vrot.lane.b32.xlu1 %v12577_v63, %s9663_s23  ;;  %v5274_v14 = vpop.permute.xlu0 %5273 }
 0x764   : > { %5361 = vst.msk [vmem:[#allocation4 + $0x40] sm:$0xff] %vm1081_vm3, %v5274_v14 }
 0x765   : > { %v5280_v45 = vpop.permute.xlu1 %5279  ;;  %5645 = vrot.lane.b32.xlu0 %v12315_v43, %s9663_s23 }
 0x766   : > { %5364 = vst.msk [vmem:[#allocation4 + $0x58] sm:$0xff] %vm1081_vm3, %v5280_v45 }
 0x767   : > { %5651 = vrot.lane.b32.xlu1 %v12583_v38, %s9663_s23  ;;  %v5278_v31 = vpop.permute.xlu0 %5277 }
 0x768   : > { %5363 = vst.msk [vmem:[#allocation4 + $0x50] sm:$0xff] %vm1081_vm3, %v5278_v31 }
 0x769   : > { %v5284_v53 = vpop.permute.xlu1 %5283  ;;  %5649 = vrot.lane.b32.xlu0 %v12337_v61, %s9663_s23 }
 0x76a   : > { %5366 = vst.msk [vmem:[#allocation4 + $0x68] sm:$0xff] %vm1081_vm3, %v5284_v53 }
 0x76b   : > { %5655 = vrot.lane.b32.xlu1 %v12589_v55, %s9663_s23  ;;  %v5282_v63 = vpop.permute.xlu0 %5281 }
 0x76c   : > { %5365 = vst.msk [vmem:[#allocation4 + $0x60] sm:$0xff] %vm1081_vm3, %v5282_v63 }
 0x76d   : > { %v5288_v43 = vpop.permute.xlu1 %5287  ;;  %5653 = vrot.lane.b32.xlu0 %v12359_v33, %s9663_s23 }
 0x76e   : > { %5368 = vst.msk [vmem:[#allocation4 + $0x78] sm:$0xff] %vm1081_vm3, %v5288_v43 }
 0x76f   : > { %5659 = vrot.lane.b32.xlu1 %v12595_v7, %s9663_s23  ;;  %v5286_v38 = vpop.permute.xlu0 %5285 }
 0x770   : > { %5367 = vst.msk [vmem:[#allocation4 + $0x70] sm:$0xff] %vm1081_vm3, %v5286_v38  ;;  %v13047_v38 = vld [vmem:[#allocation2 + $0x30c] sm:$0xff] }
 0x771   : > { %v5292_v61 = vpop.permute.xlu1 %5291  ;;  %5657 = vrot.lane.b32.xlu0 %v12381_v49, %s9663_s23 }
 0x772   : > { %5370 = vst.msk [vmem:[#allocation4 + $0x88] sm:$0xff] %vm1081_vm3, %v5292_v61 }
 0x773   : > { %5663 = vrot.lane.b32.xlu1 %v12601_v2, %s9663_s23  ;;  %v5290_v55 = vpop.permute.xlu0 %5289 }
 0x774   : > { %5369 = vst.msk [vmem:[#allocation4 + $0x80] sm:$0xff] %vm1081_vm3, %v5290_v55  ;;  %v5794_v55 = vld [vmem:[#allocation2 + $0x304] sm:$0xff] }
 0x775   : > { %v5296_v33 = vpop.permute.xlu1 %5295  ;;  %5661 = vrot.lane.b32.xlu0 %v12403_v8, %s9663_s23 }
 0x776   : > { %5372 = vst.msk [vmem:[#allocation4 + $0x98] sm:$0xff] %vm1081_vm3, %v5296_v33  ;;  %v13055_v33 = vld [vmem:[#allocation2 + $0x32c] sm:$0xff] }
 0x777   : > { %5667 = vrot.lane.b32.xlu1 %v12607_v13, %s9663_s23  ;;  %v5294_v7 = vpop.permute.xlu0 %5293 }
 0x778   : > { %5371 = vst.msk [vmem:[#allocation4 + $0x90] sm:$0xff] %vm1081_vm3, %v5294_v7  ;;  %v5796_v7 = vld [vmem:[#allocation2 + $0x324] sm:$0xff] }
 0x779   : > { %v5300_v62 = vpop.permute.xlu1 %5299  ;;  %5665 = vrot.lane.b32.xlu0 %v12425_v50, %s9663_s23 }
 0x77a   : > { %5374 = vst.msk [vmem:[#allocation4 + $0xa8] sm:$0xff] %vm1081_vm3, %v5300_v62  ;;  %v9171_v62 = vld [vmem:[%s14488_s1 + $0x60] sm:$0xff] }
 0x77b   : > { %5671 = vrot.lane.b32.xlu1 %v12613_v28, %s9663_s23  ;;  %v5298_v2 = vpop.permute.xlu0 %5297 }
 0x77c   : > { %5373 = vst.msk [vmem:[#allocation4 + $0xa0] sm:$0xff] %vm1081_vm3, %v5298_v2 }
 0x77d   : > { %v5304_v57 = vpop.permute.xlu1 %5303  ;;  %5669 = vrot.lane.b32.xlu0 %v12447_v4, %s9663_s23 }
 0x77e   : > { %5376 = vst.msk [vmem:[#allocation4 + $0xb8] sm:$0xff] %vm1081_vm3, %v5304_v57  ;;  %v13065_v57 = vld [vmem:[#allocation2 + $0x34c] sm:$0xff] }
 0x77f   : > { %5675 = vrot.lane.b32.xlu1 %v12619_v51, %s9663_s23  ;;  %v5302_v13 = vpop.permute.xlu0 %5301 }
 0x780   : > { %5375 = vst.msk [vmem:[#allocation4 + $0xb0] sm:$0xff] %vm1081_vm3, %v5302_v13 }
 0x781   : > { %v5308_v22 = vpop.permute.xlu1 %5307  ;;  %5673 = vrot.lane.b32.xlu0 %v12469_v5, %s9663_s23 }
 0x782   : > { %5378 = vst.msk [vmem:[#allocation4 + $0xc8] sm:$0xff] %vm1081_vm3, %v5308_v22  ;;  %v5798_v22 = vld [vmem:[#allocation2 + $0x344] sm:$0xff] }
 0x783   : > { %5679 = vrot.lane.b32.xlu1 %v12625_v3, %s9663_s23  ;;  %v5306_v28 = vpop.permute.xlu0 %5305 }
 0x784   : > { %5377 = vst.msk [vmem:[#allocation4 + $0xc0] sm:$0xff] %vm1081_vm3, %v5306_v28 }
 0x785   : > { %v5312_v46 = vpop.permute.xlu1 %5311  ;;  %5677 = vrot.lane.b32.xlu0 %v12491_v9, %s9663_s23 }
 0x786   : > { %5380 = vst.msk [vmem:[#allocation4 + $0xd8] sm:$0xff] %vm1081_vm3, %v5312_v46  ;;  %v9170_v46 = vld [vmem:[%s14488_s1 + $0x58] sm:$0xff] }
 0x787   : > { %5683 = vrot.lane.b32.xlu1 %v12631_v11, %s9663_s23  ;;  %v5310_v51 = vpop.permute.xlu0 %5309  ;;  %v12938_v11 = vld [vmem:[#allocation2 + $0x294] sm:$0xff] }
 0x788   : > { %5379 = vst.msk [vmem:[#allocation4 + $0xd0] sm:$0xff] %vm1081_vm3, %v5310_v51 }
 0x789   : > { %v5316_v54 = vpop.permute.xlu1 %5315  ;;  %5681 = vrot.lane.b32.xlu0 %v12513_v39, %s9663_s23 }
 0x78a   : > { %5382 = vst.msk [vmem:[#allocation4 + $0xe8] sm:$0xff] %vm1081_vm3, %v5316_v54  ;;  %v5963_v54 = vld [vmem:[#allocation2 + $0x190] sm:$0xff] }
 0x78b   : > { %5687 = vrot.lane.b32.xlu1 %v12637_v42, %s9663_s23  ;;  %v5314_v3 = vpop.permute.xlu0 %5313  ;;  %v12946_v42 = vld [vmem:[#allocation2 + $0x2b4] sm:$0xff] }
 0x78c   : > { %5381 = vst.msk [vmem:[#allocation4 + $0xe0] sm:$0xff] %vm1081_vm3, %v5314_v3  ;;  %v9169_v3 = vld [vmem:[%s14488_s1 + $0x50] sm:$0xff] }
 0x78d   : > { %v5320_v15 = vpop.permute.xlu1 %5319  ;;  %5685 = vrot.lane.b32.xlu0 %v12535_v37, %s9663_s23 }
 0x78e   : > { %5384 = vst.msk [vmem:[#allocation4 + $0xf8] sm:$0xff] %vm1081_vm3, %v5320_v15 }
 0x78f   : > { %5691 = vrot.lane.b32.xlu1 %v12938_v11, %s9663_s23  ;;  %v5318_v56 = vpop.permute.xlu0 %5317 }
 0x790   : > { %5383 = vst.msk [vmem:[#allocation4 + $0xf0] sm:$0xff] %vm1081_vm3, %v5318_v56  ;;  %v5962_v56 = vld [vmem:[#allocation2 + $0x188] sm:$0xff] }
 0x791   : > { %v5452_v6 = vpop.permute.xlu1 %5451  ;;  %5689 = vrot.lane.b32.xlu0 %v12714_v44, %s9663_s23 }
 0x792   : > { %5546 = vst.msk [vmem:[#allocation4 + $0x8] sm:$0xff] %vm1274_vm4, %v5452_v6 }
 0x793   : > { %5695 = vrot.lane.b32.xlu1 %v12946_v42, %s9663_s23  ;;  %v5450_v32 = vpop.permute.xlu0 %5449 }
 0x794   : > { %5545 = vst.msk [vmem:[#allocation4] sm:$0xff] %vm1274_vm4, %v5450_v32  ;;  %v6155_v32 = vld [vmem:[#allocation2 + $0x194] sm:$0xff] }
 0x795   : > { %v5456_v21 = vpop.permute.xlu1 %5455  ;;  %5693 = vrot.lane.b32.xlu0 %v12724_v60, %s9663_s23 }
 0x796   : > { %5548 = vst.msk [vmem:[#allocation4 + $0x18] sm:$0xff] %vm1274_vm4, %v5456_v21 }
 0x797   : > { %5699 = vrot.lane.b32.xlu1 %v12954_v35, %s9663_s23  ;;  %v5454_v17 = vpop.permute.xlu0 %5453 }
 0x798   : > { %5547 = vst.msk [vmem:[#allocation4 + $0x10] sm:$0xff] %vm1274_vm4, %v5454_v17  ;;  %v6154_v17 = vld [vmem:[#allocation2 + $0x18c] sm:$0xff] }
 0x799   : > { %v5460_v24 = vpop.permute.xlu1 %5459  ;;  %5697 = vrot.lane.b32.xlu0 %v12731_v26, %s9663_s23 }
 0x79a   : > { %5550 = vst.msk [vmem:[#allocation4 + $0x28] sm:$0xff] %vm1274_vm4, %v5460_v24 }
 0x79b   : > { %5703 = vrot.lane.b32.xlu1 %v12962_v0, %s9663_s23  ;;  %v5458_v59 = vpop.permute.xlu0 %5457 }
 0x79c   : > { %5549 = vst.msk [vmem:[#allocation4 + $0x20] sm:$0xff] %vm1274_vm4, %v5458_v59  ;;  %v5965_v59 = vld [vmem:[#allocation2 + $0x1b0] sm:$0xff] }
 0x79d   : > { %v5464_v14 = vpop.permute.xlu1 %5463  ;;  %5701 = vrot.lane.b32.xlu0 %v12741_v48, %s9663_s23 }
 0x79e   : > { %5552 = vst.msk [vmem:[#allocation4 + $0x38] sm:$0xff] %vm1274_vm4, %v5464_v14 }
 0x79f   : > { %5836 = vrot.lane.b32.xlu1 %v12381_v49, %s9664_s24  ;;  %v5462_v45 = vpop.permute.xlu0 %5461 }
 0x7a0   : > { %5551 = vst.msk [vmem:[#allocation4 + $0x30] sm:$0xff] %vm1274_vm4, %v5462_v45  ;;  %v5964_v45 = vld [vmem:[#allocation2 + $0x1a8] sm:$0xff] }
 0x7a1   : > { %v5468_v31 = vpop.permute.xlu1 %5467  ;;  %5834 = vrot.lane.b32.xlu0 %v12383_v29, %s9664_s24 }
 0x7a2   : > { %5554 = vst.msk [vmem:[#allocation4 + $0x48] sm:$0xff] %vm1274_vm4, %v5468_v31 }
 0x7a3   : > { %5840 = vrot.lane.b32.xlu1 %v12403_v8, %s9664_s24  ;;  %v5466_v53 = vpop.permute.xlu0 %5465 }
 0x7a4   : > { %5553 = vst.msk [vmem:[#allocation4 + $0x40] sm:$0xff] %vm1274_vm4, %v5466_v53  ;;  %v6157_v53 = vld [vmem:[#allocation2 + $0x1b4] sm:$0xff] }
 0x7a5   : > { %v5472_v63 = vpop.permute.xlu1 %5471  ;;  %5838 = vrot.lane.b32.xlu0 %v12405_v47, %s9664_s24 }
 0x7a6   : > { %5556 = vst.msk [vmem:[#allocation4 + $0x58] sm:$0xff] %vm1274_vm4, %v5472_v63 }
 0x7a7   : > { %5844 = vrot.lane.b32.xlu1 %v12425_v50, %s9664_s24  ;;  %v5470_v49 = vpop.permute.xlu0 %5469 }
 0x7a8   : > { %5555 = vst.msk [vmem:[#allocation4 + $0x50] sm:$0xff] %vm1274_vm4, %v5470_v49  ;;  %v6156_v49 = vld [vmem:[#allocation2 + $0x1ac] sm:$0xff] }
 0x7a9   : > { %v5476_v29 = vpop.permute.xlu1 %5475  ;;  %5842 = vrot.lane.b32.xlu0 %v12427_v12, %s9664_s24 }
 0x7aa   : > { %5558 = vst.msk [vmem:[#allocation4 + $0x68] sm:$0xff] %vm1274_vm4, %v5476_v29 }
 0x7ab   : > { %5848 = vrot.lane.b32.xlu1 %v12447_v4, %s9664_s24  ;;  %v5474_v8 = vpop.permute.xlu0 %5473 }
 0x7ac   : > { %5557 = vst.msk [vmem:[#allocation4 + $0x60] sm:$0xff] %vm1274_vm4, %v5474_v8  ;;  %v5967_v8 = vld [vmem:[#allocation2 + $0x1d0] sm:$0xff] }
 0x7ad   : > { %v5480_v47 = vpop.permute.xlu1 %5479  ;;  %5846 = vrot.lane.b32.xlu0 %v12449_v19, %s9664_s24 }
 0x7ae   : > { %5560 = vst.msk [vmem:[#allocation4 + $0x78] sm:$0xff] %vm1274_vm4, %v5480_v47 }
 0x7af   : > { %5852 = vrot.lane.b32.xlu1 %v12469_v5, %s9664_s24  ;;  %v5478_v50 = vpop.permute.xlu0 %5477 }
 0x7b0   : > { %5559 = vst.msk [vmem:[#allocation4 + $0x70] sm:$0xff] %vm1274_vm4, %v5478_v50  ;;  %v5966_v50 = vld [vmem:[#allocation2 + $0x1c8] sm:$0xff] }
 0x7b1   : > { %v5484_v12 = vpop.permute.xlu1 %5483  ;;  %5850 = vrot.lane.b32.xlu0 %v12471_v58, %s9664_s24  ;;  %v9173_v58 = vld [vmem:[%s14488_s1 + $0x70] sm:$0xf] }
 0x7b2   : > { %5562 = vst.msk [vmem:[#allocation4 + $0x88] sm:$0xff] %vm1274_vm4, %v5484_v12  ;;  %9517 = vmatprep.subr.msk.mxu0 %vm2215_vm7, %v9173_v58 }
 0x7b3   : > { %5856 = vrot.lane.b32.xlu1 %v12491_v9, %s9664_s24  ;;  %v5482_v4 = vpop.permute.xlu0 %5481  ;;  %9518 = vmatpush3.msk.msra.mxu0 %vm2215_vm7, %v9173_v58 }
 0x7b4   : > { %5561 = vst.msk [vmem:[#allocation4 + $0x80] sm:$0xff] %vm1274_vm4, %v5482_v4  ;;  %v6159_v4 = vld [vmem:[#allocation2 + $0x1d4] sm:$0xff] }
 0x7b5   : > { %v5488_v19 = vpop.permute.xlu1 %5487  ;;  %5854 = vrot.lane.b32.xlu0 %v12493_v20, %s9664_s24 }
 0x7b6   : > { %5564 = vst.msk [vmem:[#allocation4 + $0x98] sm:$0xff] %vm1274_vm4, %v5488_v19 }
 0x7b7   : > { %5860 = vrot.lane.b32.xlu1 %v12513_v39, %s9664_s24  ;;  %v5486_v5 = vpop.permute.xlu0 %5485 }
 0x7b8   : > { %5563 = vst.msk [vmem:[#allocation4 + $0x90] sm:$0xff] %vm1274_vm4, %v5486_v5  ;;  %v6158_v5 = vld [vmem:[#allocation2 + $0x1cc] sm:$0xff] }
 0x7b9   : > { %v5492_v9 = vpop.permute.xlu1 %5491  ;;  %5858 = vrot.lane.b32.xlu0 %v12515_v30, %s9664_s24 }
 0x7ba   : > { %5566 = vst.msk [vmem:[#allocation4 + $0xa8] sm:$0xff] %vm1274_vm4, %v5492_v9  ;;  %v5969_v9 = vld [vmem:[#allocation2 + $0x1f0] sm:$0xff] }
 0x7bb   : > { %5864 = vrot.lane.b32.xlu1 %v12535_v37, %s9664_s24  ;;  %v5490_v20 = vpop.permute.xlu0 %5489 }
 0x7bc   : > { %5565 = vst.msk [vmem:[#allocation4 + $0xa0] sm:$0xff] %vm1274_vm4, %v5490_v20 }
 0x7bd   : > { %v5496_v39 = vpop.permute.xlu1 %5495  ;;  %5862 = vrot.lane.b32.xlu0 %v12537_v40, %s9664_s24  ;;  %v9172_v40 = vld [vmem:[%s14488_s1 + $0x68] sm:$0xff] }
 0x7be   : > { %5568 = vst.msk [vmem:[#allocation4 + $0xb8] sm:$0xff] %vm1274_vm4, %v5496_v39  ;;  %9519 = vmatprep.subr.mxu0 %v9172_v40  ;;  %v5968_v39 = vld [vmem:[#allocation2 + $0x1e8] sm:$0xff] }
 0x7bf   : > { %5868 = vrot.lane.b32.xlu1 %v12714_v44, %s9664_s24  ;;  %v5494_v30 = vpop.permute.xlu0 %5493  ;;  %9520 = vmatpush3.msra.mxu0 %v9172_v40  ;;  %v6160_v40 = vld [vmem:[#allocation2 + $0x1ec] sm:$0xff] }
 0x7c0   : > { %5567 = vst.msk [vmem:[#allocation4 + $0xb0] sm:$0xff] %vm1274_vm4, %v5494_v30  ;;  %9521 = vmatprep.subr.mxu0 %v9171_v62 }
 0x7c1   : > { %v5500_v43 = vpop.permute.xlu1 %5499  ;;  %5866 = vrot.lane.b32.xlu0 %v12719_v1, %s9664_s24  ;;  %9522 = vmatpush3.msra.mxu0 %v9171_v62 }
 0x7c2   : > { %5570 = vst.msk [vmem:[#allocation4 + $0xc8] sm:$0xff] %vm1274_vm4, %v5500_v43  ;;  %9523 = vmatprep.subr.mxu0 %v9170_v46  ;;  %v6161_v43 = vld [vmem:[#allocation2 + $0x1f4] sm:$0xff] }
 0x7c3   : > { %5872 = vrot.lane.b32.xlu1 %v12724_v60, %s9664_s24  ;;  %v5498_v37 = vpop.permute.xlu0 %5497  ;;  %9524 = vmatpush3.msra.mxu0 %v9170_v46  ;;  %v6164_v46 = vld [vmem:[#allocation2 + $0x22c] sm:$0xff] }
 0x7c4   : > { %5569 = vst.msk [vmem:[#allocation4 + $0xc0] sm:$0xff] %vm1274_vm4, %v5498_v37  ;;  %9525 = vmatprep.subr.mxu0 %v9169_v3 }
 0x7c5   : > { %v5504_v44 = vpop.permute.xlu1 %5503  ;;  %5870 = vrot.lane.b32.xlu0 %v12729_v34, %s9664_s24  ;;  %9526 = vmatpush3.msra.mxu0 %v9169_v3 }
 0x7c6   : > { %5572 = vst.msk [vmem:[#allocation4 + $0xd8] sm:$0xff] %vm1274_vm4, %v5504_v44 }
 0x7c7   : > { %5876 = vrot.lane.b32.xlu1 %v12731_v26, %s9664_s24  ;;  %v5502_v1 = vpop.permute.xlu0 %5501  ;;  %v14671_v26 = vld [vmem:[#allocation35_spill] sm:$0xff] }
 0x7c8   : > { %5571 = vst.msk [vmem:[#allocation4 + $0xd0] sm:$0xff] %vm1274_vm4, %v5502_v1  ;;  %v5971_v1 = vld [vmem:[#allocation2 + $0x210] sm:$0xff] }
 0x7c9   : > { %v5508_v60 = vpop.permute.xlu1 %5507  ;;  %5874 = vrot.lane.b32.xlu0 %v12739_v27, %s9664_s24 }
 0x7ca   : > { %5574 = vst.msk [vmem:[#allocation4 + $0xe8] sm:$0xff] %vm1274_vm4, %v5508_v60 }
 0x7cb   : > { %5880 = vrot.lane.b32.xlu1 %v12741_v48, %s9664_s24  ;;  %v5506_v34 = vpop.permute.xlu0 %5505 }
 0x7cc   : > { %5573 = vst.msk [vmem:[#allocation4 + $0xe0] sm:$0xff] %vm1274_vm4, %v5506_v34  ;;  %v5970_v34 = vld [vmem:[#allocation2 + $0x208] sm:$0xff] }
 0x7cd   : > { %v5512_v61 = vpop.permute.xlu1 %5511  ;;  %5878 = vrot.lane.b32.xlu0 %v14671_v26, %s9664_s24  ;;  %v6163_v26 = vld [vmem:[#allocation2 + $0x214] sm:$0xff] }
 0x7ce   : > { %5576 = vst.msk [vmem:[#allocation4 + $0xf8] sm:$0xff] %vm1274_vm4, %v5512_v61 }
 0x7cf   : > { %5884 = vrot.lane.b32.xlu1 %v13047_v38, %s9664_s24  ;;  %v5510_v27 = vpop.permute.xlu0 %5509 }
 0x7d0   : > { %5575 = vst.msk [vmem:[#allocation4 + $0xf0] sm:$0xff] %vm1274_vm4, %v5510_v27  ;;  %v6162_v27 = vld [vmem:[#allocation2 + $0x20c] sm:$0xff] }
 0x7d1   : > { %v5644_v48 = vpop.permute.xlu1 %5643  ;;  %5882 = vrot.lane.b32.xlu0 %v5794_v55, %s9664_s24 }
 0x7d2   : > { %5738 = vst.msk [vmem:[#allocation4 + $0x8] sm:$0xff] %vm1467_vm5, %v5644_v48 }
 0x7d3   : > { %5888 = vrot.lane.b32.xlu1 %v13055_v33, %s9664_s24  ;;  %v5642_v2 = vpop.permute.xlu0 %5641 }
 0x7d4   : > { %5737 = vst.msk [vmem:[#allocation4] sm:$0xff] %vm1467_vm5, %v5642_v2  ;;  %v5972_v2 = vld [vmem:[#allocation2 + $0x228] sm:$0xff] }
 0x7d5   : > { %v5648_v13 = vpop.permute.xlu1 %5647  ;;  %5886 = vrot.lane.b32.xlu0 %v5796_v7, %s9664_s24  ;;  %v5973_v7 = vld [vmem:[#allocation2 + $0x230] sm:$0xff] }
 0x7d6   : > { %5740 = vst.msk [vmem:[#allocation4 + $0x18] sm:$0xff] %vm1467_vm5, %v5648_v13 }
 0x7d7   : > { %5892 = vrot.lane.b32.xlu1 %v13065_v57, %s9664_s24  ;;  %v5646_v28 = vpop.permute.xlu0 %5645 }
 0x7d8   : > { %5739 = vst.msk [vmem:[#allocation4 + $0x10] sm:$0xff] %vm1467_vm5, %v5646_v28 }
 0x7d9   : > { %v5652_v51 = vpop.permute.xlu1 %5651  ;;  %5890 = vrot.lane.b32.xlu0 %v5798_v22, %s9664_s24  ;;  %v6165_v22 = vld [vmem:[#allocation2 + $0x234] sm:$0xff] }
 0x7da   : > { %5742 = vst.msk [vmem:[#allocation4 + $0x28] sm:$0xff] %vm1467_vm5, %v5652_v51 }
 0x7db   : > { %6028 = vrot.lane.b32.xlu1 %v5963_v54, %s9665_s25  ;;  %v5650_v15 = vpop.permute.xlu0 %5649  ;;  %v5975_v54 = vld [vmem:[#allocation2 + $0x250] sm:$0xff] }
 0x7dc   : > { %5741 = vst.msk [vmem:[#allocation4 + $0x20] sm:$0xff] %vm1467_vm5, %v5650_v15  ;;  %v5974_v15 = vld [vmem:[#allocation2 + $0x248] sm:$0xff] }
 0x7dd   : > { %v5656_v6 = vpop.permute.xlu1 %5655  ;;  %6026 = vrot.lane.b32.xlu0 %v5962_v56, %s9665_s25 }
 0x7de   : > { %5744 = vst.msk [vmem:[#allocation4 + $0x38] sm:$0xff] %vm1467_vm5, %v5656_v6  ;;  %v6167_v6 = vld [vmem:[#allocation2 + $0x254] sm:$0xff] }
 0x7df   : > { %6220 = vrot.lane.b32.xlu1 %v6155_v32, %s9666_s9  ;;  %v5654_v21 = vpop.permute.xlu0 %5653 }
 0x7e0   : > { %5743 = vst.msk [vmem:[#allocation4 + $0x30] sm:$0xff] %vm1467_vm5, %v5654_v21  ;;  %v6166_v21 = vld [vmem:[#allocation2 + $0x24c] sm:$0xff] }
 0x7e1   : > { %v5660_v24 = vpop.permute.xlu1 %5659  ;;  %6218 = vrot.lane.b32.xlu0 %v6154_v17, %s9666_s9 }
 0x7e2   : > { %5746 = vst.msk [vmem:[#allocation4 + $0x48] sm:$0xff] %vm1467_vm5, %v5660_v24  ;;  %v5977_v24 = vld [vmem:[#allocation2 + $0x270] sm:$0xff] }
 0x7e3   : > { %6032 = vrot.lane.b32.xlu1 %v5965_v59, %s9665_s25  ;;  %v5658_v14 = vpop.permute.xlu0 %5657 }
 0x7e4   : > { %5745 = vst.msk [vmem:[#allocation4 + $0x40] sm:$0xff] %vm1467_vm5, %v5658_v14  ;;  %v5976_v14 = vld [vmem:[#allocation2 + $0x268] sm:$0xff] }
 0x7e5   : > { %v5664_v31 = vpop.permute.xlu1 %5663  ;;  %6030 = vrot.lane.b32.xlu0 %v5964_v45, %s9665_s25 }
 0x7e6   : > { %5748 = vst.msk [vmem:[#allocation4 + $0x58] sm:$0xff] %vm1467_vm5, %v5664_v31  ;;  %v6169_v31 = vld [vmem:[#allocation2 + $0x274] sm:$0xff] }
 0x7e7   : > { %6224 = vrot.lane.b32.xlu1 %v6157_v53, %s9666_s9  ;;  %v5662_v63 = vpop.permute.xlu0 %5661 }
 0x7e8   : > { %5747 = vst.msk [vmem:[#allocation4 + $0x50] sm:$0xff] %vm1467_vm5, %v5662_v63  ;;  %v6168_v63 = vld [vmem:[#allocation2 + $0x26c] sm:$0xff] }
 0x7e9   : > { %v5668_v29 = vpop.permute.xlu1 %5667  ;;  %6222 = vrot.lane.b32.xlu0 %v6156_v49, %s9666_s9 }
 0x7ea   : > { %5750 = vst.msk [vmem:[#allocation4 + $0x68] sm:$0xff] %vm1467_vm5, %v5668_v29 }
 0x7eb   : > { %6036 = vrot.lane.b32.xlu1 %v5967_v8, %s9665_s25  ;;  %v5666_v47 = vpop.permute.xlu0 %5665 }
 0x7ec   : > { %5749 = vst.msk [vmem:[#allocation4 + $0x60] sm:$0xff] %vm1467_vm5, %v5666_v47 }
 0x7ed   : > { %v5672_v12 = vpop.permute.xlu1 %5671  ;;  %6034 = vrot.lane.b32.xlu0 %v5966_v50, %s9665_s25  ;;  %v6170_v50 = vld [vmem:[#allocation2 + $0x28c] sm:$0xff] }
 0x7ee   : > { %5752 = vst.msk [vmem:[#allocation4 + $0x78] sm:$0xff] %vm1467_vm5, %v5672_v12 }
 0x7ef   : > { %6228 = vrot.lane.b32.xlu1 %v6159_v4, %s9666_s9  ;;  %v5670_v19 = vpop.permute.xlu0 %5669  ;;  %v6172_v4 = vld [vmem:[#allocation2 + $0x2ac] sm:$0xff] }
 0x7f0   : > { %5751 = vst.msk [vmem:[#allocation4 + $0x70] sm:$0xff] %vm1467_vm5, %v5670_v19 }
 0x7f1   : > { %v5676_v58 = vpop.permute.xlu1 %5675  ;;  %6226 = vrot.lane.b32.xlu0 %v6158_v5, %s9666_s9  ;;  %v6174_v5 = vld [vmem:[#allocation2 + $0x2cc] sm:$0xff] }
 0x7f2   : > { %5754 = vst.msk [vmem:[#allocation4 + $0x88] sm:$0xff] %vm1467_vm5, %v5676_v58 }
 0x7f3   : > { %6040 = vrot.lane.b32.xlu1 %v5969_v9, %s9665_s25  ;;  %v5674_v20 = vpop.permute.xlu0 %5673  ;;  %v6176_v9 = vld [vmem:[#allocation2 + $0x2ec] sm:$0xff] }
 0x7f4   : > { %5753 = vst.msk [vmem:[#allocation4 + $0x80] sm:$0xff] %vm1467_vm5, %v5674_v20  ;;  %v5987_v20 = vld [vmem:[#allocation2 + $0x310] sm:$0xff] }
 0x7f5   : > { %v5680_v30 = vpop.permute.xlu1 %5679  ;;  %6038 = vrot.lane.b32.xlu0 %v5968_v39, %s9665_s25 }
 0x7f6   : > { %5756 = vst.msk [vmem:[#allocation4 + $0x98] sm:$0xff] %vm1467_vm5, %v5680_v30 }
 0x7f7   : > { %6232 = vrot.lane.b32.xlu1 %v6161_v43, %s9666_s9  ;;  %v5678_v37 = vpop.permute.xlu0 %5677 }
 0x7f8   : > { %5755 = vst.msk [vmem:[#allocation4 + $0x90] sm:$0xff] %vm1467_vm5, %v5678_v37  ;;  %v5989_v37 = vld [vmem:[#allocation2 + $0x330] sm:$0xff] }
 0x7f9   : > { %v5684_v44 = vpop.permute.xlu1 %5683  ;;  %6230 = vrot.lane.b32.xlu0 %v6160_v40, %s9666_s9 }
 0x7fa   : > { %5758 = vst.msk [vmem:[#allocation4 + $0xa8] sm:$0xff] %vm1467_vm5, %v5684_v44  ;;  %v5988_v44 = vld [vmem:[#allocation2 + $0x328] sm:$0xff] }
 0x7fb   : > { %6044 = vrot.lane.b32.xlu1 %v5971_v1, %s9665_s25  ;;  %v5682_v60 = vpop.permute.xlu0 %5681 }
 0x7fc   : > { %5757 = vst.msk [vmem:[#allocation4 + $0xa0] sm:$0xff] %vm1467_vm5, %v5682_v60  ;;  %v6181_v60 = vld [vmem:[#allocation2 + $0x334] sm:$0xff] }
 0x7fd   : > { %v5688_v61 = vpop.permute.xlu1 %5687  ;;  %6042 = vrot.lane.b32.xlu0 %v5970_v34, %s9665_s25 }
 0x7fe   : > { %5760 = vst.msk [vmem:[#allocation4 + $0xb8] sm:$0xff] %vm1467_vm5, %v5688_v61 }
 0x7ff   : > { %6236 = vrot.lane.b32.xlu1 %v6163_v26, %s9666_s9  ;;  %v5686_v55 = vpop.permute.xlu0 %5685 }
 0x800   : > { %5759 = vst.msk [vmem:[#allocation4 + $0xb0] sm:$0xff] %vm1467_vm5, %v5686_v55  ;;  %v5990_v55 = vld [vmem:[#allocation2 + $0x348] sm:$0xff] }
 0x801   : > { %v5692_v48 = vpop.permute.xlu1 %5691  ;;  %6234 = vrot.lane.b32.xlu0 %v6162_v27, %s9666_s9 }
 0x802   : > { %5762 = vst.msk [vmem:[#allocation4 + $0xc8] sm:$0xff] %vm1467_vm5, %v5692_v48  ;;  %v6183_v48 = vld [vmem:[#allocation2 + $0x354] sm:$0xff] }
 0x803   : > { %6048 = vrot.lane.b32.xlu1 %v5973_v7, %s9665_s25  ;;  %v5690_v62 = vpop.permute.xlu0 %5689 }
 0x804   : > { %5761 = vst.msk [vmem:[#allocation4 + $0xc0] sm:$0xff] %vm1467_vm5, %v5690_v62 }
 0x805   : > { %v5696_v13 = vpop.permute.xlu1 %5695  ;;  %6046 = vrot.lane.b32.xlu0 %v5972_v2, %s9665_s25 }
 0x806   : > { %5764 = vst.msk [vmem:[#allocation4 + $0xd8] sm:$0xff] %vm1467_vm5, %v5696_v13  ;;  %v5800_v13 = vld [vmem:[#allocation2 + $0x364] sm:$0xff] }
 0x807   : > { %6240 = vrot.lane.b32.xlu1 %v6165_v22, %s9666_s9  ;;  %v5694_v28 = vpop.permute.xlu0 %5693 }
 0x808   : > { %5763 = vst.msk [vmem:[#allocation4 + $0xd0] sm:$0xff] %vm1467_vm5, %v5694_v28  ;;  %v5993_v28 = vld [vmem:[#allocation2 + $0x370] sm:$0xff] }
 0x809   : > { %v5700_v51 = vpop.permute.xlu1 %5699  ;;  %6238 = vrot.lane.b32.xlu0 %v6164_v46, %s9666_s9 }
 0x80a   : > { %5766 = vst.msk [vmem:[#allocation4 + $0xe8] sm:$0xff] %vm1467_vm5, %v5700_v51  ;;  %v5992_v51 = vld [vmem:[#allocation2 + $0x368] sm:$0xff] }
 0x80b   : > { %6052 = vrot.lane.b32.xlu1 %v5975_v54, %s9665_s25  ;;  %v5698_v3 = vpop.permute.xlu0 %5697 }
 0x80c   : > { %5765 = vst.msk [vmem:[#allocation4 + $0xe0] sm:$0xff] %vm1467_vm5, %v5698_v3 }
 0x80d   : > { %v5704_v56 = vpop.permute.xlu1 %5703  ;;  %6050 = vrot.lane.b32.xlu0 %v5974_v15, %s9665_s25 }
 0x80e   : > { %5768 = vst.msk [vmem:[#allocation4 + $0xf8] sm:$0xff] %vm1467_vm5, %v5704_v56  ;;  %v6940_v56 = vld [vmem:[#allocation3 + $0x8] sm:$0xff] }
 0x80f   : > { %6244 = vrot.lane.b32.xlu1 %v6167_v6, %s9666_s9  ;;  %v5702_v32 = vpop.permute.xlu0 %5701 }
 0x810   : > { %5767 = vst.msk [vmem:[#allocation4 + $0xf0] sm:$0xff] %vm1467_vm5, %v5702_v32 }
 0x811   : > { %v5837_v17 = vpop.permute.xlu1 %5836  ;;  %6242 = vrot.lane.b32.xlu0 %v6166_v21, %s9666_s9  ;;  %v13227_v21 = vld [vmem:[#allocation3 + $0x10] sm:$0xff] }
 0x812   : > { %5931 = vst.msk [vmem:[#allocation4 + $0x8] sm:$0xff] %vm1661_vm6, %v5837_v17 }
 0x813   : > { %6056 = vrot.lane.b32.xlu1 %v5977_v24, %s9665_s25  ;;  %v5835_v59 = vpop.permute.xlu0 %5834 }
 0x814   : > { %5930 = vst.msk [vmem:[#allocation4] sm:$0xff] %vm1661_vm6, %v5835_v59  ;;  %v13235_v59 = vld [vmem:[#allocation3 + $0x30] sm:$0xff] }
 0x815   : > { %v5841_v45 = vpop.permute.xlu1 %5840  ;;  %6054 = vrot.lane.b32.xlu0 %v5976_v14, %s9665_s25 }
 0x816   : > { %5933 = vst.msk [vmem:[#allocation4 + $0x18] sm:$0xff] %vm1661_vm6, %v5841_v45 }
 0x817   : > { %6248 = vrot.lane.b32.xlu1 %v6169_v31, %s9666_s9  ;;  %v5839_v53 = vpop.permute.xlu0 %5838  ;;  %v6942_v31 = vld [vmem:[#allocation3 + $0x28] sm:$0xff] }
 0x818   : > { %5932 = vst.msk [vmem:[#allocation4 + $0x10] sm:$0xff] %vm1661_vm6, %v5839_v53 }
 0x819   : > { %v5845_v49 = vpop.permute.xlu1 %5844  ;;  %6246 = vrot.lane.b32.xlu0 %v6168_v63, %s9666_s9 }
 0x81a   : > { %5935 = vst.msk [vmem:[#allocation4 + $0x28] sm:$0xff] %vm1661_vm6, %v5845_v49  ;;  %v13244_v49 = vld [vmem:[#allocation3 + $0x50] sm:$0xff] }
 0x81b   : > { %6060 = vrot.lane.b32.xlu1 %v12826_v16, %s9665_s25  ;;  %v5843_v29 = vpop.permute.xlu0 %5842 }
 0x81c   : > { %5934 = vst.msk [vmem:[#allocation4 + $0x20] sm:$0xff] %vm1661_vm6, %v5843_v29 }
 0x81d   : > { %v5849_v8 = vpop.permute.xlu1 %5848  ;;  %6058 = vrot.lane.b32.xlu0 %v12831_v52, %s9665_s25 }
 0x81e   : > { %5937 = vst.msk [vmem:[#allocation4 + $0x38] sm:$0xff] %vm1661_vm6, %v5849_v8  ;;  %v6944_v8 = vld [vmem:[#allocation3 + $0x48] sm:$0xff] }
 0x81f   : > { %6252 = vrot.lane.b32.xlu1 %v12938_v11, %s9666_s9  ;;  %v5847_v47 = vpop.permute.xlu0 %5846 }
 0x820   : > { %5936 = vst.msk [vmem:[#allocation4 + $0x30] sm:$0xff] %vm1661_vm6, %v5847_v47 }
 0x821   : > { %v5853_v12 = vpop.permute.xlu1 %5852  ;;  %6250 = vrot.lane.b32.xlu0 %v6170_v50, %s9666_s9  ;;  %v13252_v50 = vld [vmem:[#allocation3 + $0x70] sm:$0xff] }
 0x822   : > { %5939 = vst.msk [vmem:[#allocation4 + $0x48] sm:$0xff] %vm1661_vm6, %v5853_v12 }
 0x823   : > { %6064 = vrot.lane.b32.xlu1 %v12836_v41, %s9665_s25  ;;  %v5851_v16 = vpop.permute.xlu0 %5850 }
 0x824   : > { %5938 = vst.msk [vmem:[#allocation4 + $0x40] sm:$0xff] %vm1661_vm6, %v5851_v16 }
 0x825   : > { %v5857_v52 = vpop.permute.xlu1 %5856  ;;  %6062 = vrot.lane.b32.xlu0 %v12841_v25, %s9665_s25 }
 0x826   : > { %5941 = vst.msk [vmem:[#allocation4 + $0x58] sm:$0xff] %vm1661_vm6, %v5857_v52  ;;  %v6946_v52 = vld [vmem:[#allocation3 + $0x68] sm:$0xff] }
 0x827   : > { %6256 = vrot.lane.b32.xlu1 %v12946_v42, %s9666_s9  ;;  %v5855_v11 = vpop.permute.xlu0 %5854 }
 0x828   : > { %5940 = vst.msk [vmem:[#allocation4 + $0x50] sm:$0xff] %vm1661_vm6, %v5855_v11 }
 0x829   : > { %v5861_v19 = vpop.permute.xlu1 %5860  ;;  %6254 = vrot.lane.b32.xlu0 %v6172_v4, %s9666_s9 }
 0x82a   : > { %5943 = vst.msk [vmem:[#allocation4 + $0x68] sm:$0xff] %vm1661_vm6, %v5861_v19  ;;  %v13261_v19 = vld [vmem:[#allocation3 + $0x90] sm:$0xff] }
 0x82b   : > { %6068 = vrot.lane.b32.xlu1 %v12846_v36, %s9665_s25  ;;  %v5859_v41 = vpop.permute.xlu0 %5858 }
 0x82c   : > { %5942 = vst.msk [vmem:[#allocation4 + $0x60] sm:$0xff] %vm1661_vm6, %v5859_v41 }
 0x82d   : > { %v5865_v25 = vpop.permute.xlu1 %5864  ;;  %6066 = vrot.lane.b32.xlu0 %v12851_v23, %s9665_s25 }
 0x82e   : > { %5945 = vst.msk [vmem:[#allocation4 + $0x78] sm:$0xff] %vm1661_vm6, %v5865_v25  ;;  %v6948_v25 = vld [vmem:[#allocation3 + $0x88] sm:$0xff] }
 0x82f   : > { %6260 = vrot.lane.b32.xlu1 %v12954_v35, %s9666_s9  ;;  %v5863_v42 = vpop.permute.xlu0 %5862 }
 0x830   : > { %5944 = vst.msk [vmem:[#allocation4 + $0x70] sm:$0xff] %vm1661_vm6, %v5863_v42 }
 0x831   : > { %v5869_v58 = vpop.permute.xlu1 %5868  ;;  %6258 = vrot.lane.b32.xlu0 %v6174_v5, %s9666_s9 }
 0x832   : > { %5947 = vst.msk [vmem:[#allocation4 + $0x88] sm:$0xff] %vm1661_vm6, %v5869_v58 }
 0x833   : > { %6072 = vrot.lane.b32.xlu1 %v12856_v10, %s9665_s25  ;;  %v5867_v36 = vpop.permute.xlu0 %5866  ;;  %v5986_v10 = vld [vmem:[#allocation2 + $0x308] sm:$0xff] }
 0x834   : > { %5946 = vst.msk [vmem:[#allocation4 + $0x80] sm:$0xff] %vm1661_vm6, %v5867_v36 }
 0x835   : > { %v5873_v23 = vpop.permute.xlu1 %5872  ;;  %6070 = vrot.lane.b32.xlu0 %v12861_v18, %s9665_s25  ;;  %v6179_v18 = vld [vmem:[#allocation2 + $0x314] sm:$0xff] }
 0x836   : > { %5949 = vst.msk [vmem:[#allocation4 + $0x98] sm:$0xff] %vm1661_vm6, %v5873_v23 }
 0x837   : > { %6264 = vrot.lane.b32.xlu1 %v12962_v0, %s9666_s9  ;;  %v5871_v35 = vpop.permute.xlu0 %5870 }
 0x838   : > { %5948 = vst.msk [vmem:[#allocation4 + $0x90] sm:$0xff] %vm1661_vm6, %v5871_v35 }
 0x839   : > { %v5877_v39 = vpop.permute.xlu1 %5876  ;;  %6262 = vrot.lane.b32.xlu0 %v6176_v9, %s9666_s9 }
 0x83a   : > { %5951 = vst.msk [vmem:[#allocation4 + $0xa8] sm:$0xff] %vm1661_vm6, %v5877_v39 }
 0x83b   : > { %v5875_v30 = vpop.permute.xlu0 %5874  ;;  %6076 = vrot.lane.b32.xlu1 %v5987_v20, %s9665_s25 }
 0x83c   : > { %5950 = vst.msk [vmem:[#allocation4 + $0xa0] sm:$0xff] %vm1661_vm6, %v5875_v30 }
 0x83d   : > { %v5881_v43 = vpop.permute.xlu1 %5880  ;;  %6074 = vrot.lane.b32.xlu0 %v5986_v10, %s9665_s25 }
 0x83e   : > { %5953 = vst.msk [vmem:[#allocation4 + $0xb8] sm:$0xff] %vm1661_vm6, %v5881_v43 }
 0x83f   : > { %v5879_v0 = vpop.permute.xlu0 %5878  ;;  %6268 = vrot.lane.b32.xlu1 %v6179_v18, %s9666_s9 }
 0x840   : > { %5952 = vst.msk [vmem:[#allocation4 + $0xb0] sm:$0xff] %vm1661_vm6, %v5879_v0 }
 0x841   : > { %v5885_v40 = vpop.permute.xlu1 %5884  ;;  %6266 = vrot.lane.b32.xlu0 %v13047_v38, %s9666_s9  ;;  %v5991_v38 = vld [vmem:[#allocation2 + $0x350] sm:$0xff] }
 0x842   : > { %5955 = vst.msk [vmem:[#allocation4 + $0xc8] sm:$0xff] %vm1661_vm6, %v5885_v40 }
 0x843   : > { %v5883_v1 = vpop.permute.xlu0 %5882  ;;  %6080 = vrot.lane.b32.xlu1 %v5989_v37, %s9665_s25 }
 0x844   : > { %5954 = vst.msk [vmem:[#allocation4 + $0xc0] sm:$0xff] %vm1661_vm6, %v5883_v1 }
 0x845   : > { %v5889_v34 = vpop.permute.xlu1 %5888  ;;  %6078 = vrot.lane.b32.xlu0 %v5988_v44, %s9665_s25 }
 0x846   : > { %5957 = vst.msk [vmem:[#allocation4 + $0xd8] sm:$0xff] %vm1661_vm6, %v5889_v34 }
 0x847   : > { %v5887_v61 = vpop.permute.xlu0 %5886  ;;  %6272 = vrot.lane.b32.xlu1 %v6181_v60, %s9666_s9 }
 0x848   : > { %5956 = vst.msk [vmem:[#allocation4 + $0xd0] sm:$0xff] %vm1661_vm6, %v5887_v61 }
 0x849   : > { %v5893_v26 = vpop.permute.xlu1 %5892  ;;  %6270 = vrot.lane.b32.xlu0 %v13055_v33, %s9666_s9  ;;  %v5801_v33 = vld [vmem:[#allocation2 + $0x36c] sm:$0xff] }
 0x84a   : > { %5959 = vst.msk [vmem:[#allocation4 + $0xe8] sm:$0xff] %vm1661_vm6, %v5893_v26 }
 0x84b   : > { %v5891_v27 = vpop.permute.xlu0 %5890  ;;  %6084 = vrot.lane.b32.xlu1 %v5991_v38, %s9665_s25 }
 0x84c   : > { %5958 = vst.msk [vmem:[#allocation4 + $0xe0] sm:$0xff] %vm1661_vm6, %v5891_v27 }
 0x84d   : > { %v6029_v7 = vpop.permute.xlu1 %6028  ;;  %6082 = vrot.lane.b32.xlu0 %v5990_v55, %s9665_s25 }
 0x84e   : > { %6123 = vst.msk [vmem:[#allocation4 + $0x8] sm:$0xff] %vm1854_vm8, %v6029_v7 }
 0x84f   : > { %v6027_v62 = vpop.permute.xlu0 %6026  ;;  %6276 = vrot.lane.b32.xlu1 %v6183_v48, %s9666_s9 }
 0x850   : > { %6122 = vst.msk [vmem:[#allocation4] sm:$0xff] %vm1854_vm8, %v6027_v62 }
 0x851   : > { %v6221_v2 = vpop.permute.xlu1 %6220  ;;  %6274 = vrot.lane.b32.xlu0 %v13065_v57, %s9666_s9  ;;  %v6185_v57 = vld [vmem:[#allocation2 + $0x374] sm:$0xff] }
 0x852   : > { %6315 = vst.msk [vmem:[#allocation4 + $0x8] sm:$0xff] %vm2047_vm9, %v6221_v2 }
 0x853   : > { %v6219_v22 = vpop.permute.xlu0 %6218  ;;  %5896 = vrot.lane.b32.xlu1 %v5801_v33, %s9664_s24 }
 0x854   : > { %6314 = vst.msk [vmem:[#allocation4] sm:$0xff] %vm2047_vm9, %v6219_v22 }
 0x855   : > { %v6033_v46 = vpop.permute.xlu1 %6032  ;;  %5894 = vrot.lane.b32.xlu0 %v5800_v13, %s9664_s24 }
 0x856   : > { %6125 = vst.msk [vmem:[#allocation4 + $0x18] sm:$0xff] %vm1854_vm8, %v6033_v46 }
 0x857   : > { %v6031_v54 = vpop.permute.xlu0 %6030  ;;  %6088 = vrot.lane.b32.xlu1 %v5993_v28, %s9665_s25 }
 0x858   : > { %6124 = vst.msk [vmem:[#allocation4 + $0x10] sm:$0xff] %vm1854_vm8, %v6031_v54 }
 0x859   : > { %v6225_v3 = vpop.permute.xlu1 %6224  ;;  %6086 = vrot.lane.b32.xlu0 %v5992_v51, %s9665_s25  ;;  %v6347_v15 = vld [vmem:[#allocation4 + $0x8] sm:$0xff] }
 0x85a   : > { %6317 = vst.msk [vmem:[#allocation4 + $0x18] sm:$0xff] %vm2047_vm9, %v6225_v3 }
 0x85b   : > { %6909 = vst.msk [vmem:[#allocation4 + $0x8] sm:$0xff] %vm171_vm0, %v6940_v56  ;;  %v6223_v6 = vpop.permute.xlu0 %6222  ;;  %v6346_v32 = vld [vmem:[#allocation4] sm:$0xff]  ;;  %6280 = vrot.lane.b32.xlu1 %v6185_v57, %s9666_s9 }
 0x85c   : > { %6316 = vst.msk [vmem:[#allocation4 + $0x10] sm:$0xff] %vm2047_vm9, %v6223_v6  ;;  %9527 = vmatprep.mubr.msk.f32.mxu0 %vm2118_vm10, %v6346_v32  ;;  %v13311_v32 = vld [vmem:[#allocation3 + $0xb0] sm:$0xff] }
 0x85d   : > { %v6037_v17 = vpop.permute.xlu1 %6036  ;;  %6278 = vrot.lane.b32.xlu0 %v5801_v33, %s9666_s9  ;;  %9528 = vmatmul.mubr.msk.f32.vlgmr.msra.gmra.mxu0 %vm2118_vm10, %v6347_v15 }
 0x85e   : > { %6127 = vst.msk [vmem:[#allocation4 + $0x28] sm:$0xff] %vm1854_vm8, %v6037_v17 }
 0x85f   : > { %v6035_v24 = vpop.permute.xlu0 %6034  ;;  %7006 = vrot.lane.b32.xlu1 %v13227_v21, %s9659_s19 }
 0x860   : > { %6126 = vst.msk [vmem:[#allocation4 + $0x20] sm:$0xff] %vm1854_vm8, %v6035_v24  ;;  %v6950_v24 = vld [vmem:[#allocation3 + $0xa8] sm:$0xff] }
 0x861   : > { %v6229_v14 = vpop.permute.xlu1 %6228  ;;  %v6349_v45 = vld [vmem:[#allocation4 + $0x18] sm:$0xff]  ;;  %7004 = vrot.lane.b32.xlu0 %v6940_v56, %s9659_s19 }
 0x862   : > { %6319 = vst.msk [vmem:[#allocation4 + $0x28] sm:$0xff] %vm2047_vm9, %v6229_v14  ;;  %v13317_v14 = vld [vmem:[#allocation3 + $0xd0] sm:$0xff] }
 0x863   : > { %6911 = vst.msk [vmem:[#allocation4 + $0x18] sm:$0xff] %vm171_vm0, %v6942_v31  ;;  %v6227_v53 = vpop.permute.xlu0 %6226  ;;  %v6348_v63 = vld [vmem:[#allocation4 + $0x10] sm:$0xff]  ;;  %7010 = vrot.lane.b32.xlu1 %v13235_v59, %s9659_s19 }
 0x864   : > { %6318 = vst.msk [vmem:[#allocation4 + $0x20] sm:$0xff] %vm2047_vm9, %v6227_v53  ;;  %9530 = vmatprep.mubr.msk.f32.mxu0 %vm2118_vm10, %v6348_v63 }
 0x865   : > { %v6041_v29 = vpop.permute.xlu1 %6040  ;;  %9531 = vmatmul.mubr.msk.f32.gmra.mxu0 %vm2118_vm10, %v6349_v45  ;;  %7008 = vrot.lane.b32.xlu0 %v6942_v31, %s9659_s19  ;;  %v6952_v45 = vld [vmem:[#allocation3 + $0xc8] sm:$0xff] }
 0x866   : > { %6129 = vst.msk [vmem:[#allocation4 + $0x38] sm:$0xff] %vm1854_vm8, %v6041_v29 }
 0x867   : > { %v6039_v47 = vpop.permute.xlu0 %6038  ;;  %7014 = vrot.lane.b32.xlu1 %v13244_v49, %s9659_s19 }
 0x868   : > { %6128 = vst.msk [vmem:[#allocation4 + $0x30] sm:$0xff] %vm1854_vm8, %v6039_v47  ;;  %v13329_v47 = vld [vmem:[#allocation3 + $0xf0] sm:$0xff] }
 0x869   : > { %v6233_v12 = vpop.permute.xlu1 %6232  ;;  %v6351_v16 = vld [vmem:[#allocation4 + $0x28] sm:$0xff]  ;;  %7012 = vrot.lane.b32.xlu0 %v6944_v8, %s9659_s19 }
 0x86a   : > { %6321 = vst.msk [vmem:[#allocation4 + $0x38] sm:$0xff] %vm2047_vm9, %v6233_v12 }
 0x86b   : > { %6913 = vst.msk [vmem:[#allocation4 + $0x28] sm:$0xff] %vm171_vm0, %v6944_v8  ;;  %v6231_v11 = vpop.permute.xlu0 %6230  ;;  %v6350_v4 = vld [vmem:[#allocation4 + $0x20] sm:$0xff]  ;;  %7018 = vrot.lane.b32.xlu1 %v13252_v50, %s9659_s19 }
 0x86c   : > { %6320 = vst.msk [vmem:[#allocation4 + $0x30] sm:$0xff] %vm2047_vm9, %v6231_v11  ;;  %9533 = vmatprep.mubr.msk.f32.mxu0 %vm2118_vm10, %v6350_v4 }
 0x86d   : > { %v6045_v41 = vpop.permute.xlu1 %6044  ;;  %9534 = vmatmul.mubr.msk.f32.gmra.mxu0 %vm2118_vm10, %v6351_v16  ;;  %7016 = vrot.lane.b32.xlu0 %v6946_v52, %s9659_s19  ;;  %v6954_v16 = vld [vmem:[#allocation3 + $0xe8] sm:$0xff] }
 0x86e   : > { %6131 = vst.msk [vmem:[#allocation4 + $0x48] sm:$0xff] %vm1854_vm8, %v6045_v41 }
 0x86f   : > { %v6043_v42 = vpop.permute.xlu0 %6042  ;;  %7022 = vrot.lane.b32.xlu1 %v13261_v19, %s9659_s19 }
 0x870   : > { %6130 = vst.msk [vmem:[#allocation4 + $0x40] sm:$0xff] %vm1854_vm8, %v6043_v42 }
 0x871   : > { %v6237_v5 = vpop.permute.xlu1 %6236  ;;  %v6353_v58 = vld [vmem:[#allocation4 + $0x38] sm:$0xff]  ;;  %7020 = vrot.lane.b32.xlu0 %v6948_v25, %s9659_s19 }
 0x872   : > { %6323 = vst.msk [vmem:[#allocation4 + $0x48] sm:$0xff] %vm2047_vm9, %v6237_v5 }
 0x873   : > { %6915 = vst.msk [vmem:[#allocation4 + $0x38] sm:$0xff] %vm171_vm0, %v6946_v52  ;;  %v6235_v36 = vpop.permute.xlu0 %6234  ;;  %v6352_v23 = vld [vmem:[#allocation4 + $0x30] sm:$0xff]  ;;  %7026 = vrot.lane.b32.xlu1 %v13311_v32, %s9659_s19 }
 0x874   : > { %6322 = vst.msk [vmem:[#allocation4 + $0x40] sm:$0xff] %vm2047_vm9, %v6235_v36  ;;  %9536 = vmatprep.mubr.msk.f32.mxu0 %vm2118_vm10, %v6352_v23 }
 0x875   : > { %v6049_v35 = vpop.permute.xlu1 %6048  ;;  %9537 = vmatmul.mubr.msk.f32.gmra.mxu0 %vm2118_vm10, %v6353_v58  ;;  %7024 = vrot.lane.b32.xlu0 %v6950_v24, %s9659_s19 }
 0x876   : > { %6133 = vst.msk [vmem:[#allocation4 + $0x58] sm:$0xff] %vm1854_vm8, %v6049_v35 }
 0x877   : > { %v6047_v9 = vpop.permute.xlu0 %6046  ;;  %7030 = vrot.lane.b32.xlu1 %v13317_v14, %s9659_s19 }
 0x878   : > { %6132 = vst.msk [vmem:[#allocation4 + $0x50] sm:$0xff] %vm1854_vm8, %v6047_v9 }
 0x879   : > { %v6241_v20 = vpop.permute.xlu1 %6240  ;;  %v6355_v39 = vld [vmem:[#allocation4 + $0x48] sm:$0xff]  ;;  %7028 = vrot.lane.b32.xlu0 %v6952_v45, %s9659_s19 }
 0x87a   : > { %6325 = vst.msk [vmem:[#allocation4 + $0x58] sm:$0xff] %vm2047_vm9, %v6241_v20 }
 0x87b   : > { %6917 = vst.msk [vmem:[#allocation4 + $0x48] sm:$0xff] %vm171_vm0, %v6948_v25  ;;  %v6239_v10 = vpop.permute.xlu0 %6238  ;;  %v6354_v30 = vld [vmem:[#allocation4 + $0x40] sm:$0xff]  ;;  %7034 = vrot.lane.b32.xlu1 %v13329_v47, %s9659_s19 }
 0x87c   : > { %6324 = vst.msk [vmem:[#allocation4 + $0x50] sm:$0xff] %vm2047_vm9, %v6239_v10  ;;  %9539 = vmatprep.mubr.msk.f32.mxu0 %vm2118_vm10, %v6354_v30 }
 0x87d   : > { %v6053_v18 = vpop.permute.xlu1 %6052  ;;  %9540 = vmatmul.mubr.msk.f32.gmra.mxu0 %vm2118_vm10, %v6355_v39  ;;  %7032 = vrot.lane.b32.xlu0 %v6954_v16, %s9659_s19 }
 0x87e   : > { %6135 = vst.msk [vmem:[#allocation4 + $0x68] sm:$0xff] %vm1854_vm8, %v6053_v18 }
 0x87f   : > { %v6051_v43 = vpop.permute.xlu0 %6050 }
 0x880   : > { %6134 = vst.msk [vmem:[#allocation4 + $0x60] sm:$0xff] %vm1854_vm8, %v6051_v43 }
 0x881   : > { %v6245_v0 = vpop.permute.xlu1 %6244  ;;  %v6357_v44 = vld [vmem:[#allocation4 + $0x58] sm:$0xff] }
 0x882   : > { %6327 = vst.msk [vmem:[#allocation4 + $0x68] sm:$0xff] %vm2047_vm9, %v6245_v0 }
 0x883   : > { %v6243_v37 = vpop.permute.xlu0 %6242  ;;  %v6356_v40 = vld [vmem:[#allocation4 + $0x50] sm:$0xff]  ;;  %6919 = vst.msk [vmem:[#allocation4 + $0x58] sm:$0xff] %vm171_vm0, %v6950_v24 }
 0x884   : > { %6326 = vst.msk [vmem:[#allocation4 + $0x60] sm:$0xff] %vm2047_vm9, %v6243_v37  ;;  %9542 = vmatprep.mubr.msk.f32.mxu0 %vm2118_vm10, %v6356_v40 }
 0x885   : > { %v6057_v1 = vpop.permute.xlu1 %6056  ;;  %9543 = vmatmul.mubr.msk.f32.gmra.mxu0 %vm2118_vm10, %v6357_v44 }
 0x886   : > { %6137 = vst.msk [vmem:[#allocation4 + $0x78] sm:$0xff] %vm1854_vm8, %v6057_v1 }
 0x887   : > { %v6055_v60 = vpop.permute.xlu0 %6054 }
 0x888   : > { %6136 = vst.msk [vmem:[#allocation4 + $0x70] sm:$0xff] %vm1854_vm8, %v6055_v60 }
 0x889   : > { %v6249_v34 = vpop.permute.xlu1 %6248  ;;  %v6359_v26 = vld [vmem:[#allocation4 + $0x68] sm:$0xff] }
 0x88a   : > { %6329 = vst.msk [vmem:[#allocation4 + $0x78] sm:$0xff] %vm2047_vm9, %v6249_v34 }
 0x88b   : > { %v6247_v61 = vpop.permute.xlu0 %6246  ;;  %v6358_v38 = vld [vmem:[#allocation4 + $0x60] sm:$0xff]  ;;  %6921 = vst.msk [vmem:[#allocation4 + $0x68] sm:$0xff] %vm171_vm0, %v6952_v45 }
 0x88c   : > { %6328 = vst.msk [vmem:[#allocation4 + $0x70] sm:$0xff] %vm2047_vm9, %v6247_v61  ;;  %9545 = vmatprep.mubr.msk.f32.mxu0 %vm2118_vm10, %v6358_v38 }
 0x88d   : > { %v6061_v55 = vpop.permute.xlu1 %6060  ;;  %9546 = vmatmul.mubr.msk.f32.gmra.mxu0 %vm2118_vm10, %v6359_v26 }
 0x88e   : > { %6139 = vst.msk [vmem:[#allocation4 + $0x88] sm:$0xff] %vm1854_vm8, %v6061_v55  ;;  %v6876_v55 = vld [vmem:[#allocation3] sm:$0xff] }
 0x88f   : > { %v6059_v27 = vpop.permute.xlu0 %6058  ;;  %6908 = vst.msk [vmem:[#allocation4] sm:$0xff] %vm171_vm0, %v6876_v55 }
 0x890   : > { %6138 = vst.msk [vmem:[#allocation4 + $0x80] sm:$0xff] %vm1854_vm8, %v6059_v27 }
 0x891   : > { %v6253_v48 = vpop.permute.xlu1 %6252  ;;  %v6361_v33 = vld [vmem:[#allocation4 + $0x78] sm:$0xff] }
 0x892   : > { %6331 = vst.msk [vmem:[#allocation4 + $0x88] sm:$0xff] %vm2047_vm9, %v6253_v48 }
 0x893   : > { %v6251_v7 = vpop.permute.xlu0 %6250  ;;  %v6360_v62 = vld [vmem:[#allocation4 + $0x70] sm:$0xff]  ;;  %6923 = vst.msk [vmem:[#allocation4 + $0x78] sm:$0xff] %vm171_vm0, %v6954_v16  ;;  %v6890_v16 = vld [vmem:[#allocation3 + $0xe0] sm:$0xff] }
 0x894   : > { %6330 = vst.msk [vmem:[#allocation4 + $0x80] sm:$0xff] %vm2047_vm9, %v6251_v7  ;;  %9548 = vmatprep.mubr.msk.f32.mxu0 %vm2118_vm10, %v6360_v62  ;;  %v6878_v7 = vld [vmem:[#allocation3 + $0x20] sm:$0xff] }
 0x895   : > { %v6065_v2 = vpop.permute.xlu1 %6064  ;;  %9549 = vmatmul.mubr.msk.f32.gmra.mxu0 %vm2118_vm10, %v6361_v33  ;;  %6910 = vst.msk [vmem:[#allocation4 + $0x10] sm:$0xff] %vm171_vm0, %v6878_v7  ;;  %6922 = vst.msk [vmem:[#allocation4 + $0x70] sm:$0xff] %vm171_vm0, %v6890_v16  ;;  %v6749_v16 = vld [vmem:[#allocation5 + $0x48] sm:$0xff] }
 0x896   : > { %6141 = vst.msk [vmem:[#allocation4 + $0x98] sm:$0xff] %vm1854_vm8, %v6065_v2  ;;  %v6880_v2 = vld [vmem:[#allocation3 + $0x40] sm:$0xff] }
 0x897   : > { %v6063_v13 = vpop.permute.xlu0 %6062  ;;  %6912 = vst.msk [vmem:[#allocation4 + $0x20] sm:$0xff] %vm171_vm0, %v6880_v2  ;;  %v13442_v2 = vld [vmem:[#allocation3 + $0x160] sm:$0xff] }
 0x898   : > { %6140 = vst.msk [vmem:[#allocation4 + $0x90] sm:$0xff] %vm1854_vm8, %v6063_v13 }
 0x899   : > { %v6257_v22 = vpop.permute.xlu1 %6256  ;;  %v6363_v51 = vld [vmem:[#allocation4 + $0x88] sm:$0xff] }
 0x89a   : > { %6333 = vst.msk [vmem:[#allocation4 + $0x98] sm:$0xff] %vm2047_vm9, %v6257_v22 }
 0x89b   : > { %v6255_v28 = vpop.permute.xlu0 %6254  ;;  %v6362_v46 = vld [vmem:[#allocation4 + $0x80] sm:$0xff] }
 0x89c   : > { %6332 = vst.msk [vmem:[#allocation4 + $0x90] sm:$0xff] %vm2047_vm9, %v6255_v28  ;;  %9551 = vmatprep.mubr.msk.f32.mxu0 %vm2118_vm10, %v6362_v46  ;;  %v6882_v28 = vld [vmem:[#allocation3 + $0x60] sm:$0xff] }
 0x89d   : > { %v6069_v54 = vpop.permute.xlu1 %6068  ;;  %9552 = vmatmul.mubr.msk.f32.gmra.mxu0 %vm2118_vm10, %v6363_v51  ;;  %6914 = vst.msk [vmem:[#allocation4 + $0x30] sm:$0xff] %vm171_vm0, %v6882_v28  ;;  %v13448_v28 = vld [vmem:[#allocation3 + $0x180] sm:$0xff] }
 0x89e   : > { %6143 = vst.msk [vmem:[#allocation4 + $0xa8] sm:$0xff] %vm1854_vm8, %v6069_v54  ;;  %v6884_v54 = vld [vmem:[#allocation3 + $0x80] sm:$0xff] }
 0x89f   : > { %v6067_v57 = vpop.permute.xlu0 %6066  ;;  %6916 = vst.msk [vmem:[#allocation4 + $0x40] sm:$0xff] %vm171_vm0, %v6884_v54  ;;  %v6747_v54 = vld [vmem:[#allocation5 + $0x38] sm:$0xff] }
 0x8a0   : > { %6142 = vst.msk [vmem:[#allocation4 + $0xa0] sm:$0xff] %vm1854_vm8, %v6067_v57 }
 0x8a1   : > { %v6261_v3 = vpop.permute.xlu1 %6260  ;;  %v6365_v6 = vld [vmem:[#allocation4 + $0x98] sm:$0xff] }
 0x8a2   : > { %6335 = vst.msk [vmem:[#allocation4 + $0xa8] sm:$0xff] %vm2047_vm9, %v6261_v3  ;;  %v6886_v3 = vld [vmem:[#allocation3 + $0xa0] sm:$0xff] }
 0x8a3   : > { %v6259_v15 = vpop.permute.xlu0 %6258  ;;  %v6364_v56 = vld [vmem:[#allocation4 + $0x90] sm:$0xff]  ;;  %6918 = vst.msk [vmem:[#allocation4 + $0x50] sm:$0xff] %vm171_vm0, %v6886_v3 }
 0x8a4   : > { %6334 = vst.msk [vmem:[#allocation4 + $0xa0] sm:$0xff] %vm2047_vm9, %v6259_v15  ;;  %9554 = vmatprep.mubr.msk.f32.mxu0 %vm2118_vm10, %v6364_v56  ;;  %v6888_v15 = vld [vmem:[#allocation3 + $0xc0] sm:$0xff] }
 0x8a5   : > { %v6073_v17 = vpop.permute.xlu1 %6072  ;;  %9555 = vmatmul.mubr.msk.f32.gmra.mxu0 %vm2118_vm10, %v6365_v6  ;;  %6920 = vst.msk [vmem:[#allocation4 + $0x60] sm:$0xff] %vm171_vm0, %v6888_v15 }
 0x8a6   : > { %6145 = vst.msk [vmem:[#allocation4 + $0xb8] sm:$0xff] %vm1854_vm8, %v6073_v17  ;;  %v13386_v17 = vld [vmem:[%s14489_s2 + $0x2] ss:$0 sm:$0xff] }
 0x8a7   : > { %v6071_v31 = vpop.permute.xlu0 %6070 }
 0x8a8   : > { %6144 = vst.msk [vmem:[#allocation4 + $0xb0] sm:$0xff] %vm1854_vm8, %v6071_v31 }
 0x8a9   : > { %v6265_v53 = vpop.permute.xlu1 %6264  ;;  %v6367_v8 = vld [vmem:[#allocation4 + $0xa8] sm:$0xff] }
 0x8aa   : > { %6337 = vst.msk [vmem:[#allocation4 + $0xb8] sm:$0xff] %vm2047_vm9, %v6265_v53 }
 0x8ab   : > { %v6263_v63 = vpop.permute.xlu0 %6262  ;;  %v6366_v29 = vld [vmem:[#allocation4 + $0xa0] sm:$0xff] }
 0x8ac   : > { %6336 = vst.msk [vmem:[#allocation4 + $0xb0] sm:$0xff] %vm2047_vm9, %v6263_v63  ;;  %9557 = vmatprep.mubr.msk.f32.mxu0 %vm2118_vm10, %v6366_v29 }
 0x8ad   : > { %9558 = vmatmul.mubr.msk.f32.gmra.mxu0 %vm2118_vm10, %v6367_v8  ;;  %v6077_v12 = vpop.permute.xlu1 %6076 }
 0x8ae   : > { %6147 = vst.msk [vmem:[#allocation4 + $0xc8] sm:$0xff] %vm1854_vm8, %v6077_v12 }
 0x8af   : > { %v6075_v52 = vpop.permute.xlu0 %6074 }
 0x8b0   : > { %6146 = vst.msk [vmem:[#allocation4 + $0xc0] sm:$0xff] %vm1854_vm8, %v6075_v52  ;;  %v6741_v52 = vld [vmem:[#allocation5 + $0x8] sm:$0xff] }
 0x8b1   : > { %v6269_v11 = vpop.permute.xlu1 %6268  ;;  %v6369_v25 = vld [vmem:[#allocation4 + $0xb8] sm:$0xff] }
 0x8b2   : > { %6339 = vst.msk [vmem:[#allocation4 + $0xc8] sm:$0xff] %vm2047_vm9, %v6269_v11 }
 0x8b3   : > { %v6267_v4 = vpop.permute.xlu0 %6266  ;;  %v6368_v41 = vld [vmem:[#allocation4 + $0xb0] sm:$0xff] }
 0x8b4   : > { %6338 = vst.msk [vmem:[#allocation4 + $0xc0] sm:$0xff] %vm2047_vm9, %v6267_v4  ;;  %9560 = vmatprep.mubr.msk.f32.mxu0 %vm2118_vm10, %v6368_v41 }
 0x8b5   : > { %9561 = vmatmul.mubr.msk.f32.gmra.mxu0 %vm2118_vm10, %v6369_v25  ;;  %v6081_v42 = vpop.permute.xlu1 %6080  ;;  %v13396_v25 = vld [vmem:[#allocation3 + $0x100] sm:$0xff]  ;;  %6930 = vst.msk [vmem:[#allocation4 + $0xb0] sm:$0xff] %vm171_vm0, %v13442_v2 }
 0x8b6   : > { %6149 = vst.msk [vmem:[#allocation4 + $0xd8] sm:$0xff] %vm1854_vm8, %v6081_v42  ;;  %v6740_v42 = vld [vmem:[#allocation5] sm:$0xff] }
 0x8b7   : > { %v6079_v5 = vpop.permute.xlu0 %6078  ;;  %6924 = vst.msk [vmem:[#allocation4 + $0x80] sm:$0xff] %vm171_vm0, %v13396_v25 }
 0x8b8   : > { %6148 = vst.msk [vmem:[#allocation4 + $0xd0] sm:$0xff] %vm1854_vm8, %v6079_v5 }
 0x8b9   : > { %v6273_v58 = vpop.permute.xlu1 %6272  ;;  %v6371_v36 = vld [vmem:[#allocation4 + $0xc8] sm:$0xff] }
 0x8ba   : > { %6341 = vst.msk [vmem:[#allocation4 + $0xd8] sm:$0xff] %vm2047_vm9, %v6273_v58 }
 0x8bb   : > { %v6271_v23 = vpop.permute.xlu0 %6270  ;;  %v6370_v35 = vld [vmem:[#allocation4 + $0xc0] sm:$0xff] }
 0x8bc   : > { %6340 = vst.msk [vmem:[#allocation4 + $0xd0] sm:$0xff] %vm2047_vm9, %v6271_v23  ;;  %9563 = vmatprep.mubr.msk.f32.mxu0 %vm2118_vm10, %v6370_v35 }
 0x8bd   : > { %9564 = vmatmul.mubr.msk.f32.gmra.mxu0 %vm2118_vm10, %v6371_v36  ;;  %v6085_v9 = vpop.permute.xlu1 %6084  ;;  %v13402_v36 = vld [vmem:[#allocation3 + $0x120] sm:$0xff]  ;;  %6932 = vst.msk [vmem:[#allocation4 + $0xc0] sm:$0xff] %vm171_vm0, %v13448_v28 }
 0x8be   : > { %6151 = vst.msk [vmem:[#allocation4 + $0xe8] sm:$0xff] %vm1854_vm8, %v6085_v9 }
 0x8bf   : > { %v6083_v20 = vpop.permute.xlu0 %6082  ;;  %6926 = vst.msk [vmem:[#allocation4 + $0x90] sm:$0xff] %vm171_vm0, %v13402_v36 }
 0x8c0   : > { %6150 = vst.msk [vmem:[#allocation4 + $0xe0] sm:$0xff] %vm1854_vm8, %v6083_v20 }
 0x8c1   : > { %v6277_v39 = vpop.permute.xlu1 %6276  ;;  %v6373_v10 = vld [vmem:[#allocation4 + $0xd8] sm:$0xff] }
 0x8c2   : > { %6343 = vst.msk [vmem:[#allocation4 + $0xe8] sm:$0xff] %vm2047_vm9, %v6277_v39  ;;  %v6743_v39 = vld [vmem:[#allocation5 + $0x18] sm:$0xff] }
 0x8c3   : > { %v6275_v30 = vpop.permute.xlu0 %6274  ;;  %v6372_v18 = vld [vmem:[#allocation4 + $0xd0] sm:$0xff] }
 0x8c4   : > { %6342 = vst.msk [vmem:[#allocation4 + $0xe0] sm:$0xff] %vm2047_vm9, %v6275_v30  ;;  %9566 = vmatprep.mubr.msk.f32.mxu0 %vm2118_vm10, %v6372_v18 }
 0x8c5   : > { %9567 = vmatmul.mubr.msk.f32.gmra.mxu0 %vm2118_vm10, %v6373_v10  ;;  %v5897_v43 = vpop.permute.xlu1 %5896 }
 0x8c6   : > { %5961 = vst.msk [vmem:[#allocation4 + $0xf8] sm:$0xff] %vm1661_vm6, %v5897_v43  ;;  %v6742_v43 = vld [vmem:[#allocation5 + $0x10] sm:$0xff] }
 0x8c7   : > { %v5895_v0 = vpop.permute.xlu0 %5894 }
 0x8c8   : > { %5960 = vst.msk [vmem:[#allocation4 + $0xf0] sm:$0xff] %vm1661_vm6, %v5895_v0 }
 0x8c9   : > { %v6089_v37 = vpop.permute.xlu1 %6088  ;;  %v6375_v40 = vld [vmem:[#allocation4 + $0xe8] sm:$0xff] }
 0x8ca   : > { %6153 = vst.msk [vmem:[#allocation4 + $0xf8] sm:$0xff] %vm1854_vm8, %v6089_v37 }
 0x8cb   : > { %v6087_v44 = vpop.permute.xlu0 %6086  ;;  %v6374_v1 = vld [vmem:[#allocation4 + $0xe0] sm:$0xff] }
 0x8cc   : > { %6152 = vst.msk [vmem:[#allocation4 + $0xf0] sm:$0xff] %vm1854_vm8, %v6087_v44  ;;  %9569 = vmatprep.mubr.msk.f32.mxu0 %vm2118_vm10, %v6374_v1  ;;  %v13422_v44 = vld [vmem:[#allocation3 + $0x140] sm:$0xff] }
 0x8cd   : > { %9570 = vmatmul.mubr.msk.f32.gmra.mxu0 %vm2118_vm10, %v6375_v40  ;;  %v6281_v60 = vpop.permute.xlu1 %6280  ;;  %6928 = vst.msk [vmem:[#allocation4 + $0xa0] sm:$0xff] %vm171_vm0, %v13422_v44 }
 0x8ce   : > { %6345 = vst.msk [vmem:[#allocation4 + $0xf8] sm:$0xff] %vm2047_vm9, %v6281_v60 }
 0x8cf   : > { %v6279_v34 = vpop.permute.xlu0 %6278 }
 0x8d0   : > { %6344 = vst.msk [vmem:[#allocation4 + $0xf0] sm:$0xff] %vm2047_vm9, %v6279_v34 }
 0x8d1   : > { %v7007_v26 = vpop.permute.xlu1 %7006 }
 0x8d2   : > { %7101 = vst.msk [vmem:[#allocation4 + $0x8] sm:$0xff] %vm695_vm1, %v7007_v26 }
 0x8d3   : > { %v7005_v27 = vpop.permute.xlu0 %7004 }
 0x8d4   : > { %7100 = vst.msk [vmem:[#allocation4] sm:$0xff] %vm695_vm1, %v7005_v27 }
 0x8d5   : > { %v6377_v61 = vld [vmem:[#allocation4 + $0xf8] sm:$0xff]  ;;  %v7011_v48 = vpop.permute.xlu1 %7010 }
 0x8d6   : > { %7103 = vst.msk [vmem:[#allocation4 + $0x18] sm:$0xff] %vm695_vm1, %v7011_v48  ;;  %v6744_v48 = vld [vmem:[#allocation5 + $0x20] sm:$0xff] }
 0x8d7   : > { %v6376_v38 = vld [vmem:[#allocation4 + $0xf0] sm:$0xff]  ;;  %v7009_v62 = vpop.permute.xlu0 %7008 }
 0x8d8   : > { %9572 = vmatprep.mubr.msk.f32.mxu0 %vm2118_vm10, %v6376_v38  ;;  %7102 = vst.msk [vmem:[#allocation4 + $0x10] sm:$0xff] %vm695_vm1, %v7009_v62  ;;  %v6745_v38 = vld [vmem:[#allocation5 + $0x28] sm:$0xff] }
 0x8d9   : > { %9573 = vmatmul.mubr.msk.f32.gmra.mxu0 %vm2118_vm10, %v6377_v61  ;;  %v7015_v33 = vpop.permute.xlu1 %7014 }
 0x8da   : > { %7105 = vst.msk [vmem:[#allocation4 + $0x28] sm:$0xff] %vm695_vm1, %v7015_v33 }
 0x8db   : > { %v7013_v13 = vpop.permute.xlu0 %7012 }
 0x8dc   : > { %7104 = vst.msk [vmem:[#allocation4 + $0x20] sm:$0xff] %vm695_vm1, %v7013_v13 }
 0x8dd   : > { %v7019_v22 = vpop.permute.xlu1 %7018 }
 0x8de   : > { %7107 = vst.msk [vmem:[#allocation4 + $0x38] sm:$0xff] %vm695_vm1, %v7019_v22 }
 0x8df   : > { %v7017_v46 = vpop.permute.xlu0 %7016 }
 0x8e0   : > { %7106 = vst.msk [vmem:[#allocation4 + $0x30] sm:$0xff] %vm695_vm1, %v7017_v46 }
 0x8e1   : > { %v7023_v51 = vpop.permute.xlu1 %7022 }
 0x8e2   : > { %7109 = vst.msk [vmem:[#allocation4 + $0x48] sm:$0xff] %vm695_vm1, %v7023_v51 }
 0x8e3   : > { %v7021_v57 = vpop.permute.xlu0 %7020 }
 0x8e4   : > { %7108 = vst.msk [vmem:[#allocation4 + $0x40] sm:$0xff] %vm695_vm1, %v7021_v57 }
 0x8e5   : > { %v7027_v56 = vpop.permute.xlu1 %7026 }
 0x8e6   : > { %7111 = vst.msk [vmem:[#allocation4 + $0x58] sm:$0xff] %vm695_vm1, %v7027_v56  ;;  %v6746_v56 = vld [vmem:[#allocation5 + $0x30] sm:$0xff] }
 0x8e7   : > { %v7025_v6 = vpop.permute.xlu0 %7024 }
 0x8e8   : > { %7110 = vst.msk [vmem:[#allocation4 + $0x50] sm:$0xff] %vm695_vm1, %v7025_v6 }
 0x8e9   : > { %v7031_v24 = vpop.permute.xlu1 %7030 }
 0x8ea   : > { %7113 = vst.msk [vmem:[#allocation4 + $0x68] sm:$0xff] %vm695_vm1, %v7031_v24 }
 0x8eb   : > { %v7029_v31 = vpop.permute.xlu0 %7028 }
 0x8ec   : > { %7112 = vst.msk [vmem:[#allocation4 + $0x60] sm:$0xff] %vm695_vm1, %v7029_v31  ;;  %v13466_v31 = vld [vmem:[#allocation3 + $0x1a0] sm:$0xff] }
 0x8ed   : > { %v7035_v29 = vpop.permute.xlu1 %7034  ;;  %6934 = vst.msk [vmem:[#allocation4 + $0xd0] sm:$0xff] %vm171_vm0, %v13466_v31 }
 0x8ee   : > { %7115 = vst.msk [vmem:[#allocation4 + $0x78] sm:$0xff] %vm695_vm1, %v7035_v29  ;;  %v13472_v29 = vld [vmem:[#allocation3 + $0x1c0] sm:$0xff] }
 0x8ef   : > { %v7033_v11 = vpop.permute.xlu0 %7032  ;;  %6936 = vst.msk [vmem:[#allocation4 + $0xe0] sm:$0xff] %vm171_vm0, %v13472_v29 }
 0x8f0   : > { %7114 = vst.msk [vmem:[#allocation4 + $0x70] sm:$0xff] %vm695_vm1, %v7033_v11 }
 0x91d   : > { %v9529_v45 = vpop.f32.mrf.mxu0 }
 0x91e   : > { %v6555_v53 = vadd.f32 %v9529_v45, %v13386_v17 }
 0x91f   : > { %v6549_v63 = vpop.f32.mrf.mxu0 }
 0x920   : > { %v6709_v8 = vmax.f32 %v6555_v53, 0.0  ;;  %v6550_v12 = vadd.f32 %v13386_v17, %v6549_v63 }
 0x922   : > { %v6773_v4 = vadd.f32 %v6741_v52, %v6709_v8  ;;  %6837 = vst.msk [vmem:[#allocation3 + $0x110] sm:$0xff] %vm171_vm0, %v6709_v8  ;;  %v6708_v41 = vmax.f32 %v6550_v12, 0.0 }
 0x924   : > { %6805 = vst.msk [vmem:[#allocation5 + $0x8] sm:$0xff] %vm171_vm0, %v6773_v4  ;;  %v6772_v5 = vadd.f32 %v6740_v42, %v6708_v41  ;;  %6836 = vst.msk [vmem:[#allocation3 + $0x108] sm:$0xff] %vm171_vm0, %v6708_v41  ;;  %v6748_v41 = vld [vmem:[#allocation5 + $0x40] sm:$0xff] }
 0x925   : > { %v9532_v58 = vpop.f32.mrf.mxu0 }
 0x926   : > { %6804 = vst.msk [vmem:[#allocation5] sm:$0xff] %vm171_vm0, %v6772_v5  ;;  %v6565_v23 = vadd.f32 %v9532_v58, %v13386_v17 }
 0x927   : > { %v6559_v35 = vpop.f32.mrf.mxu0 }
 0x928   : > { %v6711_v9 = vmax.f32 %v6565_v23, 0.0  ;;  %v6560_v20 = vadd.f32 %v13386_v17, %v6559_v35  ;;  %v13490_v23 = vld [vmem:[#allocation3 + $0x1e0] sm:$0xff] }
 0x929   : > { %v13409_v10 = vld [vmem:[#allocation3 + $0x110] sm:$0xff]  ;;  %6938 = vst.msk [vmem:[#allocation4 + $0xf0] sm:$0xff] %vm171_vm0, %v13490_v23 }
 0x92a   : > { %v6775_v30 = vadd.f32 %v6743_v39, %v6711_v9  ;;  %6839 = vst.msk [vmem:[#allocation3 + $0x130] sm:$0xff] %vm171_vm0, %v6711_v9  ;;  %v6710_v18 = vmax.f32 %v6560_v20, 0.0  ;;  %7038 = vrot.lane.b32.xlu1 %v13409_v10, %s9659_s19 }
 0x92b   : > { %v13414_v0 = vld [vmem:[#allocation3 + $0x108] sm:$0xff] }
 0x92c   : > { %6807 = vst.msk [vmem:[#allocation5 + $0x18] sm:$0xff] %vm171_vm0, %v6775_v30  ;;  %v6774_v37 = vadd.f32 %v6742_v43, %v6710_v18  ;;  %6838 = vst.msk [vmem:[#allocation3 + $0x128] sm:$0xff] %vm171_vm0, %v6710_v18  ;;  %7036 = vrot.lane.b32.xlu0 %v13414_v0, %s9659_s19  ;;  %v6751_v30 = vld [vmem:[#allocation5 + $0x58] sm:$0xff] }
 0x92d   : > { %6925 = vst.msk [vmem:[#allocation4 + $0x88] sm:$0xff] %vm171_vm0, %v13414_v0  ;;  %v9535_v40 = vpop.f32.mrf.mxu0 }
 0x92e   : > { %6806 = vst.msk [vmem:[#allocation5 + $0x10] sm:$0xff] %vm171_vm0, %v6774_v37  ;;  %v6575_v1 = vadd.f32 %v9535_v40, %v13386_v17  ;;  %v6750_v40 = vld [vmem:[#allocation5 + $0x50] sm:$0xff] }
 0x92f   : > { %v6569_v60 = vpop.f32.mrf.mxu0 }
 0x930   : > { %v6713_v34 = vmax.f32 %v6575_v1, 0.0  ;;  %v6570_v61 = vadd.f32 %v13386_v17, %v6569_v60 }
 0x931   : > { %v13429_v26 = vld [vmem:[#allocation3 + $0x130] sm:$0xff] }
 0x932   : > { %v6777_v55 = vadd.f32 %v6745_v38, %v6713_v34  ;;  %6841 = vst.msk [vmem:[#allocation3 + $0x150] sm:$0xff] %vm171_vm0, %v6713_v34  ;;  %v6712_v27 = vmax.f32 %v6570_v61, 0.0  ;;  %7042 = vrot.lane.b32.xlu1 %v13429_v26, %s9659_s19 }
 0x933   : > { %v13434_v7 = vld [vmem:[#allocation3 + $0x128] sm:$0xff] }
 0x934   : > { %6809 = vst.msk [vmem:[#allocation5 + $0x28] sm:$0xff] %vm171_vm0, %v6777_v55  ;;  %v6776_v62 = vadd.f32 %v6744_v48, %v6712_v27  ;;  %6840 = vst.msk [vmem:[#allocation3 + $0x148] sm:$0xff] %vm171_vm0, %v6712_v27  ;;  %7040 = vrot.lane.b32.xlu0 %v13434_v7, %s9659_s19  ;;  %v6753_v48 = vld [vmem:[#allocation5 + $0x68] sm:$0xff] }
 0x935   : > { %6927 = vst.msk [vmem:[#allocation4 + $0x98] sm:$0xff] %vm171_vm0, %v13434_v7  ;;  %v9538_v33 = vpop.f32.mrf.mxu0 }
 0x936   : > { %6808 = vst.msk [vmem:[#allocation5 + $0x20] sm:$0xff] %vm171_vm0, %v6776_v62  ;;  %v6585_v13 = vadd.f32 %v9538_v33, %v13386_v17 }
 0x937   : > { %v6579_v22 = vpop.f32.mrf.mxu0 }
 0x938   : > { %v6715_v46 = vmax.f32 %v6585_v13, 0.0  ;;  %v6580_v51 = vadd.f32 %v13386_v17, %v6579_v22  ;;  %v6752_v22 = vld [vmem:[#allocation5 + $0x60] sm:$0xff] }
 0x939   : > { %v13453_v57 = vld [vmem:[#allocation3 + $0x150] sm:$0xff] }
 0x93a   : > { %v6779_v3 = vadd.f32 %v6747_v54, %v6715_v46  ;;  %6843 = vst.msk [vmem:[#allocation3 + $0x170] sm:$0xff] %vm171_vm0, %v6715_v46  ;;  %v6714_v15 = vmax.f32 %v6580_v51, 0.0  ;;  %7046 = vrot.lane.b32.xlu1 %v13453_v57, %s9659_s19 }
 0x93b   : > { %v13458_v6 = vld [vmem:[#allocation3 + $0x148] sm:$0xff] }
 0x93c   : > { %6811 = vst.msk [vmem:[#allocation5 + $0x38] sm:$0xff] %vm171_vm0, %v6779_v3  ;;  %v6778_v24 = vadd.f32 %v6746_v56, %v6714_v15  ;;  %6842 = vst.msk [vmem:[#allocation3 + $0x168] sm:$0xff] %vm171_vm0, %v6714_v15  ;;  %7044 = vrot.lane.b32.xlu0 %v13458_v6, %s9659_s19 }
 0x93d   : > { %6929 = vst.msk [vmem:[#allocation4 + $0xa8] sm:$0xff] %vm171_vm0, %v13458_v6  ;;  %v9541_v45 = vpop.f32.mrf.mxu0 }
 0x93e   : > { %6810 = vst.msk [vmem:[#allocation5 + $0x30] sm:$0xff] %vm171_vm0, %v6778_v24  ;;  %v6595_v53 = vadd.f32 %v9541_v45, %v13386_v17  ;;  %v6755_v45 = vld [vmem:[#allocation5 + $0x78] sm:$0xff] }
 0x93f   : > { %v6589_v63 = vpop.f32.mrf.mxu0 }
 0x940   : > { %v6717_v8 = vmax.f32 %v6595_v53, 0.0  ;;  %v6590_v12 = vadd.f32 %v13386_v17, %v6589_v63 }
 0x941   : > { %v13477_v52 = vld [vmem:[#allocation3 + $0x170] sm:$0xff] }
 0x942   : > { %v6781_v11 = vadd.f32 %v6749_v16, %v6717_v8  ;;  %6845 = vst.msk [vmem:[#allocation3 + $0x190] sm:$0xff] %vm171_vm0, %v6717_v8  ;;  %v6716_v4 = vmax.f32 %v6590_v12, 0.0  ;;  %7050 = vrot.lane.b32.xlu1 %v13477_v52, %s9659_s19  ;;  %v6754_v12 = vld [vmem:[#allocation5 + $0x70] sm:$0xff] }
 0x943   : > { %v13482_v42 = vld [vmem:[#allocation3 + $0x168] sm:$0xff] }
 0x944   : > { %6813 = vst.msk [vmem:[#allocation5 + $0x48] sm:$0xff] %vm171_vm0, %v6781_v11  ;;  %v6780_v5 = vadd.f32 %v6748_v41, %v6716_v4  ;;  %6844 = vst.msk [vmem:[#allocation3 + $0x188] sm:$0xff] %vm171_vm0, %v6716_v4  ;;  %7048 = vrot.lane.b32.xlu0 %v13482_v42, %s9659_s19 }
 0x945   : > { %6931 = vst.msk [vmem:[#allocation4 + $0xb8] sm:$0xff] %vm171_vm0, %v13482_v42  ;;  %v9544_v58 = vpop.f32.mrf.mxu0 }
 0x946   : > { %6812 = vst.msk [vmem:[#allocation5 + $0x40] sm:$0xff] %vm171_vm0, %v6780_v5  ;;  %v6605_v35 = vadd.f32 %v9544_v58, %v13386_v17 }
 0x947   : > { %v6599_v9 = vpop.f32.mrf.mxu0 }
 0x948   : > { %v6719_v20 = vmax.f32 %v6605_v35, 0.0  ;;  %v6600_v39 = vadd.f32 %v13386_v17, %v6599_v9  ;;  %v6757_v9 = vld [vmem:[#allocation5 + $0x88] sm:$0xff] }
 0x949   : > { %v13497_v18 = vld [vmem:[#allocation3 + $0x190] sm:$0xff] }
 0x94a   : > { %v6783_v43 = vadd.f32 %v6751_v30, %v6719_v20  ;;  %6847 = vst.msk [vmem:[#allocation3 + $0x1b0] sm:$0xff] %vm171_vm0, %v6719_v20  ;;  %v6718_v37 = vmax.f32 %v6600_v39, 0.0  ;;  %7054 = vrot.lane.b32.xlu1 %v13497_v18, %s9659_s19 }
 0x94b   : > { %v13502_v1 = vld [vmem:[#allocation3 + $0x188] sm:$0xff] }
 0x94c   : > { %6815 = vst.msk [vmem:[#allocation5 + $0x58] sm:$0xff] %vm171_vm0, %v6783_v43  ;;  %v6782_v60 = vadd.f32 %v6750_v40, %v6718_v37  ;;  %6846 = vst.msk [vmem:[#allocation3 + $0x1a8] sm:$0xff] %vm171_vm0, %v6718_v37  ;;  %7052 = vrot.lane.b32.xlu0 %v13502_v1, %s9659_s19  ;;  %v6756_v43 = vld [vmem:[#allocation5 + $0x80] sm:$0xff]  ;;  %v7133_v40 = vld [vmem:[#allocation3 + $0x18] sm:$0xff] }
 0x94d   : > { %6933 = vst.msk [vmem:[#allocation4 + $0xc8] sm:$0xff] %vm171_vm0, %v13502_v1  ;;  %v9547_v34 = vpop.f32.mrf.mxu0 }
 0x94e   : > { %6814 = vst.msk [vmem:[#allocation5 + $0x50] sm:$0xff] %vm171_vm0, %v6782_v60  ;;  %v6615_v61 = vadd.f32 %v9547_v34, %v13386_v17 }
 0x94f   : > { %v6609_v38 = vpop.f32.mrf.mxu0 }
 0x950   : > { %v6721_v55 = vmax.f32 %v6615_v61, 0.0  ;;  %v6610_v27 = vadd.f32 %v13386_v17, %v6609_v38 }
 0x951   : > { %v13513_v62 = vld [vmem:[#allocation3 + $0x1b0] sm:$0xff] }
 0x952   : > { %v6785_v33 = vadd.f32 %v6753_v48, %v6721_v55  ;;  %6849 = vst.msk [vmem:[#allocation3 + $0x1d0] sm:$0xff] %vm171_vm0, %v6721_v55  ;;  %v6720_v13 = vmax.f32 %v6610_v27, 0.0  ;;  %7058 = vrot.lane.b32.xlu1 %v13513_v62, %s9659_s19  ;;  %v7135_v55 = vld [vmem:[#allocation3 + $0x38] sm:$0xff] }
 0x953   : > { %v13518_v46 = vld [vmem:[#allocation3 + $0x1a8] sm:$0xff] }
 0x954   : > { %6817 = vst.msk [vmem:[#allocation5 + $0x68] sm:$0xff] %vm171_vm0, %v6785_v33  ;;  %v6784_v51 = vadd.f32 %v6752_v22, %v6720_v13  ;;  %6848 = vst.msk [vmem:[#allocation3 + $0x1c8] sm:$0xff] %vm171_vm0, %v6720_v13  ;;  %7056 = vrot.lane.b32.xlu0 %v13518_v46, %s9659_s19  ;;  %v6759_v33 = vld [vmem:[#allocation5 + $0x98] sm:$0xff] }
 0x955   : > { %6935 = vst.msk [vmem:[#allocation4 + $0xd8] sm:$0xff] %vm171_vm0, %v13518_v46  ;;  %v9550_v54 = vpop.f32.mrf.mxu0 }
 0x956   : > { %6816 = vst.msk [vmem:[#allocation5 + $0x60] sm:$0xff] %vm171_vm0, %v6784_v51  ;;  %v6625_v3 = vadd.f32 %v9550_v54, %v13386_v17  ;;  %v6758_v51 = vld [vmem:[#allocation5 + $0x90] sm:$0xff]  ;;  %v7137_v54 = vld [vmem:[#allocation3 + $0x58] sm:$0xff] }
 0x957   : > { %v6619_v15 = vpop.f32.mrf.mxu0 }
 0x958   : > { %v6723_v56 = vmax.f32 %v6625_v3, 0.0  ;;  %v6620_v24 = vadd.f32 %v13386_v17, %v6619_v15 }
 0x959   : > { %v13529_v53 = vld [vmem:[#allocation3 + $0x1d0] sm:$0xff] }
 0x95a   : > { %v6787_v63 = vadd.f32 %v6755_v45, %v6723_v56  ;;  %6851 = vst.msk [vmem:[#allocation3 + $0x1f0] sm:$0xff] %vm171_vm0, %v6723_v56  ;;  %v6722_v8 = vmax.f32 %v6620_v24, 0.0  ;;  %7062 = vrot.lane.b32.xlu1 %v13529_v53, %s9659_s19  ;;  %v7139_v24 = vld [vmem:[#allocation3 + $0x78] sm:$0xff] }
 0x95b   : > { %v13534_v16 = vld [vmem:[#allocation3 + $0x1c8] sm:$0xff] }
 0x95c   : > { %6819 = vst.msk [vmem:[#allocation5 + $0x78] sm:$0xff] %vm171_vm0, %v6787_v63  ;;  %v6786_v11 = vadd.f32 %v6754_v12, %v6722_v8  ;;  %6850 = vst.msk [vmem:[#allocation3 + $0x1e8] sm:$0xff] %vm171_vm0, %v6722_v8  ;;  %7060 = vrot.lane.b32.xlu0 %v13534_v16, %s9659_s19  ;;  %v6761_v8 = vld [vmem:[#allocation5 + $0xa8] sm:$0xff] }
 0x95d   : > { %6937 = vst.msk [vmem:[#allocation4 + $0xe8] sm:$0xff] %vm171_vm0, %v13534_v16  ;;  %v9553_v4 = vpop.f32.mrf.mxu0 }
 0x95e   : > { %6818 = vst.msk [vmem:[#allocation5 + $0x70] sm:$0xff] %vm171_vm0, %v6786_v11  ;;  %v6635_v41 = vadd.f32 %v9553_v4, %v13386_v17  ;;  %v6760_v11 = vld [vmem:[#allocation5 + $0xa0] sm:$0xff]  ;;  %v7141_v4 = vld [vmem:[#allocation3 + $0x98] sm:$0xff] }
 0x95f   : > { %v6629_v5 = vpop.f32.mrf.mxu0 }
 0x960   : > { %v6725_v58 = vmax.f32 %v6635_v41, 0.0  ;;  %v6630_v35 = vadd.f32 %v13386_v17, %v6629_v5 }
 0x961   : > { %v13545_v20 = vld [vmem:[#allocation3 + $0x1f0] sm:$0xff] }
 0x962   : > { %v6789_v39 = vadd.f32 %v6757_v9, %v6725_v58  ;;  %6853 = vst.msk [vmem:[#allocation3 + $0x210] sm:$0xff] %vm171_vm0, %v6725_v58  ;;  %v6724_v30 = vmax.f32 %v6630_v35, 0.0  ;;  %7066 = vrot.lane.b32.xlu1 %v13545_v20, %s9659_s19  ;;  %v7143_v35 = vld [vmem:[#allocation3 + $0xb8] sm:$0xff] }
 0x963   : > { %v13550_v37 = vld [vmem:[#allocation3 + $0x1e8] sm:$0xff] }
 0x964   : > { %6821 = vst.msk [vmem:[#allocation5 + $0x88] sm:$0xff] %vm171_vm0, %v6789_v39  ;;  %v6788_v60 = vadd.f32 %v6756_v43, %v6724_v30  ;;  %6852 = vst.msk [vmem:[#allocation3 + $0x208] sm:$0xff] %vm171_vm0, %v6724_v30  ;;  %7064 = vrot.lane.b32.xlu0 %v13550_v37, %s9659_s19  ;;  %v6763_v30 = vld [vmem:[#allocation5 + $0xb8] sm:$0xff] }
 0x965   : > { %6939 = vst.msk [vmem:[#allocation4 + $0xf8] sm:$0xff] %vm171_vm0, %v13550_v37  ;;  %v9556_v34 = vpop.f32.mrf.mxu0 }
 0x966   : > { %6820 = vst.msk [vmem:[#allocation5 + $0x80] sm:$0xff] %vm171_vm0, %v6788_v60  ;;  %v6645_v61 = vadd.f32 %v9556_v34, %v13386_v17  ;;  %7198 = vrot.lane.b32.xlu1 %v7133_v40, %s9660_s20  ;;  %v6762_v40 = vld [vmem:[#allocation5 + $0xb0] sm:$0xff]  ;;  %v7145_v60 = vld [vmem:[#allocation3 + $0xd8] sm:$0xff] }
 0x967   : > { %v6639_v38 = vpop.f32.mrf.mxu0 }
 0x968   : > { %v6727_v27 = vmax.f32 %v6645_v61, 0.0  ;;  %v6640_v48 = vadd.f32 %v13386_v17, %v6639_v38  ;;  %7196 = vrot.lane.b32.xlu0 %v13227_v21, %s9660_s20 }
 0x96a   : > { %v6791_v13 = vadd.f32 %v6759_v33, %v6727_v27  ;;  %6855 = vst.msk [vmem:[#allocation3 + $0x230] sm:$0xff] %vm171_vm0, %v6727_v27  ;;  %v6726_v22 = vmax.f32 %v6640_v48, 0.0  ;;  %7202 = vrot.lane.b32.xlu1 %v7135_v55, %s9660_s20  ;;  %v7147_v55 = vld [vmem:[#allocation3 + $0xf8] sm:$0xff]  ;;  %v6765_v33 = vld [vmem:[#allocation5 + $0xc8] sm:$0xff] }
 0x96c   : > { %6823 = vst.msk [vmem:[#allocation5 + $0x98] sm:$0xff] %vm171_vm0, %v6791_v13  ;;  %v6790_v3 = vadd.f32 %v6758_v51, %v6726_v22  ;;  %6854 = vst.msk [vmem:[#allocation3 + $0x228] sm:$0xff] %vm171_vm0, %v6726_v22  ;;  %7200 = vrot.lane.b32.xlu0 %v13235_v59, %s9660_s20  ;;  %v6764_v22 = vld [vmem:[#allocation5 + $0xc0] sm:$0xff]  ;;  %v13602_v51 = vld [vmem:[#allocation3 + $0x118] sm:$0xff] }
 0x96d   : > { %v9559_v15 = vpop.f32.mrf.mxu0 }
 0x96e   : > { %6822 = vst.msk [vmem:[#allocation5 + $0x90] sm:$0xff] %vm171_vm0, %v6790_v3  ;;  %v6655_v21 = vadd.f32 %v9559_v15, %v13386_v17  ;;  %7206 = vrot.lane.b32.xlu1 %v7137_v54, %s9660_s20 }
 0x96f   : > { %v6649_v56 = vpop.f32.mrf.mxu0 }
 0x970   : > { %v6729_v45 = vmax.f32 %v6655_v21, 0.0  ;;  %v6650_v63 = vadd.f32 %v13386_v17, %v6649_v56  ;;  %7204 = vrot.lane.b32.xlu0 %v13244_v49, %s9660_s20  ;;  %v13612_v21 = vld [vmem:[#allocation3 + $0x138] sm:$0xff] }
 0x972   : > { %v6793_v12 = vadd.f32 %v6761_v8, %v6729_v45  ;;  %6857 = vst.msk [vmem:[#allocation3 + $0x250] sm:$0xff] %vm171_vm0, %v6729_v45  ;;  %v6728_v59 = vmax.f32 %v6650_v63, 0.0  ;;  %7210 = vrot.lane.b32.xlu1 %v7139_v24, %s9660_s20  ;;  %v6767_v45 = vld [vmem:[#allocation5 + $0xd8] sm:$0xff]  ;;  %v6766_v8 = vld [vmem:[#allocation5 + $0xd0] sm:$0xff] }
 0x974   : > { %6825 = vst.msk [vmem:[#allocation5 + $0xa8] sm:$0xff] %vm171_vm0, %v6793_v12  ;;  %v6792_v41 = vadd.f32 %v6760_v11, %v6728_v59  ;;  %6856 = vst.msk [vmem:[#allocation3 + $0x248] sm:$0xff] %vm171_vm0, %v6728_v59  ;;  %7208 = vrot.lane.b32.xlu0 %v13252_v50, %s9660_s20  ;;  %v13620_v12 = vld [vmem:[#allocation3 + $0x158] sm:$0xff] }
 0x975   : > { %v9562_v5 = vpop.f32.mrf.mxu0 }
 0x976   : > { %6824 = vst.msk [vmem:[#allocation5 + $0xa0] sm:$0xff] %vm171_vm0, %v6792_v41  ;;  %v6665_v49 = vadd.f32 %v9562_v5, %v13386_v17  ;;  %7214 = vrot.lane.b32.xlu1 %v7141_v4, %s9660_s20  ;;  %v13630_v5 = vld [vmem:[#allocation3 + $0x178] sm:$0xff] }
 0x977   : > { %v6659_v58 = vpop.f32.mrf.mxu0 }
 0x978   : > { %v6731_v9 = vmax.f32 %v6665_v49, 0.0  ;;  %v6660_v39 = vadd.f32 %v13386_v17, %v6659_v58  ;;  %7212 = vrot.lane.b32.xlu0 %v13261_v19, %s9660_s20 }
 0x97a   : > { %v6795_v43 = vadd.f32 %v6763_v30, %v6731_v9  ;;  %6859 = vst.msk [vmem:[#allocation3 + $0x270] sm:$0xff] %vm171_vm0, %v6731_v9  ;;  %v6730_v50 = vmax.f32 %v6660_v39, 0.0  ;;  %7218 = vrot.lane.b32.xlu1 %v7143_v35, %s9660_s20  ;;  %v6769_v35 = vld [vmem:[#allocation5 + $0xe8] sm:$0xff]  ;;  %v6768_v30 = vld [vmem:[#allocation5 + $0xe0] sm:$0xff] }
 0x97c   : > { %6827 = vst.msk [vmem:[#allocation5 + $0xb8] sm:$0xff] %vm171_vm0, %v6795_v43  ;;  %v6794_v34 = vadd.f32 %v6762_v40, %v6730_v50  ;;  %6858 = vst.msk [vmem:[#allocation3 + $0x268] sm:$0xff] %vm171_vm0, %v6730_v50  ;;  %7216 = vrot.lane.b32.xlu0 %v13311_v32, %s9660_s20  ;;  %v13638_v43 = vld [vmem:[#allocation3 + $0x198] sm:$0xff] }
 0x97d   : > { %v9565_v61 = vpop.f32.mrf.mxu0  ;;  %v13647_v40 = vld [vmem:[#allocation3 + $0x1b8] sm:$0xff] }
 0x97e   : > { %6826 = vst.msk [vmem:[#allocation5 + $0xb0] sm:$0xff] %vm171_vm0, %v6794_v34  ;;  %v6675_v19 = vadd.f32 %v9565_v61, %v13386_v17  ;;  %7222 = vrot.lane.b32.xlu1 %v7145_v60, %s9660_s20 }
 0x97f   : > { %v6669_v38 = vpop.f32.mrf.mxu0 }
 0x980   : > { %v6733_v27 = vmax.f32 %v6675_v19, 0.0  ;;  %v6670_v48 = vadd.f32 %v13386_v17, %v6669_v38  ;;  %7220 = vrot.lane.b32.xlu0 %v13317_v14, %s9660_s20  ;;  %v13654_v19 = vld [vmem:[#allocation3 + $0x1d8] sm:$0xff] }
 0x982   : > { %v6797_v13 = vadd.f32 %v6765_v33, %v6733_v27  ;;  %6861 = vst.msk [vmem:[#allocation3 + $0x290] sm:$0xff] %vm171_vm0, %v6733_v27  ;;  %v6732_v32 = vmax.f32 %v6670_v48, 0.0  ;;  %7226 = vrot.lane.b32.xlu1 %v7147_v55, %s9660_s20  ;;  %v6771_v27 = vld [vmem:[#allocation5 + $0xf8] sm:$0xff] }
 0x984   : > { %6829 = vst.msk [vmem:[#allocation5 + $0xc8] sm:$0xff] %vm171_vm0, %v6797_v13  ;;  %v6796_v54 = vadd.f32 %v6764_v22, %v6732_v32  ;;  %6860 = vst.msk [vmem:[#allocation3 + $0x288] sm:$0xff] %vm171_vm0, %v6732_v32  ;;  %7224 = vrot.lane.b32.xlu0 %v13329_v47, %s9660_s20  ;;  %v6770_v13 = vld [vmem:[#allocation5 + $0xf0] sm:$0xff]  ;;  %v13664_v32 = vld [vmem:[#allocation3 + $0x1f8] sm:$0xff] }
 0x985   : > { %v9568_v3 = vpop.f32.mrf.mxu0 }
 0x986   : > { %6828 = vst.msk [vmem:[#allocation5 + $0xc0] sm:$0xff] %vm171_vm0, %v6796_v54  ;;  %v6685_v14 = vadd.f32 %v9568_v3, %v13386_v17  ;;  %7230 = vrot.lane.b32.xlu1 %v13602_v51, %s9660_s20  ;;  %v13733_v54 = vld [vmem:[#allocation3 + $0x240] sm:$0xff] }
 0x987   : > { %v6679_v15 = vpop.f32.mrf.mxu0 }
 0x988   : > { %v6735_v56 = vmax.f32 %v6685_v14, 0.0  ;;  %v6680_v24 = vadd.f32 %v13386_v17, %v6679_v15  ;;  %7228 = vrot.lane.b32.xlu0 %v13409_v10, %s9660_s20 }
 0x98a   : > { %v6799_v63 = vadd.f32 %v6767_v45, %v6735_v56  ;;  %6863 = vst.msk [vmem:[#allocation3 + $0x2b0] sm:$0xff] %vm171_vm0, %v6735_v56  ;;  %v6734_v47 = vmax.f32 %v6680_v24, 0.0  ;;  %7234 = vrot.lane.b32.xlu1 %v13612_v21, %s9660_s20  ;;  %v9212_v45 = vld [vmem:[%s14488_s1 + $0x90] sm:$0xff] }
 0x98c   : > { %6831 = vst.msk [vmem:[#allocation5 + $0xd8] sm:$0xff] %vm171_vm0, %v6799_v63  ;;  %v6798_v59 = vadd.f32 %v6766_v8, %v6734_v47  ;;  %6862 = vst.msk [vmem:[#allocation3 + $0x2a8] sm:$0xff] %vm171_vm0, %v6734_v47  ;;  %7232 = vrot.lane.b32.xlu0 %v13429_v26, %s9660_s20  ;;  %v13770_v47 = vld [vmem:[#allocation3 + $0x210] sm:$0xff] }
 0x98d   : > { %v9571_v11 = vpop.f32.mrf.mxu0 }
 0x98e   : > { %6830 = vst.msk [vmem:[#allocation5 + $0xd0] sm:$0xff] %vm171_vm0, %v6798_v59  ;;  %v6695_v4 = vadd.f32 %v9571_v11, %v13386_v17  ;;  %7238 = vrot.lane.b32.xlu1 %v13620_v12, %s9660_s20  ;;  %v9210_v59 = vld [vmem:[%s14488_s1 + $0x80] sm:$0xff] }
 0x98f   : > { %v6689_v41 = vpop.f32.mrf.mxu0 }
 0x990   : > { %v6737_v49 = vmax.f32 %v6695_v4, 0.0  ;;  %v6690_v58 = vadd.f32 %v13386_v17, %v6689_v41  ;;  %7236 = vrot.lane.b32.xlu0 %v13453_v57, %s9660_s20  ;;  %v9209_v4 = vld [vmem:[%s14488_s1 + $0x78] sm:$0xff] }
 0x992   : > { %v6801_v9 = vadd.f32 %v6769_v35, %v6737_v49  ;;  %6865 = vst.msk [vmem:[#allocation3 + $0x2d0] sm:$0xff] %vm171_vm0, %v6737_v49  ;;  %v6736_v39 = vmax.f32 %v6690_v58, 0.0  ;;  %7242 = vrot.lane.b32.xlu1 %v13630_v5, %s9660_s20  ;;  %v13793_v58 = vld [vmem:[#allocation3 + $0x218] sm:$0xff] }
 0x994   : > { %6833 = vst.msk [vmem:[#allocation5 + $0xe8] sm:$0xff] %vm171_vm0, %v6801_v9  ;;  %v6800_v50 = vadd.f32 %v6768_v30, %v6736_v39  ;;  %6864 = vst.msk [vmem:[#allocation3 + $0x2c8] sm:$0xff] %vm171_vm0, %v6736_v39  ;;  %7240 = vrot.lane.b32.xlu0 %v13477_v52, %s9660_s20 }
 0x996   : > { %6832 = vst.msk [vmem:[#allocation5 + $0xe0] sm:$0xff] %vm171_vm0, %v6800_v50  ;;  %7246 = vrot.lane.b32.xlu1 %v13638_v43, %s9660_s20  ;;  %v13813_v50 = vld [vmem:[#allocation3 + $0x230] sm:$0xff] }
 0x998   : > { %7244 = vrot.lane.b32.xlu0 %v13497_v18, %s9660_s20 }
 0x999   : > { %v9574_v60 = vpop.f32.mrf.mxu0 }
 0x99a   : > { %v6705_v34 = vadd.f32 %v9574_v60, %v13386_v17  ;;  %7250 = vrot.lane.b32.xlu1 %v13647_v40, %s9660_s20 }
 0x99b   : > { %v6699_v61 = vpop.f32.mrf.mxu0 }
 0x99c   : > { %v6739_v52 = vmax.f32 %v6705_v34, 0.0  ;;  %v6700_v38 = vadd.f32 %v13386_v17, %v6699_v61  ;;  %v7039_v55 = vpop.permute.xlu1 %7038  ;;  %7248 = vrot.lane.b32.xlu0 %v13513_v62, %s9660_s20 }
 0x99d   : > { %7117 = vst.msk [vmem:[#allocation4 + $0x88] sm:$0xff] %vm695_vm1, %v7039_v55 }
 0x99e   : > { %v6803_v18 = vadd.f32 %v6771_v27, %v6739_v52  ;;  %6867 = vst.msk [vmem:[#allocation3 + $0x2f0] sm:$0xff] %vm171_vm0, %v6739_v52  ;;  %v6738_v48 = vmax.f32 %v6700_v38, 0.0  ;;  %v7037_v33 = vpop.permute.xlu0 %7036  ;;  %7254 = vrot.lane.b32.xlu1 %v13654_v19, %s9660_s20  ;;  %v13827_v52 = vld [vmem:[#allocation3 + $0x238] sm:$0xff] }
 0x99f   : > { %7116 = vst.msk [vmem:[#allocation4 + $0x80] sm:$0xff] %vm695_vm1, %v7037_v33 }
 0x9a0   : > { %6835 = vst.msk [vmem:[#allocation5 + $0xf8] sm:$0xff] %vm171_vm0, %v6803_v18  ;;  %v6802_v17 = vadd.f32 %v6770_v13, %v6738_v48  ;;  %6866 = vst.msk [vmem:[#allocation3 + $0x2e8] sm:$0xff] %vm171_vm0, %v6738_v48  ;;  %7252 = vrot.lane.b32.xlu0 %v13529_v53, %s9660_s20  ;;  %v13847_v48 = vld [vmem:[#allocation3 + $0x250] sm:$0xff] }
 0x9a2   : > { %6834 = vst.msk [vmem:[#allocation5 + $0xf0] sm:$0xff] %vm171_vm0, %v6802_v17  ;;  %7258 = vrot.lane.b32.xlu1 %v13664_v32, %s9660_s20 }
 0x9a4   : > { %v7043_v62 = vpop.permute.xlu1 %7042  ;;  %7256 = vrot.lane.b32.xlu0 %v13545_v20, %s9660_s20 }
 0x9a5   : > { %7119 = vst.msk [vmem:[#allocation4 + $0x98] sm:$0xff] %vm695_vm1, %v7043_v62 }
 0x9a6   : > { %v7041_v22 = vpop.permute.xlu0 %7040  ;;  %7390 = vrot.lane.b32.xlu1 %v13414_v0, %s9661_s21 }
 0x9a7   : > { %7118 = vst.msk [vmem:[#allocation4 + $0x90] sm:$0xff] %vm695_vm1, %v7041_v22  ;;  %v13859_v22 = vld [vmem:[#allocation3 + $0x258] sm:$0xff] }
 0x9a8   : > { %7388 = vrot.lane.b32.xlu0 %v13396_v25, %s9661_s21 }
 0x9aa   : > { %7394 = vrot.lane.b32.xlu1 %v13434_v7, %s9661_s21 }
 0x9ac   : > { %v7047_v53 = vpop.permute.xlu1 %7046  ;;  %7392 = vrot.lane.b32.xlu0 %v13402_v36, %s9661_s21 }
 0x9ad   : > { %7121 = vst.msk [vmem:[#allocation4 + $0xa8] sm:$0xff] %vm695_vm1, %v7047_v53 }
 0x9ae   : > { %v7045_v20 = vpop.permute.xlu0 %7044  ;;  %7398 = vrot.lane.b32.xlu1 %v13458_v6, %s9661_s21 }
 0x9af   : > { %7120 = vst.msk [vmem:[#allocation4 + $0xa0] sm:$0xff] %vm695_vm1, %v7045_v20 }
 0x9b0   : > { %7396 = vrot.lane.b32.xlu0 %v13422_v44, %s9661_s21 }
 0x9b2   : > { %7402 = vrot.lane.b32.xlu1 %v13482_v42, %s9661_s21 }
 0x9b4   : > { %v7051_v25 = vpop.permute.xlu1 %7050  ;;  %7400 = vrot.lane.b32.xlu0 %v13442_v2, %s9661_s21 }
 0x9b5   : > { %7123 = vst.msk [vmem:[#allocation4 + $0xb8] sm:$0xff] %vm695_vm1, %v7051_v25  ;;  %v13867_v25 = vld [vmem:[#allocation3 + $0x268] sm:$0xff] }
 0x9b6   : > { %v7049_v36 = vpop.permute.xlu0 %7048  ;;  %7406 = vrot.lane.b32.xlu1 %v13502_v1, %s9661_s21  ;;  %v7340_v1 = vld [vmem:[#allocation3 + $0x200] sm:$0xff] }
 0x9b7   : > { %7122 = vst.msk [vmem:[#allocation4 + $0xb0] sm:$0xff] %vm695_vm1, %v7049_v36  ;;  %v13869_v36 = vld [vmem:[#allocation3 + $0x260] sm:$0xff] }
 0x9b8   : > { %7404 = vrot.lane.b32.xlu0 %v13448_v28, %s9661_s21 }
 0x9ba   : > { %7410 = vrot.lane.b32.xlu1 %v13518_v46, %s9661_s21 }
 0x9bc   : > { %v7055_v44 = vpop.permute.xlu1 %7054  ;;  %7408 = vrot.lane.b32.xlu0 %v13466_v31, %s9661_s21  ;;  %v13716_v31 = vld [vmem:[#allocation3 + $0x208] sm:$0xff] }
 0x9bd   : > { %7125 = vst.msk [vmem:[#allocation4 + $0xc8] sm:$0xff] %vm695_vm1, %v7055_v44 }
 0x9be   : > { %v7053_v2 = vpop.permute.xlu0 %7052  ;;  %7414 = vrot.lane.b32.xlu1 %v13534_v16, %s9661_s21  ;;  %v13724_v16 = vld [vmem:[#allocation3 + $0x220] sm:$0xff] }
 0x9bf   : > { %7124 = vst.msk [vmem:[#allocation4 + $0xc0] sm:$0xff] %vm695_vm1, %v7053_v2  ;;  %v7524_v2 = vld [vmem:[#allocation3 + $0x188] sm:$0xff] }
 0x9c0   : > { %7412 = vrot.lane.b32.xlu0 %v13472_v29, %s9661_s21  ;;  %v13722_v29 = vld [vmem:[#allocation3 + $0x228] sm:$0xff] }
 0x9c2   : > { %7418 = vrot.lane.b32.xlu1 %v13550_v37, %s9661_s21  ;;  %v13731_v37 = vld [vmem:[#allocation3 + $0x248] sm:$0xff] }
 0x9c4   : > { %v7059_v28 = vpop.permute.xlu1 %7058  ;;  %7416 = vrot.lane.b32.xlu0 %v13490_v23, %s9661_s21 }
 0x9c5   : > { %7127 = vst.msk [vmem:[#allocation4 + $0xd8] sm:$0xff] %vm695_vm1, %v7059_v28 }
 0x9c6   : > { %v7057_v46 = vpop.permute.xlu0 %7056  ;;  %7422 = vrot.lane.b32.xlu1 %v13716_v31, %s9661_s21 }
 0x9c7   : > { %7126 = vst.msk [vmem:[#allocation4 + $0xd0] sm:$0xff] %vm695_vm1, %v7057_v46  ;;  %v13882_v46 = vld [vmem:[#allocation3 + $0x270] sm:$0xff] }
 0x9c8   : > { %7420 = vrot.lane.b32.xlu0 %v7340_v1, %s9661_s21 }
 0x9ca   : > { %7426 = vrot.lane.b32.xlu1 %v13722_v29, %s9661_s21 }
 0x9cc   : > { %v7063_v23 = vpop.permute.xlu1 %7062  ;;  %7424 = vrot.lane.b32.xlu0 %v13724_v16, %s9661_s21 }
 0x9cd   : > { %7129 = vst.msk [vmem:[#allocation4 + $0xe8] sm:$0xff] %vm695_vm1, %v7063_v23 }
 0x9ce   : > { %v7061_v3 = vpop.permute.xlu0 %7060  ;;  %7430 = vrot.lane.b32.xlu1 %v13731_v37, %s9661_s21 }
 0x9cf   : > { %7128 = vst.msk [vmem:[#allocation4 + $0xe0] sm:$0xff] %vm695_vm1, %v7061_v3 }
 0x9d0   : > { %7428 = vrot.lane.b32.xlu0 %v13733_v54, %s9661_s21 }
 0x9d2   : > { %7582 = vrot.lane.b32.xlu1 %v13409_v10, %s9662_s22 }
 0x9d4   : > { %v7067_v14 = vpop.permute.xlu1 %7066  ;;  %7580 = vrot.lane.b32.xlu0 %v13414_v0, %s9662_s22 }
 0x9d5   : > { %7131 = vst.msk [vmem:[#allocation4 + $0xf8] sm:$0xff] %vm695_vm1, %v7067_v14 }
 0x9d6   : > { %7774 = vrot.lane.b32.xlu1 %v13602_v51, %s9663_s23  ;;  %v7065_v15 = vpop.permute.xlu0 %7064  ;;  %v9213_v51 = vld [vmem:[%s14488_s1 + $0x98] sm:$0xf] }
 0x9d7   : > { %7130 = vst.msk [vmem:[#allocation4 + $0xf0] sm:$0xff] %vm695_vm1, %v7065_v15  ;;  %9575 = vmatprep.subr.msk.mxu1 %vm2215_vm7, %v9213_v51  ;;  %v13894_v15 = vld [vmem:[#allocation3 + $0x278] sm:$0xff] }
 0x9d8   : > { %v7199_v56 = vpop.permute.xlu1 %7198  ;;  %7772 = vrot.lane.b32.xlu0 %v13409_v10, %s9663_s23  ;;  %9576 = vmatpush3.msk.msra.mxu1 %vm2215_vm7, %v9213_v51  ;;  %v13904_v51 = vld [vmem:[#allocation3 + $0x280] sm:$0xff] }
 0x9d9   : > { %7293 = vst.msk [vmem:[#allocation4 + $0x8] sm:$0xff] %vm888_vm2, %v7199_v56  ;;  %9577 = vmatprep.subr.mxu1 %v9212_v45 }
 0x9da   : > { %7967 = vrot.lane.b32.xlu1 %v13716_v31, %s9664_s24  ;;  %v7197_v24 = vpop.permute.xlu0 %7196  ;;  %9578 = vmatpush3.msra.mxu1 %v9212_v45  ;;  %v7526_v45 = vld [vmem:[#allocation3 + $0x1a8] sm:$0xff] }
 0x9db   : > { %7292 = vst.msk [vmem:[#allocation4] sm:$0xff] %vm888_vm2, %v7197_v24  ;;  %v13899_v24 = vld [vmem:[#allocation3 + $0x288] sm:$0xff] }
 0x9dc   : > { %v7203_v0 = vpop.permute.xlu1 %7202  ;;  %7965 = vrot.lane.b32.xlu0 %v7340_v1, %s9664_s24 }
 0x9dd   : > { %7295 = vst.msk [vmem:[#allocation4 + $0x18] sm:$0xff] %vm888_vm2, %v7203_v0 }
 0x9de   : > { %7584 = vrot.lane.b32.xlu1 %v13434_v7, %s9662_s22  ;;  %v7201_v10 = vpop.permute.xlu0 %7200  ;;  %v9211_v7 = vld [vmem:[%s14488_s1 + $0x88] sm:$0xff] }
 0x9df   : > { %7294 = vst.msk [vmem:[#allocation4 + $0x10] sm:$0xff] %vm888_vm2, %v7201_v10  ;;  %9579 = vmatprep.subr.mxu1 %v9211_v7 }
 0x9e0   : > { %v7207_v63 = vpop.permute.xlu1 %7206  ;;  %8157 = vrot.lane.b32.xlu0 %v13716_v31, %s9665_s25  ;;  %9580 = vmatpush3.msra.mxu1 %v9211_v7 }
 0x9e1   : > { %7297 = vst.msk [vmem:[#allocation4 + $0x28] sm:$0xff] %vm888_vm2, %v7207_v63  ;;  %9581 = vmatprep.subr.mxu1 %v9210_v59 }
 0x9e2   : > { %8349 = vrot.lane.b32.xlu1 %v13770_v47, %s9666_s9  ;;  %v7205_v8 = vpop.permute.xlu0 %7204  ;;  %9582 = vmatpush3.msra.mxu1 %v9210_v59 }
 0x9e3   : > { %7296 = vst.msk [vmem:[#allocation4 + $0x20] sm:$0xff] %vm888_vm2, %v7205_v8  ;;  %9583 = vmatprep.subr.mxu1 %v9209_v4  ;;  %v13917_v8 = vld [vmem:[#allocation3 + $0x290] sm:$0xff] }
 0x9e4   : > { %v7211_v11 = vpop.permute.xlu1 %7210  ;;  %8159 = vrot.lane.b32.xlu0 %v13770_v47, %s9665_s25  ;;  %9584 = vmatpush3.msra.mxu1 %v9209_v4  ;;  %v7718_v4 = vld [vmem:[#allocation3 + $0x1b0] sm:$0xff] }
 0x9e5   : > { %7299 = vst.msk [vmem:[#allocation4 + $0x38] sm:$0xff] %vm888_vm2, %v7211_v11 }
 0x9e6   : > { %7776 = vrot.lane.b32.xlu1 %v13429_v26, %s9663_s23  ;;  %v7209_v41 = vpop.permute.xlu0 %7208 }
 0x9e7   : > { %7298 = vst.msk [vmem:[#allocation4 + $0x30] sm:$0xff] %vm888_vm2, %v7209_v41 }
 0x9e8   : > { %v7215_v49 = vpop.permute.xlu1 %7214  ;;  %7586 = vrot.lane.b32.xlu0 %v13429_v26, %s9662_s22 }
 0x9e9   : > { %7301 = vst.msk [vmem:[#allocation4 + $0x48] sm:$0xff] %vm888_vm2, %v7215_v49 }
 0x9ea   : > { %7778 = vrot.lane.b32.xlu1 %v13612_v21, %s9663_s23  ;;  %v7213_v35 = vpop.permute.xlu0 %7212 }
 0x9eb   : > { %7300 = vst.msk [vmem:[#allocation4 + $0x40] sm:$0xff] %vm888_vm2, %v7213_v35  ;;  %v13929_v35 = vld [vmem:[#allocation3 + $0x298] sm:$0xff] }
 0x9ec   : > { %v7219_v9 = vpop.permute.xlu1 %7218  ;;  %8351 = vrot.lane.b32.xlu0 %v13793_v58, %s9666_s9 }
 0x9ed   : > { %7303 = vst.msk [vmem:[#allocation4 + $0x58] sm:$0xff] %vm888_vm2, %v7219_v9 }
 0x9ee   : > { %7971 = vrot.lane.b32.xlu1 %v13722_v29, %s9664_s24  ;;  %v7217_v26 = vpop.permute.xlu0 %7216 }
 0x9ef   : > { %7302 = vst.msk [vmem:[#allocation4 + $0x50] sm:$0xff] %vm888_vm2, %v7217_v26  ;;  %v13934_v26 = vld [vmem:[#allocation3 + $0x2a8] sm:$0xff] }
 0x9f0   : > { %v7223_v39 = vpop.permute.xlu1 %7222  ;;  %7969 = vrot.lane.b32.xlu0 %v13724_v16, %s9664_s24 }
 0x9f1   : > { %7305 = vst.msk [vmem:[#allocation4 + $0x68] sm:$0xff] %vm888_vm2, %v7223_v39 }
 0x9f2   : > { %7588 = vrot.lane.b32.xlu1 %v13458_v6, %s9662_s22  ;;  %v7221_v21 = vpop.permute.xlu0 %7220 }
 0x9f3   : > { %7304 = vst.msk [vmem:[#allocation4 + $0x60] sm:$0xff] %vm888_vm2, %v7221_v21  ;;  %v13939_v21 = vld [vmem:[#allocation3 + $0x2a0] sm:$0xff] }
 0x9f4   : > { %v7227_v30 = vpop.permute.xlu1 %7226  ;;  %8161 = vrot.lane.b32.xlu0 %v13722_v29, %s9665_s25 }
 0x9f5   : > { %7307 = vst.msk [vmem:[#allocation4 + $0x78] sm:$0xff] %vm888_vm2, %v7227_v30 }
 0x9f6   : > { %8353 = vrot.lane.b32.xlu1 %v13813_v50, %s9666_s9  ;;  %v7225_v60 = vpop.permute.xlu0 %7224 }
 0x9f7   : > { %7306 = vst.msk [vmem:[#allocation4 + $0x70] sm:$0xff] %vm888_vm2, %v7225_v60  ;;  %v7528_v60 = vld [vmem:[#allocation3 + $0x1c8] sm:$0xff] }
 0x9f8   : > { %v7231_v34 = vpop.permute.xlu1 %7230  ;;  %8163 = vrot.lane.b32.xlu0 %v13813_v50, %s9665_s25 }
 0x9f9   : > { %7309 = vst.msk [vmem:[#allocation4 + $0x88] sm:$0xff] %vm888_vm2, %v7231_v34 }
 0x9fa   : > { %7780 = vrot.lane.b32.xlu1 %v13453_v57, %s9663_s23  ;;  %v7229_v6 = vpop.permute.xlu0 %7228 }
 0x9fb   : > { %7308 = vst.msk [vmem:[#allocation4 + $0x80] sm:$0xff] %vm888_vm2, %v7229_v6 }
 0x9fc   : > { %v7235_v61 = vpop.permute.xlu1 %7234  ;;  %7590 = vrot.lane.b32.xlu0 %v13453_v57, %s9662_s22 }
 0x9fd   : > { %7311 = vst.msk [vmem:[#allocation4 + $0x98] sm:$0xff] %vm888_vm2, %v7235_v61  ;;  %v13952_v61 = vld [vmem:[#allocation3 + $0x2b0] sm:$0xff] }
 0x9fe   : > { %7782 = vrot.lane.b32.xlu1 %v13620_v12, %s9663_s23  ;;  %v7233_v38 = vpop.permute.xlu0 %7232 }
 0x9ff   : > { %7310 = vst.msk [vmem:[#allocation4 + $0x90] sm:$0xff] %vm888_vm2, %v7233_v38 }
 0xa00   : > { %v7239_v55 = vpop.permute.xlu1 %7238  ;;  %8355 = vrot.lane.b32.xlu0 %v13827_v52, %s9666_s9 }
 0xa01   : > { %7313 = vst.msk [vmem:[#allocation4 + $0xa8] sm:$0xff] %vm888_vm2, %v7239_v55 }
 0xa02   : > { %7975 = vrot.lane.b32.xlu1 %v13731_v37, %s9664_s24  ;;  %v7237_v57 = vpop.permute.xlu0 %7236 }
 0xa03   : > { %7312 = vst.msk [vmem:[#allocation4 + $0xa0] sm:$0xff] %vm888_vm2, %v7237_v57  ;;  %v7720_v57 = vld [vmem:[#allocation3 + $0x1d0] sm:$0xff] }
 0xa04   : > { %v7243_v27 = vpop.permute.xlu1 %7242  ;;  %7973 = vrot.lane.b32.xlu0 %v13733_v54, %s9664_s24  ;;  %v7716_v54 = vld [vmem:[#allocation3 + $0x190] sm:$0xff] }
 0xa05   : > { %7315 = vst.msk [vmem:[#allocation4 + $0xb8] sm:$0xff] %vm888_vm2, %v7243_v27 }
 0xa06   : > { %7592 = vrot.lane.b32.xlu1 %v13482_v42, %s9662_s22  ;;  %v7241_v12 = vpop.permute.xlu0 %7240  ;;  %v7714_v42 = vld [vmem:[#allocation3 + $0x170] sm:$0xff] }
 0xa07   : > { %7314 = vst.msk [vmem:[#allocation4 + $0xb0] sm:$0xff] %vm888_vm2, %v7241_v12 }
 0xa08   : > { %v7247_v18 = vpop.permute.xlu1 %7246  ;;  %8165 = vrot.lane.b32.xlu0 %v13731_v37, %s9665_s25 }
 0xa09   : > { %7317 = vst.msk [vmem:[#allocation4 + $0xc8] sm:$0xff] %vm888_vm2, %v7247_v18  ;;  %v13964_v18 = vld [vmem:[#allocation3 + $0x2b8] sm:$0xff] }
 0xa0a   : > { %8357 = vrot.lane.b32.xlu1 %v13847_v48, %s9666_s9  ;;  %v7245_v33 = vpop.permute.xlu0 %7244 }
 0xa0b   : > { %7316 = vst.msk [vmem:[#allocation4 + $0xc0] sm:$0xff] %vm888_vm2, %v7245_v33 }
 0xa0c   : > { %v7251_v13 = vpop.permute.xlu1 %7250  ;;  %8167 = vrot.lane.b32.xlu0 %v13847_v48, %s9665_s25 }
 0xa0d   : > { %7319 = vst.msk [vmem:[#allocation4 + $0xd8] sm:$0xff] %vm888_vm2, %v7251_v13  ;;  %v13969_v13 = vld [vmem:[#allocation3 + $0x2c8] sm:$0xff] }
 0xa0e   : > { %7784 = vrot.lane.b32.xlu1 %v7714_v42, %s9663_s23  ;;  %v7249_v17 = vpop.permute.xlu0 %7248 }
 0xa0f   : > { %7318 = vst.msk [vmem:[#allocation4 + $0xd0] sm:$0xff] %vm888_vm2, %v7249_v17  ;;  %v13974_v17 = vld [vmem:[#allocation3 + $0x2c0] sm:$0xff] }
 0xa10   : > { %v7255_v62 = vpop.permute.xlu1 %7254  ;;  %7594 = vrot.lane.b32.xlu0 %v7714_v42, %s9662_s22 }
 0xa11   : > { %7321 = vst.msk [vmem:[#allocation4 + $0xe8] sm:$0xff] %vm888_vm2, %v7255_v62 }
 0xa12   : > { %7786 = vrot.lane.b32.xlu1 %v13630_v5, %s9663_s23  ;;  %v7253_v53 = vpop.permute.xlu0 %7252 }
 0xa13   : > { %7320 = vst.msk [vmem:[#allocation4 + $0xe0] sm:$0xff] %vm888_vm2, %v7253_v53  ;;  %v7530_v53 = vld [vmem:[#allocation3 + $0x1e8] sm:$0xff] }
 0xa14   : > { %v7259_v20 = vpop.permute.xlu1 %7258  ;;  %8359 = vrot.lane.b32.xlu0 %v13859_v22, %s9666_s9 }
 0xa15   : > { %7323 = vst.msk [vmem:[#allocation4 + $0xf8] sm:$0xff] %vm888_vm2, %v7259_v20 }
 0xa16   : > { %7979 = vrot.lane.b32.xlu1 %v13867_v25, %s9664_s24  ;;  %v7257_v44 = vpop.permute.xlu0 %7256 }
 0xa17   : > { %7322 = vst.msk [vmem:[#allocation4 + $0xf0] sm:$0xff] %vm888_vm2, %v7257_v44 }
 0xa18   : > { %v7391_v5 = vpop.permute.xlu1 %7390  ;;  %7977 = vrot.lane.b32.xlu0 %v13869_v36, %s9664_s24 }
 0xa19   : > { %7485 = vst.msk [vmem:[#allocation4 + $0x8] sm:$0xff] %vm1081_vm3, %v7391_v5  ;;  %v13987_v5 = vld [vmem:[#allocation3 + $0x2d0] sm:$0xff] }
 0xa1a   : > { %7596 = vrot.lane.b32.xlu1 %v7524_v2, %s9662_s22  ;;  %v7389_v28 = vpop.permute.xlu0 %7388 }
 0xa1b   : > { %7484 = vst.msk [vmem:[#allocation4] sm:$0xff] %vm1081_vm3, %v7389_v28 }
 0xa1c   : > { %v7395_v1 = vpop.permute.xlu1 %7394  ;;  %8169 = vrot.lane.b32.xlu0 %v13867_v25, %s9665_s25 }
 0xa1d   : > { %7487 = vst.msk [vmem:[#allocation4 + $0x18] sm:$0xff] %vm1081_vm3, %v7395_v1 }
 0xa1e   : > { %8361 = vrot.lane.b32.xlu1 %v13882_v46, %s9666_s9  ;;  %v7393_v16 = vpop.permute.xlu0 %7392 }
 0xa1f   : > { %7486 = vst.msk [vmem:[#allocation4 + $0x10] sm:$0xff] %vm1081_vm3, %v7393_v16  ;;  %v7722_v16 = vld [vmem:[#allocation3 + $0x1f0] sm:$0xff] }
 0xa20   : > { %v7399_v23 = vpop.permute.xlu1 %7398  ;;  %8171 = vrot.lane.b32.xlu0 %v13882_v46, %s9665_s25 }
 0xa21   : > { %7489 = vst.msk [vmem:[#allocation4 + $0x28] sm:$0xff] %vm1081_vm3, %v7399_v23 }
 0xa22   : > { %7788 = vrot.lane.b32.xlu1 %v7716_v54, %s9663_s23  ;;  %v7397_v3 = vpop.permute.xlu0 %7396 }
 0xa23   : > { %7488 = vst.msk [vmem:[#allocation4 + $0x20] sm:$0xff] %vm1081_vm3, %v7397_v3  ;;  %v14000_v3 = vld [vmem:[#allocation3 + $0x2d8] sm:$0xff] }
 0xa24   : > { %v7403_v14 = vpop.permute.xlu1 %7402  ;;  %7598 = vrot.lane.b32.xlu0 %v7716_v54, %s9662_s22 }
 0xa25   : > { %7491 = vst.msk [vmem:[#allocation4 + $0x38] sm:$0xff] %vm1081_vm3, %v7403_v14 }
 0xa26   : > { %7790 = vrot.lane.b32.xlu1 %v13638_v43, %s9663_s23  ;;  %v7401_v56 = vpop.permute.xlu0 %7400 }
 0xa27   : > { %7490 = vst.msk [vmem:[#allocation4 + $0x30] sm:$0xff] %vm1081_vm3, %v7401_v56  ;;  %v14005_v56 = vld [vmem:[#allocation3 + $0x2e8] sm:$0xff] }
 0xa28   : > { %v7407_v0 = vpop.permute.xlu1 %7406  ;;  %8363 = vrot.lane.b32.xlu0 %v13894_v15, %s9666_s9 }
 0xa29   : > { %7493 = vst.msk [vmem:[#allocation4 + $0x48] sm:$0xff] %vm1081_vm3, %v7407_v0 }
 0xa2a   : > { %7983 = vrot.lane.b32.xlu1 %v13899_v24, %s9664_s24  ;;  %v7405_v10 = vpop.permute.xlu0 %7404 }
 0xa2b   : > { %7492 = vst.msk [vmem:[#allocation4 + $0x40] sm:$0xff] %vm1081_vm3, %v7405_v10  ;;  %v14010_v10 = vld [vmem:[#allocation3 + $0x2e0] sm:$0xff] }
 0xa2c   : > { %v7411_v43 = vpop.permute.xlu1 %7410  ;;  %7981 = vrot.lane.b32.xlu0 %v13904_v51, %s9664_s24 }
 0xa2d   : > { %7495 = vst.msk [vmem:[#allocation4 + $0x58] sm:$0xff] %vm1081_vm3, %v7411_v43 }
 0xa2e   : > { %7600 = vrot.lane.b32.xlu1 %v7526_v45, %s9662_s22  ;;  %v7409_v63 = vpop.permute.xlu0 %7408 }
 0xa2f   : > { %7494 = vst.msk [vmem:[#allocation4 + $0x50] sm:$0xff] %vm1081_vm3, %v7409_v63 }
 0xa30   : > { %v7415_v7 = vpop.permute.xlu1 %7414  ;;  %8173 = vrot.lane.b32.xlu0 %v13899_v24, %s9665_s25 }
 0xa31   : > { %7497 = vst.msk [vmem:[#allocation4 + $0x68] sm:$0xff] %vm1081_vm3, %v7415_v7 }
 0xa32   : > { %8365 = vrot.lane.b32.xlu1 %v13917_v8, %s9666_s9  ;;  %v7413_v59 = vpop.permute.xlu0 %7412 }
 0xa33   : > { %7496 = vst.msk [vmem:[#allocation4 + $0x60] sm:$0xff] %vm1081_vm3, %v7413_v59  ;;  %v14025_v59 = vld [vmem:[#allocation3 + $0x2f0] sm:$0xff] }
 0xa34   : > { %v7419_v11 = vpop.permute.xlu1 %7418  ;;  %8175 = vrot.lane.b32.xlu0 %v13917_v8, %s9665_s25 }
 0xa35   : > { %7499 = vst.msk [vmem:[#allocation4 + $0x78] sm:$0xff] %vm1081_vm3, %v7419_v11 }
 0xa36   : > { %7792 = vrot.lane.b32.xlu1 %v7718_v4, %s9663_s23  ;;  %v7417_v41 = vpop.permute.xlu0 %7416 }
 0xa37   : > { %7498 = vst.msk [vmem:[#allocation4 + $0x70] sm:$0xff] %vm1081_vm3, %v7417_v41 }
 0xa38   : > { %v7423_v49 = vpop.permute.xlu1 %7422  ;;  %7602 = vrot.lane.b32.xlu0 %v7718_v4, %s9662_s22 }
 0xa39   : > { %7501 = vst.msk [vmem:[#allocation4 + $0x88] sm:$0xff] %vm1081_vm3, %v7423_v49 }
 0xa3a   : > { %7794 = vrot.lane.b32.xlu1 %v13647_v40, %s9663_s23  ;;  %v7421_v9 = vpop.permute.xlu0 %7420 }
 0xa3b   : > { %7500 = vst.msk [vmem:[#allocation4 + $0x80] sm:$0xff] %vm1081_vm3, %v7421_v9  ;;  %v14040_v9 = vld [vmem:[#allocation3 + $0x2f8] sm:$0xff] }
 0xa3c   : > { %v7427_v39 = vpop.permute.xlu1 %7426  ;;  %8367 = vrot.lane.b32.xlu0 %v13929_v35, %s9666_s9 }
 0xa3d   : > { %7503 = vst.msk [vmem:[#allocation4 + $0x98] sm:$0xff] %vm1081_vm3, %v7427_v39 }
 0xa3e   : > { %7987 = vrot.lane.b32.xlu1 %v13934_v26, %s9664_s24  ;;  %v7425_v30 = vpop.permute.xlu0 %7424 }
 0xa3f   : > { %7502 = vst.msk [vmem:[#allocation4 + $0x90] sm:$0xff] %vm1081_vm3, %v7425_v30  ;;  %v7918_v30 = vld [vmem:[#allocation3 + $0x308] sm:$0xff] }
 0xa40   : > { %v7431_v40 = vpop.permute.xlu1 %7430  ;;  %7985 = vrot.lane.b32.xlu0 %v13939_v21, %s9664_s24 }
 0xa41   : > { %7505 = vst.msk [vmem:[#allocation4 + $0xa8] sm:$0xff] %vm1081_vm3, %v7431_v40 }
 0xa42   : > { %7604 = vrot.lane.b32.xlu1 %v7528_v60, %s9662_s22  ;;  %v7429_v34 = vpop.permute.xlu0 %7428  ;;  %v7917_v60 = vld [vmem:[#allocation3 + $0x300] sm:$0xff] }
 0xa43   : > { %7504 = vst.msk [vmem:[#allocation4 + $0xa0] sm:$0xff] %vm1081_vm3, %v7429_v34 }
 0xa44   : > { %v7583_v6 = vpop.permute.xlu1 %7582  ;;  %8177 = vrot.lane.b32.xlu0 %v13934_v26, %s9665_s25 }
 0xa45   : > { %7677 = vst.msk [vmem:[#allocation4 + $0x8] sm:$0xff] %vm1274_vm4, %v7583_v6 }
 0xa46   : > { %8369 = vrot.lane.b32.xlu1 %v13952_v61, %s9666_s9  ;;  %v7581_v38 = vpop.permute.xlu0 %7580 }
 0xa47   : > { %7676 = vst.msk [vmem:[#allocation4] sm:$0xff] %vm1274_vm4, %v7581_v38  ;;  %v8301_v38 = vld [vmem:[#allocation3 + $0x310] sm:$0xff] }
 0xa48   : > { %v7775_v55 = vpop.permute.xlu1 %7774  ;;  %8179 = vrot.lane.b32.xlu0 %v13952_v61, %s9665_s25 }
 0xa49   : > { %7869 = vst.msk [vmem:[#allocation4 + $0x8] sm:$0xff] %vm1467_vm5, %v7775_v55 }
 0xa4a   : > { %7796 = vrot.lane.b32.xlu1 %v7720_v57, %s9663_s23  ;;  %v7773_v27 = vpop.permute.xlu0 %7772 }
 0xa4b   : > { %7868 = vst.msk [vmem:[#allocation4] sm:$0xff] %vm1467_vm5, %v7773_v27 }
 0xa4c   : > { %v7968_v12 = vpop.permute.xlu1 %7967  ;;  %7606 = vrot.lane.b32.xlu0 %v7720_v57, %s9662_s22 }
 0xa4d   : > { %8062 = vst.msk [vmem:[#allocation4 + $0x8] sm:$0xff] %vm1661_vm6, %v7968_v12 }
 0xa4e   : > { %7798 = vrot.lane.b32.xlu1 %v13654_v19, %s9663_s23  ;;  %v7966_v33 = vpop.permute.xlu0 %7965 }
 0xa4f   : > { %8061 = vst.msk [vmem:[#allocation4] sm:$0xff] %vm1661_vm6, %v7966_v33 }
 0xa50   : > { %v7585_v42 = vpop.permute.xlu1 %7584  ;;  %8371 = vrot.lane.b32.xlu0 %v13964_v18, %s9666_s9 }
 0xa51   : > { %7678 = vst.msk [vmem:[#allocation4 + $0x10] sm:$0xff] %vm1274_vm4, %v7585_v42  ;;  %v8302_v42 = vld [vmem:[#allocation3 + $0x318] sm:$0xff] }
 0xa52   : > { %7991 = vrot.lane.b32.xlu1 %v13969_v13, %s9664_s24  ;;  %v8158_v62 = vpop.permute.xlu0 %8157 }
 0xa53   : > { %8253 = vst.msk [vmem:[#allocation4] sm:$0xff] %vm1854_vm8, %v8158_v62 }
 0xa54   : > { %v8350_v19 = vpop.permute.xlu1 %8349  ;;  %7989 = vrot.lane.b32.xlu0 %v13974_v17, %s9664_s24 }
 0xa55   : > { %8445 = vst.msk [vmem:[#allocation4] sm:$0xff] %vm2047_vm9, %v8350_v19  ;;  %v7920_v19 = vld [vmem:[#allocation3 + $0x328] sm:$0xff] }
 0xa56   : > { %7608 = vrot.lane.b32.xlu1 %v7530_v53, %s9662_s22  ;;  %v8160_v20 = vpop.permute.xlu0 %8159 }
 0xa57   : > { %8254 = vst.msk [vmem:[#allocation4 + $0x8] sm:$0xff] %vm1854_vm8, %v8160_v20  ;;  %v7919_v20 = vld [vmem:[#allocation3 + $0x320] sm:$0xff] }
 0xa58   : > { %v7777_v44 = vpop.permute.xlu1 %7776  ;;  %8181 = vrot.lane.b32.xlu0 %v13969_v13, %s9665_s25 }
 0xa59   : > { %7870 = vst.msk [vmem:[#allocation4 + $0x10] sm:$0xff] %vm1467_vm5, %v7777_v44 }
 0xa5a   : > { %8373 = vrot.lane.b32.xlu1 %v13987_v5, %s9666_s9  ;;  %v7587_v2 = vpop.permute.xlu0 %7586 }
 0xa5b   : > { %7679 = vst.msk [vmem:[#allocation4 + $0x18] sm:$0xff] %vm1274_vm4, %v7587_v2 }
 0xa5c   : > { %v7779_v28 = vpop.permute.xlu1 %7778  ;;  %8183 = vrot.lane.b32.xlu0 %v13987_v5, %s9665_s25  ;;  %v8477_v1 = vld [vmem:[#allocation4] sm:$0xff] }
 0xa5d   : > { %7871 = vst.msk [vmem:[#allocation4 + $0x18] sm:$0xff] %vm1467_vm5, %v7779_v28  ;;  %9585 = vmatprep.mubr.msk.f32.mxu1 %vm2118_vm10, %v8477_v1  ;;  %v8303_v28 = vld [vmem:[#allocation3 + $0x330] sm:$0xff] }
 0xa5e   : > { %7800 = vrot.lane.b32.xlu1 %v7722_v16, %s9663_s23  ;;  %v8352_v23 = vpop.permute.xlu0 %8351 }
 0xa5f   : > { %8446 = vst.msk [vmem:[#allocation4 + $0x8] sm:$0xff] %vm2047_vm9, %v8352_v23 }
 0xa60   : > { %v7972_v54 = vpop.permute.xlu1 %7971  ;;  %7610 = vrot.lane.b32.xlu0 %v7722_v16, %s9662_s22 }
 0xa61   : > { %8064 = vst.msk [vmem:[#allocation4 + $0x18] sm:$0xff] %vm1661_vm6, %v7972_v54 }
 0xa62   : > { %7802 = vrot.lane.b32.xlu1 %v13664_v32, %s9663_s23  ;;  %v7970_v14 = vpop.permute.xlu0 %7969 }
 0xa63   : > { %8063 = vst.msk [vmem:[#allocation4 + $0x10] sm:$0xff] %vm1661_vm6, %v7970_v14 }
 0xa64   : > { %v7589_v0 = vpop.permute.xlu1 %7588  ;;  %8375 = vrot.lane.b32.xlu0 %v14000_v3, %s9666_s9 }
 0xa65   : > { %7680 = vst.msk [vmem:[#allocation4 + $0x20] sm:$0xff] %vm1274_vm4, %v7589_v0  ;;  %v8304_v0 = vld [vmem:[#allocation3 + $0x338] sm:$0xff] }
 0xa66   : > { %7995 = vrot.lane.b32.xlu1 %v14005_v56, %s9664_s24  ;;  %v8162_v43 = vpop.permute.xlu0 %8161  ;;  %v8478_v45 = vld [vmem:[#allocation4 + $0x8] sm:$0xff] }
 0xa67   : > { %8255 = vst.msk [vmem:[#allocation4 + $0x10] sm:$0xff] %vm1854_vm8, %v8162_v43  ;;  %9586 = vmatmul.mubr.msk.f32.vlgmr.msra.gmra.mxu1 %vm2118_vm10, %v8478_v45 }
 0xa68   : > { %v8354_v32 = vpop.permute.xlu1 %8353  ;;  %7993 = vrot.lane.b32.xlu0 %v14010_v10, %s9664_s24 }
 0xa69   : > { %8447 = vst.msk [vmem:[#allocation4 + $0x10] sm:$0xff] %vm2047_vm9, %v8354_v32  ;;  %v7921_v32 = vld [vmem:[#allocation3 + $0x340] sm:$0xff] }
 0xa6a   : > { %7612 = vrot.lane.b32.xlu1 %v13716_v31, %s9662_s22  ;;  %v8164_v63 = vpop.permute.xlu0 %8163 }
 0xa6b   : > { %8256 = vst.msk [vmem:[#allocation4 + $0x18] sm:$0xff] %vm1854_vm8, %v8164_v63 }
 0xa6c   : > { %v7781_v7 = vpop.permute.xlu1 %7780  ;;  %8185 = vrot.lane.b32.xlu0 %v14005_v56, %s9665_s25 }
 0xa6d   : > { %7872 = vst.msk [vmem:[#allocation4 + $0x20] sm:$0xff] %vm1467_vm5, %v7781_v7  ;;  %v8113_v7 = vld [vmem:[#allocation3 + $0x348] sm:$0xff] }
 0xa6e   : > { %8377 = vrot.lane.b32.xlu1 %v14025_v59, %s9666_s9  ;;  %v7591_v11 = vpop.permute.xlu0 %7590 }
 0xa6f   : > { %7681 = vst.msk [vmem:[#allocation4 + $0x28] sm:$0xff] %vm1274_vm4, %v7591_v11 }
 0xa70   : > { %v7783_v4 = vpop.permute.xlu1 %7782  ;;  %8187 = vrot.lane.b32.xlu0 %v14025_v59, %s9665_s25  ;;  %v8479_v31 = vld [vmem:[#allocation4 + $0x10] sm:$0xff] }
 0xa71   : > { %7873 = vst.msk [vmem:[#allocation4 + $0x28] sm:$0xff] %vm1467_vm5, %v7783_v4  ;;  %9588 = vmatprep.mubr.msk.f32.mxu1 %vm2118_vm10, %v8479_v31  ;;  %v8305_v31 = vld [vmem:[#allocation3 + $0x350] sm:$0xff] }
 0xa72   : > { %7804 = vrot.lane.b32.xlu1 %v13770_v47, %s9663_s23  ;;  %v8356_v41 = vpop.permute.xlu0 %8355 }
 0xa73   : > { %8448 = vst.msk [vmem:[#allocation4 + $0x18] sm:$0xff] %vm2047_vm9, %v8356_v41 }
 0xa74   : > { %v7976_v49 = vpop.permute.xlu1 %7975  ;;  %7614 = vrot.lane.b32.xlu0 %v13770_v47, %s9662_s22 }
 0xa75   : > { %8066 = vst.msk [vmem:[#allocation4 + $0x28] sm:$0xff] %vm1661_vm6, %v7976_v49 }
 0xa76   : > { %7806 = vrot.lane.b32.xlu1 %v13793_v58, %s9663_s23  ;;  %v7974_v39 = vpop.permute.xlu0 %7973 }
 0xa77   : > { %8065 = vst.msk [vmem:[#allocation4 + $0x20] sm:$0xff] %vm1661_vm6, %v7974_v39 }
 0xa78   : > { %v7593_v40 = vpop.permute.xlu1 %7592  ;;  %8379 = vrot.lane.b32.xlu0 %v14040_v9, %s9666_s9 }
 0xa79   : > { %7682 = vst.msk [vmem:[#allocation4 + $0x30] sm:$0xff] %vm1274_vm4, %v7593_v40 }
 0xa7a   : > { %7999 = vrot.lane.b32.xlu1 %v7918_v30, %s9664_s24  ;;  %v8166_v47 = vpop.permute.xlu0 %8165  ;;  %v8480_v34 = vld [vmem:[#allocation4 + $0x18] sm:$0xff] }
 0xa7b   : > { %8257 = vst.msk [vmem:[#allocation4 + $0x20] sm:$0xff] %vm1854_vm8, %v8166_v47  ;;  %9589 = vmatmul.mubr.msk.f32.gmra.mxu1 %vm2118_vm10, %v8480_v34 }
 0xa7c   : > { %v8358_v58 = vpop.permute.xlu1 %8357  ;;  %7997 = vrot.lane.b32.xlu0 %v7917_v60, %s9664_s24  ;;  %v8306_v60 = vld [vmem:[#allocation3 + $0x358] sm:$0xff] }
 0xa7d   : > { %8449 = vst.msk [vmem:[#allocation4 + $0x20] sm:$0xff] %vm2047_vm9, %v8358_v58 }
 0xa7e   : > { %7616 = vrot.lane.b32.xlu1 %v13722_v29, %s9662_s22  ;;  %v8168_v6 = vpop.permute.xlu0 %8167 }
 0xa7f   : > { %8258 = vst.msk [vmem:[#allocation4 + $0x28] sm:$0xff] %vm1854_vm8, %v8168_v6  ;;  %v7923_v6 = vld [vmem:[#allocation3 + $0x360] sm:$0xff] }
 0xa80   : > { %v7785_v55 = vpop.permute.xlu1 %7784  ;;  %8189 = vrot.lane.b32.xlu0 %v7918_v30, %s9665_s25 }
 0xa81   : > { %7874 = vst.msk [vmem:[#allocation4 + $0x30] sm:$0xff] %vm1467_vm5, %v7785_v55 }
 0xa82   : > { %8381 = vrot.lane.b32.xlu1 %v8301_v38, %s9666_s9  ;;  %v7595_v57 = vpop.permute.xlu0 %7594 }
 0xa83   : > { %7683 = vst.msk [vmem:[#allocation4 + $0x38] sm:$0xff] %vm1274_vm4, %v7595_v57 }
 0xa84   : > { %v7787_v27 = vpop.permute.xlu1 %7786  ;;  %8191 = vrot.lane.b32.xlu0 %v8301_v38, %s9665_s25  ;;  %v8481_v12 = vld [vmem:[#allocation4 + $0x20] sm:$0xff]  ;;  %v8115_v38 = vld [vmem:[#allocation3 + $0x368] sm:$0xff] }
 0xa85   : > { %7875 = vst.msk [vmem:[#allocation4 + $0x38] sm:$0xff] %vm1467_vm5, %v7787_v27  ;;  %9591 = vmatprep.mubr.msk.f32.mxu1 %vm2118_vm10, %v8481_v12  ;;  %v8307_v12 = vld [vmem:[#allocation3 + $0x370] sm:$0xff] }
 0xa86   : > { %7808 = vrot.lane.b32.xlu1 %v13813_v50, %s9663_s23  ;;  %v8360_v29 = vpop.permute.xlu0 %8359 }
 0xa87   : > { %8450 = vst.msk [vmem:[#allocation4 + $0x28] sm:$0xff] %vm2047_vm9, %v8360_v29 }
 0xa88   : > { %v7980_v33 = vpop.permute.xlu1 %7979  ;;  %7618 = vrot.lane.b32.xlu0 %v13813_v50, %s9662_s22 }
 0xa89   : > { %8068 = vst.msk [vmem:[#allocation4 + $0x38] sm:$0xff] %vm1661_vm6, %v7980_v33 }
 0xa8a   : > { %7810 = vrot.lane.b32.xlu1 %v13827_v52, %s9663_s23  ;;  %v7978_v62 = vpop.permute.xlu0 %7977 }
 0xa8b   : > { %8067 = vst.msk [vmem:[#allocation4 + $0x30] sm:$0xff] %vm1661_vm6, %v7978_v62 }
 0xa8c   : > { %v7597_v53 = vpop.permute.xlu1 %7596  ;;  %8383 = vrot.lane.b32.xlu0 %v8302_v42, %s9666_s9 }
 0xa8d   : > { %7684 = vst.msk [vmem:[#allocation4 + $0x40] sm:$0xff] %vm1274_vm4, %v7597_v53  ;;  %v8308_v53 = vld [vmem:[#allocation3 + $0x378] sm:$0xff] }
 0xa8e   : > { %8003 = vrot.lane.b32.xlu1 %v7920_v19, %s9664_s24  ;;  %v8170_v44 = vpop.permute.xlu0 %8169  ;;  %v8482_v50 = vld [vmem:[#allocation4 + $0x28] sm:$0xff] }
 0xa8f   : > { %8259 = vst.msk [vmem:[#allocation4 + $0x30] sm:$0xff] %vm1854_vm8, %v8170_v44  ;;  %9592 = vmatmul.mubr.msk.f32.gmra.mxu1 %vm2118_vm10, %v8482_v50  ;;  %v7925_v50 = vld [vmem:[#allocation3 + $0x380] sm:$0xff] }
 0xa90   : > { %v8362_v2 = vpop.permute.xlu1 %8361  ;;  %8001 = vrot.lane.b32.xlu0 %v7919_v20, %s9664_s24 }
 0xa91   : > { %8451 = vst.msk [vmem:[#allocation4 + $0x30] sm:$0xff] %vm2047_vm9, %v8362_v2 }
 0xa92   : > { %7620 = vrot.lane.b32.xlu1 %v13731_v37, %s9662_s22  ;;  %v8172_v52 = vpop.permute.xlu0 %8171 }
 0xa93   : > { %8260 = vst.msk [vmem:[#allocation4 + $0x38] sm:$0xff] %vm1854_vm8, %v8172_v52 }
 0xa94   : > { %v7789_v1 = vpop.permute.xlu1 %7788  ;;  %8193 = vrot.lane.b32.xlu0 %v7920_v19, %s9665_s25 }
 0xa95   : > { %7876 = vst.msk [vmem:[#allocation4 + $0x40] sm:$0xff] %vm1467_vm5, %v7789_v1 }
 0xa96   : > { %8385 = vrot.lane.b32.xlu1 %v8303_v28, %s9666_s9  ;;  %v7599_v16 = vpop.permute.xlu0 %7598 }
 0xa97   : > { %7685 = vst.msk [vmem:[#allocation4 + $0x48] sm:$0xff] %vm1274_vm4, %v7599_v16  ;;  %v8309_v16 = vld [vmem:[#allocation3 + $0x390] sm:$0xff] }
 0xa98   : > { %v7791_v23 = vpop.permute.xlu1 %7790  ;;  %8195 = vrot.lane.b32.xlu0 %v8303_v28, %s9665_s25  ;;  %v8483_v54 = vld [vmem:[#allocation4 + $0x30] sm:$0xff] }
 0xa99   : > { %7877 = vst.msk [vmem:[#allocation4 + $0x48] sm:$0xff] %vm1467_vm5, %v7791_v23  ;;  %9594 = vmatprep.mubr.msk.f32.mxu1 %vm2118_vm10, %v8483_v54 }
 0xa9a   : > { %7812 = vrot.lane.b32.xlu1 %v13847_v48, %s9663_s23  ;;  %v8364_v37 = vpop.permute.xlu0 %8363 }
 0xa9b   : > { %8452 = vst.msk [vmem:[#allocation4 + $0x38] sm:$0xff] %vm2047_vm9, %v8364_v37 }
 0xa9c   : > { %v7984_v14 = vpop.permute.xlu1 %7983  ;;  %7622 = vrot.lane.b32.xlu0 %v13847_v48, %s9662_s22 }
 0xa9d   : > { %8070 = vst.msk [vmem:[#allocation4 + $0x48] sm:$0xff] %vm1661_vm6, %v7984_v14 }
 0xa9e   : > { %7814 = vrot.lane.b32.xlu1 %v13859_v22, %s9663_s23  ;;  %v7982_v43 = vpop.permute.xlu0 %7981 }
 0xa9f   : > { %8069 = vst.msk [vmem:[#allocation4 + $0x40] sm:$0xff] %vm1661_vm6, %v7982_v43  ;;  %v8310_v43 = vld [vmem:[#allocation3 + $0x398] sm:$0xff] }
 0xaa0   : > { %v7601_v45 = vpop.permute.xlu1 %7600  ;;  %8387 = vrot.lane.b32.xlu0 %v8304_v0, %s9666_s9 }
 0xaa1   : > { %7686 = vst.msk [vmem:[#allocation4 + $0x50] sm:$0xff] %vm1274_vm4, %v7601_v45 }
 0xaa2   : > { %7432 = vrot.lane.b32.xlu1 %v13869_v36, %s9661_s21  ;;  %v8174_v63 = vpop.permute.xlu0 %8173  ;;  %v8484_v48 = vld [vmem:[#allocation4 + $0x38] sm:$0xff] }
 0xaa3   : > { %8261 = vst.msk [vmem:[#allocation4 + $0x40] sm:$0xff] %vm1854_vm8, %v8174_v63  ;;  %9595 = vmatmul.mubr.msk.f32.gmra.mxu1 %vm2118_vm10, %v8484_v48  ;;  %v7927_v48 = vld [vmem:[#allocation3 + $0x3a0] sm:$0xff] }
 0xaa4   : > { %v8366_v22 = vpop.permute.xlu1 %8365  ;;  %8005 = vrot.lane.b32.xlu0 %v7921_v32, %s9664_s24 }
 0xaa5   : > { %8453 = vst.msk [vmem:[#allocation4 + $0x40] sm:$0xff] %vm2047_vm9, %v8366_v22 }
 0xaa6   : > { %8197 = vrot.lane.b32.xlu1 %v8113_v7, %s9665_s25  ;;  %v8176_v11 = vpop.permute.xlu0 %8175 }
 0xaa7   : > { %8262 = vst.msk [vmem:[#allocation4 + $0x48] sm:$0xff] %vm1854_vm8, %v8176_v11 }
 0xaa8   : > { %v7793_v4 = vpop.permute.xlu1 %7792  ;;  %8007 = vrot.lane.b32.xlu0 %v8113_v7, %s9664_s24  ;;  %v8119_v7 = vld [vmem:[#allocation3 + $0x3a8] sm:$0xff] }
 0xaa9   : > { %7878 = vst.msk [vmem:[#allocation4 + $0x50] sm:$0xff] %vm1467_vm5, %v7793_v4 }
 0xaaa   : > { %7624 = vrot.lane.b32.xlu1 %v13867_v25, %s9662_s22  ;;  %v7603_v36 = vpop.permute.xlu0 %7602 }
 0xaab   : > { %7687 = vst.msk [vmem:[#allocation4 + $0x58] sm:$0xff] %vm1274_vm4, %v7603_v36  ;;  %v8311_v36 = vld [vmem:[#allocation3 + $0x3b0] sm:$0xff] }
 0xaac   : > { %v7795_v41 = vpop.permute.xlu1 %7794  ;;  %7434 = vrot.lane.b32.xlu0 %v13867_v25, %s9661_s21  ;;  %v8485_v49 = vld [vmem:[#allocation4 + $0x40] sm:$0xff] }
 0xaad   : > { %7879 = vst.msk [vmem:[#allocation4 + $0x58] sm:$0xff] %vm1467_vm5, %v7795_v41  ;;  %9597 = vmatprep.mubr.msk.f32.mxu1 %vm2118_vm10, %v8485_v49 }
 0xaae   : > { %8389 = vrot.lane.b32.xlu1 %v8305_v31, %s9666_s9  ;;  %v8368_v39 = vpop.permute.xlu0 %8367 }
 0xaaf   : > { %8454 = vst.msk [vmem:[#allocation4 + $0x48] sm:$0xff] %vm2047_vm9, %v8368_v39 }
 0xab0   : > { %v7988_v30 = vpop.permute.xlu1 %7987  ;;  %8199 = vrot.lane.b32.xlu0 %v8305_v31, %s9665_s25 }
 0xab1   : > { %8072 = vst.msk [vmem:[#allocation4 + $0x58] sm:$0xff] %vm1661_vm6, %v7988_v30 }
 0xab2   : > { %7816 = vrot.lane.b32.xlu1 %v13882_v46, %s9663_s23  ;;  %v7986_v40 = vpop.permute.xlu0 %7985 }
 0xab3   : > { %8071 = vst.msk [vmem:[#allocation4 + $0x50] sm:$0xff] %vm1661_vm6, %v7986_v40  ;;  %v8312_v40 = vld [vmem:[#allocation3 + $0x3b8] sm:$0xff] }
 0xab4   : > { %v7605_v25 = vpop.permute.xlu1 %7604  ;;  %7626 = vrot.lane.b32.xlu0 %v13882_v46, %s9662_s22 }
 0xab5   : > { %7688 = vst.msk [vmem:[#allocation4 + $0x60] sm:$0xff] %vm1274_vm4, %v7605_v25 }
 0xab6   : > { %7818 = vrot.lane.b32.xlu1 %v13894_v15, %s9663_s23  ;;  %v8178_v47 = vpop.permute.xlu0 %8177  ;;  %v8486_v34 = vld [vmem:[#allocation4 + $0x48] sm:$0xff] }
 0xab7   : > { %8263 = vst.msk [vmem:[#allocation4 + $0x50] sm:$0xff] %vm1854_vm8, %v8178_v47  ;;  %9598 = vmatmul.mubr.msk.f32.gmra.mxu1 %vm2118_vm10, %v8486_v34  ;;  %v7929_v47 = vld [vmem:[#allocation3 + $0x3c0] sm:$0xff]  ;;  %v8121_v34 = vld [vmem:[#allocation3 + $0x3c8] sm:$0xff] }
 0xab8   : > { %v8370_v58 = vpop.permute.xlu1 %8369  ;;  %8391 = vrot.lane.b32.xlu0 %v8306_v60, %s9666_s9 }
 0xab9   : > { %8455 = vst.msk [vmem:[#allocation4 + $0x50] sm:$0xff] %vm2047_vm9, %v8370_v58 }
 0xaba   : > { %7436 = vrot.lane.b32.xlu1 %v13904_v51, %s9661_s21  ;;  %v8180_v46 = vpop.permute.xlu0 %8179 }
 0xabb   : > { %8264 = vst.msk [vmem:[#allocation4 + $0x58] sm:$0xff] %vm1854_vm8, %v8180_v46 }
 0xabc   : > { %v7797_v15 = vpop.permute.xlu1 %7796  ;;  %8009 = vrot.lane.b32.xlu0 %v7923_v6, %s9664_s24 }
 0xabd   : > { %7880 = vst.msk [vmem:[#allocation4 + $0x60] sm:$0xff] %vm1467_vm5, %v7797_v15 }
 0xabe   : > { %8201 = vrot.lane.b32.xlu1 %v8115_v38, %s9665_s25  ;;  %v7607_v55 = vpop.permute.xlu0 %7606 }
 0xabf   : > { %7689 = vst.msk [vmem:[#allocation4 + $0x68] sm:$0xff] %vm1274_vm4, %v7607_v55 }
 0xac0   : > { %v7799_v57 = vpop.permute.xlu1 %7798  ;;  %8011 = vrot.lane.b32.xlu0 %v8115_v38, %s9664_s24  ;;  %v8487_v27 = vld [vmem:[#allocation4 + $0x50] sm:$0xff] }
 0xac1   : > { %7881 = vst.msk [vmem:[#allocation4 + $0x68] sm:$0xff] %vm1467_vm5, %v7799_v57  ;;  %9600 = vmatprep.mubr.msk.f32.mxu1 %vm2118_vm10, %v8487_v27  ;;  %v8313_v38 = vld [vmem:[#allocation3 + $0x3d0] sm:$0xff] }
 0xac2   : > { %7628 = vrot.lane.b32.xlu1 %v13899_v24, %s9662_s22  ;;  %v8372_v51 = vpop.permute.xlu0 %8371 }
 0xac3   : > { %8456 = vst.msk [vmem:[#allocation4 + $0x58] sm:$0xff] %vm2047_vm9, %v8372_v51 }
 0xac4   : > { %v7992_v29 = vpop.permute.xlu1 %7991  ;;  %7438 = vrot.lane.b32.xlu0 %v13899_v24, %s9661_s21 }
 0xac5   : > { %8074 = vst.msk [vmem:[#allocation4 + $0x68] sm:$0xff] %vm1661_vm6, %v7992_v29 }
 0xac6   : > { %8393 = vrot.lane.b32.xlu1 %v8307_v12, %s9666_s9  ;;  %v7990_v33 = vpop.permute.xlu0 %7989 }
 0xac7   : > { %8073 = vst.msk [vmem:[#allocation4 + $0x60] sm:$0xff] %vm1661_vm6, %v7990_v33  ;;  %v7932_v33 = vld [vmem:[#allocation3 + $0x3e8] sm:$0xff] }
 0xac8   : > { %v7609_v42 = vpop.permute.xlu1 %7608  ;;  %8203 = vrot.lane.b32.xlu0 %v8307_v12, %s9665_s25  ;;  %v8314_v12 = vld [vmem:[#allocation3 + $0x3d8] sm:$0xff] }
 0xac9   : > { %7690 = vst.msk [vmem:[#allocation4 + $0x70] sm:$0xff] %vm1274_vm4, %v7609_v42 }
 0xaca   : > { %7820 = vrot.lane.b32.xlu1 %v13917_v8, %s9663_s23  ;;  %v8182_v62 = vpop.permute.xlu0 %8181  ;;  %v8488_v19 = vld [vmem:[#allocation4 + $0x58] sm:$0xff] }
 0xacb   : > { %8265 = vst.msk [vmem:[#allocation4 + $0x60] sm:$0xff] %vm1854_vm8, %v8182_v62  ;;  %9601 = vmatmul.mubr.msk.f32.gmra.mxu1 %vm2118_vm10, %v8488_v19  ;;  %v7931_v62 = vld [vmem:[#allocation3 + $0x3e0] sm:$0xff] }
 0xacc   : > { %v8374_v24 = vpop.permute.xlu1 %8373  ;;  %7630 = vrot.lane.b32.xlu0 %v13917_v8, %s9662_s22  ;;  %v8117_v8 = vld [vmem:[#allocation3 + $0x388] sm:$0xff] }
 0xacd   : > { %8457 = vst.msk [vmem:[#allocation4 + $0x60] sm:$0xff] %vm2047_vm9, %v8374_v24 }
 0xace   : > { %7822 = vrot.lane.b32.xlu1 %v13929_v35, %s9663_s23  ;;  %v8184_v20 = vpop.permute.xlu0 %8183 }
 0xacf   : > { %8266 = vst.msk [vmem:[#allocation4 + $0x68] sm:$0xff] %vm1854_vm8, %v8184_v20  ;;  %v8316_v20 = vld [vmem:[#allocation3 + $0x3f8] sm:$0xff] }
 0xad0   : > { %v7801_v44 = vpop.permute.xlu1 %7800  ;;  %8395 = vrot.lane.b32.xlu0 %v8308_v53, %s9666_s9 }
 0xad1   : > { %7882 = vst.msk [vmem:[#allocation4 + $0x70] sm:$0xff] %vm1467_vm5, %v7801_v44 }
 0xad2   : > { %7440 = vrot.lane.b32.xlu1 %v13939_v21, %s9661_s21  ;;  %v7611_v2 = vpop.permute.xlu0 %7610 }
 0xad3   : > { %7691 = vst.msk [vmem:[#allocation4 + $0x78] sm:$0xff] %vm1274_vm4, %v7611_v2 }
 0xad4   : > { %v7803_v52 = vpop.permute.xlu1 %7802  ;;  %8013 = vrot.lane.b32.xlu0 %v7925_v50, %s9664_s24  ;;  %v8489_v35 = vld [vmem:[#allocation4 + $0x60] sm:$0xff] }
 0xad5   : > { %7883 = vst.msk [vmem:[#allocation4 + $0x78] sm:$0xff] %vm1467_vm5, %v7803_v52  ;;  %9603 = vmatprep.mubr.msk.f32.mxu1 %vm2118_vm10, %v8489_v35 }
 0xad6   : > { %8205 = vrot.lane.b32.xlu1 %v8117_v8, %s9665_s25  ;;  %v8376_v28 = vpop.permute.xlu0 %8375 }
 0xad7   : > { %8458 = vst.msk [vmem:[#allocation4 + $0x68] sm:$0xff] %vm2047_vm9, %v8376_v28 }
 0xad8   : > { %v7996_v1 = vpop.permute.xlu1 %7995  ;;  %8015 = vrot.lane.b32.xlu0 %v8117_v8, %s9664_s24  ;;  %v14278_v8 = vld [vmem:[%s14489_s2 + $0x3] ss:$0 sm:$0xff] }
 0xad9   : > { %8076 = vst.msk [vmem:[#allocation4 + $0x78] sm:$0xff] %vm1661_vm6, %v7996_v1 }
 0xada   : > { %7632 = vrot.lane.b32.xlu1 %v13934_v26, %s9662_s22  ;;  %v7994_v21 = vpop.permute.xlu0 %7993 }
 0xadb   : > { %8075 = vst.msk [vmem:[#allocation4 + $0x70] sm:$0xff] %vm1661_vm6, %v7994_v21 }
 0xadc   : > { %v7613_v23 = vpop.permute.xlu1 %7612  ;;  %7442 = vrot.lane.b32.xlu0 %v13934_v26, %s9661_s21 }
 0xadd   : > { %7692 = vst.msk [vmem:[#allocation4 + $0x80] sm:$0xff] %vm1274_vm4, %v7613_v23 }
 0xade   : > { %8397 = vrot.lane.b32.xlu1 %v8309_v16, %s9666_s9  ;;  %v8186_v54 = vpop.permute.xlu0 %8185  ;;  %v8490_v37 = vld [vmem:[#allocation4 + $0x68] sm:$0xff] }
 0xadf   : > { %8267 = vst.msk [vmem:[#allocation4 + $0x70] sm:$0xff] %vm1854_vm8, %v8186_v54  ;;  %9604 = vmatmul.mubr.msk.f32.gmra.mxu1 %vm2118_vm10, %v8490_v37 }
 0xae0   : > { %v8378_v14 = vpop.permute.xlu1 %8377  ;;  %8207 = vrot.lane.b32.xlu0 %v8309_v16, %s9665_s25 }
 0xae1   : > { %8459 = vst.msk [vmem:[#allocation4 + $0x70] sm:$0xff] %vm2047_vm9, %v8378_v14  ;;  %v8872_v14 = vld [vmem:[#allocation5 + $0x8] sm:$0xff] }
 0xae2   : > { %7824 = vrot.lane.b32.xlu1 %v13952_v61, %s9663_s23  ;;  %v8188_v0 = vpop.permute.xlu0 %8187 }
 0xae3   : > { %8268 = vst.msk [vmem:[#allocation4 + $0x78] sm:$0xff] %vm1854_vm8, %v8188_v0 }
 0xae4   : > { %v7805_v26 = vpop.permute.xlu1 %7804  ;;  %7634 = vrot.lane.b32.xlu0 %v13952_v61, %s9662_s22 }
 0xae5   : > { %7884 = vst.msk [vmem:[#allocation4 + $0x80] sm:$0xff] %vm1467_vm5, %v7805_v26 }
 0xae6   : > { %7826 = vrot.lane.b32.xlu1 %v13964_v18, %s9663_s23  ;;  %v7615_v45 = vpop.permute.xlu0 %7614 }
 0xae7   : > { %7693 = vst.msk [vmem:[#allocation4 + $0x88] sm:$0xff] %vm1274_vm4, %v7615_v45  ;;  %v8871_v45 = vld [vmem:[#allocation5] sm:$0xff] }
 0xae8   : > { %v7807_v32 = vpop.permute.xlu1 %7806  ;;  %8399 = vrot.lane.b32.xlu0 %v8310_v43, %s9666_s9  ;;  %v8491_v63 = vld [vmem:[#allocation4 + $0x70] sm:$0xff] }
 0xae9   : > { %7885 = vst.msk [vmem:[#allocation4 + $0x88] sm:$0xff] %vm1467_vm5, %v7807_v32  ;;  %9606 = vmatprep.mubr.msk.f32.mxu1 %vm2118_vm10, %v8491_v63 }
 0xaea   : > { %7444 = vrot.lane.b32.xlu1 %v13974_v17, %s9661_s21  ;;  %v8380_v61 = vpop.permute.xlu0 %8379 }
 0xaeb   : > { %8460 = vst.msk [vmem:[#allocation4 + $0x78] sm:$0xff] %vm2047_vm9, %v8380_v61 }
 0xaec   : > { %v8000_v18 = vpop.permute.xlu1 %7999  ;;  %8017 = vrot.lane.b32.xlu0 %v7927_v48, %s9664_s24 }
 0xaed   : > { %8078 = vst.msk [vmem:[#allocation4 + $0x88] sm:$0xff] %vm1661_vm6, %v8000_v18 }
 0xaee   : > { %8209 = vrot.lane.b32.xlu1 %v8119_v7, %s9665_s25  ;;  %v7998_v22 = vpop.permute.xlu0 %7997 }
 0xaef   : > { %8077 = vst.msk [vmem:[#allocation4 + $0x80] sm:$0xff] %vm1661_vm6, %v7998_v22 }
 0xaf0   : > { %v7617_v11 = vpop.permute.xlu1 %7616  ;;  %8019 = vrot.lane.b32.xlu0 %v8119_v7, %s9664_s24 }
 0xaf1   : > { %7694 = vst.msk [vmem:[#allocation4 + $0x90] sm:$0xff] %vm1274_vm4, %v7617_v11 }
 0xaf2   : > { %7636 = vrot.lane.b32.xlu1 %v13969_v13, %s9662_s22  ;;  %v8190_v17 = vpop.permute.xlu0 %8189  ;;  %v8492_v4 = vld [vmem:[#allocation4 + $0x78] sm:$0xff] }
 0xaf3   : > { %8269 = vst.msk [vmem:[#allocation4 + $0x80] sm:$0xff] %vm1854_vm8, %v8190_v17  ;;  %9607 = vmatmul.mubr.msk.f32.gmra.mxu1 %vm2118_vm10, %v8492_v4 }
 0xaf4   : > { %v8382_v31 = vpop.permute.xlu1 %8381  ;;  %7446 = vrot.lane.b32.xlu0 %v13969_v13, %s9661_s21 }
 0xaf5   : > { %8461 = vst.msk [vmem:[#allocation4 + $0x80] sm:$0xff] %vm2047_vm9, %v8382_v31 }
 0xaf6   : > { %8401 = vrot.lane.b32.xlu1 %v8311_v36, %s9666_s9  ;;  %v8192_v41 = vpop.permute.xlu0 %8191 }
 0xaf7   : > { %8270 = vst.msk [vmem:[#allocation4 + $0x88] sm:$0xff] %vm1854_vm8, %v8192_v41 }
 0xaf8   : > { %v7809_v49 = vpop.permute.xlu1 %7808  ;;  %8211 = vrot.lane.b32.xlu0 %v8311_v36, %s9665_s25 }
 0xaf9   : > { %7886 = vst.msk [vmem:[#allocation4 + $0x90] sm:$0xff] %vm1467_vm5, %v7809_v49 }
 0xafa   : > { %7828 = vrot.lane.b32.xlu1 %v13987_v5, %s9663_s23  ;;  %v7619_v39 = vpop.permute.xlu0 %7618 }
 0xafb   : > { %7695 = vst.msk [vmem:[#allocation4 + $0x98] sm:$0xff] %vm1274_vm4, %v7619_v39 }
 0xafc   : > { %v7811_v30 = vpop.permute.xlu1 %7810  ;;  %7638 = vrot.lane.b32.xlu0 %v13987_v5, %s9662_s22  ;;  %v8493_v13 = vld [vmem:[#allocation4 + $0x80] sm:$0xff] }
 0xafd   : > { %7887 = vst.msk [vmem:[#allocation4 + $0x98] sm:$0xff] %vm1467_vm5, %v7811_v30  ;;  %9609 = vmatprep.mubr.msk.f32.mxu1 %vm2118_vm10, %v8493_v13 }
 0xafe   : > { %7830 = vrot.lane.b32.xlu1 %v14000_v3, %s9663_s23  ;;  %v8384_v25 = vpop.permute.xlu0 %8383 }
 0xaff   : > { %8462 = vst.msk [vmem:[#allocation4 + $0x88] sm:$0xff] %vm2047_vm9, %v8384_v25  ;;  %v8874_v25 = vld [vmem:[#allocation5 + $0x18] sm:$0xff] }
 0xb00   : > { %v8004_v60 = vpop.permute.xlu1 %8003  ;;  %8403 = vrot.lane.b32.xlu0 %v8312_v40, %s9666_s9 }
 0xb01   : > { %8080 = vst.msk [vmem:[#allocation4 + $0x98] sm:$0xff] %vm1661_vm6, %v8004_v60 }
 0xb02   : > { %7448 = vrot.lane.b32.xlu1 %v14010_v10, %s9661_s21  ;;  %v8002_v5 = vpop.permute.xlu0 %8001 }
 0xb03   : > { %8079 = vst.msk [vmem:[#allocation4 + $0x90] sm:$0xff] %vm1661_vm6, %v8002_v5 }
 0xb04   : > { %v7621_v58 = vpop.permute.xlu1 %7620  ;;  %8021 = vrot.lane.b32.xlu0 %v7929_v47, %s9664_s24 }
 0xb05   : > { %7696 = vst.msk [vmem:[#allocation4 + $0xa0] sm:$0xff] %vm1274_vm4, %v7621_v58  ;;  %v8873_v58 = vld [vmem:[#allocation5 + $0x10] sm:$0xff] }
 0xb06   : > { %8213 = vrot.lane.b32.xlu1 %v8121_v34, %s9665_s25  ;;  %v8194_v3 = vpop.permute.xlu0 %8193  ;;  %v8494_v6 = vld [vmem:[#allocation4 + $0x88] sm:$0xff] }
 0xb07   : > { %8271 = vst.msk [vmem:[#allocation4 + $0x90] sm:$0xff] %vm1854_vm8, %v8194_v3  ;;  %9610 = vmatmul.mubr.msk.f32.gmra.mxu1 %vm2118_vm10, %v8494_v6 }
 0xb08   : > { %v8386_v46 = vpop.permute.xlu1 %8385  ;;  %8023 = vrot.lane.b32.xlu0 %v8121_v34, %s9664_s24 }
 0xb09   : > { %8463 = vst.msk [vmem:[#allocation4 + $0x90] sm:$0xff] %vm2047_vm9, %v8386_v46 }
 0xb0a   : > { %7640 = vrot.lane.b32.xlu1 %v14005_v56, %s9662_s22  ;;  %v8196_v10 = vpop.permute.xlu0 %8195 }
 0xb0b   : > { %8272 = vst.msk [vmem:[#allocation4 + $0x98] sm:$0xff] %vm1854_vm8, %v8196_v10 }
 0xb0c   : > { %v7813_v15 = vpop.permute.xlu1 %7812  ;;  %7450 = vrot.lane.b32.xlu0 %v14005_v56, %s9661_s21 }
 0xb0d   : > { %7888 = vst.msk [vmem:[#allocation4 + $0xa0] sm:$0xff] %vm1467_vm5, %v7813_v15 }
 0xb0e   : > { %8405 = vrot.lane.b32.xlu1 %v8313_v38, %s9666_s9  ;;  %v7623_v55 = vpop.permute.xlu0 %7622 }
 0xb0f   : > { %7697 = vst.msk [vmem:[#allocation4 + $0xa8] sm:$0xff] %vm1274_vm4, %v7623_v55 }
 0xb10   : > { %v7815_v57 = vpop.permute.xlu1 %7814  ;;  %8215 = vrot.lane.b32.xlu0 %v8313_v38, %s9665_s25  ;;  %v8495_v27 = vld [vmem:[#allocation4 + $0x90] sm:$0xff] }
 0xb11   : > { %7889 = vst.msk [vmem:[#allocation4 + $0xa8] sm:$0xff] %vm1467_vm5, %v7815_v57  ;;  %9612 = vmatprep.mubr.msk.f32.mxu1 %vm2118_vm10, %v8495_v27 }
 0xb12   : > { %7832 = vrot.lane.b32.xlu1 %v14025_v59, %s9663_s23  ;;  %v8388_v51 = vpop.permute.xlu0 %8387 }
 0xb13   : > { %8464 = vst.msk [vmem:[#allocation4 + $0x98] sm:$0xff] %vm2047_vm9, %v8388_v51 }
 0xb14   : > { %v7433_v56 = vpop.permute.xlu1 %7432  ;;  %7642 = vrot.lane.b32.xlu0 %v14025_v59, %s9662_s22  ;;  %v8124_v59 = vld [vmem:[#allocation3 + $0x3f0] sm:$0xff] }
 0xb15   : > { %7506 = vst.msk [vmem:[#allocation4 + $0xb0] sm:$0xff] %vm1081_vm3, %v7433_v56 }
 0xb16   : > { %v8006_v29 = vpop.permute.xlu0 %8005  ;;  %7834 = vrot.lane.b32.xlu1 %v14040_v9, %s9663_s23 }
 0xb17   : > { %8081 = vst.msk [vmem:[#allocation4 + $0xa0] sm:$0xff] %vm1661_vm6, %v8006_v29 }
 0xb18   : > { %v8198_v42 = vpop.permute.xlu1 %8197  ;;  %8407 = vrot.lane.b32.xlu0 %v8314_v12, %s9666_s9 }
 0xb19   : > { %8273 = vst.msk [vmem:[#allocation4 + $0xa0] sm:$0xff] %vm1854_vm8, %v8198_v42 }
 0xb1a   : > { %v8008_v19 = vpop.permute.xlu0 %8007  ;;  %v8496_v24 = vld [vmem:[#allocation4 + $0x98] sm:$0xff]  ;;  %8027 = vrot.lane.b32.xlu1 %v7932_v33, %s9664_s24 }
 0xb1b   : > { %8082 = vst.msk [vmem:[#allocation4 + $0xa8] sm:$0xff] %vm1661_vm6, %v8008_v19  ;;  %9613 = vmatmul.mubr.msk.f32.gmra.mxu1 %vm2118_vm10, %v8496_v24 }
 0xb1c   : > { %v7625_v53 = vpop.permute.xlu1 %7624  ;;  %8025 = vrot.lane.b32.xlu0 %v7931_v62, %s9664_s24 }
 0xb1d   : > { %7698 = vst.msk [vmem:[#allocation4 + $0xb0] sm:$0xff] %vm1274_vm4, %v7625_v53 }
 0xb1e   : > { %v7435_v9 = vpop.permute.xlu0 %7434  ;;  %8219 = vrot.lane.b32.xlu1 %v8124_v59, %s9665_s25 }
 0xb1f   : > { %7507 = vst.msk [vmem:[#allocation4 + $0xb8] sm:$0xff] %vm1081_vm3, %v7435_v9 }
 0xb20   : > { %v8390_v44 = vpop.permute.xlu1 %8389  ;;  %8217 = vrot.lane.b32.xlu0 %v7932_v33, %s9665_s25  ;;  %s14296_s25 = scalar_lea.vmem %s14490_s3, %s9251_s15 }
 0xb21   : > { %8465 = vst.msk [vmem:[#allocation4 + $0xa0] sm:$0xff] %vm2047_vm9, %v8390_v44  ;;  %v8875_v44 = vld [vmem:[#allocation5 + $0x20] sm:$0xff] }
 0xb22   : > { %v8200_v50 = vpop.permute.xlu0 %8199  ;;  %8411 = vrot.lane.b32.xlu1 %v8316_v20, %s9666_s9 }
 0xb23   : > { %8274 = vst.msk [vmem:[#allocation4 + $0xa8] sm:$0xff] %vm1854_vm8, %v8200_v50 }
 0xb24   : > { %v7817_v2 = vpop.permute.xlu1 %7816  ;;  %8409 = vrot.lane.b32.xlu0 %v8124_v59, %s9666_s9  ;;  %v8876_v59 = vld [vmem:[#allocation5 + $0x28] sm:$0xff] }
 0xb25   : > { %7890 = vst.msk [vmem:[#allocation4 + $0xb0] sm:$0xff] %vm1467_vm5, %v7817_v2 }
 0xb26   : > { %v7627_v52 = vpop.permute.xlu0 %7626 }
 0xb27   : > { %7699 = vst.msk [vmem:[#allocation4 + $0xb8] sm:$0xff] %vm1274_vm4, %v7627_v52  ;;  %v9587_v35 = vpop.f32.mrf.mxu1 }
 0xb28   : > { %v8686_v28 = vadd.f32 %v9587_v35, %v14278_v8  ;;  %v7819_v1 = vpop.permute.xlu1 %7818  ;;  %v8497_v21 = vld [vmem:[#allocation4 + $0xa0] sm:$0xff] }
 0xb29   : > { %7891 = vst.msk [vmem:[#allocation4 + $0xb8] sm:$0xff] %vm1467_vm5, %v7819_v1  ;;  %v8680_v16 = vpop.f32.mrf.mxu1  ;;  %9615 = vmatprep.mubr.msk.f32.mxu1 %vm2118_vm10, %v8497_v21 }
 0xb2a   : > { %v8840_v23 = vmax.f32 %v8686_v28, 0.0  ;;  %v8681_v54 = vadd.f32 %v14278_v8, %v8680_v16  ;;  %v8392_v37 = vpop.permute.xlu0 %8391 }
 0xb2b   : > { %8466 = vst.msk [vmem:[#allocation4 + $0xa8] sm:$0xff] %vm2047_vm9, %v8392_v37 }
 0xb2c   : > { %v8904_v0 = vadd.f32 %v8872_v14, %v8840_v23  ;;  %v8839_v26 = vmax.f32 %v8681_v54, 0.0  ;;  %v7437_v43 = vpop.permute.xlu1 %7436 }
 0xb2d   : > { %7508 = vst.msk [vmem:[#allocation4 + $0xc0] sm:$0xff] %vm1081_vm3, %v7437_v43 }
 0xb2e   : > { %8936 = vst.msk [vmem:[#allocation5 + $0x8] sm:$0xff] %vm171_vm0, %v8904_v0  ;;  %v8903_v32 = vadd.f32 %v8871_v45, %v8839_v26  ;;  %v8010_v63 = vpop.permute.xlu0 %8009 }
 0xb2f   : > { %8083 = vst.msk [vmem:[#allocation4 + $0xb0] sm:$0xff] %vm1661_vm6, %v8010_v63 }
 0xb30   : > { %8935 = vst.msk [vmem:[#allocation5] sm:$0xff] %vm171_vm0, %v8903_v32  ;;  %v8202_v48 = vpop.permute.xlu1 %8201 }
 0xb31   : > { %8275 = vst.msk [vmem:[#allocation4 + $0xb0] sm:$0xff] %vm1854_vm8, %v8202_v48 }
 0xb32   : > { %v8012_v61 = vpop.permute.xlu0 %8011  ;;  %v8498_v7 = vld [vmem:[#allocation4 + $0xa8] sm:$0xff] }
 0xb33   : > { %8084 = vst.msk [vmem:[#allocation4 + $0xb8] sm:$0xff] %vm1661_vm6, %v8012_v61  ;;  %9616 = vmatmul.mubr.msk.f32.gmra.mxu1 %vm2118_vm10, %v8498_v7  ;;  %v8878_v61 = vld [vmem:[#allocation5 + $0x38] sm:$0xff] }
 0xb34   : > { %v7629_v18 = vpop.permute.xlu1 %7628 }
 0xb35   : > { %v8968_v22 = vld [vmem:[#allocation5 + $0x8] sm:$0xff]  ;;  %7700 = vst.msk [vmem:[#allocation4 + $0xc0] sm:$0xff] %vm1274_vm4, %v7629_v18 }
 0xb36   : > { %9000 = vst.msk [vmem:[%s14296_s25 + $0x8] sm:$0xff] %vm171_vm0, %v8968_v22  ;;  %v7439_v11 = vpop.permute.xlu0 %7438 }
 0xb37   : > { %v8967_v17 = vld [vmem:[#allocation5] sm:$0xff]  ;;  %7509 = vst.msk [vmem:[#allocation4 + $0xc8] sm:$0xff] %vm1081_vm3, %v7439_v11  ;;  %v8877_v11 = vld [vmem:[#allocation5 + $0x30] sm:$0xff] }
 0xb38   : > { %8999 = vst.msk [vmem:[%s14296_s25] sm:$0xff] %vm171_vm0, %v8967_v17  ;;  %v8394_v4 = vpop.permute.xlu1 %8393 }
 0xb39   : > { %8467 = vst.msk [vmem:[#allocation4 + $0xb0] sm:$0xff] %vm2047_vm9, %v8394_v4 }
 0xb3a   : > { %v8204_v36 = vpop.permute.xlu0 %8203 }
 0xb3b   : > { %8276 = vst.msk [vmem:[#allocation4 + $0xb8] sm:$0xff] %vm1854_vm8, %v8204_v36  ;;  %v9590_v31 = vpop.f32.mrf.mxu1 }
 0xb3c   : > { %v8696_v41 = vadd.f32 %v9590_v31, %v14278_v8  ;;  %v7821_v49 = vpop.permute.xlu1 %7820 }
 0xb3d   : > { %7892 = vst.msk [vmem:[#allocation4 + $0xc0] sm:$0xff] %vm1467_vm5, %v7821_v49  ;;  %v8690_v39 = vpop.f32.mrf.mxu1 }
 0xb3e   : > { %v8842_v30 = vmax.f32 %v8696_v41, 0.0  ;;  %v8691_v13 = vadd.f32 %v14278_v8, %v8690_v39  ;;  %v7631_v40 = vpop.permute.xlu0 %7630 }
 0xb3f   : > { %7701 = vst.msk [vmem:[#allocation4 + $0xc8] sm:$0xff] %vm1274_vm4, %v7631_v40 }
 0xb40   : > { %v8906_v60 = vadd.f32 %v8874_v25, %v8842_v30  ;;  %v8841_v47 = vmax.f32 %v8691_v13, 0.0  ;;  %v7823_v5 = vpop.permute.xlu1 %7822  ;;  %v8499_v34 = vld [vmem:[#allocation4 + $0xb0] sm:$0xff] }
 0xb41   : > { %7893 = vst.msk [vmem:[#allocation4 + $0xc8] sm:$0xff] %vm1467_vm5, %v7823_v5  ;;  %9618 = vmatprep.mubr.msk.f32.mxu1 %vm2118_vm10, %v8499_v34 }
 0xb42   : > { %8938 = vst.msk [vmem:[#allocation5 + $0x18] sm:$0xff] %vm171_vm0, %v8906_v60  ;;  %v8905_v3 = vadd.f32 %v8873_v58, %v8841_v47  ;;  %v8396_v6 = vpop.permute.xlu0 %8395 }
 0xb43   : > { %8468 = vst.msk [vmem:[#allocation4 + $0xb8] sm:$0xff] %vm2047_vm9, %v8396_v6 }
 0xb44   : > { %8937 = vst.msk [vmem:[#allocation5 + $0x10] sm:$0xff] %vm171_vm0, %v8905_v3  ;;  %v7441_v46 = vpop.permute.xlu1 %7440 }
 0xb45   : > { %7510 = vst.msk [vmem:[#allocation4 + $0xd0] sm:$0xff] %vm1081_vm3, %v7441_v46 }
 0xb46   : > { %v8014_v10 = vpop.permute.xlu0 %8013 }
 0xb47   : > { %8085 = vst.msk [vmem:[#allocation4 + $0xc0] sm:$0xff] %vm1661_vm6, %v8014_v10  ;;  %v8880_v10 = vld [vmem:[#allocation5 + $0x48] sm:$0xff] }
 0xb48   : > { %v8206_v38 = vpop.permute.xlu1 %8205 }
 0xb49   : > { %v8970_v15 = vld [vmem:[#allocation5 + $0x18] sm:$0xff]  ;;  %8277 = vst.msk [vmem:[#allocation4 + $0xc0] sm:$0xff] %vm1854_vm8, %v8206_v38 }
 0xb4a   : > { %9002 = vst.msk [vmem:[%s14296_s25 + $0x18] sm:$0xff] %vm171_vm0, %v8970_v15  ;;  %v8016_v55 = vpop.permute.xlu0 %8015  ;;  %v8500_v57 = vld [vmem:[#allocation4 + $0xb8] sm:$0xff] }
 0xb4b   : > { %v8969_v27 = vld [vmem:[#allocation5 + $0x10] sm:$0xff]  ;;  %8086 = vst.msk [vmem:[#allocation4 + $0xc8] sm:$0xff] %vm1661_vm6, %v8016_v55  ;;  %9619 = vmatmul.mubr.msk.f32.gmra.mxu1 %vm2118_vm10, %v8500_v57  ;;  %v8879_v57 = vld [vmem:[#allocation5 + $0x40] sm:$0xff] }
 0xb4c   : > { %9001 = vst.msk [vmem:[%s14296_s25 + $0x10] sm:$0xff] %vm171_vm0, %v8969_v27  ;;  %v7633_v51 = vpop.permute.xlu1 %7632 }
 0xb4d   : > { %7702 = vst.msk [vmem:[#allocation4 + $0xd0] sm:$0xff] %vm1274_vm4, %v7633_v51 }
 0xb4e   : > { %v7443_v56 = vpop.permute.xlu0 %7442 }
 0xb4f   : > { %7511 = vst.msk [vmem:[#allocation4 + $0xd8] sm:$0xff] %vm1081_vm3, %v7443_v56  ;;  %v9593_v12 = vpop.f32.mrf.mxu1 }
 0xb50   : > { %v8706_v29 = vadd.f32 %v9593_v12, %v14278_v8  ;;  %v8398_v33 = vpop.permute.xlu1 %8397 }
 0xb51   : > { %8469 = vst.msk [vmem:[#allocation4 + $0xc0] sm:$0xff] %vm2047_vm9, %v8398_v33  ;;  %v8700_v42 = vpop.f32.mrf.mxu1 }
 0xb52   : > { %v8844_v62 = vmax.f32 %v8706_v29, 0.0  ;;  %v8701_v19 = vadd.f32 %v14278_v8, %v8700_v42  ;;  %v8208_v24 = vpop.permute.xlu0 %8207 }
 0xb53   : > { %8278 = vst.msk [vmem:[#allocation4 + $0xc8] sm:$0xff] %vm1854_vm8, %v8208_v24 }
 0xb54   : > { %v8908_v53 = vadd.f32 %v8876_v59, %v8844_v62  ;;  %v8843_v9 = vmax.f32 %v8701_v19, 0.0  ;;  %v7825_v20 = vpop.permute.xlu1 %7824 }
 0xb55   : > { %7894 = vst.msk [vmem:[#allocation4 + $0xd0] sm:$0xff] %vm1467_vm5, %v7825_v20 }
 0xb56   : > { %8940 = vst.msk [vmem:[#allocation5 + $0x28] sm:$0xff] %vm171_vm0, %v8908_v53  ;;  %v8907_v50 = vadd.f32 %v8875_v44, %v8843_v9  ;;  %v7635_v2 = vpop.permute.xlu0 %7634 }
 0xb57   : > { %7703 = vst.msk [vmem:[#allocation4 + $0xd8] sm:$0xff] %vm1274_vm4, %v7635_v2 }
 0xb58   : > { %8939 = vst.msk [vmem:[#allocation5 + $0x20] sm:$0xff] %vm171_vm0, %v8907_v50  ;;  %v7827_v52 = vpop.permute.xlu1 %7826  ;;  %v8501_v35 = vld [vmem:[#allocation4 + $0xc0] sm:$0xff] }
 0xb59   : > { %7895 = vst.msk [vmem:[#allocation4 + $0xd8] sm:$0xff] %vm1467_vm5, %v7827_v52  ;;  %9621 = vmatprep.mubr.msk.f32.mxu1 %vm2118_vm10, %v8501_v35  ;;  %v8882_v35 = vld [vmem:[#allocation5 + $0x58] sm:$0xff] }
 0xb5a   : > { %v8400_v28 = vpop.permute.xlu0 %8399 }
 0xb5b   : > { %8470 = vst.msk [vmem:[#allocation4 + $0xc8] sm:$0xff] %vm2047_vm9, %v8400_v28 }
 0xb5c   : > { %v7445_v1 = vpop.permute.xlu1 %7444 }
 0xb5d   : > { %v8972_v21 = vld [vmem:[#allocation5 + $0x28] sm:$0xff]  ;;  %7512 = vst.msk [vmem:[#allocation4 + $0xe0] sm:$0xff] %vm1081_vm3, %v7445_v1 }
 0xb5e   : > { %9004 = vst.msk [vmem:[%s14296_s25 + $0x28] sm:$0xff] %vm171_vm0, %v8972_v21  ;;  %v8018_v16 = vpop.permute.xlu0 %8017 }
 0xb5f   : > { %v8971_v23 = vld [vmem:[#allocation5 + $0x20] sm:$0xff]  ;;  %8087 = vst.msk [vmem:[#allocation4 + $0xd0] sm:$0xff] %vm1661_vm6, %v8018_v16  ;;  %v8881_v16 = vld [vmem:[#allocation5 + $0x50] sm:$0xff] }
 0xb60   : > { %9003 = vst.msk [vmem:[%s14296_s25 + $0x20] sm:$0xff] %vm171_vm0, %v8971_v23  ;;  %v8210_v54 = vpop.permute.xlu1 %8209 }
 0xb61   : > { %8279 = vst.msk [vmem:[#allocation4 + $0xd0] sm:$0xff] %vm1854_vm8, %v8210_v54 }
 0xb62   : > { %v8020_v37 = vpop.permute.xlu0 %8019  ;;  %v8502_v14 = vld [vmem:[#allocation4 + $0xc8] sm:$0xff] }
 0xb63   : > { %8088 = vst.msk [vmem:[#allocation4 + $0xd8] sm:$0xff] %vm1661_vm6, %v8020_v37  ;;  %v9596_v0 = vpop.f32.mrf.mxu1  ;;  %9622 = vmatmul.mubr.msk.f32.gmra.mxu1 %vm2118_vm10, %v8502_v14 }
 0xb64   : > { %v8716_v26 = vadd.f32 %v9596_v0, %v14278_v8  ;;  %v7637_v43 = vpop.permute.xlu1 %7636 }
 0xb65   : > { %7704 = vst.msk [vmem:[#allocation4 + $0xe0] sm:$0xff] %vm1274_vm4, %v7637_v43  ;;  %v8710_v45 = vpop.f32.mrf.mxu1 }
 0xb66   : > { %v8846_v32 = vmax.f32 %v8716_v26, 0.0  ;;  %v8711_v63 = vadd.f32 %v14278_v8, %v8710_v45  ;;  %v7447_v48 = vpop.permute.xlu0 %7446 }
 0xb67   : > { %7513 = vst.msk [vmem:[#allocation4 + $0xe8] sm:$0xff] %vm1081_vm3, %v7447_v48 }
 0xb68   : > { %v8910_v7 = vadd.f32 %v8878_v61, %v8846_v32  ;;  %v8845_v18 = vmax.f32 %v8711_v63, 0.0  ;;  %v8402_v22 = vpop.permute.xlu1 %8401 }
 0xb69   : > { %8471 = vst.msk [vmem:[#allocation4 + $0xd0] sm:$0xff] %vm2047_vm9, %v8402_v22  ;;  %v8884_v22 = vld [vmem:[#allocation5 + $0x68] sm:$0xff] }
 0xb6a   : > { %8942 = vst.msk [vmem:[#allocation5 + $0x38] sm:$0xff] %vm171_vm0, %v8910_v7  ;;  %v8909_v17 = vadd.f32 %v8877_v11, %v8845_v18  ;;  %v8212_v4 = vpop.permute.xlu0 %8211 }
 0xb6b   : > { %8280 = vst.msk [vmem:[#allocation4 + $0xd8] sm:$0xff] %vm1854_vm8, %v8212_v4  ;;  %v8883_v4 = vld [vmem:[#allocation5 + $0x60] sm:$0xff] }
 0xb6c   : > { %8941 = vst.msk [vmem:[#allocation5 + $0x30] sm:$0xff] %vm171_vm0, %v8909_v17  ;;  %v7829_v36 = vpop.permute.xlu1 %7828 }
 0xb6d   : > { %7896 = vst.msk [vmem:[#allocation4 + $0xe0] sm:$0xff] %vm1467_vm5, %v7829_v36 }
 0xb6e   : > { %v7639_v31 = vpop.permute.xlu0 %7638 }
 0xb6f   : > { %7705 = vst.msk [vmem:[#allocation4 + $0xe8] sm:$0xff] %vm1274_vm4, %v7639_v31 }
 0xb70   : > { %v7831_v41 = vpop.permute.xlu1 %7830  ;;  %v8503_v49 = vld [vmem:[#allocation4 + $0xd0] sm:$0xff] }
 0xb71   : > { %v8974_v39 = vld [vmem:[#allocation5 + $0x38] sm:$0xff]  ;;  %7897 = vst.msk [vmem:[#allocation4 + $0xe8] sm:$0xff] %vm1467_vm5, %v7831_v41  ;;  %9624 = vmatprep.mubr.msk.f32.mxu1 %vm2118_vm10, %v8503_v49 }
 0xb72   : > { %9006 = vst.msk [vmem:[%s14296_s25 + $0x38] sm:$0xff] %vm171_vm0, %v8974_v39  ;;  %v8404_v30 = vpop.permute.xlu0 %8403 }
 0xb73   : > { %v8973_v13 = vld [vmem:[#allocation5 + $0x30] sm:$0xff]  ;;  %8472 = vst.msk [vmem:[#allocation4 + $0xd8] sm:$0xff] %vm2047_vm9, %v8404_v30 }
 0xb74   : > { %9005 = vst.msk [vmem:[%s14296_s25 + $0x30] sm:$0xff] %vm171_vm0, %v8973_v13  ;;  %v7449_v40 = vpop.permute.xlu1 %7448 }
 0xb75   : > { %7514 = vst.msk [vmem:[#allocation4 + $0xf0] sm:$0xff] %vm1081_vm3, %v7449_v40 }
 0xb76   : > { %v8022_v25 = vpop.permute.xlu0 %8021 }
 0xb77   : > { %8089 = vst.msk [vmem:[#allocation4 + $0xe0] sm:$0xff] %vm1661_vm6, %v8022_v25  ;;  %v9599_v60 = vpop.f32.mrf.mxu1  ;;  %v8886_v25 = vld [vmem:[#allocation5 + $0x78] sm:$0xff] }
 0xb78   : > { %v8726_v47 = vadd.f32 %v9599_v60, %v14278_v8  ;;  %v8214_v5 = vpop.permute.xlu1 %8213 }
 0xb79   : > { %8281 = vst.msk [vmem:[#allocation4 + $0xe0] sm:$0xff] %vm1854_vm8, %v8214_v5  ;;  %v8720_v34 = vpop.f32.mrf.mxu1  ;;  %v8885_v5 = vld [vmem:[#allocation5 + $0x70] sm:$0xff] }
 0xb7a   : > { %v8848_v58 = vmax.f32 %v8726_v47, 0.0  ;;  %v8721_v3 = vadd.f32 %v14278_v8, %v8720_v34  ;;  %v8024_v6 = vpop.permute.xlu0 %8023  ;;  %v8504_v46 = vld [vmem:[#allocation4 + $0xd8] sm:$0xff] }
 0xb7b   : > { %8090 = vst.msk [vmem:[#allocation4 + $0xe8] sm:$0xff] %vm1661_vm6, %v8024_v6  ;;  %9625 = vmatmul.mubr.msk.f32.gmra.mxu1 %vm2118_vm10, %v8504_v46 }
 0xb7c   : > { %v8912_v38 = vadd.f32 %v8880_v10, %v8848_v58  ;;  %v8847_v15 = vmax.f32 %v8721_v3, 0.0  ;;  %v7641_v55 = vpop.permute.xlu1 %7640 }
 0xb7d   : > { %7706 = vst.msk [vmem:[#allocation4 + $0xf0] sm:$0xff] %vm1274_vm4, %v7641_v55  ;;  %v8888_v55 = vld [vmem:[#allocation5 + $0x88] sm:$0xff] }
 0xb7e   : > { %8944 = vst.msk [vmem:[#allocation5 + $0x48] sm:$0xff] %vm171_vm0, %v8912_v38  ;;  %v8911_v27 = vadd.f32 %v8879_v57, %v8847_v15  ;;  %v7451_v51 = vpop.permute.xlu0 %7450 }
 0xb7f   : > { %7515 = vst.msk [vmem:[#allocation4 + $0xf8] sm:$0xff] %vm1081_vm3, %v7451_v51  ;;  %v8887_v51 = vld [vmem:[#allocation5 + $0x80] sm:$0xff] }
 0xb80   : > { %8943 = vst.msk [vmem:[#allocation5 + $0x40] sm:$0xff] %vm171_vm0, %v8911_v27  ;;  %v8406_v56 = vpop.permute.xlu1 %8405 }
 0xb81   : > { %8473 = vst.msk [vmem:[#allocation4 + $0xe0] sm:$0xff] %vm2047_vm9, %v8406_v56 }
 0xb82   : > { %v8216_v12 = vpop.permute.xlu0 %8215 }
 0xb83   : > { %8282 = vst.msk [vmem:[#allocation4 + $0xe8] sm:$0xff] %vm1854_vm8, %v8216_v12 }
 0xb84   : > { %v7833_v29 = vpop.permute.xlu1 %7832 }
 0xb85   : > { %v8976_v33 = vld [vmem:[#allocation5 + $0x48] sm:$0xff]  ;;  %7898 = vst.msk [vmem:[#allocation4 + $0xf0] sm:$0xff] %vm1467_vm5, %v7833_v29 }
 0xb86   : > { %9008 = vst.msk [vmem:[%s14296_s25 + $0x48] sm:$0xff] %vm171_vm0, %v8976_v33  ;;  %v7643_v42 = vpop.permute.xlu0 %7642 }
 0xb87   : > { %v8975_v62 = vld [vmem:[#allocation5 + $0x40] sm:$0xff]  ;;  %7707 = vst.msk [vmem:[#allocation4 + $0xf8] sm:$0xff] %vm1274_vm4, %v7643_v42 }
 0xb88   : > { %9007 = vst.msk [vmem:[%s14296_s25 + $0x40] sm:$0xff] %vm171_vm0, %v8975_v62  ;;  %v7835_v19 = vpop.permute.xlu1 %7834  ;;  %v8505_v24 = vld [vmem:[#allocation4 + $0xe0] sm:$0xff] }
 0xb89   : > { %7899 = vst.msk [vmem:[#allocation4 + $0xf8] sm:$0xff] %vm1467_vm5, %v7835_v19  ;;  %9627 = vmatprep.mubr.msk.f32.mxu1 %vm2118_vm10, %v8505_v24 }
 0xb8a   : > { %v8408_v59 = vpop.permute.xlu0 %8407 }
 0xb8b   : > { %8474 = vst.msk [vmem:[#allocation4 + $0xe8] sm:$0xff] %vm2047_vm9, %v8408_v59  ;;  %v9602_v53 = vpop.f32.mrf.mxu1  ;;  %v8890_v59 = vld [vmem:[#allocation5 + $0x98] sm:$0xff] }
 0xb8c   : > { %v8736_v9 = vadd.f32 %v9602_v53, %v14278_v8  ;;  %v8028_v20 = vpop.permute.xlu1 %8027 }
 0xb8d   : > { %v8730_v44 = vpop.f32.mrf.mxu1  ;;  %8092 = vst.msk [vmem:[#allocation4 + $0xf8] sm:$0xff] %vm1661_vm6, %v8028_v20  ;;  %v8889_v20 = vld [vmem:[#allocation5 + $0x90] sm:$0xff] }
 0xb8e   : > { %v8850_v50 = vmax.f32 %v8736_v9, 0.0  ;;  %v8731_v2 = vadd.f32 %v14278_v8, %v8730_v44  ;;  %v8026_v52 = vpop.permute.xlu0 %8025 }
 0xb8f   : > { %8091 = vst.msk [vmem:[#allocation4 + $0xf0] sm:$0xff] %vm1661_vm6, %v8026_v52 }
 0xb90   : > { %v8914_v28 = vadd.f32 %v8882_v35, %v8850_v50  ;;  %v8849_v1 = vmax.f32 %v8731_v2, 0.0  ;;  %v8220_v21 = vpop.permute.xlu1 %8219 }
 0xb91   : > { %8284 = vst.msk [vmem:[#allocation4 + $0xf8] sm:$0xff] %vm1854_vm8, %v8220_v21 }
 0xb92   : > { %8946 = vst.msk [vmem:[#allocation5 + $0x58] sm:$0xff] %vm171_vm0, %v8914_v28  ;;  %v8913_v23 = vadd.f32 %v8881_v16, %v8849_v1  ;;  %v8218_v54 = vpop.permute.xlu0 %8217  ;;  %v8506_v37 = vld [vmem:[#allocation4 + $0xe8] sm:$0xff] }
 0xb93   : > { %8283 = vst.msk [vmem:[#allocation4 + $0xf0] sm:$0xff] %vm1854_vm8, %v8218_v54  ;;  %9628 = vmatmul.mubr.msk.f32.gmra.mxu1 %vm2118_vm10, %v8506_v37  ;;  %v8892_v16 = vld [vmem:[#allocation5 + $0xa8] sm:$0xff]  ;;  %v8891_v37 = vld [vmem:[#allocation5 + $0xa0] sm:$0xff] }
 0xb94   : > { %8945 = vst.msk [vmem:[#allocation5 + $0x50] sm:$0xff] %vm171_vm0, %v8913_v23  ;;  %v8412_v14 = vpop.permute.xlu1 %8411 }
 0xb95   : > { %8476 = vst.msk [vmem:[#allocation4 + $0xf8] sm:$0xff] %vm2047_vm9, %v8412_v14 }
 0xb96   : > { %v8410_v0 = vpop.permute.xlu0 %8409 }
 0xb97   : > { %8475 = vst.msk [vmem:[#allocation4 + $0xf0] sm:$0xff] %vm2047_vm9, %v8410_v0 }
 0xb99   : > { %v8978_v26 = vld [vmem:[#allocation5 + $0x58] sm:$0xff] }
 0xb9a   : > { %9010 = vst.msk [vmem:[%s14296_s25 + $0x58] sm:$0xff] %vm171_vm0, %v8978_v26 }
 0xb9b   : > { %v8977_v43 = vld [vmem:[#allocation5 + $0x50] sm:$0xff] }
 0xb9c   : > { %9009 = vst.msk [vmem:[%s14296_s25 + $0x50] sm:$0xff] %vm171_vm0, %v8977_v43  ;;  %v8508_v45 = vld [vmem:[#allocation4 + $0xf8] sm:$0xff] }
 0xb9e   : > { %v8507_v32 = vld [vmem:[#allocation4 + $0xf0] sm:$0xff] }
 0xb9f   : > { %v9605_v63 = vpop.f32.mrf.mxu1  ;;  %9630 = vmatprep.mubr.msk.f32.mxu1 %vm2118_vm10, %v8507_v32 }
 0xba0   : > { %v8746_v48 = vadd.f32 %v9605_v63, %v14278_v8  ;;  %9631 = vmatmul.mubr.msk.f32.gmra.mxu1 %vm2118_vm10, %v8508_v45 }
 0xba1   : > { %v8740_v61 = vpop.f32.mrf.mxu1 }
 0xba2   : > { %v8852_v7 = vmax.f32 %v8746_v48, 0.0  ;;  %v8741_v18 = vadd.f32 %v14278_v8, %v8740_v61  ;;  %v8894_v61 = vld [vmem:[#allocation5 + $0xb8] sm:$0xff] }
 0xba4   : > { %v8916_v11 = vadd.f32 %v8884_v22, %v8852_v7  ;;  %v8851_v17 = vmax.f32 %v8741_v18, 0.0  ;;  %v8893_v22 = vld [vmem:[#allocation5 + $0xb0] sm:$0xff] }
 0xba6   : > { %8948 = vst.msk [vmem:[#allocation5 + $0x68] sm:$0xff] %vm171_vm0, %v8916_v11  ;;  %v8915_v36 = vadd.f32 %v8883_v4, %v8851_v17 }
 0xba8   : > { %8947 = vst.msk [vmem:[#allocation5 + $0x60] sm:$0xff] %vm171_vm0, %v8915_v36 }
 0xbad   : > { %v8980_v31 = vld [vmem:[#allocation5 + $0x68] sm:$0xff] }
 0xbae   : > { %9012 = vst.msk [vmem:[%s14296_s25 + $0x68] sm:$0xff] %vm171_vm0, %v8980_v31 }
 0xbaf   : > { %v8979_v41 = vld [vmem:[#allocation5 + $0x60] sm:$0xff] }
 0xbb0   : > { %9011 = vst.msk [vmem:[%s14296_s25 + $0x60] sm:$0xff] %vm171_vm0, %v8979_v41 }
 0xbb3   : > { %v9608_v49 = vpop.f32.mrf.mxu1 }
 0xbb4   : > { %v8756_v39 = vadd.f32 %v9608_v49, %v14278_v8 }
 0xbb5   : > { %v8750_v30 = vpop.f32.mrf.mxu1 }
 0xbb6   : > { %v8854_v13 = vmax.f32 %v8756_v39, 0.0  ;;  %v8751_v40 = vadd.f32 %v14278_v8, %v8750_v30  ;;  %v8896_v30 = vld [vmem:[#allocation5 + $0xc8] sm:$0xff] }
 0xbb8   : > { %v8918_v60 = vadd.f32 %v8886_v25, %v8854_v13  ;;  %v8853_v47 = vmax.f32 %v8751_v40, 0.0  ;;  %v8895_v25 = vld [vmem:[#allocation5 + $0xc0] sm:$0xff] }
 0xbba   : > { %8950 = vst.msk [vmem:[#allocation5 + $0x78] sm:$0xff] %vm171_vm0, %v8918_v60  ;;  %v8917_v34 = vadd.f32 %v8885_v5, %v8853_v47 }
 0xbbc   : > { %8949 = vst.msk [vmem:[#allocation5 + $0x70] sm:$0xff] %vm171_vm0, %v8917_v34 }
 0xbc1   : > { %v8982_v58 = vld [vmem:[#allocation5 + $0x78] sm:$0xff] }
 0xbc2   : > { %9014 = vst.msk [vmem:[%s14296_s25 + $0x78] sm:$0xff] %vm171_vm0, %v8982_v58 }
 0xbc3   : > { %v8981_v3 = vld [vmem:[#allocation5 + $0x70] sm:$0xff] }
 0xbc4   : > { %9013 = vst.msk [vmem:[%s14296_s25 + $0x70] sm:$0xff] %vm171_vm0, %v8981_v3 }
 0xbc7   : > { %v9611_v6 = vpop.f32.mrf.mxu1 }
 0xbc8   : > { %v8766_v46 = vadd.f32 %v9611_v6, %v14278_v8 }
 0xbc9   : > { %v8760_v10 = vpop.f32.mrf.mxu1 }
 0xbca   : > { %v8856_v38 = vmax.f32 %v8766_v46, 0.0  ;;  %v8761_v15 = vadd.f32 %v14278_v8, %v8760_v10  ;;  %v8898_v10 = vld [vmem:[#allocation5 + $0xd8] sm:$0xff] }
 0xbcc   : > { %v8920_v57 = vadd.f32 %v8888_v55, %v8856_v38  ;;  %v8855_v27 = vmax.f32 %v8761_v15, 0.0  ;;  %v8897_v55 = vld [vmem:[#allocation5 + $0xd0] sm:$0xff] }
 0xbce   : > { %8952 = vst.msk [vmem:[#allocation5 + $0x88] sm:$0xff] %vm171_vm0, %v8920_v57  ;;  %v8919_v56 = vadd.f32 %v8887_v51, %v8855_v27 }
 0xbd0   : > { %8951 = vst.msk [vmem:[#allocation5 + $0x80] sm:$0xff] %vm171_vm0, %v8919_v56 }
 0xbd5   : > { %v8984_v12 = vld [vmem:[#allocation5 + $0x88] sm:$0xff] }
 0xbd6   : > { %9016 = vst.msk [vmem:[%s14296_s25 + $0x88] sm:$0xff] %vm171_vm0, %v8984_v12 }
 0xbd7   : > { %v8983_v29 = vld [vmem:[#allocation5 + $0x80] sm:$0xff] }
 0xbd8   : > { %9015 = vst.msk [vmem:[%s14296_s25 + $0x80] sm:$0xff] %vm171_vm0, %v8983_v29 }
 0xbdb   : > { %v9614_v33 = vpop.f32.mrf.mxu1 }
 0xbdc   : > { %v8776_v42 = vadd.f32 %v9614_v33, %v14278_v8 }
 0xbdd   : > { %v8770_v62 = vpop.f32.mrf.mxu1 }
 0xbde   : > { %v8858_v19 = vmax.f32 %v8776_v42, 0.0  ;;  %v8771_v24 = vadd.f32 %v14278_v8, %v8770_v62  ;;  %v8900_v62 = vld [vmem:[#allocation5 + $0xe8] sm:$0xff] }
 0xbe0   : > { %v8922_v53 = vadd.f32 %v8890_v59, %v8858_v19  ;;  %v8857_v9 = vmax.f32 %v8771_v24, 0.0  ;;  %v8899_v59 = vld [vmem:[#allocation5 + $0xe0] sm:$0xff] }
 0xbe2   : > { %8954 = vst.msk [vmem:[#allocation5 + $0x98] sm:$0xff] %vm171_vm0, %v8922_v53  ;;  %v8921_v44 = vadd.f32 %v8889_v20, %v8857_v9 }
 0xbe4   : > { %8953 = vst.msk [vmem:[#allocation5 + $0x90] sm:$0xff] %vm171_vm0, %v8921_v44 }
 0xbe9   : > { %v8986_v50 = vld [vmem:[#allocation5 + $0x98] sm:$0xff] }
 0xbea   : > { %9018 = vst.msk [vmem:[%s14296_s25 + $0x98] sm:$0xff] %vm171_vm0, %v8986_v50 }
 0xbeb   : > { %v8985_v2 = vld [vmem:[#allocation5 + $0x90] sm:$0xff] }
 0xbec   : > { %9017 = vst.msk [vmem:[%s14296_s25 + $0x90] sm:$0xff] %vm171_vm0, %v8985_v2 }
 0xbf3   : > { %v9617_v52 = vpop.f32.mrf.mxu1 }
 0xbf4   : > { %v8786_v35 = vadd.f32 %v9617_v52, %v14278_v8 }
 0xbf5   : > { %v8780_v28 = vpop.f32.mrf.mxu1 }
 0xbf6   : > { %v8860_v1 = vmax.f32 %v8786_v35, 0.0  ;;  %v8781_v21 = vadd.f32 %v14278_v8, %v8780_v28  ;;  %v8902_v28 = vld [vmem:[#allocation5 + $0xf8] sm:$0xff] }
 0xbf8   : > { %v8924_v23 = vadd.f32 %v8892_v16, %v8860_v1  ;;  %v8859_v54 = vmax.f32 %v8781_v21, 0.0  ;;  %v8901_v16 = vld [vmem:[#allocation5 + $0xf0] sm:$0xff] }
 0xbfa   : > { %8956 = vst.msk [vmem:[#allocation5 + $0xa8] sm:$0xff] %vm171_vm0, %v8924_v23  ;;  %v8923_v14 = vadd.f32 %v8891_v37, %v8859_v54 }
 0xbfc   : > { %8955 = vst.msk [vmem:[#allocation5 + $0xa0] sm:$0xff] %vm171_vm0, %v8923_v14 }
 0xc01   : > { %v8988_v0 = vld [vmem:[#allocation5 + $0xa8] sm:$0xff] }
 0xc02   : > { %9020 = vst.msk [vmem:[%s14296_s25 + $0xa8] sm:$0xff] %vm171_vm0, %v8988_v0 }
 0xc03   : > { %v8987_v26 = vld [vmem:[#allocation5 + $0xa0] sm:$0xff] }
 0xc04   : > { %9019 = vst.msk [vmem:[%s14296_s25 + $0xa0] sm:$0xff] %vm171_vm0, %v8987_v26 }
 0xc0b   : > { %v9620_v43 = vpop.f32.mrf.mxu1 }
 0xc0c   : > { %v8796_v45 = vadd.f32 %v9620_v43, %v14278_v8 }
 0xc0d   : > { %v8790_v32 = vpop.f32.mrf.mxu1 }
 0xc0e   : > { %v8862_v63 = vmax.f32 %v8796_v45, 0.0  ;;  %v8791_v48 = vadd.f32 %v14278_v8, %v8790_v32 }
 0xc10   : > { %v8926_v7 = vadd.f32 %v8894_v61, %v8862_v63  ;;  %v8861_v18 = vmax.f32 %v8791_v48, 0.0 }
 0xc12   : > { %8958 = vst.msk [vmem:[#allocation5 + $0xb8] sm:$0xff] %vm171_vm0, %v8926_v7  ;;  %v8925_v11 = vadd.f32 %v8893_v22, %v8861_v18 }
 0xc14   : > { %8957 = vst.msk [vmem:[#allocation5 + $0xb0] sm:$0xff] %vm171_vm0, %v8925_v11 }
 0xc19   : > { %v8990_v17 = vld [vmem:[#allocation5 + $0xb8] sm:$0xff] }
 0xc1a   : > { %9022 = vst.msk [vmem:[%s14296_s25 + $0xb8] sm:$0xff] %vm171_vm0, %v8990_v17 }
 0xc1b   : > { %v8989_v4 = vld [vmem:[#allocation5 + $0xb0] sm:$0xff] }
 0xc1c   : > { %9021 = vst.msk [vmem:[%s14296_s25 + $0xb0] sm:$0xff] %vm171_vm0, %v8989_v4 }
 0xc23   : > { %v9623_v36 = vpop.f32.mrf.mxu1 }
 0xc24   : > { %v8806_v31 = vadd.f32 %v9623_v36, %v14278_v8 }
 0xc25   : > { %v8800_v41 = vpop.f32.mrf.mxu1 }
 0xc26   : > { %v8864_v49 = vmax.f32 %v8806_v31, 0.0  ;;  %v8801_v39 = vadd.f32 %v14278_v8, %v8800_v41 }
 0xc28   : > { %v8928_v13 = vadd.f32 %v8896_v30, %v8864_v49  ;;  %v8863_v40 = vmax.f32 %v8801_v39, 0.0 }
 0xc2a   : > { %8960 = vst.msk [vmem:[#allocation5 + $0xc8] sm:$0xff] %vm171_vm0, %v8928_v13  ;;  %v8927_v60 = vadd.f32 %v8895_v25, %v8863_v40 }
 0xc2c   : > { %8959 = vst.msk [vmem:[#allocation5 + $0xc0] sm:$0xff] %vm171_vm0, %v8927_v60 }
 0xc31   : > { %v8992_v47 = vld [vmem:[#allocation5 + $0xc8] sm:$0xff] }
 0xc32   : > { %9024 = vst.msk [vmem:[%s14296_s25 + $0xc8] sm:$0xff] %vm171_vm0, %v8992_v47 }
 0xc33   : > { %v8991_v5 = vld [vmem:[#allocation5 + $0xc0] sm:$0xff] }
 0xc34   : > { %9023 = vst.msk [vmem:[%s14296_s25 + $0xc0] sm:$0xff] %vm171_vm0, %v8991_v5 }
 0xc3b   : > { %v9626_v34 = vpop.f32.mrf.mxu1 }
 0xc3c   : > { %v8816_v58 = vadd.f32 %v9626_v34, %v14278_v8 }
 0xc3d   : > { %v8810_v3 = vpop.f32.mrf.mxu1 }
 0xc3e   : > { %v8866_v6 = vmax.f32 %v8816_v58, 0.0  ;;  %v8811_v46 = vadd.f32 %v14278_v8, %v8810_v3 }
 0xc40   : > { %v8930_v38 = vadd.f32 %v8898_v10, %v8866_v6  ;;  %v8865_v15 = vmax.f32 %v8811_v46, 0.0 }
 0xc42   : > { %8962 = vst.msk [vmem:[#allocation5 + $0xd8] sm:$0xff] %vm171_vm0, %v8930_v38  ;;  %v8929_v57 = vadd.f32 %v8897_v55, %v8865_v15 }
 0xc44   : > { %8961 = vst.msk [vmem:[#allocation5 + $0xd0] sm:$0xff] %vm171_vm0, %v8929_v57 }
 0xc49   : > { %v8994_v27 = vld [vmem:[#allocation5 + $0xd8] sm:$0xff] }
 0xc4a   : > { %9026 = vst.msk [vmem:[%s14296_s25 + $0xd8] sm:$0xff] %vm171_vm0, %v8994_v27 }
 0xc4b   : > { %v8993_v51 = vld [vmem:[#allocation5 + $0xd0] sm:$0xff] }
 0xc4c   : > { %9025 = vst.msk [vmem:[%s14296_s25 + $0xd0] sm:$0xff] %vm171_vm0, %v8993_v51 }
 0xc53   : > { %v9629_v56 = vpop.f32.mrf.mxu1 }
 0xc54   : > { %v8826_v12 = vadd.f32 %v9629_v56, %v14278_v8 }
 0xc55   : > { %v8820_v29 = vpop.f32.mrf.mxu1 }
 0xc56   : > { %v8868_v33 = vmax.f32 %v8826_v12, 0.0  ;;  %v8821_v42 = vadd.f32 %v14278_v8, %v8820_v29 }
 0xc58   : > { %v8932_v19 = vadd.f32 %v8900_v62, %v8868_v33  ;;  %v8867_v24 = vmax.f32 %v8821_v42, 0.0 }
 0xc5a   : > { %8964 = vst.msk [vmem:[#allocation5 + $0xe8] sm:$0xff] %vm171_vm0, %v8932_v19  ;;  %v8931_v53 = vadd.f32 %v8899_v59, %v8867_v24 }
 0xc5c   : > { %8963 = vst.msk [vmem:[#allocation5 + $0xe0] sm:$0xff] %vm171_vm0, %v8931_v53 }
 0xc60   : > { %v9632_v9 = vpop.f32.mrf.mxu1 }
 0xc61   : > { %v8996_v20 = vld [vmem:[#allocation5 + $0xe8] sm:$0xff]  ;;  %v8836_v44 = vadd.f32 %v9632_v9, %v14278_v8 }
 0xc62   : > { %9028 = vst.msk [vmem:[%s14296_s25 + $0xe8] sm:$0xff] %vm171_vm0, %v8996_v20  ;;  %v8830_v50 = vpop.f32.mrf.mxu1 }
 0xc63   : > { %v8995_v2 = vld [vmem:[#allocation5 + $0xe0] sm:$0xff]  ;;  %v8870_v52 = vmax.f32 %v8836_v44, 0.0  ;;  %v8831_v35 = vadd.f32 %v14278_v8, %v8830_v50 }
 0xc64   : > { %9027 = vst.msk [vmem:[%s14296_s25 + $0xe0] sm:$0xff] %vm171_vm0, %v8995_v2 }
 0xc65   : > { %v8934_v1 = vadd.f32 %v8902_v28, %v8870_v52  ;;  %v8869_v21 = vmax.f32 %v8831_v35, 0.0 }
 0xc67   : > { %8966 = vst.msk [vmem:[#allocation5 + $0xf8] sm:$0xff] %vm171_vm0, %v8934_v1  ;;  %v8933_v23 = vadd.f32 %v8901_v16, %v8869_v21 }
 0xc69   : > { %8965 = vst.msk [vmem:[#allocation5 + $0xf0] sm:$0xff] %vm171_vm0, %v8933_v23 }
 0xc6e   : > { %v8998_v54 = vld [vmem:[#allocation5 + $0xf8] sm:$0xff] }
 0xc6f   : > { %9030 = vst.msk [vmem:[%s14296_s25 + $0xf8] sm:$0xff] %vm171_vm0, %v8998_v54 }
 0xc70   : > { %v8997_v37 = vld [vmem:[#allocation5 + $0xf0] sm:$0xff] }
 0xc71   : > { %9029 = vst.msk [vmem:[%s14296_s25 + $0xf0] sm:$0xff] %vm171_vm0, %v8997_v37 }
 0xc72 PF: > { %s13_s12 = sadd.s32 1, %s9656_s12  }
 0xc73   : > { %p10_p4 = scmp.ge.s32.totalorder %s13_s12, 4  }
 0xc75   :  { %12 = sbr.rel (!%p10_p4) target bundleno = 1 (0x1), region = 79 }

</bundles_post_ra>
